<compile_context>
chip_gen: v6e
topology: v6e:2x2x1
jax: 0.10.0
libtpu: 0.0.40
codegen_flags: <defaults>
</compile_context>

<pallas_src>
import functools
import math

import jax
import jax.numpy as jnp
from jax import lax
from jax.experimental import pallas as pl
from jax.experimental.pallas import tpu as pltpu

FEATURES = 1792          # efficientnet_b4 classifier[1].in_features (14 * 128)
NUM_CLASSES = 200
NUM_CLASSES_PAD = 256    # lane-dense padded output width (sliced to 200 in wrapper)
ATTR_DIM = 312
ATTR_DIM_PAD = 384       # 3 * 128: keeps the concat-matmul contraction lane-aligned
BN_EPS = 1e-5


def _round_up(x, m):
    return -(-x // m) * m


def _gelu(x, approximate=False):
    if approximate:
        # tanh form: routes the transcendental through the otherwise-idle EUP
        # slot (useful on v6e/v7x where the erf polynomial makes the VALU the
        # co-bottleneck). Numerics differ slightly from PyTorch's default.
        c = math.sqrt(2.0 / math.pi)
        return 0.5 * x * (1.0 + jnp.tanh(c * (x + 0.044715 * x * x * x)))
    # PyTorch nn.GELU() default: exact erf-based GELU.
    return 0.5 * x * (1.0 + lax.erf(x * (1.0 / math.sqrt(2.0))))


def _bird_classifier_kernel(pooled_ref, attr_ref, wh_ref,
                            w1a_ref, w1b_ref, b1_ref,
                            w2_ref, b2_ref,
                            w3_ref, b3_ref,
                            w4_ref, b4_ref,
                            out_ref, *, approximate_gelu):
    gelu = functools.partial(_gelu, approximate=approximate_gelu)

    # Backbone-tail stand-in (stage 2): 1x1-conv-style head on pooled channels,
    # as a lane-aligned MXU matmul (K padded to 128 with zero rows).
    pooled = pooled_ref[...].astype(jnp.bfloat16)               # (tb, C_pad)
    feats = jnp.dot(pooled, wh_ref[...],
                    preferred_element_type=jnp.float32)         # (tb, 1792)

    attrs = attr_ref[...].astype(jnp.bfloat16)                  # (tb, 384) zero-padded

    # torch.cat((feats, attrs), dim=1) @ W1 + b1 == feats @ W1a + attrs @ W1b + b1
    h = (jnp.dot(feats.astype(jnp.bfloat16), w1a_ref[...],
                 preferred_element_type=jnp.float32)
         + jnp.dot(attrs, w1b_ref[...],
                   preferred_element_type=jnp.float32)
         + b1_ref[...])                                         # (tb, 1024) [BN folded]
    h = gelu(h)                                                 # Dropout(eval) = identity

    h = jnp.dot(h.astype(jnp.bfloat16), w2_ref[...],
                preferred_element_type=jnp.float32) + b2_ref[...]
    h = gelu(h)                                                 # (tb, 512)

    h = jnp.dot(h.astype(jnp.bfloat16), w3_ref[...],
                preferred_element_type=jnp.float32) + b3_ref[...]
    h = gelu(h)                                                 # (tb, 256)

    out = jnp.dot(h.astype(jnp.bfloat16), w4_ref[...],
                  preferred_element_type=jnp.float32) + b4_ref[...]
    out_ref[...] = out.astype(out_ref.dtype)                    # (tb, 256) padded classes


def _resident_spec(shape):
    """Constant block index -> DMA'd once, single-buffered, VMEM-resident."""
    nd = len(shape)
    index_map = lambda b, _nd=nd: (0,) * _nd
    if hasattr(pl, "Buffered"):
        try:
            return pl.BlockSpec(shape, index_map, pipeline_mode=pl.Buffered(1))
        except TypeError:
            pass
    return pl.BlockSpec(shape, index_map)


def bird_classifier_forward(x_nchw, attributes, params, *,
                            batch_tile=256, approximate_gelu=False):
    """Full forward pass. x_nchw: (B, C, H, W) float32, attributes: (B, 312)."""
    B, C, H, W = x_nchw.shape

    # Backbone-tail stand-in (stage 1, XLA): global average pool over H, W.
    # Done outside the kernel so the kernel DMA is independent of the image size.
    pooled = jnp.mean(x_nchw.astype(jnp.float32), axis=(2, 3))        # (B, C)

    c_pad = _round_up(C, 128)                  # lane-align the head contraction
    pooled = jnp.pad(pooled, ((0, 0), (0, c_pad - C)))
    attrs = jnp.pad(attributes.astype(jnp.float32),
                    ((0, 0), (0, ATTR_DIM_PAD - ATTR_DIM)))

    w_head = params["w_head"]
    if w_head.shape[0] != c_pad:
        w_head = jnp.pad(w_head, ((0, c_pad - w_head.shape[0]), (0, 0)))

    # Batch tiling: multiples of 8 sublanes, at most `batch_tile` rows per pass.
    tb = max(8, min(batch_tile, _round_up(B, 8)))
    b_pad = _round_up(B, tb)
    if b_pad // tb < 2:
        # v7x megacore: keep >= 2 grid steps so both TensorCores get work.
        # Extra rows are zero-padding and get sliced off below.
        if tb >= 16:
            tb = _round_up(tb // 2, 8)
            b_pad = _round_up(B, tb)
        if b_pad // tb < 2:
            b_pad = 2 * tb
    if b_pad != B:
        pooled = jnp.pad(pooled, ((0, b_pad - B), (0, 0)))
        attrs = jnp.pad(attrs, ((0, b_pad - B), (0, 0)))

    in_arrays = (pooled, attrs, w_head,
                 params["w1a"], params["w1b"], params["b1"],
                 params["w2"], params["b2"],
                 params["w3"], params["b3"],
                 params["w4"], params["b4"])

    in_specs = [
        pl.BlockSpec((tb, c_pad), lambda b: (b, 0)),            # streamed per tile
        pl.BlockSpec((tb, ATTR_DIM_PAD), lambda b: (b, 0)),     # streamed per tile
    ] + [_resident_spec(a.shape) for a in in_arrays[2:]]        # VMEM-resident weights

    kernel = functools.partial(_bird_classifier_kernel,
                               approximate_gelu=approximate_gelu)

    out_padded = pl.pallas_call(
        kernel,
        out_shape=jax.ShapeDtypeStruct((b_pad, NUM_CLASSES_PAD), jnp.float32),
        grid=(b_pad // tb,),
        in_specs=in_specs,
        out_specs=pl.BlockSpec((tb, NUM_CLASSES_PAD), lambda b: (b, 0)),
        compiler_params=pltpu.CompilerParams(
            dimension_semantics=("parallel",),
            # Actual footprint ~14 MiB at tb=256 (single-buffered weights ~6 MiB,
            # streamed tiles + activations the rest); tight enough for v7x 64 MiB.
            vmem_limit_bytes=24 << 20),
    )(*in_arrays)

    return out_padded[:B, :NUM_CLASSES]


def init_params(key, in_channels):
    """Deterministic synthetic parameters (shapes match the PyTorch module)."""
    ks = jax.random.split(key, 8)

    def dense(k, fan_in, fan_out):
        # PyTorch Linear-style uniform init; weight stored as (in, out).
        bound = 1.0 / math.sqrt(fan_in)
        kw, kb = jax.random.split(k)
        w = jax.random.uniform(kw, (fan_in, fan_out), jnp.float32, -bound, bound)
        b = jax.random.uniform(kb, (fan_out,), jnp.float32, -bound, bound)
        return w, b

    def bn_stats(k, n):
        k1, k2, k3, k4 = jax.random.split(k, 4)
        gamma = jax.random.uniform(k1, (n,), jnp.float32, 0.5, 1.5)
        beta = 0.1 * jax.random.normal(k2, (n,), jnp.float32)
        run_mean = 0.1 * jax.random.normal(k3, (n,), jnp.float32)
        run_var = jax.random.uniform(k4, (n,), jnp.float32, 0.5, 1.5)
        return gamma, beta, run_mean, run_var

    def fold_bn(w, b, gamma, beta, run_mean, run_var):
        # BN(eval)(x @ W + b) == x @ (W*s) + (b*s + beta - run_mean*s)
        s = gamma / jnp.sqrt(run_var + BN_EPS)
        return w * s[None, :], b * s + beta - run_mean * s

    # Backbone head stand-in (1x1-conv-style head acting on pooled channels).
    w_head = jax.random.normal(ks[0], (in_channels, FEATURES), jnp.float32) \
        * (1.0 / math.sqrt(in_channels))

    w1, b1 = dense(ks[1], FEATURES + ATTR_DIM, 1024)
    w1, b1 = fold_bn(w1, b1, *bn_stats(ks[2], 1024))
    w2, b2 = dense(ks[3], 1024, 512)
    w2, b2 = fold_bn(w2, b2, *bn_stats(ks[4], 512))
    w3, b3 = dense(ks[5], 512, 256)
    w3, b3 = fold_bn(w3, b3, *bn_stats(ks[6], 256))
    w4, b4 = dense(ks[7], 256, NUM_CLASSES)

    # Lane-alignment padding (pure zero padding; no change to the math):
    #   attrs contraction 312 -> 384 (zero rows of w1b contribute nothing),
    #   classes 200 -> 256 (extra output columns are sliced off in the wrapper).
    w1b = jnp.pad(w1[FEATURES:], ((0, ATTR_DIM_PAD - ATTR_DIM), (0, 0)))
    w4 = jnp.pad(w4, ((0, 0), (0, NUM_CLASSES_PAD - NUM_CLASSES)))
    b4 = jnp.pad(b4, (0, NUM_CLASSES_PAD - NUM_CLASSES))

    bf16 = jnp.bfloat16
    return {
        "w_head": w_head.astype(bf16),
        "w1a": w1[:FEATURES].astype(bf16),
        "w1b": w1b.astype(bf16),
        "b1": b1.reshape(1, -1),                   # biases stay f32
        "w2": w2.astype(bf16), "b2": b2.reshape(1, -1),
        "w3": w3.astype(bf16), "b3": b3.reshape(1, -1),
        "w4": w4.astype(bf16), "b4": b4.reshape(1, -1),
    }


def _reference_forward(x, attributes, params):
    """Pure-JAX f32 reference (same synthetic weights) for a sanity check."""
    B, C, H, W = x.shape
    pooled = x.astype(jnp.float32).reshape(B, C, H * W).mean(-1)
    feats = pooled @ params["w_head"].astype(jnp.float32)
    w1a = params["w1a"].astype(jnp.float32)
    w1b = params["w1b"].astype(jnp.float32)[:ATTR_DIM]
    h = feats @ w1a + attributes @ w1b + params["b1"][0]
    h = jax.nn.gelu(h, approximate=False)
    h = h @ params["w2"].astype(jnp.float32) + params["b2"][0]
    h = jax.nn.gelu(h, approximate=False)
    h = h @ params["w3"].astype(jnp.float32) + params["b3"][0]
    h = jax.nn.gelu(h, approximate=False)
    out = h @ params["w4"].astype(jnp.float32)[:, :NUM_CLASSES] \
        + params["b4"][0, :NUM_CLASSES]
    return out


if __name__ == "__main__":
    key = jax.random.PRNGKey(0)
    k_x, k_attr, k_par = jax.random.split(key, 3)

    B, C, H, W = 2, 4, 16, 16                       # small synthetic image batch (NCHW)
    x = jax.random.normal(k_x, (B, C, H, W), jnp.float32)
    attributes = jax.random.normal(k_attr, (B, ATTR_DIM), jnp.float32)
    params = init_params(k_par, C)

    out = bird_classifier_forward(x, attributes, params)
    out = jax.block_until_ready(out)
    assert out.shape == (B, NUM_CLASSES) and out.dtype == jnp.float32
    assert bool(jnp.all(jnp.isfinite(out)))

    # Loose tolerance: kernel uses bf16 weights/activations with f32 accumulation.
    ref = _reference_forward(x, attributes, params)
    rel_err = float(jnp.max(jnp.abs(out - ref)) / (jnp.max(jnp.abs(ref)) + 1e-6))
    assert rel_err < 5e-2, f"mismatch vs reference: rel_err={rel_err}"

    print("KERNEL_OK")
</pallas_src>

<mosaic_0001>
module attributes {stable_mosaic.version = 11 : i64} {
  func.func @_bird_classifier_kernel(%arg0: i32, %arg1: memref<8x128xf32, #tpu.memory_space<vmem>>, %arg2: memref<8x384xf32, #tpu.memory_space<vmem>>, %arg3: memref<128x1792xbf16, #tpu.memory_space<vmem>>, %arg4: memref<1792x1024xbf16, #tpu.memory_space<vmem>>, %arg5: memref<384x1024xbf16, #tpu.memory_space<vmem>>, %arg6: memref<1x1024xf32, #tpu.memory_space<vmem>>, %arg7: memref<1024x512xbf16, #tpu.memory_space<vmem>>, %arg8: memref<1x512xf32, #tpu.memory_space<vmem>>, %arg9: memref<512x256xbf16, #tpu.memory_space<vmem>>, %arg10: memref<1x256xf32, #tpu.memory_space<vmem>>, %arg11: memref<256x256xbf16, #tpu.memory_space<vmem>>, %arg12: memref<1x256xf32, #tpu.memory_space<vmem>>, %arg13: memref<8x256xf32, #tpu.memory_space<vmem>>) attributes {dimension_semantics = [#tpu.dimension_semantics<parallel>], iteration_bounds = array<i64: 2>, scalar_prefetch = 0 : i64, scratch_operands = 0 : i64, tpu.core_type = #tpu.core_type<tc>, window_params = [{transform_indices = @transform_0, window_bounds = array<i64: 8, 128>}, {transform_indices = @transform_1, window_bounds = array<i64: 8, 384>}, {pipeline_mode = #tpu.pipeline_mode<synchronous>, transform_indices = @transform_2, window_bounds = array<i64: 128, 1792>}, {pipeline_mode = #tpu.pipeline_mode<synchronous>, transform_indices = @transform_3, window_bounds = array<i64: 1792, 1024>}, {pipeline_mode = #tpu.pipeline_mode<synchronous>, transform_indices = @transform_4, window_bounds = array<i64: 384, 1024>}, {pipeline_mode = #tpu.pipeline_mode<synchronous>, transform_indices = @transform_5, window_bounds = array<i64: 1, 1024>}, {pipeline_mode = #tpu.pipeline_mode<synchronous>, transform_indices = @transform_6, window_bounds = array<i64: 1024, 512>}, {pipeline_mode = #tpu.pipeline_mode<synchronous>, transform_indices = @transform_7, window_bounds = array<i64: 1, 512>}, {pipeline_mode = #tpu.pipeline_mode<synchronous>, transform_indices = @transform_8, window_bounds = array<i64: 512, 256>}, {pipeline_mode = #tpu.pipeline_mode<synchronous>, transform_indices = @transform_9, window_bounds = array<i64: 1, 256>}, {pipeline_mode = #tpu.pipeline_mode<synchronous>, transform_indices = @transform_10, window_bounds = array<i64: 256, 256>}, {pipeline_mode = #tpu.pipeline_mode<synchronous>, transform_indices = @transform_11, window_bounds = array<i64: 1, 256>}, {transform_indices = @transform_12, window_bounds = array<i64: 8, 256>}]} {
    %c0 = arith.constant 0 : index
    %c0_0 = arith.constant 0 : index
    %0 = vector.load %arg1[%c0, %c0_0] : memref<8x128xf32, #tpu.memory_space<vmem>>, vector<8x128xf32>
    %1 = arith.truncf %0 : vector<8x128xf32> to vector<8x128xbf16>
    %c0_1 = arith.constant 0 : index
    %c0_2 = arith.constant 0 : index
    %2 = vector.load %arg3[%c0_1, %c0_2] : memref<128x1792xbf16, #tpu.memory_space<vmem>>, vector<128x1792xbf16>
    %cst = arith.constant dense<0.000000e+00> : vector<8x1792xf32>
    %3 = tpu.matmul %1, %2, %cst {dimension_numbers = #tpu.dot_dimension_numbers<[1], [0], [0], [1], [0, 0, 1, 1], [], []>} : vector<8x128xbf16>, vector<128x1792xbf16>, vector<8x1792xf32> -> vector<8x1792xf32>
    %c0_3 = arith.constant 0 : index
    %c0_4 = arith.constant 0 : index
    %4 = vector.load %arg2[%c0_3, %c0_4] : memref<8x384xf32, #tpu.memory_space<vmem>>, vector<8x384xf32>
    %5 = arith.truncf %4 : vector<8x384xf32> to vector<8x384xbf16>
    %6 = arith.truncf %3 : vector<8x1792xf32> to vector<8x1792xbf16>
    %c0_5 = arith.constant 0 : index
    %c0_6 = arith.constant 0 : index
    %7 = vector.load %arg4[%c0_5, %c0_6] : memref<1792x1024xbf16, #tpu.memory_space<vmem>>, vector<1792x1024xbf16>
    %cst_7 = arith.constant dense<0.000000e+00> : vector<8x1024xf32>
    %8 = tpu.matmul %6, %7, %cst_7 {dimension_numbers = #tpu.dot_dimension_numbers<[1], [0], [0], [1], [0, 0, 1, 1], [], []>} : vector<8x1792xbf16>, vector<1792x1024xbf16>, vector<8x1024xf32> -> vector<8x1024xf32>
    %c0_8 = arith.constant 0 : index
    %c0_9 = arith.constant 0 : index
    %9 = vector.load %arg5[%c0_8, %c0_9] : memref<384x1024xbf16, #tpu.memory_space<vmem>>, vector<384x1024xbf16>
    %cst_10 = arith.constant dense<0.000000e+00> : vector<8x1024xf32>
    %10 = tpu.matmul %5, %9, %cst_10 {dimension_numbers = #tpu.dot_dimension_numbers<[1], [0], [0], [1], [0, 0, 1, 1], [], []>} : vector<8x384xbf16>, vector<384x1024xbf16>, vector<8x1024xf32> -> vector<8x1024xf32>
    %11 = arith.addf %8, %10 : vector<8x1024xf32>
    %c0_11 = arith.constant 0 : index
    %c0_12 = arith.constant 0 : index
    %12 = vector.load %arg6[%c0_11, %c0_12] : memref<1x1024xf32, #tpu.memory_space<vmem>>, vector<1x1024xf32>
    %13 = vector.broadcast %12 : vector<1x1024xf32> to vector<8x1024xf32>
    %14 = arith.addf %11, %13 : vector<8x1024xf32>
    %cst_13 = arith.constant 5.000000e-01 : f32
    %15 = vector.broadcast %cst_13 : f32 to vector<8x1024xf32>
    %16 = arith.mulf %15, %14 : vector<8x1024xf32>
    %cst_14 = arith.constant 0.707106769 : f32
    %17 = vector.broadcast %cst_14 : f32 to vector<8x1024xf32>
    %18 = arith.mulf %14, %17 : vector<8x1024xf32>
    %19 = math.erf %18 : vector<8x1024xf32>
    %cst_15 = arith.constant 1.000000e+00 : f32
    %20 = vector.broadcast %cst_15 : f32 to vector<8x1024xf32>
    %21 = arith.addf %20, %19 : vector<8x1024xf32>
    %22 = arith.mulf %16, %21 : vector<8x1024xf32>
    %23 = arith.truncf %22 : vector<8x1024xf32> to vector<8x1024xbf16>
    %c0_16 = arith.constant 0 : index
    %c0_17 = arith.constant 0 : index
    %24 = vector.load %arg7[%c0_16, %c0_17] : memref<1024x512xbf16, #tpu.memory_space<vmem>>, vector<1024x512xbf16>
    %cst_18 = arith.constant dense<0.000000e+00> : vector<8x512xf32>
    %25 = tpu.matmul %23, %24, %cst_18 {dimension_numbers = #tpu.dot_dimension_numbers<[1], [0], [0], [1], [0, 0, 1, 1], [], []>} : vector<8x1024xbf16>, vector<1024x512xbf16>, vector<8x512xf32> -> vector<8x512xf32>
    %c0_19 = arith.constant 0 : index
    %c0_20 = arith.constant 0 : index
    %26 = vector.load %arg8[%c0_19, %c0_20] : memref<1x512xf32, #tpu.memory_space<vmem>>, vector<1x512xf32>
    %27 = vector.broadcast %26 : vector<1x512xf32> to vector<8x512xf32>
    %28 = arith.addf %25, %27 : vector<8x512xf32>
    %cst_21 = arith.constant 5.000000e-01 : f32
    %29 = vector.broadcast %cst_21 : f32 to vector<8x512xf32>
    %30 = arith.mulf %29, %28 : vector<8x512xf32>
    %cst_22 = arith.constant 0.707106769 : f32
    %31 = vector.broadcast %cst_22 : f32 to vector<8x512xf32>
    %32 = arith.mulf %28, %31 : vector<8x512xf32>
    %33 = math.erf %32 : vector<8x512xf32>
    %cst_23 = arith.constant 1.000000e+00 : f32
    %34 = vector.broadcast %cst_23 : f32 to vector<8x512xf32>
    %35 = arith.addf %34, %33 : vector<8x512xf32>
    %36 = arith.mulf %30, %35 : vector<8x512xf32>
    %37 = arith.truncf %36 : vector<8x512xf32> to vector<8x512xbf16>
    %c0_24 = arith.constant 0 : index
    %c0_25 = arith.constant 0 : index
    %38 = vector.load %arg9[%c0_24, %c0_25] : memref<512x256xbf16, #tpu.memory_space<vmem>>, vector<512x256xbf16>
    %cst_26 = arith.constant dense<0.000000e+00> : vector<8x256xf32>
    %39 = tpu.matmul %37, %38, %cst_26 {dimension_numbers = #tpu.dot_dimension_numbers<[1], [0], [0], [1], [0, 0, 1, 1], [], []>} : vector<8x512xbf16>, vector<512x256xbf16>, vector<8x256xf32> -> vector<8x256xf32>
    %c0_27 = arith.constant 0 : index
    %c0_28 = arith.constant 0 : index
    %40 = vector.load %arg10[%c0_27, %c0_28] : memref<1x256xf32, #tpu.memory_space<vmem>>, vector<1x256xf32>
    %41 = vector.broadcast %40 : vector<1x256xf32> to vector<8x256xf32>
    %42 = arith.addf %39, %41 : vector<8x256xf32>
    %cst_29 = arith.constant 5.000000e-01 : f32
    %43 = vector.broadcast %cst_29 : f32 to vector<8x256xf32>
    %44 = arith.mulf %43, %42 : vector<8x256xf32>
    %cst_30 = arith.constant 0.707106769 : f32
    %45 = vector.broadcast %cst_30 : f32 to vector<8x256xf32>
    %46 = arith.mulf %42, %45 : vector<8x256xf32>
    %47 = math.erf %46 : vector<8x256xf32>
    %cst_31 = arith.constant 1.000000e+00 : f32
    %48 = vector.broadcast %cst_31 : f32 to vector<8x256xf32>
    %49 = arith.addf %48, %47 : vector<8x256xf32>
    %50 = arith.mulf %44, %49 : vector<8x256xf32>
    %51 = arith.truncf %50 : vector<8x256xf32> to vector<8x256xbf16>
    %c0_32 = arith.constant 0 : index
    %c0_33 = arith.constant 0 : index
    %52 = vector.load %arg11[%c0_32, %c0_33] : memref<256x256xbf16, #tpu.memory_space<vmem>>, vector<256x256xbf16>
    %cst_34 = arith.constant dense<0.000000e+00> : vector<8x256xf32>
    %53 = tpu.matmul %51, %52, %cst_34 {dimension_numbers = #tpu.dot_dimension_numbers<[1], [0], [0], [1], [0, 0, 1, 1], [], []>} : vector<8x256xbf16>, vector<256x256xbf16>, vector<8x256xf32> -> vector<8x256xf32>
    %c0_35 = arith.constant 0 : index
    %c0_36 = arith.constant 0 : index
    %54 = vector.load %arg12[%c0_35, %c0_36] : memref<1x256xf32, #tpu.memory_space<vmem>>, vector<1x256xf32>
    %55 = vector.broadcast %54 : vector<1x256xf32> to vector<8x256xf32>
    %56 = arith.addf %53, %55 : vector<8x256xf32>
    %c0_37 = arith.constant 0 : index
    %c0_38 = arith.constant 0 : index
    %57 = vector.load %arg13[%c0_37, %c0_38] : memref<8x256xf32, #tpu.memory_space<vmem>>, vector<8x256xf32>
    tpu.vector_store %arg13[%c0_37, %c0_38], %56 {strides = array<i32>} : memref<8x256xf32, #tpu.memory_space<vmem>>, vector<8x256xf32>,
    return
  }
  func.func @transform_0(%arg0: i32) -> (i32, i32) {
    %c0_i32 = arith.constant 0 : i32
    %c0_i32_0 = arith.constant 0 : i32
    return %arg0, %c0_i32 : i32, i32
  }
  func.func @transform_1(%arg0: i32) -> (i32, i32) {
    %c0_i32 = arith.constant 0 : i32
    %c0_i32_0 = arith.constant 0 : i32
    return %arg0, %c0_i32 : i32, i32
  }
  func.func @transform_2(%arg0: i32) -> (i32, i32) {
    %c0_i32 = arith.constant 0 : i32
    %c0_i32_0 = arith.constant 0 : i32
    %c0_i32_1 = arith.constant 0 : i32
    return %c0_i32, %c0_i32_0 : i32, i32
  }
  func.func @transform_3(%arg0: i32) -> (i32, i32) {
    %c0_i32 = arith.constant 0 : i32
    %c0_i32_0 = arith.constant 0 : i32
    %c0_i32_1 = arith.constant 0 : i32
    return %c0_i32, %c0_i32_0 : i32, i32
  }
  func.func @transform_4(%arg0: i32) -> (i32, i32) {
    %c0_i32 = arith.constant 0 : i32
    %c0_i32_0 = arith.constant 0 : i32
    %c0_i32_1 = arith.constant 0 : i32
    return %c0_i32, %c0_i32_0 : i32, i32
  }
  func.func @transform_5(%arg0: i32) -> (i32, i32) {
    %c0_i32 = arith.constant 0 : i32
    %c0_i32_0 = arith.constant 0 : i32
    %c0_i32_1 = arith.constant 0 : i32
    return %c0_i32, %c0_i32_0 : i32, i32
  }
  func.func @transform_6(%arg0: i32) -> (i32, i32) {
    %c0_i32 = arith.constant 0 : i32
    %c0_i32_0 = arith.constant 0 : i32
    %c0_i32_1 = arith.constant 0 : i32
    return %c0_i32, %c0_i32_0 : i32, i32
  }
  func.func @transform_7(%arg0: i32) -> (i32, i32) {
    %c0_i32 = arith.constant 0 : i32
    %c0_i32_0 = arith.constant 0 : i32
    %c0_i32_1 = arith.constant 0 : i32
    return %c0_i32, %c0_i32_0 : i32, i32
  }
  func.func @transform_8(%arg0: i32) -> (i32, i32) {
    %c0_i32 = arith.constant 0 : i32
    %c0_i32_0 = arith.constant 0 : i32
    %c0_i32_1 = arith.constant 0 : i32
    return %c0_i32, %c0_i32_0 : i32, i32
  }
  func.func @transform_9(%arg0: i32) -> (i32, i32) {
    %c0_i32 = arith.constant 0 : i32
    %c0_i32_0 = arith.constant 0 : i32
    %c0_i32_1 = arith.constant 0 : i32
    return %c0_i32, %c0_i32_0 : i32, i32
  }
  func.func @transform_10(%arg0: i32) -> (i32, i32) {
    %c0_i32 = arith.constant 0 : i32
    %c0_i32_0 = arith.constant 0 : i32
    %c0_i32_1 = arith.constant 0 : i32
    return %c0_i32, %c0_i32_0 : i32, i32
  }
  func.func @transform_11(%arg0: i32) -> (i32, i32) {
    %c0_i32 = arith.constant 0 : i32
    %c0_i32_0 = arith.constant 0 : i32
    %c0_i32_1 = arith.constant 0 : i32
    return %c0_i32, %c0_i32_0 : i32, i32
  }
  func.func @transform_12(%arg0: i32) -> (i32, i32) {
    %c0_i32 = arith.constant 0 : i32
    %c0_i32_0 = arith.constant 0 : i32
    return %arg0, %c0_i32 : i32, i32
  }
}

</mosaic_0001>

<bundles_post_ra>
// kernel: tpu_custom_call.1
= control target key start
LH: loop header
LB: loop body
LE: loop exit
PB: predicated region body
PF: predicated region fallthrough
CT: control target
= control target key end

     0   :  { %s16327_s0 = inlined_call_operand.hbm [shape: f32[16,128], index: 0, kind: input, shape index: {}]   ;;  %s16328_s1 = inlined_call_operand.hbm [shape: f32[16,384], index: 1, kind: input, shape index: {}]   ;;  %s16329_s2 = inlined_call_operand.hbm [shape: bf16[128,1792], index: 2, kind: input, shape index: {}]   ;;  %s16330_s3 = inlined_call_operand.hbm [shape: bf16[1792,1024], index: 3, kind: input, shape index: {}]   ;;  %s16331_s4 = inlined_call_operand.hbm [shape: bf16[384,1024], index: 4, kind: input, shape index: {}]   ;;  %s16332_s5 = inlined_call_operand.hbm [shape: f32[1,1024], index: 5, kind: input, shape index: {}]   ;;  %s16333_s6 = inlined_call_operand.hbm [shape: bf16[1024,512], index: 6, kind: input, shape index: {}]   ;;  %s16334_s7 = inlined_call_operand.hbm [shape: f32[1,512], index: 7, kind: input, shape index: {}]   ;;  %s16335_s8 = inlined_call_operand.hbm [shape: bf16[512,256], index: 8, kind: input, shape index: {}]   ;;  %s16336_s9 = inlined_call_operand.hbm [shape: f32[1,256], index: 9, kind: input, shape index: {}]   ;;  %s16337_s10 = inlined_call_operand.hbm [shape: bf16[256,256], index: 10, kind: input, shape index: {}]   ;;  %s16338_s11 = inlined_call_operand.hbm [shape: f32[1,256], index: 11, kind: input, shape index: {}]   ;;  %s16339_s12 = inlined_call_operand.hbm [shape: f32[16,256], index: 12, kind: output, shape index: {}]  }
   0x1   :  { %16345 = sst [smem:[#allocation32_spill]] %s16327_s0 }
   0x2   :  { %16346 = sst [smem:[#allocation33_spill]] %s16329_s2 }
   0x3   :  { %16347 = sst [smem:[#allocation34_spill]] %s16330_s3 }
   0x4   :  { %16348 = sst [smem:[#allocation35_spill]] %s16331_s4 }
   0x5   :  { %16349 = sst [smem:[#allocation36_spill]] %s16332_s5 }
   0x6   :  { %16350 = sst [smem:[#allocation37_spill]] %s16333_s6 }
   0x7   :  { %16351 = sst [smem:[#allocation38_spill]] %s16334_s7 }
   0x8   :  { %16352 = sst [smem:[#allocation39_spill]] %s16335_s8 }
   0x9   :  { %16353 = sst [smem:[#allocation40_spill]] %s16336_s9 }
   0xa   :  { %17 = vsyncpa [#allocation3], 0 }
   0xb   :  { %19 = vsyncpa [#allocation3 + $0x1], 0 }
   0xc   :  { %20 = vsyncpa [#allocation6], 0 }
   0xd   :  { %22 = vsyncpa [#allocation6 + $0x1], 0 }
   0xe   :  { %23 = vsyncpa [#allocation9], 0 }
   0xf   :  { %24 = vsyncpa [#allocation12], 0 }
  0x10   :  { %25 = vsyncpa [#allocation15], 0 }
  0x11   :  { %26 = vsyncpa [#allocation18], 0 }
  0x12   :  { %27 = vsyncpa [#allocation21], 0 }
  0x13   :  { %28 = vsyncpa [#allocation4], 0 }
  0x14   :  { %30 = vsyncpa [#allocation4 + $0x1], 0  ;;  %s15511_s21 = smov 0   ;;  %s15513_s22 = smov 0  }
  0x15   :  { %s15515_s23 = smov 0   ;;  %s15517_s24 = smov 0  }
  0x16 LB: > { %s15424_s25 = smov [#allocation7]   ;;  %s15532_s27 = sadd.s32 4294967295, %s15422_s24   ;;  %s15422_s24 = sphi %s15517_s24, %s16394_s24   ;;  %s15418_s23 = sphi %s15515_s23, %s16393_s23   ;;  %s15414_s22 = sphi %s15513_s22, %s16392_s22   ;;  %s15410_s21 = sphi %s15511_s21, %s16391_s21  }
  0x17   : > { %s341_s26 = sshll.u32 %s15424_s25, 4  ;;  %p12539_p0 = scmp.ge.s32.totalorder %s15422_s24, 1  ;;  %s342_s26 = int_to_ptr.vmem [resolvable:$true] %s341_s26 }
  0x18   : > { %p16341_p1 = scmp.eq.s32.totalorder %s15532_s27, 0  ;;  %p329_p2 = scmp.lt.s32.totalorder %s15422_s24, 3 }
  0x19   : > { %s15425_s29 = smov [#allocation8]   ;;  %s15426_s14 = smov [#allocation11]  }
  0x1a   : > { %p15537_p3 = pnand %p12539_p0, %p329_p2  ;;  %s354_s30 = sshll.u32 %s15425_s29, 4  ;;  %s15550_s30 = int_to_ptr.vmem [resolvable:$true] %s354_s30 }
  0x1b   : > { %s15552_s15 = sshll.u32 %s15426_s14, 4  ;;  %s15025_s17 = scalar_lea.vmem %s342_s26, 14336  ;;  %s382_s15 = int_to_ptr.vmem [resolvable:$true] %s15552_s15 }
  0x1c   : > { %s16354_s28 = scalar_select %p15537_p3, 1, 0 }
  0x1d   : > { %p14174_p5 = pneg %p15537_p3  ;;  %p15026_p8 = scmp.ne.s32.totalorder %s342_s26, %s15025_s17 }
  0x1e   : > { %p15033_p11 = scmp.lt.s32.totalorder %s342_s26, %s342_s26  ;;  %p15034_p12 = scmp.lt.s32.totalorder %s15025_s17, %s15025_s17 }
  0x1f   : > { %p15546_p6 = pnand %p14174_p5, %p16341_p1 }
  0x20   : > { %p15035_p13 = por %p15034_p12, %p15033_p11 }
  0x21   : > { %p15556_p7 = pneg %p15546_p6 }
  0x23   : > { %p15028_p9 = pnand %p15026_p8, %p15556_p7 }
  0x25   : > { %p15029_p10 = pneg %p15028_p9 }
  0x27   : > { %p15036_p0 = pnand %p15035_p13, %p15029_p10 }
  0x29   : > { %15039 = shalt.err (!%p15036_p0)
}
  0x2a   : > { %s15427_s18 = smov 896   ;;  %s15428_s19 = smov 56  }
  0x2b   : > { %s16357_s2 = sld [smem:[#allocation33_spill]]  ;;  %s15051_s29 = scalar_lea.vmem %s15550_s30, 114688 }
  0x2c   : > { %p15052_p2 = scmp.ne.s32.totalorder %s15550_s30, %s15051_s29  ;;  %p15059_p9 = scmp.lt.s32.totalorder %s15550_s30, %s15550_s30 }
  0x2d   : > { %p15060_p10 = scmp.lt.s32.totalorder %s15051_s29, %s15051_s29 }
  0x2e   : > { %p15054_p5 = pnand %p15052_p2, %p15556_p7 }
  0x2f   : > { %p15061_p11 = por %p15060_p10, %p15059_p9 }
  0x30   : > { %p15055_p8 = pneg %p15054_p5 }
  0x31   : > { %14177 = dma.hbm_to_vmem [thread:$0]  (!%p15546_p6), %s16357_s2, 14336, %s342_s26, [#allocation6], %s15427_s18, %s15427_s18, %s15428_s19  }
  0x32   : > { %p15062_p12 = pnand %p15061_p11, %p15055_p8 }
  0x34   : > { %15065 = shalt.err (!%p15062_p12)
}
  0x35   : > { %s16340_s14 = smov 512   ;;  %s15430_s17 = smov 32  }
  0x36   : > { %s16358_s3 = sld [smem:[#allocation34_spill]]  ;;  %s15077_s19 = scalar_lea.vmem %s382_s15, 128 }
  0x37   : > { %p15078_p13 = scmp.ne.s32.totalorder %s382_s15, %s15077_s19  ;;  %p15085_p5 = scmp.lt.s32.totalorder %s382_s15, %s382_s15 }
  0x38   : > { %p15086_p8 = scmp.lt.s32.totalorder %s15077_s19, %s15077_s19 }
  0x39   : > { %p15080_p0 = pnand %p15078_p13, %p15556_p7 }
  0x3a   : > { %p15087_p9 = por %p15086_p8, %p15085_p5 }
  0x3b   : > { %p15081_p2 = pneg %p15080_p0 }
  0x3c   : > { %14180 = dma.hbm_to_vmem [thread:$0]  (!%p15546_p6), %s16358_s3, 114688, %s15550_s30, [#allocation9], %s16340_s14, %s16340_s14, %s15430_s17  }
  0x3d   : > { %p15088_p10 = pnand %p15087_p9, %p15081_p2 }
  0x3f   : > { %15091 = shalt.err (!%p15088_p10)
}
  0x40   : > { %s16359_s5 = sld [smem:[#allocation36_spill]]  ;;  %s15431_s29 = smov [#allocation14]  }
  0x41   : > { %s405_s30 = sshll.u32 %s15431_s29, 4  ;;  %s15432_s26 = smov [#allocation17]   ;;  %s406_s30 = int_to_ptr.vmem [resolvable:$true] %s405_s30 }
  0x42   : > { %s429_s18 = sshll.u32 %s15432_s26, 4  ;;  %s15103_s14 = scalar_lea.vmem %s406_s30, 64  ;;  %s430_s18 = int_to_ptr.vmem [resolvable:$true] %s429_s18 }
  0x43   : > { %p15104_p11 = scmp.ne.s32.totalorder %s406_s30, %s15103_s14  ;;  %p15111_p0 = scmp.lt.s32.totalorder %s406_s30, %s406_s30 }
  0x44   : > { %p15112_p2 = scmp.lt.s32.totalorder %s15103_s14, %s15103_s14 }
  0x45   : > { %p15106_p12 = pnand %p15104_p11, %p15556_p7 }
  0x46   : > { %14186 = dma.hbm_to_vmem [thread:$0]  (!%p15546_p6), %s16359_s5, 128, %s382_s15, [#allocation12]  }
  0x47   : > { %p15107_p13 = pneg %p15106_p12  ;;  %p15113_p5 = por %p15112_p2, %p15111_p0 }
  0x49   : > { %p15114_p8 = pnand %p15113_p5, %p15107_p13 }
  0x4b   : > { %15117 = shalt.err (!%p15114_p8)
}
  0x4c   : > { %s16360_s7 = sld [smem:[#allocation38_spill]]  ;;  %s15129_s15 = scalar_lea.vmem %s430_s18, 32 }
  0x4d   : > { %p15130_p9 = scmp.ne.s32.totalorder %s430_s18, %s15129_s15  ;;  %p15137_p11 = scmp.lt.s32.totalorder %s430_s18, %s430_s18 }
  0x4e   : > { %p15138_p12 = scmp.lt.s32.totalorder %s15129_s15, %s15129_s15 }
  0x4f   : > { %p15132_p10 = pnand %p15130_p9, %p15556_p7 }
  0x50   : > { %p15139_p1 = por %p15138_p12, %p15137_p11 }
  0x51   : > { %p15133_p4 = pneg %p15132_p10 }
  0x52   : > { %14192 = dma.hbm_to_vmem [thread:$0]  (!%p15546_p6), %s16360_s7, 64, %s406_s30, [#allocation15]  }
  0x53   : > { %p15140_p3 = pnand %p15139_p1, %p15133_p4 }
  0x55   : > { %15143 = shalt.err (!%p15140_p3)
}
  0x56   : > { %s16361_s9 = sld [smem:[#allocation40_spill]]  ;;  %s15433_s29 = smov [#allocation10]  }
  0x57   : > { %s367_s30 = sshll.u32 %s15433_s29, 4  ;;  %s15434_s26 = smov [#allocation13]   ;;  %s368_s30 = int_to_ptr.vmem [resolvable:$true] %s367_s30 }
  0x58   : > { %s391_s19 = sshll.u32 %s15434_s26, 4  ;;  %s15155_s20 = scalar_lea.vmem %s368_s30, 24576  ;;  %s392_s19 = int_to_ptr.vmem [resolvable:$true] %s391_s19 }
  0x59   : > { %p15156_p13 = scmp.ne.s32.totalorder %s368_s30, %s15155_s20  ;;  %p15163_p5 = scmp.lt.s32.totalorder %s368_s30, %s368_s30 }
  0x5a   : > { %p15164_p1 = scmp.lt.s32.totalorder %s15155_s20, %s15155_s20 }
  0x5b   : > { %p15158_p0 = pnand %p15156_p13, %p15556_p7 }
  0x5c   : > { %14198 = dma.hbm_to_vmem [thread:$0]  (!%p15546_p6), %s16361_s9, 32, %s430_s18, [#allocation18]  }
  0x5d   : > { %p15159_p2 = pneg %p15158_p0  ;;  %p15165_p3 = por %p15164_p1, %p15163_p5 }
  0x5f   : > { %p15166_p4 = pnand %p15165_p3, %p15159_p2 }
  0x61   : > { %15169 = shalt.err (!%p15166_p4)
}
  0x62   : > { %s16362_s15 = smov 512   ;;  %s16363_s4 = sld [smem:[#allocation35_spill]] }
  0x63   : > { %s15181_s25 = scalar_lea.vmem %s392_s19, 32768  ;;  %p15189_p11 = scmp.lt.s32.totalorder %s392_s19, %s392_s19 }
  0x64   : > { %p15182_p8 = scmp.ne.s32.totalorder %s392_s19, %s15181_s25  ;;  %p15190_p12 = scmp.lt.s32.totalorder %s15181_s25, %s15181_s25 }
  0x66   : > { %p15184_p9 = pnand %p15182_p8, %p15556_p7  ;;  %p15191_p13 = por %p15190_p12, %p15189_p11 }
  0x68   : > { %14183 = dma.hbm_to_vmem [thread:$0]  (!%p15546_p6), %s16363_s4, 24576, %s368_s30, [#allocation9], %s16362_s15, %s16362_s15, %s15430_s17  }
  0x69   : > { %p15185_p10 = pneg %p15184_p9 }
  0x6b   : > { %p15192_p0 = pnand %p15191_p13, %p15185_p10 }
  0x6d   : > { %15195 = shalt.err (!%p15192_p0)
}
  0x6e   : > { %s15435_s29 = smov 256   ;;  %s15436_s26 = smov 16  }
  0x6f   : > { %s16364_s6 = sld [smem:[#allocation37_spill]]  ;;  %s15437_s17 = smov [#allocation16]  }
  0x70   : > { %s415_s30 = sshll.u32 %s15437_s17, 4  ;;  %s416_s30 = int_to_ptr.vmem [resolvable:$true] %s415_s30 }
  0x71   : > { %s15207_s15 = scalar_lea.vmem %s416_s30, 8192  ;;  %p15215_p3 = scmp.lt.s32.totalorder %s416_s30, %s416_s30 }
  0x72   : > { %p15208_p2 = scmp.ne.s32.totalorder %s416_s30, %s15207_s15  ;;  %p15216_p4 = scmp.lt.s32.totalorder %s15207_s15, %s15207_s15 }
  0x74   : > { %p15210_p5 = pnand %p15208_p2, %p15556_p7  ;;  %p15217_p8 = por %p15216_p4, %p15215_p3 }
  0x75   : > { %14189 = dma.hbm_to_vmem [thread:$0]  (!%p15546_p6), %s16364_s6, 32768, %s392_s19, [#allocation12], %s15435_s29, %s15435_s29, %s15436_s26  }
  0x76   : > { %p15211_p1 = pneg %p15210_p5 }
  0x78   : > { %p15218_p9 = pnand %p15217_p8, %p15211_p1 }
  0x7a   : > { %15221 = shalt.err (!%p15218_p9)
}
  0x7b   : > { %s15438_s14 = smov 128   ;;  %s15439_s25 = smov 8  }
  0x7c   : > { %s16365_s8 = sld [smem:[#allocation39_spill]]  ;;  %s15440_s29 = smov [#allocation19]  }
  0x7d   : > { %s439_s26 = sshll.u32 %s15440_s29, 4  ;;  %s15441_s18 = smov [#allocation20]   ;;  %s440_s26 = int_to_ptr.vmem [resolvable:$true] %s439_s26 }
  0x7e   : > { %s453_s17 = sshll.u32 %s15441_s18, 4  ;;  %s15233_s2 = scalar_lea.vmem %s440_s26, 4096  ;;  %s454_s17 = int_to_ptr.vmem [resolvable:$true] %s453_s17 }
  0x7f   : > { %p15234_p10 = scmp.ne.s32.totalorder %s440_s26, %s15233_s2  ;;  %p15241_p13 = scmp.lt.s32.totalorder %s440_s26, %s440_s26 }
  0x80   : > { %p15242_p0 = scmp.lt.s32.totalorder %s15233_s2, %s15233_s2 }
  0x81   : > { %p15236_p11 = pnand %p15234_p10, %p15556_p7 }
  0x82   : > { %14195 = dma.hbm_to_vmem [thread:$0]  (!%p15546_p6), %s16365_s8, 8192, %s416_s30, [#allocation15], %s15438_s14, %s15438_s14, %s15439_s25  }
  0x83   : > { %p15237_p12 = pneg %p15236_p11  ;;  %p15243_p2 = por %p15242_p0, %p15241_p13 }
  0x85   : > { %p15244_p5 = pnand %p15243_p2, %p15237_p12 }
  0x87   : > { %15247 = shalt.err (!%p15244_p5)
}
  0x88   : > { %14201 = dma.hbm_to_vmem [thread:$0]  (!%p15546_p6), %s16337_s10, 4096, %s440_s26, [#allocation18], %s15438_s14, %s15438_s14, %s15439_s25  }
  0x89   : > { %s15259_s20 = scalar_lea.vmem %s454_s17, 32  ;;  %p15267_p8 = scmp.lt.s32.totalorder %s454_s17, %s454_s17 }
  0x8a   : > { %p15260_p1 = scmp.ne.s32.totalorder %s454_s17, %s15259_s20  ;;  %p15268_p9 = scmp.lt.s32.totalorder %s15259_s20, %s15259_s20 }
  0x8c   : > { %p15262_p3 = pnand %p15260_p1, %p15556_p7  ;;  %p15269_p10 = por %p15268_p9, %p15267_p8 }
  0x8e   : > { %p15263_p4 = pneg %p15262_p3 }
  0x90   : > { %p15270_p11 = pnand %p15269_p10, %p15263_p4 }
  0x92   : > { %15273 = shalt.err (!%p15270_p11)
}
  0x93   : > { %14204 = dma.hbm_to_vmem [thread:$0]  (!%p15546_p6), %s16338_s11, 32, %s454_s17, [#allocation21]  }
  0x94   : > { %s12538_s16 = sadd.s32 4294967294, %s15422_s24   ;;  %s15644_s13 = sadd.s32 1, %s15422_s24  }
  0x95   : > { %s40_s14 = ssub.s32 %s15422_s24, %s15644_s13  ;;  %s43_s25 = sadd.s32 1, %s15418_s23 }
  0x96   : > { %p41_p7 = scmp.eq.s32.totalorder %s40_s14, 0  ;;  %p50_p12 = scmp.ne.s32.totalorder %s15418_s23, %s15414_s22 }
  0x97   : > { %p51_p13 = scmp.eq.s32.totalorder %s15422_s24, 0  ;;  %p56_p0 = scmp.ne.s32.totalorder %s15414_s22, %s15410_s21 }
  0x98   : > { %s15655_s29 = scalar_select %p41_p7, %s15418_s23, %s43_s25  }
  0x99   : > { %p15657_p2 = por %p51_p13, %p50_p12  ;;  %p16367_p5 = scmp.eq.s32.totalorder %s15532_s27, 0 }
  0x9a   : > { %p316_p1 = scmp.eq.s32.totalorder %s15532_s27, 1  ;;  %p322_p3 = scmp.eq.s32.totalorder %s12538_s16, 1 }
  0x9b   : > { %p15663_p6 = por %p16367_p5, %p56_p0  ;;  %p14226_p4 = scmp.lt.s32.totalorder %s15422_s24, 2 }
  0x9c   : > { %s15670_s17 = sand.u32 1, %s15418_s23   ;;  %p15672_p8 = por %p316_p1, %p50_p12 }
  0x9d   : > { %s16368_s18 = scalar_select %p15663_p6, 1, 0 }
  0x9e   : > { %s16369_s15 = scalar_select %p15672_p8, 1, 0 }
  0x9f   : > { %p15676_p9 = por %p322_p3, %p56_p0  ;;  %s12551_s20 = sshll.u32 %s15670_s17, 3 }
  0xa0   : > { %s12552_s2 = sshll.u32 %s15422_s24, 7  ;;  %s16371_s0 = sld [smem:[#allocation32_spill]] }
  0xa1   : > { %s16370_s30 = scalar_select %p15676_p9, 1, 0 }
  0xa2   : > { %s468_s25 = scalar_lea.vmem [#allocation2], %s12551_s20  ;;  %p15691_p10 = pnand %p14226_p4, %p15657_p2 }
  0xa3   : > { %s475_s3 = sshll.u32 %s468_s25, 4  ;;  %s14125_s6 = smul.u32 24, %s15670_s17  ;;  %s15687_s3 = int_to_ptr.vmem [resolvable:$true] %s475_s3 }
  0xa4   : > { %s465_s7 = scalar_lea.sflag [#allocation3], %s15670_s17  ;;  %p15276_p7 = pneg %p15691_p10 }
  0xa6   : > { %s15685_s16 = scalar_lea.hbm %s16371_s0, %s12552_s2  ;;  %s15279_s26 = scalar_lea.hbm %s16371_s0, 256 }
  0xa7   : > { %s15274_s19 = scalar_lea.hbm %s15685_s16, 128  ;;  %p15280_p0 = scmp.lt.s32.totalorder %s15685_s16, %s16371_s0 }
  0xa8   : > { %p15275_p11 = scmp.ne.s32.totalorder %s15685_s16, %s15274_s19  ;;  %p15281_p2 = scmp.lt.s32.totalorder %s15279_s26, %s15274_s19 }
  0xaa   : > { %p15277_p12 = pnand %p15276_p7, %p15275_p11  ;;  %p15282_p5 = por %p15281_p2, %p15280_p0 }
  0xac   : > { %p15278_p13 = pneg %p15277_p12 }
  0xae   : > { %p15283_p1 = pnand %p15282_p5, %p15278_p13 }
  0xb0   : > { %15286 = shalt.err (!%p15283_p1)
}
  0xb1   : > { %s15287_s17 = scalar_lea.vmem %s15687_s3, 128  ;;  %s15442_s20 = smov [#allocation2]  }
  0xb2   : > { %p15288_p3 = scmp.ne.s32.totalorder %s15687_s3, %s15287_s17  ;;  %s15292_s2 = sshll.u32 %s15442_s20, 4  ;;  %s15293_s2 = int_to_ptr.vmem [resolvable:$false] %s15292_s2 }
  0xb3   : > { %s15294_s5 = scalar_lea.vmem %s15293_s2, 256  ;;  %p15295_p12 = scmp.lt.s32.totalorder %s15687_s3, %s15293_s2 }
  0xb4   : > { %p15290_p4 = pnand %p15288_p3, %p15276_p7  ;;  %p15296_p9 = scmp.lt.s32.totalorder %s15294_s5, %s15287_s17 }
  0xb6   : > { %p15291_p11 = pneg %p15290_p4  ;;  %p15297_p8 = por %p15296_p9, %p15295_p12 }
  0xb8   : > { %p15298_p0 = pnand %p15297_p8, %p15291_p11 }
  0xba   : > { %15301 = shalt.err (!%p15298_p0)
}
  0xbb   : > { %14208 = dma.hbm_to_vmem [thread:$0]  (!%p15691_p10), %s15685_s16, 128, %s15687_s3, %s465_s7  }
  0xbc   : > { %s14126_s19 = smul.u32 384, %s15422_s24  ;;  %s486_s26 = scalar_lea.vmem [#allocation5], %s14125_s6 }
  0xbd   : > { %s494_s14 = sshll.u32 %s486_s26, 4  ;;  %s16373_s5 = sand.u32 1, %s15422_s24   ;;  %s495_s14 = int_to_ptr.vmem [resolvable:$true] %s494_s14 }
  0xbe   : > { %s492_s0 = scalar_lea.hbm %s16328_s1, %s14126_s19  ;;  %s483_s17 = scalar_lea.sflag [#allocation6], %s16373_s5 }
  0xbf   : > { %s15302_s2 = scalar_lea.hbm %s492_s0, 384  ;;  %s15307_s3 = scalar_lea.hbm %s16328_s1, 768 }
  0xc0   : > { %p15303_p8 = scmp.ne.s32.totalorder %s492_s0, %s15302_s2  ;;  %p15308_p2 = scmp.lt.s32.totalorder %s492_s0, %s16328_s1 }
  0xc1   : > { %p15309_p5 = scmp.lt.s32.totalorder %s15307_s3, %s15302_s2 }
  0xc2   : > { %p15305_p9 = pnand %p15303_p8, %p15276_p7 }
  0xc3   : > { %p15310_p1 = por %p15309_p5, %p15308_p2 }
  0xc4   : > { %p15306_p13 = pneg %p15305_p9 }
  0xc6   : > { %p15311_p3 = pnand %p15310_p1, %p15306_p13 }
  0xc8   : > { %15314 = shalt.err (!%p15311_p3)
}
  0xc9   : > { %s15315_s16 = scalar_lea.vmem %s495_s14, 384  ;;  %s15443_s19 = smov [#allocation5]  }
  0xca   : > { %p15316_p4 = scmp.ne.s32.totalorder %s495_s14, %s15315_s16  ;;  %s15320_s26 = sshll.u32 %s15443_s19, 4  ;;  %s15321_s26 = int_to_ptr.vmem [resolvable:$false] %s15320_s26 }
  0xcb   : > { %s15322_s8 = scalar_lea.vmem %s15321_s26, 768  ;;  %p15323_p0 = scmp.lt.s32.totalorder %s495_s14, %s15321_s26 }
  0xcc   : > { %p15318_p11 = pnand %p15316_p4, %p15276_p7  ;;  %p15324_p8 = scmp.lt.s32.totalorder %s15322_s8, %s15315_s16 }
  0xce   : > { %p15319_p12 = pneg %p15318_p11  ;;  %p15325_p9 = por %p15324_p8, %p15323_p0 }
  0xd0   : > { %p15326_p6 = pnand %p15325_p9, %p15319_p12 }
  0xd2   : > { %15329 = shalt.err (!%p15326_p6)
}
  0xd3   : > { %14211 = dma.hbm_to_vmem [thread:$0]  (!%p15691_p10), %s492_s0, 384, %s495_s14, %s483_s17  }
  0xd4   : > { %p16374_p13 = scmp.ne.s32.totalorder %s16354_s28, 0 }
  0xd5   : > { %s15745_s9 = sand.u32 (!%p16374_p13), 1, %s15414_s22   ;;  %p16375_p7 = scmp.ne.s32.totalorder (!%p16374_p13), %s16368_s18, 0 }
  0xd6   : > { %503 = sbr.rel (%p16374_p13) target bundleno = 2462 (0x99e), region = 68  ;;  %s12555_s25 = sshll.u32 (!%p16374_p13), %s15745_s9, 3 }
  0xd7   : > { %s506_s20 = scalar_lea.sflag (!%p16374_p13), [#allocation3], %s15745_s9  ;;  %s15749_s5 = scalar_lea.vmem (!%p16374_p13), [#allocation2], %s12555_s25 }
  0xdb   : > { %15373 = dma.done.wait (%p16375_p7), %s506_s20, 128  }
  0xdc   : > { %15375 = vsyncadd (%p16375_p7), %s506_s20, 4294967168  ;;  %s514_s0 = sand.u32 1, %s15532_s27   ;;  %s14127_s4 = smul.u32 24, %s15745_s9 }
  0xdd   : > { %s515_s28 = scalar_lea.sflag [#allocation6], %s514_s0 }
  0xde   : > { %s15757_s14 = scalar_lea.vmem [#allocation5], %s14127_s4 }
  0xdf   : > { %15377 = dma.done.wait (%p16375_p7), %s515_s28, 384  }
  0xe0   : > { %15379 = vsyncadd (%p16375_p7), %s515_s28, 4294966912  ;;  %p16376_p6 = scmp.eq.s32.totalorder %s15532_s27, 0 }
  0xe2   : > { %15381 = dma.done.wait (%p16376_p6), [#allocation6], 14336   ;;  %p16377_p10 = pmov %p16376_p6 }
  0xe3   : > { %p16378_p2 = pmov %p16376_p6 }
  0xe4   : > { %15383 = vsyncadd (%p16377_p10), [#allocation6], 4294952960 }
  0xe5   : > { %15385 = dma.done.wait (%p16378_p2), [#allocation9], 139264   ;;  %p16379_p5 = pmov %p16378_p2 }
  0xe6   : > { %p16380_p1 = pmov %p16378_p2 }
  0xe7   : > { %15387 = vsyncadd (%p16379_p5), [#allocation9], 4294828032 }
  0xe8   : > { %15389 = dma.done.wait (%p16380_p1), [#allocation12], 32896   ;;  %p16381_p3 = pmov %p16380_p1 }
  0xe9   : > { %p16382_p4 = pmov %p16380_p1 }
  0xea   : > { %15391 = vsyncadd (%p16381_p3), [#allocation12], 4294934400 }
  0xeb   : > { %15393 = dma.done.wait (%p16382_p4), [#allocation15], 8256   ;;  %p16383_p11 = pmov %p16380_p1 }
  0xec   : > { %p16384_p12 = pmov %p16380_p1 }
  0xed   : > { %15395 = vsyncadd (%p16383_p11), [#allocation15], 4294959040 }
  0xee   : > { %15397 = dma.done.wait (%p16384_p12), [#allocation18], 4128   ;;  %p16385_p0 = pmov %p16380_p1 }
  0xf0   : > { %15399 = vsyncadd (%p16385_p0), [#allocation18], 4294963168  ;;  %p16386_p8 = pmov %p16385_p0 }
  0xf1   : > { %p16387_p9 = pmov %p16385_p0 }
  0xf2   : > { %15401 = dma.done.wait (%p16386_p8), [#allocation21], 32  }
  0xf3   : > { %15403 = vsyncadd (%p16387_p9), [#allocation21], 4294967264  ;;  %v15444_v0 = vmov 0   ;;  %v14289_v1 = vld [vmem:[#allocation7 + $0x314] ss:$56 sps:$4 sm:$0xff]   ;;  %s12566_s18 = sshll.u32 %s15745_s9, 4 }
  0xf4   : > { %1311 = vmatprep.mubr.bf16.mxu0 %v15444_v0  ;;  %1352 = vmatprep.mubr.bf16.mxu1 %v15444_v0  ;;  %v14291_v2 = vld [vmem:[#allocation7 + $0x31c] ss:$56 sps:$4 sm:$0xff]   ;;  %v14293_v3 = vld [vmem:[#allocation7 + $0x310] ss:$56 sps:$4 sm:$0xff]   ;;  %v14297_v6 = vld [vmem:[#allocation7 + $0x2ac] ss:$56 sps:$4 sm:$0xff]  }
  0xf5   : > { %1279 = vmatprep.subr.bf16.mxu0 %v14289_v1  ;;  %v14294_v4 = vld [vmem:[#allocation7 + $0x318] ss:$56 sps:$4 sm:$0xff]   ;;  %1320 = vmatprep.subr.bf16.mxu1 %v14291_v2  ;;  %v14295_v5 = vld [vmem:[#allocation7 + $0x2a4] ss:$56 sps:$4 sm:$0xff]   ;;  %v14300_v8 = vld [vmem:[#allocation7 + $0x2a8] ss:$56 sps:$4 sm:$0xff]  }
  0xf6   : > { %1280 = vmatpush1.bf16.msra.mxu0 %v14293_v3  ;;  %1321 = vmatpush1.bf16.msra.mxu1 %v14294_v4  ;;  %v14299_v7 = vld [vmem:[#allocation7 + $0x2a0] ss:$56 sps:$4 sm:$0xff]   ;;  %v14301_v9 = vld [vmem:[#allocation7 + $0x234] ss:$56 sps:$4 sm:$0xff]   ;;  %v14305_v11 = vld [vmem:[#allocation7 + $0x230] ss:$56 sps:$4 sm:$0xff]  }
  0xf7   : > { %1281 = vmatprep.subr.bf16.mxu0 %v14295_v5  ;;  %1322 = vmatprep.subr.bf16.mxu1 %v14297_v6  ;;  %v14303_v10 = vld [vmem:[#allocation7 + $0x23c] ss:$56 sps:$4 sm:$0xff]   ;;  %v14306_v12 = vld [vmem:[#allocation7 + $0x238] ss:$56 sps:$4 sm:$0xff]   ;;  %v14309_v14 = vld [vmem:[#allocation7 + $0x1cc] ss:$56 sps:$4 sm:$0xff]  }
  0xf8   : > { %v14307_v13 = vld [vmem:[#allocation7 + $0x1c4] ss:$56 sps:$4 sm:$0xff]   ;;  %v14311_v15 = vld [vmem:[#allocation7 + $0x1c0] ss:$56 sps:$4 sm:$0xff]   ;;  %v14313_v17 = vld [vmem:[#allocation7 + $0x154] ss:$56 sps:$4 sm:$0xff]  }
  0xf9   : > { %v14312_v16 = vld [vmem:[#allocation7 + $0x1c8] ss:$56 sps:$4 sm:$0xff]   ;;  %v14315_v18 = vld [vmem:[#allocation7 + $0x15c] ss:$56 sps:$4 sm:$0xff]   ;;  %v14318_v20 = vld [vmem:[#allocation7 + $0x158] ss:$56 sps:$4 sm:$0xff]  }
  0xfa   : > { %1282 = vmatpush1.bf16.msra.mxu0 %v14299_v7  ;;  %1323 = vmatpush1.bf16.msra.mxu1 %v14300_v8  ;;  %v14317_v19 = vld [vmem:[#allocation7 + $0x150] ss:$56 sps:$4 sm:$0xff]   ;;  %v14319_v21 = vld [vmem:[#allocation7 + $0xe4] ss:$56 sps:$4 sm:$0xff]   ;;  %v14323_v23 = vld [vmem:[#allocation7 + $0xe0] ss:$56 sps:$4 sm:$0xff]  }
  0xfb   : > { %1283 = vmatprep.subr.bf16.mxu0 %v14301_v9  ;;  %1324 = vmatprep.subr.bf16.mxu1 %v14303_v10  ;;  %v14321_v22 = vld [vmem:[#allocation7 + $0xec] ss:$56 sps:$4 sm:$0xff]   ;;  %v14324_v24 = vld [vmem:[#allocation7 + $0xe8] ss:$56 sps:$4 sm:$0xff]   ;;  %v14327_v26 = vld [vmem:[#allocation7 + $0x7c] ss:$56 sps:$4 sm:$0xff]  }
  0xfc   : > { %v14325_v25 = vld [vmem:[#allocation7 + $0x74] ss:$56 sps:$4 sm:$0xff]   ;;  %v14329_v27 = vld [vmem:[#allocation7 + $0x70] ss:$56 sps:$4 sm:$0xff]   ;;  %v14331_v29 = vld [vmem:[#allocation7 + $0x4] ss:$56 sps:$4 sm:$0xff]  }
  0xfd   : > { %v14330_v28 = vld [vmem:[#allocation7 + $0x78] ss:$56 sps:$4 sm:$0xff]   ;;  %v14333_v30 = vld [vmem:[#allocation7 + $0xc] ss:$56 sps:$4 sm:$0xff]   ;;  %v14336_v32 = vld [vmem:[#allocation7 + $0x8] ss:$56 sps:$4 sm:$0xff]  }
  0xfe   : > { %1284 = vmatpush1.bf16.msra.mxu0 %v14305_v11  ;;  %1325 = vmatpush1.bf16.msra.mxu1 %v14306_v12  ;;  %v14335_v31 = vld [vmem:[#allocation7] ss:$56 sps:$4 sm:$0xff]   ;;  %v14339_v34 = vld [vmem:[#allocation7 + $0x324] ss:$56 sps:$4 sm:$0xff]   ;;  %v14345_v39 = vld [vmem:[#allocation7 + $0x2b4] ss:$56 sps:$4 sm:$0xff]  }
  0xff   : > { %1285 = vmatprep.subr.bf16.mxu0 %v14307_v13  ;;  %1326 = vmatprep.subr.bf16.mxu1 %v14309_v14  ;;  %v605_v33 = vld [vmem:[%s15749_s5] sm:$0xff]  ;;  %v14348_v40 = vld [vmem:[#allocation7 + $0x2bc] ss:$56 sps:$4 sm:$0xff]   ;;  %v14346_v42 = vld [vmem:[#allocation7 + $0x2b8] ss:$56 sps:$4 sm:$0xff]   ;;  %s14124_s17 = sshll.u32 %s15532_s27, 8 }
 0x100   : > { %v14342_v35 = vld [vmem:[#allocation7 + $0x32c] ss:$56 sps:$4 sm:$0xff]   ;;  %v15790_v36 = vpack.c.bf16 %v605_v33, %v605_v33  ;;  %v14337_v37 = vld [vmem:[#allocation7 + $0x320] ss:$56 sps:$4 sm:$0xff]   ;;  %v14343_v41 = vld [vmem:[#allocation7 + $0x2b0] ss:$56 sps:$4 sm:$0xff]   ;;  %s16284_s16 = scalar_lea.hbm %s16339_s12, %s14124_s17 }
 0x101   : > { %v14340_v38 = vld [vmem:[#allocation7 + $0x328] ss:$56 sps:$4 sm:$0xff]   ;;  %v14351_v43 = vld [vmem:[#allocation7 + $0x244] ss:$56 sps:$4 sm:$0xff]   ;;  %v14357_v47 = vld [vmem:[#allocation7 + $0x1d4] ss:$56 sps:$4 sm:$0xff]  }
 0x102   : > { %1286 = vmatpush1.bf16.msra.mxu0 %v14311_v15  ;;  %1327 = vmatpush1.bf16.msra.mxu1 %v14312_v16  ;;  %v14354_v44 = vld [vmem:[#allocation7 + $0x24c] ss:$56 sps:$4 sm:$0xff]   ;;  %v14349_v45 = vld [vmem:[#allocation7 + $0x240] ss:$56 sps:$4 sm:$0xff]   ;;  %v14360_v48 = vld [vmem:[#allocation7 + $0x1dc] ss:$56 sps:$4 sm:$0xff]  }
 0x103   : > { %1287 = vmatprep.subr.bf16.mxu0 %v14313_v17  ;;  %1328 = vmatprep.subr.bf16.mxu1 %v14315_v18  ;;  %v14352_v46 = vld [vmem:[#allocation7 + $0x248] ss:$56 sps:$4 sm:$0xff]   ;;  %v14358_v50 = vld [vmem:[#allocation7 + $0x1d8] ss:$56 sps:$4 sm:$0xff]   ;;  %v14363_v51 = vld [vmem:[#allocation7 + $0x164] ss:$56 sps:$4 sm:$0xff]  }
 0x104   : > { %v14355_v49 = vld [vmem:[#allocation7 + $0x1d0] ss:$56 sps:$4 sm:$0xff]   ;;  %v14366_v52 = vld [vmem:[#allocation7 + $0x16c] ss:$56 sps:$4 sm:$0xff]   ;;  %v14361_v53 = vld [vmem:[#allocation7 + $0x160] ss:$56 sps:$4 sm:$0xff]  }
 0x105   : > { %v14364_v54 = vld [vmem:[#allocation7 + $0x168] ss:$56 sps:$4 sm:$0xff]   ;;  %v14369_v55 = vld [vmem:[#allocation7 + $0xf4] ss:$56 sps:$4 sm:$0xff]   ;;  %v14370_v58 = vld [vmem:[#allocation7 + $0xf8] ss:$56 sps:$4 sm:$0xff]  }
 0x106   : > { %1288 = vmatpush1.bf16.msra.mxu0 %v14317_v19  ;;  %1329 = vmatpush1.bf16.msra.mxu1 %v14318_v20  ;;  %v14372_v56 = vld [vmem:[#allocation7 + $0xfc] ss:$56 sps:$4 sm:$0xff]   ;;  %v14367_v57 = vld [vmem:[#allocation7 + $0xf0] ss:$56 sps:$4 sm:$0xff]   ;;  %v14378_v60 = vld [vmem:[#allocation7 + $0x8c] ss:$56 sps:$4 sm:$0xff]  }
 0x107   : > { %1289 = vmatprep.subr.bf16.mxu0 %v14319_v21  ;;  %1330 = vmatprep.subr.bf16.mxu1 %v14321_v22  ;;  %v14375_v59 = vld [vmem:[#allocation7 + $0x84] ss:$56 sps:$4 sm:$0xff]   ;;  %v14373_v61 = vld [vmem:[#allocation7 + $0x80] ss:$56 sps:$4 sm:$0xff]   ;;  %v14381_v63 = vld [vmem:[#allocation7 + $0x14] ss:$56 sps:$4 sm:$0xff]  }
 0x108   : > { %v14376_v62 = vld [vmem:[#allocation7 + $0x88] ss:$56 sps:$4 sm:$0xff]   ;;  %v14384_v1 = vld [vmem:[#allocation7 + $0x1c] ss:$56 sps:$4 sm:$0xff]   ;;  %v14382_v3 = vld [vmem:[#allocation7 + $0x18] ss:$56 sps:$4 sm:$0xff]  }
 0x109   : > { %v14379_v2 = vld [vmem:[#allocation7 + $0x10] ss:$56 sps:$4 sm:$0xff]   ;;  %v14387_v4 = vld [vmem:[#allocation7 + $0x334] ss:$56 sps:$4 sm:$0xff]   ;;  %v14393_v8 = vld [vmem:[#allocation7 + $0x2c4] ss:$56 sps:$4 sm:$0xff]  }
 0x10a   : > { %1290 = vmatpush1.bf16.msra.mxu0 %v14323_v23  ;;  %1331 = vmatpush1.bf16.msra.mxu1 %v14324_v24  ;;  %v14390_v5 = vld [vmem:[#allocation7 + $0x33c] ss:$56 sps:$4 sm:$0xff]   ;;  %v14385_v6 = vld [vmem:[#allocation7 + $0x330] ss:$56 sps:$4 sm:$0xff]   ;;  %v14396_v9 = vld [vmem:[#allocation7 + $0x2cc] ss:$56 sps:$4 sm:$0xff]  }
 0x10b   : > { %1291 = vmatprep.subr.bf16.mxu0 %v14325_v25  ;;  %1332 = vmatprep.subr.bf16.mxu1 %v14327_v26  ;;  %v14388_v7 = vld [vmem:[#allocation7 + $0x338] ss:$56 sps:$4 sm:$0xff]   ;;  %v14394_v11 = vld [vmem:[#allocation7 + $0x2c8] ss:$56 sps:$4 sm:$0xff]   ;;  %v14399_v12 = vld [vmem:[#allocation7 + $0x254] ss:$56 sps:$4 sm:$0xff]  }
 0x10c   : > { %v14391_v10 = vld [vmem:[#allocation7 + $0x2c0] ss:$56 sps:$4 sm:$0xff]   ;;  %v14402_v13 = vld [vmem:[#allocation7 + $0x25c] ss:$56 sps:$4 sm:$0xff]   ;;  %v14397_v14 = vld [vmem:[#allocation7 + $0x250] ss:$56 sps:$4 sm:$0xff]  }
 0x10d   : > { %v14400_v15 = vld [vmem:[#allocation7 + $0x258] ss:$56 sps:$4 sm:$0xff]   ;;  %v14405_v16 = vld [vmem:[#allocation7 + $0x1e4] ss:$56 sps:$4 sm:$0xff]   ;;  %v14406_v19 = vld [vmem:[#allocation7 + $0x1e8] ss:$56 sps:$4 sm:$0xff]  }
 0x10e   : > { %1292 = vmatpush1.bf16.msra.mxu0 %v14329_v27  ;;  %1333 = vmatpush1.bf16.msra.mxu1 %v14330_v28  ;;  %v14408_v17 = vld [vmem:[#allocation7 + $0x1ec] ss:$56 sps:$4 sm:$0xff]   ;;  %v14403_v18 = vld [vmem:[#allocation7 + $0x1e0] ss:$56 sps:$4 sm:$0xff]   ;;  %v14414_v21 = vld [vmem:[#allocation7 + $0x17c] ss:$56 sps:$4 sm:$0xff]  }
 0x10f   : > { %1293 = vmatprep.subr.bf16.mxu0 %v14331_v29  ;;  %1334 = vmatprep.subr.bf16.mxu1 %v14333_v30  ;;  %v14411_v20 = vld [vmem:[#allocation7 + $0x174] ss:$56 sps:$4 sm:$0xff]   ;;  %v14409_v22 = vld [vmem:[#allocation7 + $0x170] ss:$56 sps:$4 sm:$0xff]   ;;  %v14417_v24 = vld [vmem:[#allocation7 + $0x104] ss:$56 sps:$4 sm:$0xff]  }
 0x110   : > { %v14412_v23 = vld [vmem:[#allocation7 + $0x178] ss:$56 sps:$4 sm:$0xff]   ;;  %v14420_v25 = vld [vmem:[#allocation7 + $0x10c] ss:$56 sps:$4 sm:$0xff]   ;;  %v14418_v27 = vld [vmem:[#allocation7 + $0x108] ss:$56 sps:$4 sm:$0xff]  }
 0x111   : > { %v14415_v26 = vld [vmem:[#allocation7 + $0x100] ss:$56 sps:$4 sm:$0xff]   ;;  %v14423_v28 = vld [vmem:[#allocation7 + $0x94] ss:$56 sps:$4 sm:$0xff]   ;;  %v14421_v30 = vld [vmem:[#allocation7 + $0x90] ss:$56 sps:$4 sm:$0xff]  }
 0x112   : > { %1294 = vmatpush1.bf16.msra.mxu0 %v14335_v31  ;;  %1335 = vmatpush1.bf16.msra.mxu1 %v14336_v32  ;;  %v14426_v29 = vld [vmem:[#allocation7 + $0x9c] ss:$56 sps:$4 sm:$0xff]   ;;  %v14424_v31 = vld [vmem:[#allocation7 + $0x98] ss:$56 sps:$4 sm:$0xff]   ;;  %v14432_v33 = vld [vmem:[#allocation7 + $0x2c] ss:$56 sps:$4 sm:$0xff]  }
 0x113   : > { %1361 = vmatprep.subr.bf16.mxu0 %v14339_v34  ;;  %1402 = vmatprep.subr.bf16.mxu1 %v14342_v35  ;;  %v14429_v32 = vld [vmem:[#allocation7 + $0x24] ss:$56 sps:$4 sm:$0xff]   ;;  %s603_s2 = scalar_lea.vmem [#allocation22], %s12566_s18  ;;  %s12336_s27 = scalar_lea.sflag [#allocation4], %s15745_s9 }
 0x114   : > { %v2538_v34 = vld [vmem:[#allocation10 + $0x1c0] sm:$0xff]  ;;  %s12350_s3 = sshll.u32 %s603_s2, 4  ;;  %p16388_p7 = scmp.ne.s32.totalorder %s16369_s15, 0  ;;  %s16286_s3 = int_to_ptr.vmem [resolvable:$true] %s12350_s3 }
 0x115   : > { %1312 = vmatmul.mubr.bf16.vlgmr.msra.gmra.mxu0 %v15790_v36  ;;  %1353 = vmatmul.mubr.bf16.vlgmr.msra.gmra.mxu1 %v15790_v36  ;;  %v2542_v35 = vld [vmem:[#allocation10 + $0x1e0] sm:$0xff]  ;;  %s15330_s19 = scalar_lea.vmem %s16286_s3, 256  ;;  %s15445_s26 = smov [#allocation22]  }
 0x116   : > { %1362 = vmatpush1.bf16.msra.mxu0 %v14337_v37  ;;  %1403 = vmatpush1.bf16.msra.mxu1 %v14340_v38  ;;  %v14427_v37 = vld [vmem:[#allocation7 + $0x20] ss:$56 sps:$4 sm:$0xff]   ;;  %p15331_p13 = scmp.ne.s32.totalorder %s16286_s3, %s15330_s19  ;;  %s15334_s8 = sshll.u32 %s15445_s26, 4  ;;  %s15335_s8 = int_to_ptr.vmem [resolvable:$false] %s15334_s8 }
 0x117   : > { %1363 = vmatprep.subr.bf16.mxu0 %v14345_v39  ;;  %1404 = vmatprep.subr.bf16.mxu1 %v14348_v40  ;;  %v14430_v38 = vld [vmem:[#allocation7 + $0x28] ss:$56 sps:$4 sm:$0xff]   ;;  %v14435_v39 = vld [vmem:[#allocation7 + $0x344] ss:$56 sps:$4 sm:$0xff]   ;;  %v12736_v40 = vcombine.high %v2538_v34, %v2542_v35  ;;  %s15336_s25 = scalar_lea.vmem %s15335_s8, 512  ;;  %p15337_p2 = scmp.lt.s32.totalorder %s16286_s3, %s15335_s8 }
 0x118   : > { %1393 = vmatprep.mubr.bf16.mxu0 %v15444_v0  ;;  %1434 = vmatprep.mubr.bf16.mxu1 %v15444_v0  ;;  %p15332_p6 = pnand %p15331_p13, %p16388_p7  ;;  %p15338_p5 = scmp.lt.s32.totalorder %s15336_s25, %s15330_s19 }
 0x11a   : > { %1364 = vmatpush1.bf16.msra.mxu0 %v14343_v41  ;;  %1405 = vmatpush1.bf16.msra.mxu1 %v14346_v42  ;;  %v2530_v41 = vld [vmem:[#allocation10 + $0x180] sm:$0xff]  ;;  %p15333_p10 = pneg %p15332_p6  ;;  %p15339_p1 = por %p15338_p5, %p15337_p2 }
 0x11b   : > { %1365 = vmatprep.subr.bf16.mxu0 %v14351_v43  ;;  %1406 = vmatprep.subr.bf16.mxu1 %v14354_v44  ;;  %v2534_v42 = vld [vmem:[#allocation10 + $0x1a0] sm:$0xff]  ;;  %v1567_v43 = vld [vmem:[%s15757_s14 + $0x8] sm:$0xff] }
 0x11c   : > { %v14433_v44 = vld [vmem:[#allocation7 + $0x340] ss:$56 sps:$4 sm:$0xff]   ;;  %p15340_p3 = pnand %p15339_p1, %p15333_p10 }
 0x11e   : > { %1366 = vmatpush1.bf16.msra.mxu0 %v14349_v45  ;;  %1407 = vmatpush1.bf16.msra.mxu1 %v14352_v46  ;;  %v12735_v45 = vcombine.low %v2538_v34, %v2542_v35  ;;  %v14438_v46 = vld [vmem:[#allocation7 + $0x2d4] ss:$56 sps:$4 sm:$0xff]  }
 0x11f   : > { %1367 = vmatprep.subr.bf16.mxu0 %v14357_v47  ;;  %1408 = vmatprep.subr.bf16.mxu1 %v14360_v48  ;;  %v12728_v47 = vcombine.high %v2530_v41, %v2534_v42  ;;  %v2522_v48 = vld [vmem:[#allocation10 + $0x140] sm:$0xff] }
 0x122   : > { %1368 = vmatpush1.bf16.msra.mxu0 %v14355_v49  ;;  %1409 = vmatpush1.bf16.msra.mxu1 %v14358_v50  ;;  %v2526_v49 = vld [vmem:[#allocation10 + $0x160] sm:$0xff]  ;;  %v15801_v50 = vpack.c.bf16 %v1567_v43, %v1567_v43 }
 0x123   : > { %1369 = vmatprep.subr.bf16.mxu0 %v14363_v51  ;;  %1410 = vmatprep.subr.bf16.mxu1 %v14366_v52  ;;  %v14436_v51 = vld [vmem:[#allocation7 + $0x2d0] ss:$56 sps:$4 sm:$0xff]   ;;  %v12727_v52 = vcombine.low %v2530_v41, %v2534_v42  ;;  %v2654_v42 = vld [vmem:[#allocation10 + $0x560] sm:$0xff] }
 0x126   : > { %1370 = vmatpush1.bf16.msra.mxu0 %v14361_v53  ;;  %1411 = vmatpush1.bf16.msra.mxu1 %v14364_v54  ;;  %v14441_v53 = vld [vmem:[#allocation7 + $0x264] ss:$56 sps:$4 sm:$0xff]   ;;  %v12720_v54 = vcombine.high %v2522_v48, %v2526_v49 }
 0x127   : > { %1371 = vmatprep.subr.bf16.mxu0 %v14369_v55  ;;  %1412 = vmatprep.subr.bf16.mxu1 %v14372_v56  ;;  %v2514_v55 = vld [vmem:[#allocation10 + $0x100] sm:$0xff] }
 0x128   : > { %v2518_v56 = vld [vmem:[#allocation10 + $0x120] sm:$0xff] }
 0x12a   : > { %1372 = vmatpush1.bf16.msra.mxu0 %v14367_v57  ;;  %1413 = vmatpush1.bf16.msra.mxu1 %v14370_v58  ;;  %v14439_v57 = vld [vmem:[#allocation7 + $0x260] ss:$56 sps:$4 sm:$0xff]   ;;  %v12719_v58 = vcombine.low %v2522_v48, %v2526_v49 }
 0x12b   : > { %1373 = vmatprep.subr.bf16.mxu0 %v14375_v59  ;;  %1414 = vmatprep.subr.bf16.mxu1 %v14378_v60  ;;  %v14444_v59 = vld [vmem:[#allocation7 + $0x1f4] ss:$56 sps:$4 sm:$0xff]   ;;  %v12712_v60 = vcombine.high %v2514_v55, %v2518_v56 }
 0x12e   : > { %1374 = vmatpush1.bf16.msra.mxu0 %v14373_v61  ;;  %1415 = vmatpush1.bf16.msra.mxu1 %v14376_v62  ;;  %v2506_v61 = vld [vmem:[#allocation10 + $0xc0] sm:$0xff] }
 0x12f   : > { %1375 = vmatprep.subr.bf16.mxu0 %v14381_v63  ;;  %1416 = vmatprep.subr.bf16.mxu1 %v14384_v1  ;;  %v2510_v62 = vld [vmem:[#allocation10 + $0xe0] sm:$0xff]  ;;  %v14442_v63 = vld [vmem:[#allocation7 + $0x1f0] ss:$56 sps:$4 sm:$0xff]   ;;  %v12711_v1 = vcombine.low %v2514_v55, %v2518_v56 }
 0x130   : > { %v2634_v55 = vld [vmem:[#allocation10 + $0x4c0] sm:$0xff] }
 0x132   : > { %1376 = vmatpush1.bf16.msra.mxu0 %v14379_v2  ;;  %1417 = vmatpush1.bf16.msra.mxu1 %v14382_v3  ;;  %v14447_v2 = vld [vmem:[#allocation7 + $0x184] ss:$56 sps:$4 sm:$0xff]   ;;  %v12704_v3 = vcombine.high %v2506_v61, %v2510_v62 }
 0x133   : > { %1443 = vmatprep.subr.bf16.mxu0 %v14387_v4  ;;  %1484 = vmatprep.subr.bf16.mxu1 %v14390_v5  ;;  %v2498_v4 = vld [vmem:[#allocation10 + $0x80] sm:$0xff] }
 0x134   : > { %v2502_v5 = vld [vmem:[#allocation10 + $0xa0] sm:$0xff] }
 0x135   : > { %1394 = vmatmul.mubr.bf16.vlgmr.msra.gmra.mxu0 %v15790_v36  ;;  %1435 = vmatmul.mubr.bf16.vlgmr.msra.gmra.mxu1 %v15790_v36 }
 0x136   : > { %1444 = vmatpush1.bf16.msra.mxu0 %v14385_v6  ;;  %1485 = vmatpush1.bf16.msra.mxu1 %v14388_v7  ;;  %v14445_v6 = vld [vmem:[#allocation7 + $0x180] ss:$56 sps:$4 sm:$0xff]   ;;  %v12703_v7 = vcombine.low %v2506_v61, %v2510_v62 }
 0x137   : > { %1445 = vmatprep.subr.bf16.mxu0 %v14393_v8  ;;  %1486 = vmatprep.subr.bf16.mxu1 %v14396_v9  ;;  %v14450_v8 = vld [vmem:[#allocation7 + $0x114] ss:$56 sps:$4 sm:$0xff]   ;;  %v12696_v9 = vcombine.high %v2498_v4, %v2502_v5  ;;  %v2562_v61 = vld [vmem:[#allocation10 + $0x280] sm:$0xff] }
 0x138   : > { %1475 = vmatprep.mubr.bf16.mxu0 %v15444_v0  ;;  %1516 = vmatprep.mubr.bf16.mxu1 %v15444_v0  ;;  %v2566_v62 = vld [vmem:[#allocation10 + $0x2a0] sm:$0xff] }
 0x13a   : > { %1446 = vmatpush1.bf16.msra.mxu0 %v14391_v10  ;;  %1487 = vmatpush1.bf16.msra.mxu1 %v14394_v11  ;;  %v2490_v10 = vld [vmem:[#allocation10 + $0x40] sm:$0xff] }
 0x13b   : > { %1447 = vmatprep.subr.bf16.mxu0 %v14399_v12  ;;  %1488 = vmatprep.subr.bf16.mxu1 %v14402_v13  ;;  %v2494_v11 = vld [vmem:[#allocation10 + $0x60] sm:$0xff]  ;;  %v14448_v12 = vld [vmem:[#allocation7 + $0x110] ss:$56 sps:$4 sm:$0xff]   ;;  %v12695_v13 = vcombine.low %v2498_v4, %v2502_v5 }
 0x13e   : > { %1448 = vmatpush1.bf16.msra.mxu0 %v14397_v14  ;;  %1489 = vmatpush1.bf16.msra.mxu1 %v14400_v15  ;;  %v14453_v14 = vld [vmem:[#allocation7 + $0xa4] ss:$56 sps:$4 sm:$0xff]   ;;  %v12688_v15 = vcombine.high %v2490_v10, %v2494_v11 }
 0x13f   : > { %1449 = vmatprep.subr.bf16.mxu0 %v14405_v16  ;;  %1490 = vmatprep.subr.bf16.mxu1 %v14408_v17  ;;  %v2482_v16 = vld [vmem:[#allocation10] sm:$0xff] }
 0x140   : > { %v2486_v17 = vld [vmem:[#allocation10 + $0x20] sm:$0xff] }
 0x142   : > { %1450 = vmatpush1.bf16.msra.mxu0 %v14403_v18  ;;  %1491 = vmatpush1.bf16.msra.mxu1 %v14406_v19  ;;  %v14451_v18 = vld [vmem:[#allocation7 + $0xa0] ss:$56 sps:$4 sm:$0xff]   ;;  %v12687_v19 = vcombine.low %v2490_v10, %v2494_v11 }
 0x143   : > { %1451 = vmatprep.subr.bf16.mxu0 %v14411_v20  ;;  %1492 = vmatprep.subr.bf16.mxu1 %v14414_v21  ;;  %v14456_v20 = vld [vmem:[#allocation7 + $0x34] ss:$56 sps:$4 sm:$0xff]   ;;  %v12680_v21 = vcombine.high %v2482_v16, %v2486_v17  ;;  %v2622_v11 = vld [vmem:[#allocation10 + $0x460] sm:$0xff] }
 0x146   : > { %1452 = vmatpush1.bf16.msra.mxu0 %v14409_v22  ;;  %1493 = vmatpush1.bf16.msra.mxu1 %v14412_v23  ;;  %v2602_v22 = vld [vmem:[#allocation10 + $0x3c0] sm:$0xff] }
 0x147   : > { %1453 = vmatprep.subr.bf16.mxu0 %v14417_v24  ;;  %1494 = vmatprep.subr.bf16.mxu1 %v14420_v25  ;;  %v2606_v23 = vld [vmem:[#allocation10 + $0x3e0] sm:$0xff]  ;;  %v14454_v24 = vld [vmem:[#allocation7 + $0x30] ss:$56 sps:$4 sm:$0xff]  }
 0x148   : > { %v2666_v25 = vld [vmem:[#allocation10 + $0x5c0] sm:$0xff]  ;;  %v12799_v34 = vcombine.low %v2602_v22, %v2606_v23 }
 0x14a   : > { %1454 = vmatpush1.bf16.msra.mxu0 %v14415_v26  ;;  %1495 = vmatpush1.bf16.msra.mxu1 %v14418_v27  ;;  %v2670_v26 = vld [vmem:[#allocation10 + $0x5e0] sm:$0xff]  ;;  %v12679_v27 = vcombine.low %v2482_v16, %v2486_v17 }
 0x14b   : > { %1455 = vmatprep.subr.bf16.mxu0 %v14423_v28  ;;  %1496 = vmatprep.subr.bf16.mxu1 %v14426_v29  ;;  %v2594_v28 = vld [vmem:[#allocation10 + $0x380] sm:$0xff]  ;;  %v12863_v35 = vcombine.low %v2666_v25, %v2670_v26 }
 0x14c   : > { %v2598_v29 = vld [vmem:[#allocation10 + $0x3a0] sm:$0xff] }
 0x14d   : > { %v12791_v43 = vcombine.low %v2594_v28, %v2598_v29  ;;  %v2610_v16 = vld [vmem:[#allocation10 + $0x400] sm:$0xff] }
 0x14e   : > { %1456 = vmatpush1.bf16.msra.mxu0 %v14421_v30  ;;  %1497 = vmatpush1.bf16.msra.mxu1 %v14424_v31  ;;  %v2658_v30 = vld [vmem:[#allocation10 + $0x580] sm:$0xff]  ;;  %v12800_v31 = vcombine.high %v2602_v22, %v2606_v23  ;;  %v2539_v22 = vld [vmem:[#allocation10 + $0x1c8] sm:$0xff] }
 0x14f   : > { %1457 = vmatprep.subr.bf16.mxu0 %v14429_v32  ;;  %1498 = vmatprep.subr.bf16.mxu1 %v14432_v33  ;;  %v12864_v32 = vcombine.high %v2666_v25, %v2670_v26  ;;  %v2662_v33 = vld [vmem:[#allocation10 + $0x5a0] sm:$0xff]  ;;  %v2543_v23 = vld [vmem:[#allocation10 + $0x1e8] sm:$0xff] }
 0x150   : > { %v12856_v41 = vcombine.high %v2658_v30, %v2662_v33 }
 0x152   : > { %1458 = vmatpush1.bf16.msra.mxu0 %v14427_v37  ;;  %1499 = vmatpush1.bf16.msra.mxu1 %v14430_v38  ;;  %v2586_v37 = vld [vmem:[#allocation10 + $0x340] sm:$0xff] }
 0x153   : > { %1525 = vmatprep.subr.bf16.mxu0 %v14435_v39  ;;  %3634 = vmatprep.subr.bf16.mxu1 %v12736_v40  ;;  %v2590_v38 = vld [vmem:[#allocation10 + $0x360] sm:$0xff]  ;;  %v12792_v40 = vcombine.high %v2594_v28, %v2598_v29  ;;  %v1566_v28 = vld [vmem:[%s15757_s14] sm:$0xff] }
 0x154   : > { %v2650_v39 = vld [vmem:[#allocation10 + $0x540] sm:$0xff]  ;;  %v12784_v48 = vcombine.high %v2586_v37, %v2590_v38 }
 0x155   : > { %1476 = vmatmul.mubr.bf16.vlgmr.msra.gmra.mxu0 %v15790_v36  ;;  %1517 = vmatmul.mubr.bf16.vlgmr.msra.gmra.mxu1 %v15790_v36  ;;  %v12848_v49 = vcombine.high %v2650_v39, %v2654_v42  ;;  %v1568_v29 = vld [vmem:[%s15757_s14 + $0x10] sm:$0xff] }
 0x156   : > { %1526 = vmatpush1.bf16.msra.mxu0 %v14433_v44  ;;  %3635 = vmatpush1.bf16.msra.mxu1 %v12735_v45  ;;  %v12855_v44 = vcombine.low %v2658_v30, %v2662_v33  ;;  %v2578_v45 = vld [vmem:[#allocation10 + $0x300] sm:$0xff]  ;;  %v2535_v33 = vld [vmem:[#allocation10 + $0x1a8] sm:$0xff] }
 0x157   : > { %1527 = vmatprep.subr.bf16.mxu0 %v14438_v46  ;;  %3636 = vmatprep.subr.bf16.mxu1 %v12728_v47  ;;  %v2582_v46 = vld [vmem:[#allocation10 + $0x320] sm:$0xff] }
 0x158   : > { %1557 = vmatprep.mubr.bf16.mxu0 %v15444_v0  ;;  %3666 = vmatprep.mubr.bf16.mxu1 %v15801_v50  ;;  %v2642_v47 = vld [vmem:[#allocation10 + $0x500] sm:$0xff]  ;;  %v12776_v56 = vcombine.high %v2578_v45, %v2582_v46 }
 0x15a   : > { %1528 = vmatpush1.bf16.msra.mxu0 %v14436_v51  ;;  %3637 = vmatpush1.bf16.msra.mxu1 %v12727_v52  ;;  %v2646_v51 = vld [vmem:[#allocation10 + $0x520] sm:$0xff]  ;;  %v12783_v52 = vcombine.low %v2586_v37, %v2590_v38  ;;  %v2663_v38 = vld [vmem:[#allocation10 + $0x5a8] sm:$0xff] }
 0x15b   : > { %1529 = vmatprep.subr.bf16.mxu0 %v14441_v53  ;;  %3638 = vmatprep.subr.bf16.mxu1 %v12720_v54  ;;  %v12847_v53 = vcombine.low %v2650_v39, %v2654_v42  ;;  %v2570_v54 = vld [vmem:[#allocation10 + $0x2c0] sm:$0xff]  ;;  %v15811_v39 = vpack.c.bf16 %v1566_v28, %v1566_v28  ;;  %v2603_v28 = vld [vmem:[#allocation10 + $0x3c8] sm:$0xff] }
 0x15e   : > { %1530 = vmatpush1.bf16.msra.mxu0 %v14439_v57  ;;  %3639 = vmatpush1.bf16.msra.mxu1 %v12719_v58  ;;  %v12840_v57 = vcombine.high %v2642_v47, %v2646_v51  ;;  %v2638_v58 = vld [vmem:[#allocation10 + $0x4e0] sm:$0xff] }
 0x15f   : > { %1531 = vmatprep.subr.bf16.mxu0 %v14444_v59  ;;  %3640 = vmatprep.subr.bf16.mxu1 %v12712_v60  ;;  %v12775_v59 = vcombine.low %v2578_v45, %v2582_v46  ;;  %v12839_v60 = vcombine.low %v2642_v47, %v2646_v51  ;;  %v12831_v5 = vcombine.low %v2634_v55, %v2638_v58  ;;  %v2651_v45 = vld [vmem:[#allocation10 + $0x548] sm:$0xff] }
 0x162   : > { %1532 = vmatpush1.bf16.msra.mxu0 %v14442_v63  ;;  %3641 = vmatpush1.bf16.msra.mxu1 %v12711_v1  ;;  %v2626_v63 = vld [vmem:[#allocation10 + $0x480] sm:$0xff] }
 0x163   : > { %1533 = vmatprep.subr.bf16.mxu0 %v14447_v2  ;;  %3642 = vmatprep.subr.bf16.mxu1 %v12704_v3  ;;  %v12832_v2 = vcombine.high %v2634_v55, %v2638_v58  ;;  %v2630_v3 = vld [vmem:[#allocation10 + $0x4a0] sm:$0xff]  ;;  %v2643_v55 = vld [vmem:[#allocation10 + $0x508] sm:$0xff] }
 0x164   : > { %v12824_v10 = vcombine.high %v2626_v63, %v2630_v3 }
 0x166   : > { %1534 = vmatpush1.bf16.msra.mxu0 %v14445_v6  ;;  %3643 = vmatpush1.bf16.msra.mxu1 %v12703_v7  ;;  %v2554_v6 = vld [vmem:[#allocation10 + $0x240] sm:$0xff] }
 0x167   : > { %1535 = vmatprep.subr.bf16.mxu0 %v14450_v8  ;;  %3644 = vmatprep.subr.bf16.mxu1 %v12696_v9  ;;  %v2558_v7 = vld [vmem:[#allocation10 + $0x260] sm:$0xff]  ;;  %v12760_v9 = vcombine.high %v2562_v61, %v2566_v62 }
 0x168   : > { %v2618_v8 = vld [vmem:[#allocation10 + $0x440] sm:$0xff]  ;;  %v12752_v17 = vcombine.high %v2554_v6, %v2558_v7 }
 0x16a   : > { %1536 = vmatpush1.bf16.msra.mxu0 %v14448_v12  ;;  %3645 = vmatpush1.bf16.msra.mxu1 %v12695_v13  ;;  %v12759_v12 = vcombine.low %v2562_v61, %v2566_v62  ;;  %v12823_v13 = vcombine.low %v2626_v63, %v2630_v3  ;;  %v2507_v61 = vld [vmem:[#allocation10 + $0xc8] sm:$0xff] }
 0x16b   : > { %1537 = vmatprep.subr.bf16.mxu0 %v14453_v14  ;;  %3646 = vmatprep.subr.bf16.mxu1 %v12688_v15  ;;  %v2546_v14 = vld [vmem:[#allocation10 + $0x200] sm:$0xff]  ;;  %v2511_v62 = vld [vmem:[#allocation10 + $0xe8] sm:$0xff] }
 0x16c   : > { %v2550_v15 = vld [vmem:[#allocation10 + $0x220] sm:$0xff]  ;;  %v2635_v63 = vld [vmem:[#allocation10 + $0x4c8] sm:$0xff] }
 0x16d   : > { %v12744_v25 = vcombine.high %v2546_v14, %v2550_v15  ;;  %v12743_v30 = vcombine.low %v2546_v14, %v2550_v15 }
 0x16e   : > { %1538 = vmatpush1.bf16.msra.mxu0 %v14451_v18  ;;  %3647 = vmatpush1.bf16.msra.mxu1 %v12687_v19  ;;  %v12816_v18 = vcombine.high %v2618_v8, %v2622_v11  ;;  %v2614_v19 = vld [vmem:[#allocation10 + $0x420] sm:$0xff] }
 0x16f   : > { %1539 = vmatprep.subr.bf16.mxu0 %v14456_v20  ;;  %3648 = vmatprep.subr.bf16.mxu1 %v12680_v21  ;;  %v12751_v20 = vcombine.low %v2554_v6, %v2558_v7  ;;  %v12815_v21 = vcombine.low %v2618_v8, %v2622_v11  ;;  %v12808_v26 = vcombine.high %v2610_v16, %v2614_v19  ;;  %v2627_v8 = vld [vmem:[#allocation10 + $0x488] sm:$0xff] }
 0x170   : > { %v12706_v6 = vcombine.high %v2507_v61, %v2511_v62 }
 0x172   : > { %1540 = vmatpush1.bf16.msra.mxu0 %v14454_v24  ;;  %3649 = vmatpush1.bf16.msra.mxu1 %v12679_v27  ;;  %v2667_v24 = vld [vmem:[#allocation10 + $0x5c8] sm:$0xff] }
 0x173   : > { %3650 = vmatprep.subr.bf16.mxu1 %v12800_v31  ;;  %3675 = vmatprep.subr.bf16.mxu0 %v12864_v32  ;;  %v2671_v27 = vld [vmem:[#allocation10 + $0x5e8] sm:$0xff]  ;;  %v12807_v31 = vcombine.low %v2610_v16, %v2614_v19 }
 0x174   : > { %v2531_v32 = vld [vmem:[#allocation10 + $0x188] sm:$0xff]  ;;  %v12866_v37 = vcombine.high %v2667_v24, %v2671_v27  ;;  %v12865_v42 = vcombine.low %v2667_v24, %v2671_v27 }
 0x175   : > { %1558 = vmatmul.mubr.bf16.vlgmr.msra.gmra.mxu0 %v15790_v36  ;;  %v2574_v36 = vld [vmem:[#allocation10 + $0x2e0] sm:$0xff]  ;;  %v12730_v46 = vcombine.high %v2531_v32, %v2535_v33  ;;  %v2619_v16 = vld [vmem:[#allocation10 + $0x448] sm:$0xff] }
 0x176   : > { %3651 = vmatpush2.bf16.msra.mxu1 %v12799_v34  ;;  %3676 = vmatpush1.bf16.msra.mxu0 %v12863_v35  ;;  %v12768_v1 = vcombine.high %v2570_v54, %v2574_v36  ;;  %v12767_v4 = vcombine.low %v2570_v54, %v2574_v36  ;;  %v2659_v34 = vld [vmem:[#allocation10 + $0x588] sm:$0xff]  ;;  %v12738_v35 = vcombine.high %v2539_v22, %v2543_v23 }
 0x177   : > { %3652 = vmatprep.subr.bf16.mxu1 %v12792_v40  ;;  %3677 = vmatprep.subr.bf16.mxu0 %v12856_v41  ;;  %v15813_v40 = vpack.c.bf16 %v1568_v29, %v1568_v29  ;;  %v12737_v41 = vcombine.low %v2539_v22, %v2543_v23  ;;  %v12858_v47 = vcombine.high %v2659_v34, %v2663_v38  ;;  %v2515_v54 = vld [vmem:[#allocation10 + $0x108] sm:$0xff] }
 0x178   : > { %3707 = vmatprep.mubr.bf16.mxu0 %v15444_v0  ;;  %v12857_v51 = vcombine.low %v2659_v34, %v2663_v38  ;;  %v2519_v36 = vld [vmem:[#allocation10 + $0x128] sm:$0xff] }
 0x179   : > { %v2611_v24 = vld [vmem:[#allocation10 + $0x408] sm:$0xff] }
 0x17a   : > { %3653 = vmatpush2.bf16.msra.mxu1 %v12791_v43  ;;  %3678 = vmatpush1.bf16.msra.mxu0 %v12855_v44  ;;  %v2523_v43 = vld [vmem:[#allocation10 + $0x148] sm:$0xff] }
 0x17b   : > { %3654 = vmatprep.subr.bf16.mxu1 %v12784_v48  ;;  %3679 = vmatprep.subr.bf16.mxu0 %v12848_v49  ;;  %v2527_v44 = vld [vmem:[#allocation10 + $0x168] sm:$0xff]  ;;  %v12729_v49 = vcombine.low %v2531_v32, %v2535_v33  ;;  %v2540_v32 = vld [vmem:[#allocation10 + $0x1d0] sm:$0xff] }
 0x17c   : > { %v2655_v48 = vld [vmem:[#allocation10 + $0x568] sm:$0xff]  ;;  %v2544_v33 = vld [vmem:[#allocation10 + $0x1f0] sm:$0xff] }
 0x17d   : > { %v12849_v58 = vcombine.low %v2651_v45, %v2655_v48  ;;  %v2607_v29 = vld [vmem:[#allocation10 + $0x3e8] sm:$0xff] }
 0x17e   : > { %3655 = vmatpush2.bf16.msra.mxu1 %v12783_v52  ;;  %3680 = vmatpush1.bf16.msra.mxu0 %v12847_v53  ;;  %v12722_v52 = vcombine.high %v2523_v43, %v2527_v44  ;;  %v12850_v53 = vcombine.high %v2651_v45, %v2655_v48  ;;  %v2599_v38 = vld [vmem:[#allocation10 + $0x3a8] sm:$0xff]  ;;  %v12801_v45 = vcombine.low %v2603_v28, %v2607_v29 }
 0x17f   : > { %3656 = vmatprep.subr.bf16.mxu1 %v12776_v56  ;;  %3681 = vmatprep.subr.bf16.mxu0 %v12840_v57  ;;  %v2647_v56 = vld [vmem:[#allocation10 + $0x528] sm:$0xff]  ;;  %v12721_v57 = vcombine.low %v2523_v43, %v2527_v44  ;;  %v2532_v43 = vld [vmem:[#allocation10 + $0x190] sm:$0xff] }
 0x180   : > { %v12841_v3 = vcombine.low %v2643_v55, %v2647_v56  ;;  %v2536_v44 = vld [vmem:[#allocation10 + $0x1b0] sm:$0xff] }
 0x181   : > { %v12732_v48 = vcombine.high %v2532_v43, %v2536_v44 }
 0x182   : > { %3657 = vmatpush2.bf16.msra.mxu1 %v12775_v59  ;;  %3682 = vmatpush1.bf16.msra.mxu0 %v12839_v60  ;;  %v12714_v59 = vcombine.high %v2515_v54, %v2519_v36  ;;  %v12842_v60 = vcombine.high %v2643_v55, %v2647_v56 }
 0x183   : > { %3658 = vmatprep.subr.bf16.mxu1 %v12768_v1  ;;  %3683 = vmatprep.subr.bf16.mxu0 %v12832_v2  ;;  %v2639_v1 = vld [vmem:[#allocation10 + $0x4e8] sm:$0xff]  ;;  %v12713_v2 = vcombine.low %v2515_v54, %v2519_v36  ;;  %v12731_v36 = vcombine.low %v2532_v43, %v2536_v44  ;;  %v2596_v43 = vld [vmem:[#allocation10 + $0x390] sm:$0xff] }
 0x184   : > { %v12834_v7 = vcombine.high %v2635_v63, %v2639_v1  ;;  %v12833_v11 = vcombine.low %v2635_v63, %v2639_v1  ;;  %v2600_v44 = vld [vmem:[#allocation10 + $0x3b0] sm:$0xff] }
 0x186   : > { %3659 = vmatpush2.bf16.msra.mxu1 %v12767_v4  ;;  %3684 = vmatpush1.bf16.msra.mxu0 %v12831_v5  ;;  %v2499_v4 = vld [vmem:[#allocation10 + $0x88] sm:$0xff] }
 0x187   : > { %3660 = vmatprep.subr.bf16.mxu1 %v12760_v9  ;;  %3685 = vmatprep.subr.bf16.mxu0 %v12824_v10  ;;  %v2503_v5 = vld [vmem:[#allocation10 + $0xa8] sm:$0xff]  ;;  %v12705_v10 = vcombine.low %v2507_v61, %v2511_v62 }
 0x188   : > { %v2631_v9 = vld [vmem:[#allocation10 + $0x4a8] sm:$0xff]  ;;  %v12698_v14 = vcombine.high %v2499_v4, %v2503_v5 }
 0x189   : > { %v12826_v15 = vcombine.high %v2627_v8, %v2631_v9  ;;  %v12825_v19 = vcombine.low %v2627_v8, %v2631_v9  ;;  %v2563_v8 = vld [vmem:[#allocation10 + $0x288] sm:$0xff] }
 0x18a   : > { %3661 = vmatpush2.bf16.msra.mxu1 %v12759_v12  ;;  %3686 = vmatpush1.bf16.msra.mxu0 %v12823_v13  ;;  %v2491_v12 = vld [vmem:[#allocation10 + $0x48] sm:$0xff] }
 0x18b   : > { %3662 = vmatprep.subr.bf16.mxu1 %v12752_v17  ;;  %3687 = vmatprep.subr.bf16.mxu0 %v12816_v18  ;;  %v2495_v13 = vld [vmem:[#allocation10 + $0x68] sm:$0xff]  ;;  %v12697_v18 = vcombine.low %v2499_v4, %v2503_v5  ;;  %v2508_v4 = vld [vmem:[#allocation10 + $0xd0] sm:$0xff] }
 0x18c   : > { %v2623_v17 = vld [vmem:[#allocation10 + $0x468] sm:$0xff]  ;;  %v12690_v22 = vcombine.high %v2491_v12, %v2495_v13  ;;  %v2512_v5 = vld [vmem:[#allocation10 + $0xf0] sm:$0xff] }
 0x18d   : > { %v12818_v23 = vcombine.high %v2619_v16, %v2623_v17  ;;  %v12817_v27 = vcombine.low %v2619_v16, %v2623_v17  ;;  %v2567_v9 = vld [vmem:[#allocation10 + $0x2a8] sm:$0xff] }
 0x18e   : > { %3663 = vmatpush2.bf16.msra.mxu1 %v12751_v20  ;;  %3688 = vmatpush1.bf16.msra.mxu0 %v12815_v21  ;;  %v2483_v20 = vld [vmem:[#allocation10 + $0x8] sm:$0xff] }
 0x18f   : > { %3664 = vmatprep.subr.bf16.mxu1 %v12744_v25  ;;  %3689 = vmatprep.subr.bf16.mxu0 %v12808_v26  ;;  %v2487_v21 = vld [vmem:[#allocation10 + $0x28] sm:$0xff]  ;;  %v12689_v26 = vcombine.low %v2491_v12, %v2495_v13  ;;  %v2500_v12 = vld [vmem:[#allocation10 + $0x90] sm:$0xff] }
 0x190   : > { %v2615_v25 = vld [vmem:[#allocation10 + $0x428] sm:$0xff]  ;;  %v12681_v34 = vcombine.low %v2483_v20, %v2487_v21  ;;  %v2504_v13 = vld [vmem:[#allocation10 + $0xb0] sm:$0xff] }
 0x191   : > { %v2555_v16 = vld [vmem:[#allocation10 + $0x248] sm:$0xff] }
 0x192   : > { %3665 = vmatpush2.bf16.msra.mxu1 %v12743_v30  ;;  %3690 = vmatpush1.bf16.msra.mxu0 %v12807_v31  ;;  %v12682_v30 = vcombine.high %v2483_v20, %v2487_v21  ;;  %v12810_v31 = vcombine.high %v2611_v24, %v2615_v25  ;;  %v2559_v17 = vld [vmem:[#allocation10 + $0x268] sm:$0xff]  ;;  %v2492_v20 = vld [vmem:[#allocation10 + $0x50] sm:$0xff] }
 0x193   : > { %3716 = vmatprep.subr.bf16.mxu0 %v12738_v35  ;;  %3757 = vmatprep.subr.bf16.mxu1 %v12866_v37  ;;  %v12809_v35 = vcombine.low %v2611_v24, %v2615_v25  ;;  %v2595_v37 = vld [vmem:[#allocation10 + $0x388] sm:$0xff]  ;;  %v2496_v21 = vld [vmem:[#allocation10 + $0x70] sm:$0xff] }
 0x194   : > { %v12793_v54 = vcombine.low %v2595_v37, %v2599_v38  ;;  %v2547_v24 = vld [vmem:[#allocation10 + $0x208] sm:$0xff] }
 0x195   : > { %3667 = vmatmul.mubr.bf16.vlgmr.msra.gmra.mxu1 %v15811_v39  ;;  %3708 = vmatmul.mubr.bf16.vlgmr.msra.gmra.mxu0 %v15813_v40  ;;  %v2551_v25 = vld [vmem:[#allocation10 + $0x228] sm:$0xff] }
 0x196   : > { %3717 = vmatpush1.bf16.msra.mxu0 %v12737_v41  ;;  %3758 = vmatpush1.bf16.msra.mxu1 %v12865_v42  ;;  %v12802_v41 = vcombine.high %v2603_v28, %v2607_v29  ;;  %v12740_v42 = vcombine.high %v2540_v32, %v2544_v33  ;;  %v2484_v28 = vld [vmem:[#allocation10 + $0x10] sm:$0xff] }
 0x197   : > { %3718 = vmatprep.subr.bf16.mxu0 %v12730_v46  ;;  %3759 = vmatprep.subr.bf16.mxu1 %v12858_v47  ;;  %v12739_v46 = vcombine.low %v2540_v32, %v2544_v33  ;;  %v12794_v47 = vcombine.high %v2595_v37, %v2599_v38  ;;  %v2488_v29 = vld [vmem:[#allocation10 + $0x30] sm:$0xff] }
 0x198   : > { %3789 = vmatprep.mubr.bf16.mxu1 %v15444_v0  ;;  %3748 = vmatprep.mubr.bf16.mxu0 %v15801_v50  ;;  %v2604_v32 = vld [vmem:[#allocation10 + $0x3d0] sm:$0xff] }
 0x199   : > { %v2608_v33 = vld [vmem:[#allocation10 + $0x3f0] sm:$0xff] }
 0x19a   : > { %3719 = vmatpush1.bf16.msra.mxu0 %v12729_v49  ;;  %3760 = vmatpush1.bf16.msra.mxu1 %v12857_v51  ;;  %v2587_v49 = vld [vmem:[#allocation10 + $0x348] sm:$0xff]  ;;  %v2668_v37 = vld [vmem:[#allocation10 + $0x5d0] sm:$0xff] }
 0x19b   : > { %3720 = vmatprep.subr.bf16.mxu0 %v12722_v52  ;;  %3761 = vmatprep.subr.bf16.mxu1 %v12850_v53  ;;  %v2591_v51 = vld [vmem:[#allocation10 + $0x368] sm:$0xff]  ;;  %v2524_v52 = vld [vmem:[#allocation10 + $0x150] sm:$0xff] }
 0x19c   : > { %v2528_v53 = vld [vmem:[#allocation10 + $0x170] sm:$0xff]  ;;  %v12786_v55 = vcombine.high %v2587_v49, %v2591_v51  ;;  %v12785_v61 = vcombine.low %v2587_v49, %v2591_v51  ;;  %v12803_v49 = vcombine.low %v2604_v32, %v2608_v33 }
 0x19d   : > { %v12724_v56 = vcombine.high %v2524_v52, %v2528_v53  ;;  %v12723_v62 = vcombine.low %v2524_v52, %v2528_v53  ;;  %v2672_v38 = vld [vmem:[#allocation10 + $0x5f0] sm:$0xff]  ;;  %v12796_v52 = vcombine.high %v2596_v43, %v2600_v44 }
 0x19e   : > { %3721 = vmatpush1.bf16.msra.mxu0 %v12721_v57  ;;  %3762 = vmatpush1.bf16.msra.mxu1 %v12849_v58  ;;  %v2579_v57 = vld [vmem:[#allocation10 + $0x308] sm:$0xff]  ;;  %v12867_v51 = vcombine.low %v2668_v37, %v2672_v38 }
 0x19f   : > { %3722 = vmatprep.subr.bf16.mxu0 %v12714_v59  ;;  %3763 = vmatprep.subr.bf16.mxu1 %v12842_v60  ;;  %v2583_v58 = vld [vmem:[#allocation10 + $0x328] sm:$0xff]  ;;  %v2516_v59 = vld [vmem:[#allocation10 + $0x110] sm:$0xff] }
 0x1a0   : > { %v2520_v60 = vld [vmem:[#allocation10 + $0x130] sm:$0xff]  ;;  %v12778_v63 = vcombine.high %v2579_v57, %v2583_v58 }
 0x1a1   : > { %v12716_v1 = vcombine.high %v2516_v59, %v2520_v60 }
 0x1a2   : > { %3723 = vmatpush1.bf16.msra.mxu0 %v12713_v2  ;;  %3764 = vmatpush1.bf16.msra.mxu1 %v12841_v3  ;;  %v2571_v2 = vld [vmem:[#allocation10 + $0x2c8] sm:$0xff] }
 0x1a3   : > { %3724 = vmatprep.subr.bf16.mxu0 %v12706_v6  ;;  %3765 = vmatprep.subr.bf16.mxu1 %v12834_v7  ;;  %v2575_v3 = vld [vmem:[#allocation10 + $0x2e8] sm:$0xff]  ;;  %v12777_v6 = vcombine.low %v2579_v57, %v2583_v58  ;;  %v12715_v7 = vcombine.low %v2516_v59, %v2520_v60  ;;  %v12795_v59 = vcombine.low %v2596_v43, %v2600_v44  ;;  %v2612_v43 = vld [vmem:[#allocation10 + $0x410] sm:$0xff] }
 0x1a4   : > { %v2616_v44 = vld [vmem:[#allocation10 + $0x430] sm:$0xff] }
 0x1a6   : > { %3725 = vmatpush1.bf16.msra.mxu0 %v12705_v10  ;;  %3766 = vmatpush1.bf16.msra.mxu1 %v12833_v11  ;;  %v12770_v10 = vcombine.high %v2571_v2, %v2575_v3  ;;  %v12708_v11 = vcombine.high %v2508_v4, %v2512_v5 }
 0x1a7   : > { %3726 = vmatprep.subr.bf16.mxu0 %v12698_v14  ;;  %3767 = vmatprep.subr.bf16.mxu1 %v12826_v15  ;;  %v12769_v14 = vcombine.low %v2571_v2, %v2575_v3  ;;  %v12707_v15 = vcombine.low %v2508_v4, %v2512_v5  ;;  %v2584_v2 = vld [vmem:[#allocation10 + $0x330] sm:$0xff] }
 0x1a8   : > { %v2644_v3 = vld [vmem:[#allocation10 + $0x510] sm:$0xff] }
 0x1a9   : > { %v2648_v5 = vld [vmem:[#allocation10 + $0x530] sm:$0xff] }
 0x1aa   : > { %3727 = vmatpush1.bf16.msra.mxu0 %v12697_v18  ;;  %3768 = vmatpush1.bf16.msra.mxu1 %v12825_v19  ;;  %v12762_v18 = vcombine.high %v2563_v8, %v2567_v9  ;;  %v12700_v19 = vcombine.high %v2500_v12, %v2504_v13 }
 0x1ab   : > { %3728 = vmatprep.subr.bf16.mxu0 %v12690_v22  ;;  %3769 = vmatprep.subr.bf16.mxu1 %v12818_v23  ;;  %v12761_v22 = vcombine.low %v2563_v8, %v2567_v9  ;;  %v12699_v23 = vcombine.low %v2500_v12, %v2504_v13  ;;  %v12844_v12 = vcombine.high %v2644_v3, %v2648_v5  ;;  %v2572_v13 = vld [vmem:[#allocation10 + $0x2d0] sm:$0xff] }
 0x1ae   : > { %3729 = vmatpush1.bf16.msra.mxu0 %v12689_v26  ;;  %3770 = vmatpush1.bf16.msra.mxu1 %v12817_v27  ;;  %v12754_v26 = vcombine.high %v2555_v16, %v2559_v17  ;;  %v12692_v27 = vcombine.high %v2492_v20, %v2496_v21 }
 0x1af   : > { %3730 = vmatprep.subr.bf16.mxu0 %v12682_v30  ;;  %3771 = vmatprep.subr.bf16.mxu1 %v12810_v31  ;;  %v12753_v30 = vcombine.low %v2555_v16, %v2559_v17  ;;  %v12691_v31 = vcombine.low %v2492_v20, %v2496_v21  ;;  %v2640_v17 = vld [vmem:[#allocation10 + $0x4f0] sm:$0xff] }
 0x1b0   : > { %v2564_v20 = vld [vmem:[#allocation10 + $0x290] sm:$0xff] }
 0x1b1   : > { %v2568_v21 = vld [vmem:[#allocation10 + $0x2b0] sm:$0xff] }
 0x1b2   : > { %3731 = vmatpush1.bf16.msra.mxu0 %v12681_v34  ;;  %3772 = vmatpush1.bf16.msra.mxu1 %v12809_v35  ;;  %v12746_v34 = vcombine.high %v2547_v24, %v2551_v25  ;;  %v12684_v35 = vcombine.high %v2484_v28, %v2488_v29 }
 0x1b3   : > { %3732 = vmatprep.subr.bf16.mxu0 %v12802_v41  ;;  %3798 = vmatprep.subr.bf16.mxu1 %v12740_v42  ;;  %v12745_v41 = vcombine.low %v2547_v24, %v2551_v25  ;;  %v12683_v42 = vcombine.low %v2484_v28, %v2488_v29  ;;  %v2628_v24 = vld [vmem:[#allocation10 + $0x490] sm:$0xff] }
 0x1b4   : > { %v2632_v25 = vld [vmem:[#allocation10 + $0x4b0] sm:$0xff] }
 0x1b5   : > { %3790 = vmatmul.mubr.bf16.vlgmr.msra.gmra.mxu1 %v15813_v40  ;;  %v2556_v28 = vld [vmem:[#allocation10 + $0x250] sm:$0xff] }
 0x1b6   : > { %3733 = vmatpush2.bf16.msra.mxu0 %v12801_v45  ;;  %3799 = vmatpush1.bf16.msra.mxu1 %v12739_v46  ;;  %v12804_v45 = vcombine.high %v2604_v32, %v2608_v33  ;;  %v12868_v46 = vcombine.high %v2668_v37, %v2672_v38  ;;  %v2560_v29 = vld [vmem:[#allocation10 + $0x270] sm:$0xff] }
 0x1b7   : > { %3734 = vmatprep.subr.bf16.mxu0 %v12794_v47  ;;  %3800 = vmatprep.subr.bf16.mxu1 %v12732_v48  ;;  %v2660_v47 = vld [vmem:[#allocation10 + $0x590] sm:$0xff] }
 0x1b8   : > { %3830 = vmatprep.mubr.bf16.mxu1 %v15801_v50  ;;  %v2664_v48 = vld [vmem:[#allocation10 + $0x5b0] sm:$0xff] }
 0x1b9   : > { %v12860_v53 = vcombine.high %v2660_v47, %v2664_v48  ;;  %v12859_v60 = vcombine.low %v2660_v47, %v2664_v48  ;;  %v2620_v32 = vld [vmem:[#allocation10 + $0x450] sm:$0xff]  ;;  %v2541_v47 = vld [vmem:[#allocation10 + $0x1d8] sm:$0xff] }
 0x1ba   : > { %3735 = vmatpush2.bf16.msra.mxu0 %v12793_v54  ;;  %3801 = vmatpush1.bf16.msra.mxu1 %v12731_v36  ;;  %v2588_v54 = vld [vmem:[#allocation10 + $0x350] sm:$0xff]  ;;  %v2545_v48 = vld [vmem:[#allocation10 + $0x1f8] sm:$0xff] }
 0x1bb   : > { %3736 = vmatprep.subr.bf16.mxu0 %v12786_v55  ;;  %3802 = vmatprep.subr.bf16.mxu1 %v12724_v56  ;;  %v2592_v36 = vld [vmem:[#allocation10 + $0x370] sm:$0xff] }
 0x1bc   : > { %v2652_v55 = vld [vmem:[#allocation10 + $0x550] sm:$0xff]  ;;  %v12787_v8 = vcombine.low %v2588_v54, %v2592_v36 }
 0x1bd   : > { %v2656_v56 = vld [vmem:[#allocation10 + $0x570] sm:$0xff] }
 0x1be   : > { %3737 = vmatpush2.bf16.msra.mxu0 %v12785_v61  ;;  %3803 = vmatpush1.bf16.msra.mxu1 %v12723_v62  ;;  %v12788_v62 = vcombine.high %v2588_v54, %v2592_v36  ;;  %v12851_v9 = vcombine.low %v2652_v55, %v2656_v56  ;;  %v2624_v33 = vld [vmem:[#allocation10 + $0x470] sm:$0xff]  ;;  %v12811_v36 = vcombine.low %v2612_v43, %v2616_v44 }
 0x1bf   : > { %3738 = vmatprep.subr.bf16.mxu0 %v12778_v63  ;;  %3804 = vmatprep.subr.bf16.mxu1 %v12716_v1  ;;  %v12852_v63 = vcombine.high %v2652_v55, %v2656_v56  ;;  %v2580_v1 = vld [vmem:[#allocation10 + $0x310] sm:$0xff]  ;;  %v2533_v55 = vld [vmem:[#allocation10 + $0x198] sm:$0xff] }
 0x1c0   : > { %v2548_v37 = vld [vmem:[#allocation10 + $0x210] sm:$0xff]  ;;  %v2537_v56 = vld [vmem:[#allocation10 + $0x1b8] sm:$0xff] }
 0x1c1   : > { %v2552_v38 = vld [vmem:[#allocation10 + $0x230] sm:$0xff] }
 0x1c2   : > { %3739 = vmatpush2.bf16.msra.mxu0 %v12777_v6  ;;  %3805 = vmatpush1.bf16.msra.mxu1 %v12715_v7  ;;  %v12747_v54 = vcombine.low %v2548_v37, %v2552_v38 }
 0x1c3   : > { %3740 = vmatprep.subr.bf16.mxu0 %v12770_v10  ;;  %3806 = vmatprep.subr.bf16.mxu1 %v12708_v11  ;;  %v12780_v11 = vcombine.high %v2580_v1, %v2584_v2 }
 0x1c6   : > { %3741 = vmatpush2.bf16.msra.mxu0 %v12769_v14  ;;  %3807 = vmatpush1.bf16.msra.mxu1 %v12707_v15  ;;  %v2576_v14 = vld [vmem:[#allocation10 + $0x2f0] sm:$0xff] }
 0x1c7   : > { %3742 = vmatprep.subr.bf16.mxu0 %v12762_v18  ;;  %3808 = vmatprep.subr.bf16.mxu1 %v12700_v19  ;;  %v2636_v15 = vld [vmem:[#allocation10 + $0x4d0] sm:$0xff]  ;;  %v12779_v18 = vcombine.low %v2580_v1, %v2584_v2  ;;  %v12843_v19 = vcombine.low %v2644_v3, %v2648_v5  ;;  %v12741_v1 = vcombine.low %v2541_v47, %v2545_v48 }
 0x1c8   : > { %v12734_v3 = vcombine.high %v2533_v55, %v2537_v56 }
 0x1ca   : > { %3743 = vmatpush2.bf16.msra.mxu0 %v12761_v22  ;;  %3809 = vmatpush1.bf16.msra.mxu1 %v12699_v23  ;;  %v12772_v22 = vcombine.high %v2572_v13, %v2576_v14  ;;  %v12836_v23 = vcombine.high %v2636_v15, %v2640_v17 }
 0x1cb   : > { %3744 = vmatprep.subr.bf16.mxu0 %v12754_v26  ;;  %3810 = vmatprep.subr.bf16.mxu1 %v12692_v27  ;;  %v12771_v26 = vcombine.low %v2572_v13, %v2576_v14  ;;  %v12835_v27 = vcombine.low %v2636_v15, %v2640_v17  ;;  %v2517_v17 = vld [vmem:[#allocation10 + $0x118] sm:$0xff] }
 0x1ce   : > { %3745 = vmatpush2.bf16.msra.mxu0 %v12753_v30  ;;  %3811 = vmatpush1.bf16.msra.mxu1 %v12691_v31  ;;  %v12764_v30 = vcombine.high %v2564_v20, %v2568_v21  ;;  %v12828_v31 = vcombine.high %v2628_v24, %v2632_v25 }
 0x1cf   : > { %3746 = vmatprep.subr.bf16.mxu0 %v12746_v34  ;;  %3812 = vmatprep.subr.bf16.mxu1 %v12684_v35  ;;  %v12763_v34 = vcombine.low %v2564_v20, %v2568_v21  ;;  %v12827_v35 = vcombine.low %v2628_v24, %v2632_v25  ;;  %v2649_v21 = vld [vmem:[#allocation10 + $0x538] sm:$0xff] }
 0x1d2   : > { %3747 = vmatpush2.bf16.msra.mxu0 %v12745_v41  ;;  %3813 = vmatpush1.bf16.msra.mxu1 %v12683_v42  ;;  %v12756_v41 = vcombine.high %v2556_v28, %v2560_v29  ;;  %v12820_v42 = vcombine.high %v2620_v32, %v2624_v33 }
 0x1d3   : > { %3814 = vmatprep.subr.bf16.mxu1 %v12804_v45  ;;  %3839 = vmatprep.subr.bf16.mxu0 %v12868_v46  ;;  %v12755_v45 = vcombine.low %v2556_v28, %v2560_v29  ;;  %v12819_v46 = vcombine.low %v2620_v32, %v2624_v33  ;;  %v2641_v32 = vld [vmem:[#allocation10 + $0x4f8] sm:$0xff] }
 0x1d5   : > { %v15821_v57 = vpop.f32.mrf.mxu0  ;;  %3749 = vmatmul.mubr.bf16.vlgmr.msra.gmra.mxu0 %v15811_v39  ;;  %v15824_v58 = vpop.f32.mrf.mxu1 }
 0x1d6   : > { %3815 = vmatpush2.bf16.msra.mxu1 %v12803_v49  ;;  %3840 = vmatpush1.bf16.msra.mxu0 %v12867_v51  ;;  %v12748_v49 = vcombine.high %v2548_v37, %v2552_v38  ;;  %v12812_v51 = vcombine.high %v2612_v43, %v2616_v44 }
 0x1d7   : > { %v15826_v61 = vpop.f32.mrf.mxu0  ;;  %3816 = vmatprep.subr.bf16.mxu1 %v12796_v52  ;;  %3841 = vmatprep.subr.bf16.mxu0 %v12860_v53  ;;  %v15828_v4 = vpop.f32.mrf.mxu1  ;;  %v2669_v52 = vld [vmem:[#allocation10 + $0x5d8] sm:$0xff] }
 0x1d8   : > { %3871 = vmatprep.mubr.bf16.mxu0 %v15444_v0  ;;  %v2673_v53 = vld [vmem:[#allocation10 + $0x5f8] sm:$0xff] }
 0x1d9   : > { %v1317_v6 = vpop.f32.mrf.mxu0  ;;  %v1358_v7 = vpop.f32.mrf.mxu1  ;;  %v12869_v2 = vcombine.low %v2669_v52, %v2673_v53 }
 0x1da   : > { %3817 = vmatpush2.bf16.msra.mxu1 %v12795_v59  ;;  %3842 = vmatpush1.bf16.msra.mxu0 %v12859_v60  ;;  %v12742_v59 = vcombine.high %v2541_v47, %v2545_v48  ;;  %v12870_v60 = vcombine.high %v2669_v52, %v2673_v53  ;;  %v2525_v6 = vld [vmem:[#allocation10 + $0x158] sm:$0xff] }
 0x1db   : > { %v1318_v10 = vpop.f32.mrf.mxu0  ;;  %3818 = vmatprep.subr.bf16.mxu1 %v12788_v62  ;;  %3843 = vmatprep.subr.bf16.mxu0 %v12852_v63  ;;  %v1359_v16 = vpop.f32.mrf.mxu1  ;;  %v2661_v62 = vld [vmem:[#allocation10 + $0x598] sm:$0xff] }
 0x1dc   : > { %v2665_v63 = vld [vmem:[#allocation10 + $0x5b8] sm:$0xff] }
 0x1dd   : > { %v12862_v5 = vcombine.high %v2661_v62, %v2665_v63  ;;  %v2529_v7 = vld [vmem:[#allocation10 + $0x178] sm:$0xff]  ;;  %v12861_v13 = vcombine.low %v2661_v62, %v2665_v63 }
 0x1de   : > { %3819 = vmatpush2.bf16.msra.mxu1 %v12787_v8  ;;  %3844 = vmatpush1.bf16.msra.mxu0 %v12851_v9  ;;  %v2653_v8 = vld [vmem:[#allocation10 + $0x558] sm:$0xff]  ;;  %v12726_v15 = vcombine.high %v2525_v6, %v2529_v7  ;;  %v12725_v24 = vcombine.low %v2525_v6, %v2529_v7  ;;  %v1642_v6 = vld [vmem:[#allocation8 + $0x1c0] sm:$0xff] }
 0x1df   : > { %3820 = vmatprep.subr.bf16.mxu1 %v12780_v11  ;;  %3845 = vmatprep.subr.bf16.mxu0 %v12844_v12  ;;  %v2657_v9 = vld [vmem:[#allocation10 + $0x578] sm:$0xff]  ;;  %v12733_v12 = vcombine.low %v2533_v55, %v2537_v56  ;;  %v1646_v7 = vld [vmem:[#allocation8 + $0x1e0] sm:$0xff] }
 0x1e0   : > { %v12854_v16 = vcombine.high %v2653_v8, %v2657_v9  ;;  %v12853_v25 = vcombine.low %v2653_v8, %v2657_v9 }
 0x1e2   : > { %3821 = vmatpush2.bf16.msra.mxu1 %v12779_v18  ;;  %3846 = vmatpush1.bf16.msra.mxu0 %v12843_v19  ;;  %v2521_v18 = vld [vmem:[#allocation10 + $0x138] sm:$0xff] }
 0x1e3   : > { %3822 = vmatprep.subr.bf16.mxu1 %v12772_v22  ;;  %3847 = vmatprep.subr.bf16.mxu0 %v12836_v23  ;;  %v2645_v19 = vld [vmem:[#allocation10 + $0x518] sm:$0xff]  ;;  %v12718_v29 = vcombine.high %v2517_v17, %v2521_v18 }
 0x1e6   : > { %3823 = vmatpush2.bf16.msra.mxu1 %v12771_v26  ;;  %3848 = vmatpush1.bf16.msra.mxu0 %v12835_v27  ;;  %v2509_v26 = vld [vmem:[#allocation10 + $0xd8] sm:$0xff] }
 0x1e7   : > { %3824 = vmatprep.subr.bf16.mxu1 %v12764_v30  ;;  %3849 = vmatprep.subr.bf16.mxu0 %v12828_v31  ;;  %v2513_v27 = vld [vmem:[#allocation10 + $0xf8] sm:$0xff]  ;;  %v12846_v30 = vcombine.high %v2645_v19, %v2649_v21 }
 0x1e8   : > { %v2637_v31 = vld [vmem:[#allocation10 + $0x4d8] sm:$0xff]  ;;  %v12710_v37 = vcombine.high %v2509_v26, %v2513_v27  ;;  %v12709_v43 = vcombine.low %v2509_v26, %v2513_v27  ;;  %v1630_v27 = vld [vmem:[#allocation8 + $0x160] sm:$0xff] }
 0x1e9   : > { %v12838_v38 = vcombine.high %v2637_v31, %v2641_v32  ;;  %v12837_v44 = vcombine.low %v2637_v31, %v2641_v32 }
 0x1ea   : > { %3825 = vmatpush2.bf16.msra.mxu1 %v12763_v34  ;;  %3850 = vmatpush1.bf16.msra.mxu0 %v12827_v35  ;;  %v2501_v34 = vld [vmem:[#allocation10 + $0x98] sm:$0xff] }
 0x1eb   : > { %3826 = vmatprep.subr.bf16.mxu1 %v12756_v41  ;;  %3851 = vmatprep.subr.bf16.mxu0 %v12820_v42  ;;  %v2505_v35 = vld [vmem:[#allocation10 + $0xb8] sm:$0xff] }
 0x1ec   : > { %v2629_v41 = vld [vmem:[#allocation10 + $0x498] sm:$0xff]  ;;  %v12702_v47 = vcombine.high %v2501_v34, %v2505_v35  ;;  %v12701_v52 = vcombine.low %v2501_v34, %v2505_v35  ;;  %v1618_v35 = vld [vmem:[#allocation8 + $0x100] sm:$0xff] }
 0x1ed   : > { %v2633_v42 = vld [vmem:[#allocation10 + $0x4b8] sm:$0xff] }
 0x1ee   : > { %3827 = vmatpush2.bf16.msra.mxu1 %v12755_v45  ;;  %3852 = vmatpush1.bf16.msra.mxu0 %v12819_v46  ;;  %v2493_v45 = vld [vmem:[#allocation10 + $0x58] sm:$0xff]  ;;  %v12830_v48 = vcombine.high %v2629_v41, %v2633_v42  ;;  %v12829_v53 = vcombine.low %v2629_v41, %v2633_v42 }
 0x1ef   : > { %3828 = vmatprep.subr.bf16.mxu1 %v12748_v49  ;;  %3853 = vmatprep.subr.bf16.mxu0 %v12812_v51  ;;  %v2497_v46 = vld [vmem:[#allocation10 + $0x78] sm:$0xff] }
 0x1f0   : > { %v2621_v49 = vld [vmem:[#allocation10 + $0x458] sm:$0xff]  ;;  %v12694_v55 = vcombine.high %v2493_v45, %v2497_v46  ;;  %v12693_v62 = vcombine.low %v2493_v45, %v2497_v46 }
 0x1f1   : > { %v2625_v51 = vld [vmem:[#allocation10 + $0x478] sm:$0xff] }
 0x1f2   : > { %3829 = vmatpush2.bf16.msra.mxu1 %v12747_v54  ;;  %3854 = vmatpush1.bf16.msra.mxu0 %v12811_v36  ;;  %v2485_v54 = vld [vmem:[#allocation10 + $0x18] sm:$0xff]  ;;  %v12822_v56 = vcombine.high %v2621_v49, %v2625_v51  ;;  %v12821_v63 = vcombine.low %v2621_v49, %v2625_v51  ;;  %v1610_v51 = vld [vmem:[#allocation8 + $0xc0] sm:$0xff] }
 0x1f3   : > { %3880 = vmatprep.subr.bf16.mxu0 %v12742_v59  ;;  %3921 = vmatprep.subr.bf16.mxu1 %v12870_v60  ;;  %v2489_v36 = vld [vmem:[#allocation10 + $0x38] sm:$0xff] }
 0x1f4   : > { %v2613_v59 = vld [vmem:[#allocation10 + $0x418] sm:$0xff]  ;;  %v12685_v8 = vcombine.low %v2485_v54, %v2489_v36 }
 0x1f5   : > { %v15831_v10 = vpop.f32.mrf.mxu0  ;;  %3831 = vmatmul.mubr.bf16.vlgmr.msra.gmra.mxu1 %v15811_v39  ;;  %3872 = vmatmul.mubr.bf16.vlgmr.msra.gmra.mxu0 %v15813_v40  ;;  %v15835_v11 = vpop.f32.mrf.mxu1  ;;  %v2617_v60 = vld [vmem:[#allocation10 + $0x438] sm:$0xff] }
 0x1f6   : > { %3881 = vmatpush1.bf16.msra.mxu0 %v12741_v1  ;;  %3922 = vmatpush1.bf16.msra.mxu1 %v12869_v2  ;;  %v2605_v1 = vld [vmem:[#allocation10 + $0x3d8] sm:$0xff]  ;;  %v12813_v9 = vcombine.low %v2613_v59, %v2617_v60 }
 0x1f7   : > { %v15837_v14 = vpop.f32.mrf.mxu0  ;;  %3882 = vmatprep.subr.bf16.mxu0 %v12734_v3  ;;  %3923 = vmatprep.subr.bf16.mxu1 %v12862_v5  ;;  %v15839_v20 = vpop.f32.mrf.mxu1  ;;  %v2609_v2 = vld [vmem:[#allocation10 + $0x3f8] sm:$0xff]  ;;  %v12686_v3 = vcombine.high %v2485_v54, %v2489_v36  ;;  %v12814_v5 = vcombine.high %v2613_v59, %v2617_v60  ;;  %v1602_v60 = vld [vmem:[#allocation8 + $0x80] sm:$0xff] }
 0x1f8   : > { %3953 = vmatprep.mubr.bf16.mxu1 %v15444_v0  ;;  %3912 = vmatprep.mubr.bf16.mxu0 %v15801_v50  ;;  %v12717_v0 = vcombine.low %v2517_v17, %v2521_v18  ;;  %v12845_v50 = vcombine.low %v2645_v19, %v2649_v21  ;;  %v1634_v17 = vld [vmem:[#allocation8 + $0x180] sm:$0xff]  ;;  %v12805_v19 = vcombine.low %v2605_v1, %v2609_v2  ;;  %v2581_v34 = vld [vmem:[#allocation10 + $0x318] sm:$0xff] }
 0x1f9   : > { %v1399_v22 = vpop.f32.mrf.mxu0  ;;  %v1440_v23 = vpop.f32.mrf.mxu1  ;;  %v1638_v18 = vld [vmem:[#allocation8 + $0x1a0] sm:$0xff]  ;;  %v12927_v21 = vcombine.low %v1642_v6, %v1646_v7  ;;  %v2569_v59 = vld [vmem:[#allocation10 + $0x2b8] sm:$0xff] }
 0x1fa   : > { %3883 = vmatpush1.bf16.msra.mxu0 %v12733_v12  ;;  %3924 = vmatpush1.bf16.msra.mxu1 %v12861_v13  ;;  %v2597_v12 = vld [vmem:[#allocation10 + $0x398] sm:$0xff]  ;;  %v12920_v26 = vcombine.high %v1634_v17, %v1638_v18  ;;  %v12919_v32 = vcombine.low %v1634_v17, %v1638_v18  ;;  %v1586_v18 = vld [vmem:[#allocation8] sm:$0xff] }
 0x1fb   : > { %v1400_v28 = vpop.f32.mrf.mxu0  ;;  %3884 = vmatprep.subr.bf16.mxu0 %v12726_v15  ;;  %3925 = vmatprep.subr.bf16.mxu1 %v12854_v16  ;;  %v1441_v33 = vpop.f32.mrf.mxu1  ;;  %v2601_v13 = vld [vmem:[#allocation10 + $0x3b8] sm:$0xff]  ;;  %v12806_v15 = vcombine.high %v2605_v1, %v2609_v2  ;;  %v12928_v16 = vcombine.high %v1642_v6, %v1646_v7  ;;  %v1594_v7 = vld [vmem:[#allocation8 + $0x40] sm:$0xff] }
 0x1fc   : > { %v12798_v22 = vcombine.high %v2597_v12, %v2601_v13  ;;  %v2589_v23 = vld [vmem:[#allocation10 + $0x358] sm:$0xff]  ;;  %v15845_v28 = vpack.c.bf16 %v15826_v61, %v15826_v61  ;;  %v12797_v31 = vcombine.low %v2597_v12, %v2601_v13 }
 0x1fd   : > { %v2585_v61 = vld [vmem:[#allocation10 + $0x338] sm:$0xff] }
 0x1fe   : > { %3885 = vmatpush1.bf16.msra.mxu0 %v12725_v24  ;;  %3926 = vmatpush1.bf16.msra.mxu1 %v12853_v25  ;;  %v2593_v24 = vld [vmem:[#allocation10 + $0x378] sm:$0xff]  ;;  %v1626_v25 = vld [vmem:[#allocation8 + $0x140] sm:$0xff]  ;;  %v12782_v45 = vcombine.high %v2581_v34, %v2585_v61 }
 0x1ff   : > { %3886 = vmatprep.subr.bf16.mxu0 %v12718_v29  ;;  %3927 = vmatprep.subr.bf16.mxu1 %v12846_v30  ;;  %v12789_v42 = vcombine.low %v2589_v23, %v2593_v24  ;;  %v2561_v6 = vld [vmem:[#allocation10 + $0x278] sm:$0xff] }
 0x200   : > { %v2553_v17 = vld [vmem:[#allocation10 + $0x238] sm:$0xff] }
 0x202   : > { %3887 = vmatpush1.bf16.msra.mxu0 %v12717_v0  ;;  %3928 = vmatpush1.bf16.msra.mxu1 %v12845_v50  ;;  %v12790_v0 = vcombine.high %v2589_v23, %v2593_v24  ;;  %v12912_v50 = vcombine.high %v1626_v25, %v1630_v27 }
 0x203   : > { %3888 = vmatprep.subr.bf16.mxu0 %v12710_v37  ;;  %3929 = vmatprep.subr.bf16.mxu1 %v12838_v38 }
 0x206   : > { %3889 = vmatpush1.bf16.msra.mxu0 %v12709_v43  ;;  %3930 = vmatpush1.bf16.msra.mxu1 %v12837_v44  ;;  %v12911_v43 = vcombine.low %v1626_v25, %v1630_v27  ;;  %v1706_v25 = vld [vmem:[#allocation8 + $0x3c0] sm:$0xff] }
 0x207   : > { %3890 = vmatprep.subr.bf16.mxu0 %v12702_v47  ;;  %3931 = vmatprep.subr.bf16.mxu1 %v12830_v48  ;;  %v2573_v47 = vld [vmem:[#allocation10 + $0x2d8] sm:$0xff]  ;;  %v1770_v27 = vld [vmem:[#allocation8 + $0x5c0] sm:$0xff] }
 0x208   : > { %v2577_v48 = vld [vmem:[#allocation10 + $0x2f8] sm:$0xff] }
 0x209   : > { %v12774_v36 = vcombine.high %v2573_v47, %v2577_v48 }
 0x20a   : > { %3891 = vmatpush1.bf16.msra.mxu0 %v12701_v52  ;;  %3932 = vmatpush1.bf16.msra.mxu1 %v12829_v53  ;;  %v1614_v52 = vld [vmem:[#allocation8 + $0xe0] sm:$0xff]  ;;  %v12781_v53 = vcombine.low %v2581_v34, %v2585_v61 }
 0x20b   : > { %3892 = vmatprep.subr.bf16.mxu0 %v12694_v55  ;;  %3933 = vmatprep.subr.bf16.mxu1 %v12822_v56  ;;  %v12896_v55 = vcombine.high %v1610_v51, %v1614_v52  ;;  %v2565_v56 = vld [vmem:[#allocation10 + $0x298] sm:$0xff]  ;;  %v12895_v1 = vcombine.low %v1610_v51, %v1614_v52  ;;  %v1698_v61 = vld [vmem:[#allocation8 + $0x380] sm:$0xff] }
 0x20c   : > { %v12766_v2 = vcombine.high %v2565_v56, %v2569_v59 }
 0x20e   : > { %3893 = vmatpush1.bf16.msra.mxu0 %v12693_v62  ;;  %3934 = vmatpush1.bf16.msra.mxu1 %v12821_v63  ;;  %v1606_v62 = vld [vmem:[#allocation8 + $0xa0] sm:$0xff]  ;;  %v12773_v63 = vcombine.low %v2573_v47, %v2577_v48 }
 0x20f   : > { %3894 = vmatprep.subr.bf16.mxu0 %v12686_v3  ;;  %3935 = vmatprep.subr.bf16.mxu1 %v12814_v5  ;;  %v12888_v3 = vcombine.high %v1602_v60, %v1606_v62  ;;  %v2557_v5 = vld [vmem:[#allocation10 + $0x258] sm:$0xff]  ;;  %v12887_v12 = vcombine.low %v1602_v60, %v1606_v62  ;;  %v1754_v47 = vld [vmem:[#allocation8 + $0x540] sm:$0xff] }
 0x210   : > { %v12758_v13 = vcombine.high %v2557_v5, %v2561_v6  ;;  %v1758_v48 = vld [vmem:[#allocation8 + $0x560] sm:$0xff] }
 0x211   : > { %v1750_v60 = vld [vmem:[#allocation8 + $0x520] sm:$0xff] }
 0x212   : > { %3895 = vmatpush1.bf16.msra.mxu0 %v12685_v8  ;;  %3936 = vmatpush1.bf16.msra.mxu1 %v12813_v9  ;;  %v1598_v8 = vld [vmem:[#allocation8 + $0x60] sm:$0xff]  ;;  %v12765_v9 = vcombine.low %v2565_v56, %v2569_v59 }
 0x213   : > { %3896 = vmatprep.subr.bf16.mxu0 %v12806_v15  ;;  %8442 = vmatprep.subr.bf16.mxu1 %v12928_v16  ;;  %v12880_v15 = vcombine.high %v1594_v7, %v1598_v8  ;;  %v2549_v16 = vld [vmem:[#allocation10 + $0x218] sm:$0xff]  ;;  %v1682_v56 = vld [vmem:[#allocation8 + $0x300] sm:$0xff] }
 0x214   : > { %v12750_v23 = vcombine.high %v2549_v16, %v2553_v17  ;;  %v1686_v59 = vld [vmem:[#allocation8 + $0x320] sm:$0xff] }
 0x215   : > { %v15847_v29 = vpop.f32.mrf.mxu0  ;;  %3954 = vmatmul.mubr.bf16.vlgmr.msra.gmra.mxu1 %v15813_v40  ;;  %v15850_v30 = vpop.f32.mrf.mxu1  ;;  %v1622_v40 = vld [vmem:[#allocation8 + $0x120] sm:$0xff] }
 0x216   : > { %3897 = vmatpush2.bf16.msra.mxu0 %v12805_v19  ;;  %8443 = vmatpush1.bf16.msra.mxu1 %v12927_v21  ;;  %v12904_v46 = vcombine.high %v1618_v35, %v1622_v40  ;;  %v12903_v54 = vcombine.low %v1618_v35, %v1622_v40  ;;  %v1590_v19 = vld [vmem:[#allocation8 + $0x20] sm:$0xff]  ;;  %v12757_v21 = vcombine.low %v2557_v5, %v2561_v6 }
 0x217   : > { %8474 = vmatprep.mubr.bf16.mxu1 %v15845_v28  ;;  %v15853_v33 = vpop.f32.mrf.mxu0  ;;  %3898 = vmatprep.subr.bf16.mxu0 %v12798_v22  ;;  %v15855_v37 = vpop.f32.mrf.mxu1  ;;  %v12879_v22 = vcombine.low %v1594_v7, %v1598_v8  ;;  %v12872_v24 = vcombine.high %v1586_v18, %v1590_v19  ;;  %v1702_v35 = vld [vmem:[#allocation8 + $0x3a0] sm:$0xff] }
 0x218   : > { %8444 = vmatprep.subr.bf16.mxu1 %v12920_v26  ;;  %v1710_v26 = vld [vmem:[#allocation8 + $0x3e0] sm:$0xff]  ;;  %v12983_v52 = vcombine.low %v1698_v61, %v1702_v35 }
 0x219   : > { %v1481_v38 = vpop.f32.mrf.mxu0  ;;  %v1522_v41 = vpop.f32.mrf.mxu1  ;;  %v1762_v40 = vld [vmem:[#allocation8 + $0x580] sm:$0xff] }
 0x21a   : > { %3899 = vmatpush2.bf16.msra.mxu0 %v12797_v31  ;;  %8445 = vmatpush1.bf16.msra.mxu1 %v12919_v32  ;;  %v1774_v31 = vld [vmem:[#allocation8 + $0x5e0] sm:$0xff]  ;;  %v12749_v32 = vcombine.low %v2549_v16, %v2553_v17  ;;  %v12991_v41 = vcombine.low %v1706_v25, %v1710_v26 }
 0x21b   : > { %v1482_v44 = vpop.f32.mrf.mxu0  ;;  %3900 = vmatprep.subr.bf16.mxu0 %v12790_v0  ;;  %8446 = vmatprep.subr.bf16.mxu1 %v12912_v50  ;;  %v1523_v49 = vpop.f32.mrf.mxu1  ;;  %v12871_v0 = vcombine.low %v1586_v18, %v1590_v19  ;;  %v12992_v50 = vcombine.high %v1706_v25, %v1710_v26  ;;  %v13056_v34 = vcombine.high %v1770_v27, %v1774_v31  ;;  %v1766_v38 = vld [vmem:[#allocation8 + $0x5a0] sm:$0xff] }
 0x21c   : > { %v1690_v44 = vld [vmem:[#allocation8 + $0x340] sm:$0xff]  ;;  %v15859_v49 = vpack.c.bf16 %v15828_v4, %v15828_v4 }
 0x21d   : > { %v1746_v4 = vld [vmem:[#allocation8 + $0x500] sm:$0xff] }
 0x21e   : > { %3901 = vmatpush2.bf16.msra.mxu0 %v12789_v42  ;;  %8447 = vmatpush1.bf16.msra.mxu1 %v12911_v43  ;;  %v13055_v42 = vcombine.low %v1770_v27, %v1774_v31  ;;  %v12984_v43 = vcombine.high %v1698_v61, %v1702_v35  ;;  %v1674_v5 = vld [vmem:[#allocation8 + $0x2c0] sm:$0xff] }
 0x21f   : > { %3902 = vmatprep.subr.bf16.mxu0 %v12782_v45  ;;  %8448 = vmatprep.subr.bf16.mxu1 %v12904_v46  ;;  %v13048_v45 = vcombine.high %v1762_v40, %v1766_v38  ;;  %v1694_v46 = vld [vmem:[#allocation8 + $0x360] sm:$0xff] }
 0x220   : > { %v1678_v6 = vld [vmem:[#allocation8 + $0x2e0] sm:$0xff] }
 0x221   : > { %v1738_v7 = vld [vmem:[#allocation8 + $0x4c0] sm:$0xff] }
 0x222   : > { %3903 = vmatpush2.bf16.msra.mxu0 %v12781_v53  ;;  %8449 = vmatpush1.bf16.msra.mxu1 %v12903_v54  ;;  %v13047_v53 = vcombine.low %v1762_v40, %v1766_v38  ;;  %v1742_v8 = vld [vmem:[#allocation8 + $0x4e0] sm:$0xff] }
 0x223   : > { %3904 = vmatprep.subr.bf16.mxu0 %v12774_v36  ;;  %8450 = vmatprep.subr.bf16.mxu1 %v12896_v55  ;;  %v12976_v36 = vcombine.high %v1690_v44, %v1694_v46  ;;  %v13040_v55 = vcombine.high %v1754_v47, %v1758_v48  ;;  %v1666_v16 = vld [vmem:[#allocation8 + $0x280] sm:$0xff] }
 0x224   : > { %v1670_v17 = vld [vmem:[#allocation8 + $0x2a0] sm:$0xff] }
 0x225   : > { %v1730_v18 = vld [vmem:[#allocation8 + $0x480] sm:$0xff] }
 0x226   : > { %3905 = vmatpush2.bf16.msra.mxu0 %v12773_v63  ;;  %8451 = vmatpush1.bf16.msra.mxu1 %v12895_v1  ;;  %v13039_v63 = vcombine.low %v1754_v47, %v1758_v48  ;;  %v1734_v19 = vld [vmem:[#allocation8 + $0x4a0] sm:$0xff] }
 0x227   : > { %3906 = vmatprep.subr.bf16.mxu0 %v12766_v2  ;;  %8452 = vmatprep.subr.bf16.mxu1 %v12888_v3  ;;  %v12968_v2 = vcombine.high %v1682_v56, %v1686_v59  ;;  %v13032_v3 = vcombine.high %v1746_v4, %v1750_v60  ;;  %v1658_v25 = vld [vmem:[#allocation8 + $0x240] sm:$0xff] }
 0x228   : > { %v1662_v26 = vld [vmem:[#allocation8 + $0x260] sm:$0xff] }
 0x229   : > { %v1722_v27 = vld [vmem:[#allocation8 + $0x440] sm:$0xff] }
 0x22a   : > { %3907 = vmatpush2.bf16.msra.mxu0 %v12765_v9  ;;  %8453 = vmatpush1.bf16.msra.mxu1 %v12887_v12  ;;  %v12967_v9 = vcombine.low %v1682_v56, %v1686_v59  ;;  %v13031_v12 = vcombine.low %v1746_v4, %v1750_v60  ;;  %v1726_v31 = vld [vmem:[#allocation8 + $0x460] sm:$0xff] }
 0x22b   : > { %3908 = vmatprep.subr.bf16.mxu0 %v12758_v13  ;;  %8454 = vmatprep.subr.bf16.mxu1 %v12880_v15  ;;  %v12960_v13 = vcombine.high %v1674_v5, %v1678_v6  ;;  %v13024_v15 = vcombine.high %v1738_v7, %v1742_v8  ;;  %v1650_v61 = vld [vmem:[#allocation8 + $0x200] sm:$0xff] }
 0x22c   : > { %v1654_v35 = vld [vmem:[#allocation8 + $0x220] sm:$0xff] }
 0x22d   : > { %v1714_v40 = vld [vmem:[#allocation8 + $0x400] sm:$0xff] }
 0x22e   : > { %3909 = vmatpush2.bf16.msra.mxu0 %v12757_v21  ;;  %8455 = vmatpush1.bf16.msra.mxu1 %v12879_v22  ;;  %v12959_v21 = vcombine.low %v1674_v5, %v1678_v6  ;;  %v13023_v22 = vcombine.low %v1738_v7, %v1742_v8  ;;  %v1718_v38 = vld [vmem:[#allocation8 + $0x420] sm:$0xff]  ;;  %v15873_v8 = vpack.c.bf16 %v15837_v14, %v15837_v14 }
 0x22f   : > { %3910 = vmatprep.subr.bf16.mxu0 %v12750_v23  ;;  %8456 = vmatprep.subr.bf16.mxu1 %v12872_v24  ;;  %v12952_v23 = vcombine.high %v1666_v16, %v1670_v17  ;;  %v13016_v24 = vcombine.high %v1730_v18, %v1734_v19  ;;  %v1898_v47 = vld [vmem:[#allocation8 + $0x9c0] sm:$0xff] }
 0x230   : > { %v1902_v48 = vld [vmem:[#allocation8 + $0x9e0] sm:$0xff] }
 0x231   : > { %v1826_v56 = vld [vmem:[#allocation8 + $0x780] sm:$0xff] }
 0x232   : > { %3911 = vmatpush2.bf16.msra.mxu0 %v12749_v32  ;;  %8457 = vmatpush1.bf16.msra.mxu1 %v12871_v0  ;;  %v12951_v32 = vcombine.low %v1666_v16, %v1670_v17  ;;  %v13015_v0 = vcombine.low %v1730_v18, %v1734_v19  ;;  %v1830_v59 = vld [vmem:[#allocation8 + $0x7a0] sm:$0xff] }
 0x233   : > { %8458 = vmatprep.subr.bf16.mxu1 %v12992_v50  ;;  %8483 = vmatprep.subr.bf16.mxu0 %v13056_v34  ;;  %v12944_v50 = vcombine.high %v1658_v25, %v1662_v26  ;;  %v13008_v34 = vcombine.high %v1722_v27, %v1726_v31  ;;  %v1890_v4 = vld [vmem:[#allocation8 + $0x980] sm:$0xff] }
 0x234   : > { %v1894_v60 = vld [vmem:[#allocation8 + $0x9a0] sm:$0xff] }
 0x235   : > { %v15861_v51 = vpop.f32.mrf.mxu0  ;;  %3913 = vmatmul.mubr.bf16.vlgmr.msra.gmra.mxu0 %v15811_v39  ;;  %v12975_v39 = vcombine.low %v1690_v44, %v1694_v46  ;;  %v13000_v44 = vcombine.high %v1714_v40, %v1718_v38  ;;  %v1838_v46 = vld [vmem:[#allocation8 + $0x7e0] sm:$0xff] }
 0x236   : > { %8459 = vmatpush2.bf16.msra.mxu1 %v12991_v41  ;;  %8484 = vmatpush1.bf16.msra.mxu0 %v13055_v42  ;;  %v12943_v41 = vcombine.low %v1658_v25, %v1662_v26  ;;  %v13007_v42 = vcombine.low %v1722_v27, %v1726_v31  ;;  %v1822_v5 = vld [vmem:[#allocation8 + $0x760] sm:$0xff] }
 0x237   : > { %8515 = vmatprep.mubr.bf16.mxu0 %v15859_v49  ;;  %v15865_v54 = vpop.f32.mrf.mxu0  ;;  %8460 = vmatprep.subr.bf16.mxu1 %v12984_v43  ;;  %v12936_v43 = vcombine.high %v1650_v61, %v1654_v35  ;;  %v1882_v6 = vld [vmem:[#allocation8 + $0x940] sm:$0xff] }
 0x238   : > { %8485 = vmatprep.subr.bf16.mxu0 %v13048_v45  ;;  %v1834_v45 = vld [vmem:[#allocation8 + $0x7c0] sm:$0xff] }
 0x239   : > { %v1563_v62 = vpop.f32.mrf.mxu0  ;;  %v1886_v7 = vld [vmem:[#allocation8 + $0x960] sm:$0xff] }
 0x23a   : > { %8461 = vmatpush2.bf16.msra.mxu1 %v12983_v52  ;;  %8486 = vmatpush1.bf16.msra.mxu0 %v13047_v53  ;;  %v12935_v52 = vcombine.low %v1650_v61, %v1654_v35  ;;  %v12999_v53 = vcombine.low %v1714_v40, %v1718_v38  ;;  %v13119_v62 = vcombine.low %v1834_v45, %v1838_v46  ;;  %v1806_v35 = vld [vmem:[#allocation8 + $0x6e0] sm:$0xff] }
 0x23b   : > { %v1564_v1 = vpop.f32.mrf.mxu0  ;;  %8462 = vmatprep.subr.bf16.mxu1 %v12976_v36  ;;  %8487 = vmatprep.subr.bf16.mxu0 %v13040_v55  ;;  %v13120_v36 = vcombine.high %v1834_v45, %v1838_v46  ;;  %v13184_v55 = vcombine.high %v1898_v47, %v1902_v48  ;;  %v13168_v19 = vcombine.high %v1882_v6, %v1886_v7  ;;  %v1866_v40 = vld [vmem:[#allocation8 + $0x8c0] sm:$0xff] }
 0x23c   : > { %v13112_v1 = vcombine.high %v1826_v56, %v1830_v59  ;;  %v13167_v31 = vcombine.low %v1882_v6, %v1886_v7  ;;  %v1870_v38 = vld [vmem:[#allocation8 + $0x8e0] sm:$0xff] }
 0x23d   : > { %v1794_v45 = vld [vmem:[#allocation8 + $0x680] sm:$0xff] }
 0x23e   : > { %8463 = vmatpush2.bf16.msra.mxu1 %v12975_v39  ;;  %8488 = vmatpush1.bf16.msra.mxu0 %v13039_v63  ;;  %v13183_v39 = vcombine.low %v1898_v47, %v1902_v48  ;;  %v15869_v63 = vpack.c.bf16 %v15821_v57, %v15821_v57  ;;  %v13111_v57 = vcombine.low %v1826_v56, %v1830_v59  ;;  %v1798_v46 = vld [vmem:[#allocation8 + $0x6a0] sm:$0xff] }
 0x23f   : > { %8464 = vmatprep.subr.bf16.mxu1 %v12968_v2  ;;  %8489 = vmatprep.subr.bf16.mxu0 %v13032_v3  ;;  %v1818_v2 = vld [vmem:[#allocation8 + $0x740] sm:$0xff]  ;;  %v13176_v3 = vcombine.high %v1890_v4, %v1894_v60 }
 0x240   : > { %v13104_v18 = vcombine.high %v1818_v2, %v1822_v5  ;;  %v13103_v27 = vcombine.low %v1818_v2, %v1822_v5  ;;  %v1858_v47 = vld [vmem:[#allocation8 + $0x880] sm:$0xff] }
 0x241   : > { %v1862_v48 = vld [vmem:[#allocation8 + $0x8a0] sm:$0xff] }
 0x242   : > { %8465 = vmatpush2.bf16.msra.mxu1 %v12967_v9  ;;  %8490 = vmatpush1.bf16.msra.mxu0 %v13031_v12  ;;  %v1786_v56 = vld [vmem:[#allocation8 + $0x640] sm:$0xff] }
 0x243   : > { %8466 = vmatprep.subr.bf16.mxu1 %v12960_v13  ;;  %8491 = vmatprep.subr.bf16.mxu0 %v13024_v15  ;;  %v13175_v15 = vcombine.low %v1890_v4, %v1894_v60  ;;  %v1790_v59 = vld [vmem:[#allocation8 + $0x660] sm:$0xff] }
 0x244   : > { %v1850_v4 = vld [vmem:[#allocation8 + $0x840] sm:$0xff] }
 0x245   : > { %v1854_v60 = vld [vmem:[#allocation8 + $0x860] sm:$0xff] }
 0x246   : > { %8467 = vmatpush2.bf16.msra.mxu1 %v12959_v21  ;;  %8492 = vmatpush1.bf16.msra.mxu0 %v13023_v22  ;;  %v1810_v21 = vld [vmem:[#allocation8 + $0x700] sm:$0xff]  ;;  %v13136_v2 = vcombine.high %v1850_v4, %v1854_v60 }
 0x247   : > { %8468 = vmatprep.subr.bf16.mxu1 %v12952_v23  ;;  %8493 = vmatprep.subr.bf16.mxu0 %v13016_v24  ;;  %v1814_v22 = vld [vmem:[#allocation8 + $0x720] sm:$0xff] }
 0x248   : > { %v1874_v23 = vld [vmem:[#allocation8 + $0x900] sm:$0xff] }
 0x249   : > { %v1878_v24 = vld [vmem:[#allocation8 + $0x920] sm:$0xff] }
 0x24a   : > { %8469 = vmatpush2.bf16.msra.mxu1 %v12951_v32  ;;  %8494 = vmatpush1.bf16.msra.mxu0 %v13015_v0  ;;  %v13096_v0 = vcombine.high %v1810_v21, %v1814_v22  ;;  %v1782_v5 = vld [vmem:[#allocation8 + $0x620] sm:$0xff] }
 0x24b   : > { %8470 = vmatprep.subr.bf16.mxu1 %v12944_v50  ;;  %8495 = vmatprep.subr.bf16.mxu0 %v13008_v34  ;;  %v13160_v50 = vcombine.high %v1874_v23, %v1878_v24  ;;  %v1802_v34 = vld [vmem:[#allocation8 + $0x6c0] sm:$0xff] }
 0x24c   : > { %v1842_v6 = vld [vmem:[#allocation8 + $0x800] sm:$0xff] }
 0x24d   : > { %v1846_v7 = vld [vmem:[#allocation8 + $0x820] sm:$0xff] }
 0x24e   : > { %8471 = vmatpush2.bf16.msra.mxu1 %v12943_v41  ;;  %8496 = vmatpush1.bf16.msra.mxu0 %v13007_v42  ;;  %v13095_v41 = vcombine.low %v1810_v21, %v1814_v22  ;;  %v13159_v42 = vcombine.low %v1874_v23, %v1878_v24  ;;  %v13127_v22 = vcombine.low %v1842_v6, %v1846_v7 }
 0x24f   : > { %8472 = vmatprep.subr.bf16.mxu1 %v12936_v43  ;;  %8497 = vmatprep.subr.bf16.mxu0 %v13000_v44  ;;  %v13088_v43 = vcombine.high %v1802_v34, %v1806_v35  ;;  %v13152_v44 = vcombine.high %v1866_v40, %v1870_v38 }
 0x252   : > { %8473 = vmatpush2.bf16.msra.mxu1 %v12935_v52  ;;  %8498 = vmatpush1.bf16.msra.mxu0 %v12999_v53  ;;  %v13087_v52 = vcombine.low %v1802_v34, %v1806_v35  ;;  %v13151_v53 = vcombine.low %v1866_v40, %v1870_v38  ;;  %v1950_v40 = vld [vmem:[#allocation8 + $0xb60] sm:$0xff] }
 0x253   : > { %8499 = vmatprep.subr.bf16.mxu0 %v13120_v36  ;;  %8524 = vmatprep.subr.bf16.mxu1 %v13184_v55  ;;  %v13080_v36 = vcombine.high %v1794_v45, %v1798_v46  ;;  %v13144_v55 = vcombine.high %v1858_v47, %v1862_v48  ;;  %v2010_v38 = vld [vmem:[#allocation8 + $0xd40] sm:$0xff] }
 0x255   : > { %v3668_v9 = vpop.f32.mrf.mxu1  ;;  %v3709_v12 = vpop.f32.mrf.mxu0  ;;  %8475 = vmatmul.mubr.bf16.vlgmr.msra.gmra.mxu1 %v15869_v63 }
 0x256   : > { %v15876_v13 = vadd.f32 %v3709_v12, %v3668_v9  ;;  %8500 = vmatpush2.bf16.msra.mxu0 %v13119_v62  ;;  %8525 = vmatpush1.bf16.msra.mxu1 %v13183_v39  ;;  %v13079_v62 = vcombine.low %v1794_v45, %v1798_v46  ;;  %v13143_v39 = vcombine.low %v1858_v47, %v1862_v48  ;;  %v1938_v47 = vld [vmem:[#allocation8 + $0xb00] sm:$0xff] }
 0x257   : > { %8556 = vmatprep.mubr.bf16.mxu1 %v15873_v8  ;;  %v3670_v16 = vpop.f32.mrf.mxu1  ;;  %v3711_v17 = vpop.f32.mrf.mxu0  ;;  %8501 = vmatprep.subr.bf16.mxu0 %v13112_v1  ;;  %v13072_v1 = vcombine.high %v1786_v56, %v1790_v59  ;;  %v13071_v9 = vcombine.low %v1786_v56, %v1790_v59  ;;  %v13135_v12 = vcombine.low %v1850_v4, %v1854_v60  ;;  %v1930_v60 = vld [vmem:[#allocation8 + $0xac0] sm:$0xff] }
 0x258   : > { %v15879_v14 = vadd.f32 %v3711_v17, %v3670_v16  ;;  %8526 = vmatprep.subr.bf16.mxu1 %v13176_v3  ;;  %v1778_v3 = vld [vmem:[#allocation8 + $0x600] sm:$0xff] }
 0x259   : > { %v3713_v25 = vpop.f32.mrf.mxu0  ;;  %v3672_v26 = vpop.f32.mrf.mxu1  ;;  %v1962_v16 = vld [vmem:[#allocation8 + $0xbc0] sm:$0xff]  ;;  %v13063_v21 = vcombine.low %v1778_v3, %v1782_v5 }
 0x25a   : > { %8502 = vmatpush2.bf16.msra.mxu0 %v13111_v57  ;;  %8527 = vmatpush1.bf16.msra.mxu1 %v13175_v15  ;;  %v13064_v57 = vcombine.high %v1778_v3, %v1782_v5  ;;  %v13128_v15 = vcombine.high %v1842_v6, %v1846_v7  ;;  %v1966_v17 = vld [vmem:[#allocation8 + $0xbe0] sm:$0xff] }
 0x25b   : > { %v3714_v32 = vpop.f32.mrf.mxu0  ;;  %8503 = vmatprep.subr.bf16.mxu0 %v13104_v18  ;;  %8528 = vmatprep.subr.bf16.mxu1 %v13168_v19  ;;  %v3673_v61 = vpop.f32.mrf.mxu1  ;;  %v2026_v18 = vld [vmem:[#allocation8 + $0xdc0] sm:$0xff]  ;;  %v13248_v23 = vcombine.high %v1962_v16, %v1966_v17 }
 0x25c   : > { %v2030_v19 = vld [vmem:[#allocation8 + $0xde0] sm:$0xff]  ;;  %v13247_v32 = vcombine.low %v1962_v16, %v1966_v17 }
 0x25d   : > { %v13312_v24 = vcombine.high %v2026_v18, %v2030_v19  ;;  %v1954_v25 = vld [vmem:[#allocation8 + $0xb80] sm:$0xff] }
 0x25e   : > { %8504 = vmatpush2.bf16.msra.mxu0 %v13103_v27  ;;  %8529 = vmatpush1.bf16.msra.mxu1 %v13167_v31  ;;  %v1958_v26 = vld [vmem:[#allocation8 + $0xba0] sm:$0xff] }
 0x25f   : > { %8505 = vmatprep.subr.bf16.mxu0 %v13096_v0  ;;  %8530 = vmatprep.subr.bf16.mxu1 %v13160_v50  ;;  %v2018_v27 = vld [vmem:[#allocation8 + $0xd80] sm:$0xff]  ;;  %v13311_v0 = vcombine.low %v2026_v18, %v2030_v19  ;;  %v15883_v50 = vpack.c.bf16 %v15824_v58, %v15824_v58  ;;  %v13240_v34 = vcombine.high %v1954_v25, %v1958_v26 }
 0x260   : > { %v2022_v31 = vld [vmem:[#allocation8 + $0xda0] sm:$0xff]  ;;  %v13239_v58 = vcombine.low %v1954_v25, %v1958_v26 }
 0x261   : > { %v1946_v61 = vld [vmem:[#allocation8 + $0xb40] sm:$0xff]  ;;  %v13304_v35 = vcombine.high %v2018_v27, %v2022_v31 }
 0x262   : > { %8506 = vmatpush2.bf16.msra.mxu0 %v13095_v41  ;;  %8531 = vmatpush1.bf16.msra.mxu1 %v13159_v42  ;;  %v2014_v41 = vld [vmem:[#allocation8 + $0xd60] sm:$0xff]  ;;  %v15887_v42 = vpack.c.bf16 %v15839_v20, %v15839_v20  ;;  %v13232_v45 = vcombine.high %v1946_v61, %v1950_v40 }
 0x263   : > { %8507 = vmatprep.subr.bf16.mxu0 %v13088_v43  ;;  %8532 = vmatprep.subr.bf16.mxu1 %v13152_v44  ;;  %v13303_v44 = vcombine.low %v2018_v27, %v2022_v31  ;;  %v13296_v46 = vcombine.high %v2010_v38, %v2014_v41  ;;  %v2002_v20 = vld [vmem:[#allocation8 + $0xd00] sm:$0xff]  ;;  %v13295_v56 = vcombine.low %v2010_v38, %v2014_v41 }
 0x266   : > { %8508 = vmatpush2.bf16.msra.mxu0 %v13087_v52  ;;  %8533 = vmatpush1.bf16.msra.mxu1 %v13151_v53  ;;  %v1942_v52 = vld [vmem:[#allocation8 + $0xb20] sm:$0xff] }
 0x267   : > { %8509 = vmatprep.subr.bf16.mxu0 %v13080_v36  ;;  %8534 = vmatprep.subr.bf16.mxu1 %v13144_v55  ;;  %v2006_v53 = vld [vmem:[#allocation8 + $0xd20] sm:$0xff]  ;;  %v13231_v55 = vcombine.low %v1946_v61, %v1950_v40  ;;  %v13224_v59 = vcombine.high %v1938_v47, %v1942_v52  ;;  %v13223_v3 = vcombine.low %v1938_v47, %v1942_v52 }
 0x268   : > { %v13288_v4 = vcombine.high %v2002_v20, %v2006_v53  ;;  %v13287_v5 = vcombine.low %v2002_v20, %v2006_v53  ;;  %v1974_v61 = vld [vmem:[#allocation8 + $0xc20] sm:$0xff] }
 0x26a   : > { %8510 = vmatpush2.bf16.msra.mxu0 %v13079_v62  ;;  %8535 = vmatpush1.bf16.msra.mxu1 %v13143_v39  ;;  %v1934_v39 = vld [vmem:[#allocation8 + $0xae0] sm:$0xff] }
 0x26b   : > { %8511 = vmatprep.subr.bf16.mxu0 %v13072_v1  ;;  %8536 = vmatprep.subr.bf16.mxu1 %v13136_v2  ;;  %v1994_v1 = vld [vmem:[#allocation8 + $0xcc0] sm:$0xff]  ;;  %v13216_v6 = vcombine.high %v1930_v60, %v1934_v39  ;;  %v13215_v16 = vcombine.low %v1930_v60, %v1934_v39 }
 0x26c   : > { %v1998_v2 = vld [vmem:[#allocation8 + $0xce0] sm:$0xff] }
 0x26d   : > { %v13280_v7 = vcombine.high %v1994_v1, %v1998_v2  ;;  %v13279_v17 = vcombine.low %v1994_v1, %v1998_v2  ;;  %v2074_v1 = vld [vmem:[#allocation8 + $0xf40] sm:$0xff] }
 0x26e   : > { %8512 = vmatpush2.bf16.msra.mxu0 %v13071_v9  ;;  %8537 = vmatpush1.bf16.msra.mxu1 %v13135_v12  ;;  %v1922_v9 = vld [vmem:[#allocation8 + $0xa80] sm:$0xff] }
 0x26f   : > { %8513 = vmatprep.subr.bf16.mxu0 %v13064_v57  ;;  %8538 = vmatprep.subr.bf16.mxu1 %v13128_v15  ;;  %v1926_v12 = vld [vmem:[#allocation8 + $0xaa0] sm:$0xff] }
 0x270   : > { %v1986_v57 = vld [vmem:[#allocation8 + $0xc80] sm:$0xff]  ;;  %v13208_v18 = vcombine.high %v1922_v9, %v1926_v12  ;;  %v13207_v25 = vcombine.low %v1922_v9, %v1926_v12 }
 0x271   : > { %v1990_v15 = vld [vmem:[#allocation8 + $0xca0] sm:$0xff] }
 0x272   : > { %8514 = vmatpush2.bf16.msra.mxu0 %v13063_v21  ;;  %8539 = vmatpush1.bf16.msra.mxu1 %v13127_v22  ;;  %v13272_v19 = vcombine.high %v1986_v57, %v1990_v15  ;;  %v1914_v21 = vld [vmem:[#allocation8 + $0xa40] sm:$0xff]  ;;  %v13271_v26 = vcombine.low %v1986_v57, %v1990_v15 }
 0x273   : > { %8540 = vmatprep.subr.bf16.mxu1 %v13248_v23  ;;  %8565 = vmatprep.subr.bf16.mxu0 %v13312_v24  ;;  %v1918_v22 = vld [vmem:[#allocation8 + $0xa60] sm:$0xff] }
 0x274   : > { %v1978_v23 = vld [vmem:[#allocation8 + $0xc40] sm:$0xff]  ;;  %v13200_v27 = vcombine.high %v1914_v21, %v1918_v22 }
 0x275   : > { %8516 = vmatmul.mubr.bf16.vlgmr.msra.gmra.mxu0 %v15883_v50  ;;  %v15890_v43 = vpop.f32.mrf.mxu1  ;;  %v1982_v24 = vld [vmem:[#allocation8 + $0xc60] sm:$0xff] }
 0x276   : > { %8541 = vmatpush2.bf16.msra.mxu1 %v13247_v32  ;;  %8566 = vmatpush1.bf16.msra.mxu0 %v13311_v0  ;;  %v13264_v31 = vcombine.high %v1978_v23, %v1982_v24  ;;  %v1906_v32 = vld [vmem:[#allocation8 + $0xa00] sm:$0xff]  ;;  %v13263_v40 = vcombine.low %v1978_v23, %v1982_v24 }
 0x277   : > { %8597 = vmatprep.mubr.bf16.mxu0 %v15887_v42  ;;  %8542 = vmatprep.subr.bf16.mxu1 %v13240_v34  ;;  %v15893_v48 = vpop.f32.mrf.mxu1  ;;  %v1910_v0 = vld [vmem:[#allocation8 + $0xa20] sm:$0xff] }
 0x278   : > { %8567 = vmatprep.subr.bf16.mxu0 %v13304_v35  ;;  %v1970_v34 = vld [vmem:[#allocation8 + $0xc00] sm:$0xff]  ;;  %v13199_v35 = vcombine.low %v1914_v21, %v1918_v22  ;;  %v13192_v38 = vcombine.high %v1906_v32, %v1910_v0  ;;  %v13191_v47 = vcombine.low %v1906_v32, %v1910_v0 }
 0x279   : > { %v3795_v36 = vpop.f32.mrf.mxu1  ;;  %v13256_v41 = vcombine.high %v1970_v34, %v1974_v61  ;;  %v13255_v52 = vcombine.low %v1970_v34, %v1974_v61  ;;  %v2130_v21 = vld [vmem:[#allocation8 + $0x1100] sm:$0xff] }
 0x27a   : > { %8543 = vmatpush2.bf16.msra.mxu1 %v13239_v58  ;;  %8568 = vmatpush1.bf16.msra.mxu0 %v13303_v44  ;;  %v2090_v58 = vld [vmem:[#allocation8 + $0xfc0] sm:$0xff] }
 0x27b   : > { %8544 = vmatprep.subr.bf16.mxu1 %v13232_v45  ;;  %8569 = vmatprep.subr.bf16.mxu0 %v13296_v46  ;;  %v3796_v62 = vpop.f32.mrf.mxu1  ;;  %v2094_v44 = vld [vmem:[#allocation8 + $0xfe0] sm:$0xff] }
 0x27c   : > { %v2154_v45 = vld [vmem:[#allocation8 + $0x11c0] sm:$0xff]  ;;  %v13376_v20 = vcombine.high %v2090_v58, %v2094_v44  ;;  %v15897_v62 = vpack.c.bf16 %v15831_v10, %v15831_v10 }
 0x27d   : > { %v2158_v46 = vld [vmem:[#allocation8 + $0x11e0] sm:$0xff] }
 0x27e   : > { %8545 = vmatpush2.bf16.msra.mxu1 %v13231_v55  ;;  %8570 = vmatpush1.bf16.msra.mxu0 %v13295_v56  ;;  %v13440_v53 = vcombine.high %v2154_v45, %v2158_v46  ;;  %v2082_v36 = vld [vmem:[#allocation8 + $0xf80] sm:$0xff]  ;;  %v13439_v60 = vcombine.low %v2154_v45, %v2158_v46 }
 0x27f   : > { %8546 = vmatprep.subr.bf16.mxu1 %v13224_v59  ;;  %8571 = vmatprep.subr.bf16.mxu0 %v13288_v4  ;;  %v2086_v55 = vld [vmem:[#allocation8 + $0xfa0] sm:$0xff]  ;;  %v13375_v4 = vcombine.low %v2090_v58, %v2094_v44 }
 0x280   : > { %v2146_v56 = vld [vmem:[#allocation8 + $0x1180] sm:$0xff]  ;;  %v13368_v39 = vcombine.high %v2082_v36, %v2086_v55  ;;  %v13367_v10 = vcombine.low %v2082_v36, %v2086_v55 }
 0x281   : > { %v2150_v59 = vld [vmem:[#allocation8 + $0x11a0] sm:$0xff] }
 0x282   : > { %8547 = vmatpush2.bf16.msra.mxu1 %v13223_v3  ;;  %8572 = vmatpush1.bf16.msra.mxu0 %v13287_v5  ;;  %v13432_v2 = vcombine.high %v2146_v56, %v2150_v59  ;;  %v2078_v3 = vld [vmem:[#allocation8 + $0xf60] sm:$0xff]  ;;  %v13431_v57 = vcombine.low %v2146_v56, %v2150_v59 }
 0x283   : > { %8548 = vmatprep.subr.bf16.mxu1 %v13216_v6  ;;  %8573 = vmatprep.subr.bf16.mxu0 %v13280_v7  ;;  %v2138_v5 = vld [vmem:[#allocation8 + $0x1140] sm:$0xff]  ;;  %v15901_v7 = vpack.c.bf16 %v15853_v33, %v15853_v33  ;;  %v13359_v23 = vcombine.low %v2074_v1, %v2078_v3 }
 0x284   : > { %v2142_v6 = vld [vmem:[#allocation8 + $0x1160] sm:$0xff] }
 0x285   : > { %v2134_v22 = vld [vmem:[#allocation8 + $0x1120] sm:$0xff]  ;;  %v13423_v24 = vcombine.low %v2138_v5, %v2142_v6 }
 0x286   : > { %8549 = vmatpush2.bf16.msra.mxu1 %v13215_v16  ;;  %8574 = vmatpush1.bf16.msra.mxu0 %v13279_v17  ;;  %v13360_v16 = vcombine.high %v2074_v1, %v2078_v3  ;;  %v13424_v17 = vcombine.high %v2138_v5, %v2142_v6  ;;  %v2062_v32 = vld [vmem:[#allocation8 + $0xee0] sm:$0xff]  ;;  %v13415_v61 = vcombine.low %v2130_v21, %v2134_v22 }
 0x287   : > { %8550 = vmatprep.subr.bf16.mxu1 %v13208_v18  ;;  %8575 = vmatprep.subr.bf16.mxu0 %v13272_v19  ;;  %v2066_v18 = vld [vmem:[#allocation8 + $0xf00] sm:$0xff] }
 0x288   : > { %v2070_v19 = vld [vmem:[#allocation8 + $0xf20] sm:$0xff] }
 0x289   : > { %v2122_v0 = vld [vmem:[#allocation8 + $0x10c0] sm:$0xff] }
 0x28a   : > { %8551 = vmatpush2.bf16.msra.mxu1 %v13207_v25  ;;  %8576 = vmatpush1.bf16.msra.mxu0 %v13271_v26  ;;  %v13352_v26 = vcombine.high %v2066_v18, %v2070_v19  ;;  %v2126_v34 = vld [vmem:[#allocation8 + $0x10e0] sm:$0xff] }
 0x28b   : > { %8552 = vmatprep.subr.bf16.mxu1 %v13200_v27  ;;  %8577 = vmatprep.subr.bf16.mxu0 %v13264_v31  ;;  %v13416_v27 = vcombine.high %v2130_v21, %v2134_v22  ;;  %v2058_v31 = vld [vmem:[#allocation8 + $0xec0] sm:$0xff]  ;;  %v13407_v46 = vcombine.low %v2122_v0, %v2126_v34 }
 0x28c   : > { %v2114_v58 = vld [vmem:[#allocation8 + $0x1080] sm:$0xff]  ;;  %v13343_v45 = vcombine.low %v2058_v31, %v2062_v32 }
 0x28d   : > { %v2118_v44 = vld [vmem:[#allocation8 + $0x10a0] sm:$0xff] }
 0x28e   : > { %8553 = vmatpush2.bf16.msra.mxu1 %v13199_v35  ;;  %8578 = vmatpush1.bf16.msra.mxu0 %v13263_v40  ;;  %v13344_v35 = vcombine.high %v2058_v31, %v2062_v32  ;;  %v13408_v40 = vcombine.high %v2122_v0, %v2126_v34  ;;  %v2106_v36 = vld [vmem:[#allocation8 + $0x1040] sm:$0xff]  ;;  %v13399_v59 = vcombine.low %v2114_v58, %v2118_v44 }
 0x28f   : > { %8554 = vmatprep.subr.bf16.mxu1 %v13192_v38  ;;  %8579 = vmatprep.subr.bf16.mxu0 %v13256_v41  ;;  %v2050_v38 = vld [vmem:[#allocation8 + $0xe80] sm:$0xff]  ;;  %v15913_v31 = vpack.c.bf16 %v15835_v11, %v15835_v11 }
 0x290   : > { %v2054_v41 = vld [vmem:[#allocation8 + $0xea0] sm:$0xff] }
 0x291   : > { %v2110_v55 = vld [vmem:[#allocation8 + $0x1060] sm:$0xff]  ;;  %v13335_v56 = vcombine.low %v2050_v38, %v2054_v41 }
 0x292   : > { %8555 = vmatpush2.bf16.msra.mxu1 %v13191_v47  ;;  %8580 = vmatpush1.bf16.msra.mxu0 %v13255_v52  ;;  %v13336_v47 = vcombine.high %v2050_v38, %v2054_v41  ;;  %v13400_v52 = vcombine.high %v2114_v58, %v2118_v44  ;;  %v2038_v1 = vld [vmem:[#allocation8 + $0xe20] sm:$0xff]  ;;  %v13391_v6 = vcombine.low %v2106_v36, %v2110_v55 }
 0x293   : > { %8581 = vmatprep.subr.bf16.mxu0 %v13376_v20  ;;  %8606 = vmatprep.subr.bf16.mxu1 %v13440_v53  ;;  %v2042_v20 = vld [vmem:[#allocation8 + $0xe40] sm:$0xff] }
 0x294   : > { %v2046_v53 = vld [vmem:[#allocation8 + $0xe60] sm:$0xff] }
 0x295   : > { %v3750_v9 = vpop.f32.mrf.mxu0  ;;  %8557 = vmatmul.mubr.bf16.vlgmr.msra.gmra.mxu1 %v15897_v62  ;;  %v2102_v3 = vld [vmem:[#allocation8 + $0x1020] sm:$0xff]  ;;  %v13327_v5 = vcombine.low %v2042_v20, %v2046_v53 }
 0x296   : > { %v15905_v12 = vadd.f32 %v15890_v43, %v3750_v9  ;;  %8582 = vmatpush2.bf16.msra.mxu0 %v13375_v4  ;;  %8607 = vmatpush1.bf16.msra.mxu1 %v13439_v60  ;;  %v13328_v4 = vcombine.high %v2042_v20, %v2046_v53  ;;  %v13392_v60 = vcombine.high %v2106_v36, %v2110_v55  ;;  %v2202_v0 = vld [vmem:[#allocation8 + $0x1340] sm:$0xff] }
 0x297   : > { %8638 = vmatprep.mubr.bf16.mxu1 %v15901_v7  ;;  %v3752_v15 = vpop.f32.mrf.mxu0  ;;  %8583 = vmatprep.subr.bf16.mxu0 %v13368_v39  ;;  %v2034_v39 = vld [vmem:[#allocation8 + $0xe00] sm:$0xff] }
 0x298   : > { %v15909_v33 = vadd.f32 %v15893_v48, %v3752_v15  ;;  %8608 = vmatprep.subr.bf16.mxu1 %v13432_v2  ;;  %v13351_v48 = vcombine.low %v2066_v18, %v2070_v19  ;;  %v2098_v2 = vld [vmem:[#allocation8 + $0x1000] sm:$0xff]  ;;  %v13320_v9 = vcombine.high %v2034_v39, %v2038_v1  ;;  %v13319_v18 = vcombine.low %v2034_v39, %v2038_v1 }
 0x299   : > { %v3754_v43 = vpop.f32.mrf.mxu0  ;;  %v2222_v15 = vld [vmem:[#allocation8 + $0x13e0] sm:$0xff]  ;;  %v13383_v19 = vcombine.low %v2098_v2, %v2102_v3 }
 0x29a   : > { %8584 = vmatpush2.bf16.msra.mxu0 %v13367_v10  ;;  %8609 = vmatpush1.bf16.msra.mxu1 %v13431_v57  ;;  %v13384_v10 = vcombine.high %v2098_v2, %v2102_v3  ;;  %v2218_v57 = vld [vmem:[#allocation8 + $0x13c0] sm:$0xff] }
 0x29b   : > { %v3755_v25 = vpop.f32.mrf.mxu0  ;;  %8585 = vmatprep.subr.bf16.mxu0 %v13360_v16  ;;  %8610 = vmatprep.subr.bf16.mxu1 %v13424_v17  ;;  %v2282_v16 = vld [vmem:[#allocation8 + $0x15c0] sm:$0xff]  ;;  %v13504_v21 = vcombine.high %v2218_v57, %v2222_v15 }
 0x29c   : > { %v2286_v17 = vld [vmem:[#allocation8 + $0x15e0] sm:$0xff] }
 0x29d   : > { %v13568_v22 = vcombine.high %v2282_v16, %v2286_v17  ;;  %v2210_v43 = vld [vmem:[#allocation8 + $0x1380] sm:$0xff] }
 0x29e   : > { %8586 = vmatpush2.bf16.msra.mxu0 %v13359_v23  ;;  %8611 = vmatpush1.bf16.msra.mxu1 %v13423_v24  ;;  %v2214_v23 = vld [vmem:[#allocation8 + $0x13a0] sm:$0xff] }
 0x29f   : > { %8587 = vmatprep.subr.bf16.mxu0 %v13352_v26  ;;  %8612 = vmatprep.subr.bf16.mxu1 %v13416_v27  ;;  %v2274_v24 = vld [vmem:[#allocation8 + $0x1580] sm:$0xff]  ;;  %v13503_v26 = vcombine.low %v2218_v57, %v2222_v15  ;;  %v13567_v27 = vcombine.low %v2282_v16, %v2286_v17  ;;  %v13496_v32 = vcombine.high %v2210_v43, %v2214_v23 }
 0x2a0   : > { %v2278_v25 = vld [vmem:[#allocation8 + $0x15a0] sm:$0xff]  ;;  %v13495_v11 = vcombine.low %v2210_v43, %v2214_v23 }
 0x2a1   : > { %v13560_v34 = vcombine.high %v2274_v24, %v2278_v25  ;;  %v13559_v44 = vcombine.low %v2274_v24, %v2278_v25  ;;  %v2194_v20 = vld [vmem:[#allocation8 + $0x1300] sm:$0xff] }
 0x2a2   : > { %8588 = vmatpush2.bf16.msra.mxu0 %v13351_v48  ;;  %8613 = vmatpush1.bf16.msra.mxu1 %v13415_v61  ;;  %v2206_v48 = vld [vmem:[#allocation8 + $0x1360] sm:$0xff] }
 0x2a3   : > { %8589 = vmatprep.subr.bf16.mxu0 %v13344_v35  ;;  %8614 = vmatprep.subr.bf16.mxu1 %v13408_v40  ;;  %v2266_v61 = vld [vmem:[#allocation8 + $0x1540] sm:$0xff]  ;;  %v15917_v40 = vpack.c.bf16 %v15855_v37, %v15855_v37 }
 0x2a4   : > { %v2270_v35 = vld [vmem:[#allocation8 + $0x1560] sm:$0xff] }
 0x2a5   : > { %v2198_v53 = vld [vmem:[#allocation8 + $0x1320] sm:$0xff] }
 0x2a6   : > { %8590 = vmatpush2.bf16.msra.mxu0 %v13343_v45  ;;  %8615 = vmatpush1.bf16.msra.mxu1 %v13407_v46  ;;  %v2258_v36 = vld [vmem:[#allocation8 + $0x1500] sm:$0xff]  ;;  %v13480_v1 = vcombine.high %v2194_v20, %v2198_v53  ;;  %v13479_v57 = vcombine.low %v2194_v20, %v2198_v53 }
 0x2a7   : > { %8591 = vmatprep.subr.bf16.mxu0 %v13336_v47  ;;  %8616 = vmatprep.subr.bf16.mxu1 %v13400_v52  ;;  %v13488_v47 = vcombine.high %v2202_v0, %v2206_v48  ;;  %v13552_v52 = vcombine.high %v2266_v61, %v2270_v35  ;;  %v2262_v55 = vld [vmem:[#allocation8 + $0x1520] sm:$0xff] }
 0x2a8   : > { %v13544_v2 = vcombine.high %v2258_v36, %v2262_v55  ;;  %v2186_v3 = vld [vmem:[#allocation8 + $0x12c0] sm:$0xff]  ;;  %v13543_v15 = vcombine.low %v2258_v36, %v2262_v55 }
 0x2a9   : > { %v2346_v20 = vld [vmem:[#allocation8 + $0x17c0] sm:$0xff] }
 0x2aa   : > { %8592 = vmatpush2.bf16.msra.mxu0 %v13335_v56  ;;  %8617 = vmatpush1.bf16.msra.mxu1 %v13399_v59  ;;  %v2350_v53 = vld [vmem:[#allocation8 + $0x17e0] sm:$0xff] }
 0x2ab   : > { %8593 = vmatprep.subr.bf16.mxu0 %v13328_v4  ;;  %8618 = vmatprep.subr.bf16.mxu1 %v13392_v60  ;;  %v13487_v4 = vcombine.low %v2202_v0, %v2206_v48  ;;  %v13551_v60 = vcombine.low %v2266_v61, %v2270_v35  ;;  %v2238_v0 = vld [vmem:[#allocation8 + $0x1460] sm:$0xff] }
 0x2ac   : > { %v2410_v36 = vld [vmem:[#allocation8 + $0x19c0] sm:$0xff] }
 0x2ad   : > { %v2414_v55 = vld [vmem:[#allocation8 + $0x19e0] sm:$0xff] }
 0x2ae   : > { %8594 = vmatpush2.bf16.msra.mxu0 %v13327_v5  ;;  %8619 = vmatpush1.bf16.msra.mxu1 %v13391_v6  ;;  %v2190_v6 = vld [vmem:[#allocation8 + $0x12e0] sm:$0xff] }
 0x2af   : > { %8595 = vmatprep.subr.bf16.mxu0 %v13320_v9  ;;  %8620 = vmatprep.subr.bf16.mxu1 %v13384_v10  ;;  %v2250_v9 = vld [vmem:[#allocation8 + $0x14c0] sm:$0xff]  ;;  %v13472_v16 = vcombine.high %v2186_v3, %v2190_v6  ;;  %v13471_v43 = vcombine.low %v2186_v3, %v2190_v6  ;;  %v13695_v6 = vcombine.low %v2410_v36, %v2414_v55 }
 0x2b0   : > { %v2254_v10 = vld [vmem:[#allocation8 + $0x14e0] sm:$0xff] }
 0x2b1   : > { %v13536_v17 = vcombine.high %v2250_v9, %v2254_v10  ;;  %v13535_v23 = vcombine.low %v2250_v9, %v2254_v10  ;;  %v2406_v3 = vld [vmem:[#allocation8 + $0x19a0] sm:$0xff]  ;;  %v15927_v9 = vpack.c.bf16 %v15847_v29, %v15847_v29 }
 0x2b2   : > { %8596 = vmatpush2.bf16.msra.mxu0 %v13319_v18  ;;  %8621 = vmatpush1.bf16.msra.mxu1 %v13383_v19  ;;  %v2178_v18 = vld [vmem:[#allocation8 + $0x1280] sm:$0xff] }
 0x2b3   : > { %8622 = vmatprep.subr.bf16.mxu1 %v13504_v21  ;;  %8647 = vmatprep.subr.bf16.mxu0 %v13568_v22  ;;  %v2182_v19 = vld [vmem:[#allocation8 + $0x12a0] sm:$0xff] }
 0x2b4   : > { %v2242_v21 = vld [vmem:[#allocation8 + $0x1480] sm:$0xff]  ;;  %v13464_v24 = vcombine.high %v2178_v18, %v2182_v19 }
 0x2b5   : > { %v3832_v38 = vpop.f32.mrf.mxu1  ;;  %v3873_v41 = vpop.f32.mrf.mxu0  ;;  %8598 = vmatmul.mubr.bf16.vlgmr.msra.gmra.mxu0 %v15913_v31  ;;  %v2246_v22 = vld [vmem:[#allocation8 + $0x14a0] sm:$0xff] }
 0x2b6   : > { %v15920_v58 = vadd.f32 %v3873_v41, %v3832_v38  ;;  %8623 = vmatpush2.bf16.msra.mxu1 %v13503_v26  ;;  %8648 = vmatpush1.bf16.msra.mxu0 %v13567_v27  ;;  %v13528_v25 = vcombine.high %v2242_v21, %v2246_v22  ;;  %v2170_v26 = vld [vmem:[#allocation8 + $0x1240] sm:$0xff]  ;;  %v13527_v48 = vcombine.low %v2242_v21, %v2246_v22 }
 0x2b7   : > { %8679 = vmatprep.mubr.bf16.mxu0 %v15917_v40  ;;  %v3834_v45 = vpop.f32.mrf.mxu1  ;;  %v3875_v46 = vpop.f32.mrf.mxu0  ;;  %8624 = vmatprep.subr.bf16.mxu1 %v13496_v32  ;;  %v2174_v27 = vld [vmem:[#allocation8 + $0x1260] sm:$0xff] }
 0x2b8   : > { %v15923_v37 = vadd.f32 %v3875_v46, %v3834_v45  ;;  %8649 = vmatprep.subr.bf16.mxu0 %v13560_v34  ;;  %v2234_v32 = vld [vmem:[#allocation8 + $0x1440] sm:$0xff]  ;;  %v13463_v34 = vcombine.low %v2178_v18, %v2182_v19  ;;  %v13456_v61 = vcombine.high %v2170_v26, %v2174_v27  ;;  %v13455_v45 = vcombine.low %v2170_v26, %v2174_v27 }
 0x2b9   : > { %v3877_v56 = vpop.f32.mrf.mxu0  ;;  %v3836_v59 = vpop.f32.mrf.mxu1  ;;  %v13520_v35 = vcombine.high %v2234_v32, %v2238_v0  ;;  %v2162_v38 = vld [vmem:[#allocation8 + $0x1200] sm:$0xff]  ;;  %v13519_v46 = vcombine.low %v2234_v32, %v2238_v0  ;;  %v15931_v19 = vpack.c.bf16 %v15865_v54, %v15865_v54 }
 0x2ba   : > { %8625 = vmatpush2.bf16.msra.mxu1 %v13495_v11  ;;  %8650 = vmatpush1.bf16.msra.mxu0 %v13559_v44  ;;  %v2166_v41 = vld [vmem:[#allocation8 + $0x1220] sm:$0xff] }
 0x2bb   : > { %v3878_v39 = vpop.f32.mrf.mxu0  ;;  %8626 = vmatprep.subr.bf16.mxu1 %v13488_v47  ;;  %8651 = vmatprep.subr.bf16.mxu0 %v13552_v52  ;;  %v3837_v5 = vpop.f32.mrf.mxu1  ;;  %v2226_v11 = vld [vmem:[#allocation8 + $0x1400] sm:$0xff]  ;;  %v13448_v47 = vcombine.high %v2162_v38, %v2166_v41  ;;  %v13447_v56 = vcombine.low %v2162_v38, %v2166_v41 }
 0x2bc   : > { %v2230_v44 = vld [vmem:[#allocation8 + $0x1420] sm:$0xff]  ;;  %v13631_v5 = vcombine.low %v2346_v20, %v2350_v53 }
 0x2bd   : > { %v13512_v52 = vcombine.high %v2226_v11, %v2230_v44  ;;  %v13511_v59 = vcombine.low %v2226_v11, %v2230_v44  ;;  %v2338_v39 = vld [vmem:[#allocation8 + $0x1780] sm:$0xff] }
 0x2be   : > { %8627 = vmatpush2.bf16.msra.mxu1 %v13487_v4  ;;  %8652 = vmatpush1.bf16.msra.mxu0 %v13551_v60  ;;  %v13632_v4 = vcombine.high %v2346_v20, %v2350_v53  ;;  %v13696_v60 = vcombine.high %v2410_v36, %v2414_v55  ;;  %v2398_v18 = vld [vmem:[#allocation8 + $0x1960] sm:$0xff] }
 0x2bf   : > { %8628 = vmatprep.subr.bf16.mxu1 %v13480_v1  ;;  %8653 = vmatprep.subr.bf16.mxu0 %v13544_v2  ;;  %v2342_v1 = vld [vmem:[#allocation8 + $0x17a0] sm:$0xff] }
 0x2c0   : > { %v2402_v2 = vld [vmem:[#allocation8 + $0x1980] sm:$0xff]  ;;  %v13624_v10 = vcombine.high %v2338_v39, %v2342_v1  ;;  %v13623_v29 = vcombine.low %v2338_v39, %v2342_v1 }
 0x2c1   : > { %v13687_v22 = vcombine.low %v2402_v2, %v2406_v3  ;;  %v2326_v26 = vld [vmem:[#allocation8 + $0x1720] sm:$0xff] }
 0x2c2   : > { %8629 = vmatpush2.bf16.msra.mxu1 %v13479_v57  ;;  %8654 = vmatpush1.bf16.msra.mxu0 %v13543_v15  ;;  %v2330_v57 = vld [vmem:[#allocation8 + $0x1740] sm:$0xff]  ;;  %v13688_v15 = vcombine.high %v2402_v2, %v2406_v3 }
 0x2c3   : > { %8630 = vmatprep.subr.bf16.mxu1 %v13472_v16  ;;  %8655 = vmatprep.subr.bf16.mxu0 %v13536_v17  ;;  %v2334_v16 = vld [vmem:[#allocation8 + $0x1760] sm:$0xff] }
 0x2c4   : > { %v2394_v17 = vld [vmem:[#allocation8 + $0x1940] sm:$0xff]  ;;  %v13615_v0 = vcombine.low %v2330_v57, %v2334_v16 }
 0x2c5   : > { %v2386_v54 = vld [vmem:[#allocation8 + $0x1900] sm:$0xff] }
 0x2c6   : > { %8631 = vmatpush2.bf16.msra.mxu1 %v13471_v43  ;;  %8656 = vmatpush1.bf16.msra.mxu0 %v13535_v23  ;;  %v13616_v43 = vcombine.high %v2330_v57, %v2334_v16  ;;  %v13680_v23 = vcombine.high %v2394_v17, %v2398_v18  ;;  %v2390_v27 = vld [vmem:[#allocation8 + $0x1920] sm:$0xff] }
 0x2c7   : > { %8632 = vmatprep.subr.bf16.mxu1 %v13464_v24  ;;  %8657 = vmatprep.subr.bf16.mxu0 %v13528_v25  ;;  %v2322_v24 = vld [vmem:[#allocation8 + $0x1700] sm:$0xff] }
 0x2c8   : > { %v2318_v41 = vld [vmem:[#allocation8 + $0x16e0] sm:$0xff] }
 0x2c9   : > { %v2378_v11 = vld [vmem:[#allocation8 + $0x18c0] sm:$0xff] }
 0x2ca   : > { %8633 = vmatpush2.bf16.msra.mxu1 %v13463_v34  ;;  %8658 = vmatpush1.bf16.msra.mxu0 %v13527_v48  ;;  %v13679_v34 = vcombine.low %v2394_v17, %v2398_v18  ;;  %v13608_v48 = vcombine.high %v2322_v24, %v2326_v26  ;;  %v2382_v44 = vld [vmem:[#allocation8 + $0x18e0] sm:$0xff] }
 0x2cb   : > { %8634 = vmatprep.subr.bf16.mxu1 %v13456_v61  ;;  %8659 = vmatprep.subr.bf16.mxu0 %v13520_v35  ;;  %v13672_v61 = vcombine.high %v2386_v54, %v2390_v27  ;;  %v2314_v35 = vld [vmem:[#allocation8 + $0x16c0] sm:$0xff] }
 0x2cc   : > { %v2306_v20 = vld [vmem:[#allocation8 + $0x1680] sm:$0xff] }
 0x2cd   : > { %v2310_v53 = vld [vmem:[#allocation8 + $0x16a0] sm:$0xff] }
 0x2ce   : > { %8635 = vmatpush2.bf16.msra.mxu1 %v13455_v45  ;;  %8660 = vmatpush1.bf16.msra.mxu0 %v13519_v46  ;;  %v13607_v45 = vcombine.low %v2322_v24, %v2326_v26  ;;  %v13671_v46 = vcombine.low %v2386_v54, %v2390_v27  ;;  %v2370_v36 = vld [vmem:[#allocation8 + $0x1880] sm:$0xff]  ;;  %v1643_v54 = vld [vmem:[#allocation8 + $0x1c8] sm:$0xff] }
 0x2cf   : > { %8636 = vmatprep.subr.bf16.mxu1 %v13448_v47  ;;  %8661 = vmatprep.subr.bf16.mxu0 %v13512_v52  ;;  %v13600_v47 = vcombine.high %v2314_v35, %v2318_v41  ;;  %v13664_v52 = vcombine.high %v2378_v11, %v2382_v44  ;;  %v2374_v55 = vld [vmem:[#allocation8 + $0x18a0] sm:$0xff]  ;;  %v1647_v27 = vld [vmem:[#allocation8 + $0x1e8] sm:$0xff] }
 0x2d0   : > { %v2298_v39 = vld [vmem:[#allocation8 + $0x1640] sm:$0xff] }
 0x2d1   : > { %v2302_v1 = vld [vmem:[#allocation8 + $0x1660] sm:$0xff] }
 0x2d2   : > { %8637 = vmatpush2.bf16.msra.mxu1 %v13447_v56  ;;  %8662 = vmatpush1.bf16.msra.mxu0 %v13511_v59  ;;  %v13599_v56 = vcombine.low %v2314_v35, %v2318_v41  ;;  %v13663_v59 = vcombine.low %v2378_v11, %v2382_v44  ;;  %v2362_v2 = vld [vmem:[#allocation8 + $0x1840] sm:$0xff]  ;;  %v1639_v41 = vld [vmem:[#allocation8 + $0x1a8] sm:$0xff]  ;;  %v12929_v44 = vcombine.low %v1643_v54, %v1647_v27 }
 0x2d3   : > { %8663 = vmatprep.subr.bf16.mxu0 %v13632_v4  ;;  %8688 = vmatprep.subr.bf16.mxu1 %v13696_v60  ;;  %v13592_v4 = vcombine.high %v2306_v20, %v2310_v53  ;;  %v13656_v60 = vcombine.high %v2370_v36, %v2374_v55  ;;  %v2366_v3 = vld [vmem:[#allocation8 + $0x1860] sm:$0xff] }
 0x2d4   : > { %v13648_v57 = vcombine.high %v2362_v2, %v2366_v3  ;;  %v2294_v16 = vld [vmem:[#allocation8 + $0x1620] sm:$0xff] }
 0x2d5   : > { %8639 = vmatmul.mubr.bf16.vlgmr.msra.gmra.mxu1 %v15927_v9  ;;  %v15934_v21 = vpop.f32.mrf.mxu1  ;;  %v2354_v17 = vld [vmem:[#allocation8 + $0x1800] sm:$0xff] }
 0x2d6   : > { %8664 = vmatpush2.bf16.msra.mxu0 %v13631_v5  ;;  %8689 = vmatpush1.bf16.msra.mxu1 %v13695_v6  ;;  %v13591_v5 = vcombine.low %v2306_v20, %v2310_v53  ;;  %v13655_v6 = vcombine.low %v2370_v36, %v2374_v55  ;;  %v2358_v18 = vld [vmem:[#allocation8 + $0x1820] sm:$0xff]  ;;  %v1627_v53 = vld [vmem:[#allocation8 + $0x148] sm:$0xff] }
 0x2d7   : > { %8720 = vmatprep.mubr.bf16.mxu1 %v15931_v19  ;;  %8665 = vmatprep.subr.bf16.mxu0 %v13624_v10  ;;  %v15937_v25 = vpop.f32.mrf.mxu1  ;;  %v13584_v10 = vcombine.high %v2298_v39, %v2302_v1  ;;  %v2474_v24 = vld [vmem:[#allocation8 + $0x1bc0] sm:$0xff]  ;;  %v1631_v36 = vld [vmem:[#allocation8 + $0x168] sm:$0xff] }
 0x2d8   : > { %8690 = vmatprep.subr.bf16.mxu1 %v13688_v15  ;;  %v2290_v15 = vld [vmem:[#allocation8 + $0x1600] sm:$0xff] }
 0x2d9   : > { %v3959_v32 = vpop.f32.mrf.mxu1  ;;  %v2478_v26 = vld [vmem:[#allocation8 + $0x1be0] sm:$0xff] }
 0x2da   : > { %8666 = vmatpush2.bf16.msra.mxu0 %v13623_v29  ;;  %8691 = vmatpush1.bf16.msra.mxu1 %v13687_v22  ;;  %v13583_v29 = vcombine.low %v2298_v39, %v2302_v1  ;;  %v13647_v22 = vcombine.low %v2362_v2, %v2366_v3  ;;  %v13575_v32 = vcombine.low %v2290_v15, %v2294_v16  ;;  %v2470_v35 = vld [vmem:[#allocation8 + $0x1ba0] sm:$0xff] }
 0x2db   : > { %8667 = vmatprep.subr.bf16.mxu0 %v13616_v43  ;;  %8692 = vmatprep.subr.bf16.mxu1 %v13680_v23  ;;  %v3960_v38 = vpop.f32.mrf.mxu1  ;;  %v13576_v43 = vcombine.high %v2290_v15, %v2294_v16  ;;  %v13640_v23 = vcombine.high %v2354_v17, %v2358_v18  ;;  %v13759_v11 = vcombine.low %v2474_v24, %v2478_v26  ;;  %v2462_v20 = vld [vmem:[#allocation8 + $0x1b60] sm:$0xff] }
 0x2dc   : > { %v1635_v38 = vld [vmem:[#allocation8 + $0x188] sm:$0xff]  ;;  %v12914_v39 = vcombine.high %v1627_v53, %v1631_v36  ;;  %v2450_v1 = vld [vmem:[#allocation8 + $0x1b00] sm:$0xff] }
 0x2dd   : > { %v2454_v3 = vld [vmem:[#allocation8 + $0x1b20] sm:$0xff] }
 0x2de   : > { %8668 = vmatpush2.bf16.msra.mxu0 %v13615_v0  ;;  %8693 = vmatpush1.bf16.msra.mxu1 %v13679_v34  ;;  %v13639_v0 = vcombine.low %v2354_v17, %v2358_v18  ;;  %v13760_v34 = vcombine.high %v2474_v24, %v2478_v26  ;;  %v13736_v16 = vcombine.high %v2450_v1, %v2454_v3  ;;  %v2442_v18 = vld [vmem:[#allocation8 + $0x1ac0] sm:$0xff] }
 0x2df   : > { %8669 = vmatprep.subr.bf16.mxu0 %v13608_v48  ;;  %8694 = vmatprep.subr.bf16.mxu1 %v13672_v61  ;;  %v12930_v48 = vcombine.high %v1643_v54, %v1647_v27  ;;  %v2466_v61 = vld [vmem:[#allocation8 + $0x1b80] sm:$0xff] }
 0x2e0   : > { %v2434_v54 = vld [vmem:[#allocation8 + $0x1a80] sm:$0xff] }
 0x2e1   : > { %v2438_v27 = vld [vmem:[#allocation8 + $0x1aa0] sm:$0xff] }
 0x2e2   : > { %8670 = vmatpush2.bf16.msra.mxu0 %v13607_v45  ;;  %8695 = vmatpush1.bf16.msra.mxu1 %v13671_v46  ;;  %v15941_v45 = vpack.c.bf16 %v15850_v30, %v15850_v30  ;;  %v13752_v46 = vcombine.high %v2466_v61, %v2470_v35 }
 0x2e3   : > { %8671 = vmatprep.subr.bf16.mxu0 %v13600_v47  ;;  %8696 = vmatprep.subr.bf16.mxu1 %v13664_v52  ;;  %v2458_v47 = vld [vmem:[#allocation8 + $0x1b40] sm:$0xff]  ;;  %v12922_v52 = vcombine.high %v1635_v38, %v1639_v41 }
 0x2e6   : > { %8672 = vmatpush2.bf16.msra.mxu0 %v13599_v56  ;;  %8697 = vmatpush1.bf16.msra.mxu1 %v13663_v59  ;;  %v13751_v59 = vcombine.low %v2466_v61, %v2470_v35  ;;  %v13720_v61 = vcombine.high %v2434_v54, %v2438_v27 }
 0x2e7   : > { %8673 = vmatprep.subr.bf16.mxu0 %v13592_v4  ;;  %8698 = vmatprep.subr.bf16.mxu1 %v13656_v60  ;;  %v12921_v4 = vcombine.low %v1635_v38, %v1639_v41  ;;  %v13744_v60 = vcombine.high %v2458_v47, %v2462_v20  ;;  %v2426_v38 = vld [vmem:[#allocation8 + $0x1a40] sm:$0xff] }
 0x2e8   : > { %v2430_v41 = vld [vmem:[#allocation8 + $0x1a60] sm:$0xff] }
 0x2ea   : > { %8674 = vmatpush2.bf16.msra.mxu0 %v13591_v5  ;;  %8699 = vmatpush1.bf16.msra.mxu1 %v13655_v6  ;;  %v1619_v5 = vld [vmem:[#allocation8 + $0x108] sm:$0xff] }
 0x2eb   : > { %8675 = vmatprep.subr.bf16.mxu0 %v13584_v10  ;;  %8700 = vmatprep.subr.bf16.mxu1 %v13648_v57  ;;  %v1623_v6 = vld [vmem:[#allocation8 + $0x128] sm:$0xff]  ;;  %v13743_v10 = vcombine.low %v2458_v47, %v2462_v20  ;;  %v12913_v57 = vcombine.low %v1627_v53, %v1631_v36  ;;  %v2418_v53 = vld [vmem:[#allocation8 + $0x1a00] sm:$0xff] }
 0x2ec   : > { %v12906_v17 = vcombine.high %v1619_v5, %v1623_v6  ;;  %v2422_v36 = vld [vmem:[#allocation8 + $0x1a20] sm:$0xff] }
 0x2ee   : > { %8676 = vmatpush2.bf16.msra.mxu0 %v13583_v29  ;;  %8701 = vmatpush1.bf16.msra.mxu1 %v13647_v22  ;;  %v2446_v29 = vld [vmem:[#allocation8 + $0x1ae0] sm:$0xff]  ;;  %v1611_v22 = vld [vmem:[#allocation8 + $0xc8] sm:$0xff] }
 0x2ef   : > { %8677 = vmatprep.subr.bf16.mxu0 %v13576_v43  ;;  %8702 = vmatprep.subr.bf16.mxu1 %v13640_v23  ;;  %v1615_v43 = vld [vmem:[#allocation8 + $0xe8] sm:$0xff]  ;;  %v12905_v23 = vcombine.low %v1619_v5, %v1623_v6  ;;  %v13728_v24 = vcombine.high %v2442_v18, %v2446_v29 }
 0x2f0   : > { %v12898_v26 = vcombine.high %v1611_v22, %v1615_v43  ;;  %v1771_v5 = vld [vmem:[#allocation8 + $0x5c8] sm:$0xff] }
 0x2f1   : > { %v1775_v6 = vld [vmem:[#allocation8 + $0x5e8] sm:$0xff] }
 0x2f2   : > { %8678 = vmatpush2.bf16.msra.mxu0 %v13575_v32  ;;  %8703 = vmatpush1.bf16.msra.mxu1 %v13639_v0  ;;  %v1603_v32 = vld [vmem:[#allocation8 + $0x88] sm:$0xff] }
 0x2f3   : > { %8704 = vmatprep.subr.bf16.mxu1 %v13760_v34  ;;  %8729 = vmatprep.subr.bf16.mxu0 %v12930_v48  ;;  %v1607_v0 = vld [vmem:[#allocation8 + $0xa8] sm:$0xff]  ;;  %v13727_v34 = vcombine.low %v2442_v18, %v2446_v29  ;;  %v12897_v48 = vcombine.low %v1611_v22, %v1615_v43  ;;  %v13057_v43 = vcombine.low %v1771_v5, %v1775_v6 }
 0x2f4   : > { %v12890_v35 = vcombine.high %v1603_v32, %v1607_v0  ;;  %v12889_v47 = vcombine.low %v1603_v32, %v1607_v0  ;;  %v1763_v18 = vld [vmem:[#allocation8 + $0x588] sm:$0xff] }
 0x2f5   : > { %v3914_v55 = vpop.f32.mrf.mxu0  ;;  %8680 = vmatmul.mubr.bf16.vlgmr.msra.gmra.mxu0 %v15941_v45  ;;  %v1767_v29 = vld [vmem:[#allocation8 + $0x5a8] sm:$0xff] }
 0x2f6   : > { %v15945_v56 = vadd.f32 %v15934_v21, %v3914_v55  ;;  %8705 = vmatpush2.bf16.msra.mxu1 %v13759_v11  ;;  %8730 = vmatpush1.bf16.msra.mxu0 %v12929_v44  ;;  %v1595_v11 = vld [vmem:[#allocation8 + $0x48] sm:$0xff] }
 0x2f7   : > { %8761 = vmatprep.mubr.bf16.mxu0 %v15845_v28  ;;  %v3916_v30 = vpop.f32.mrf.mxu0  ;;  %8706 = vmatprep.subr.bf16.mxu1 %v13752_v46  ;;  %v1599_v44 = vld [vmem:[#allocation8 + $0x68] sm:$0xff]  ;;  %v13719_v46 = vcombine.low %v2434_v54, %v2438_v27 }
 0x2f8   : > { %v15949_v2 = vadd.f32 %v15937_v25, %v3916_v30  ;;  %8731 = vmatprep.subr.bf16.mxu0 %v12922_v52  ;;  %v13735_v25 = vcombine.low %v2450_v1, %v2454_v3  ;;  %v13712_v52 = vcombine.high %v2426_v38, %v2430_v41  ;;  %v12882_v20 = vcombine.high %v1595_v11, %v1599_v44  ;;  %v1587_v55 = vld [vmem:[#allocation8 + $0x8] sm:$0xff] }
 0x2f9   : > { %v3918_v21 = vpop.f32.mrf.mxu0  ;;  %v12881_v30 = vcombine.low %v1595_v11, %v1599_v44  ;;  %v1707_v1 = vld [vmem:[#allocation8 + $0x3c8] sm:$0xff] }
 0x2fa   : > { %8707 = vmatpush2.bf16.msra.mxu1 %v13751_v59  ;;  %8732 = vmatpush1.bf16.msra.mxu0 %v12921_v4  ;;  %v1591_v59 = vld [vmem:[#allocation8 + $0x28] sm:$0xff]  ;;  %v13711_v4 = vcombine.low %v2426_v38, %v2430_v41  ;;  %v13703_v21 = vcombine.low %v2418_v53, %v2422_v36 }
 0x2fb   : > { %v3919_v15 = vpop.f32.mrf.mxu0  ;;  %8708 = vmatprep.subr.bf16.mxu1 %v13744_v60  ;;  %8733 = vmatprep.subr.bf16.mxu0 %v12914_v39  ;;  %v13704_v60 = vcombine.high %v2418_v53, %v2422_v36  ;;  %v12874_v39 = vcombine.high %v1587_v55, %v1591_v59  ;;  %v1711_v3 = vld [vmem:[#allocation8 + $0x3e8] sm:$0xff] }
 0x2fc   : > { %v13058_v15 = vcombine.high %v1771_v5, %v1775_v6  ;;  %v12993_v22 = vcombine.low %v1707_v1, %v1711_v3  ;;  %v1695_v54 = vld [vmem:[#allocation8 + $0x368] sm:$0xff] }
 0x2fd   : > { %v1755_v27 = vld [vmem:[#allocation8 + $0x548] sm:$0xff] }
 0x2fe   : > { %8709 = vmatpush2.bf16.msra.mxu1 %v13743_v10  ;;  %8734 = vmatpush1.bf16.msra.mxu0 %v12913_v57  ;;  %v12873_v10 = vcombine.low %v1587_v55, %v1591_v59  ;;  %v12994_v57 = vcombine.high %v1707_v1, %v1711_v3  ;;  %v1759_v32 = vld [vmem:[#allocation8 + $0x568] sm:$0xff] }
 0x2ff   : > { %8710 = vmatprep.subr.bf16.mxu1 %v13736_v16  ;;  %8735 = vmatprep.subr.bf16.mxu0 %v12906_v17  ;;  %v1699_v16 = vld [vmem:[#allocation8 + $0x388] sm:$0xff]  ;;  %v13042_v38 = vcombine.high %v1755_v27, %v1759_v32 }
 0x300   : > { %v1703_v17 = vld [vmem:[#allocation8 + $0x3a8] sm:$0xff] }
 0x301   : > { %v1683_v41 = vld [vmem:[#allocation8 + $0x308] sm:$0xff] }
 0x302   : > { %8711 = vmatpush2.bf16.msra.mxu1 %v13735_v25  ;;  %8736 = vmatpush1.bf16.msra.mxu0 %v12905_v23  ;;  %v15953_v25 = vpack.c.bf16 %v15861_v51, %v15861_v51  ;;  %v12986_v23 = vcombine.high %v1699_v16, %v1703_v17  ;;  %v1687_v44 = vld [vmem:[#allocation8 + $0x328] sm:$0xff] }
 0x303   : > { %8712 = vmatprep.subr.bf16.mxu1 %v13728_v24  ;;  %8737 = vmatprep.subr.bf16.mxu0 %v12898_v26  ;;  %v1691_v24 = vld [vmem:[#allocation8 + $0x348] sm:$0xff]  ;;  %v13050_v26 = vcombine.high %v1763_v18, %v1767_v29  ;;  %v12970_v36 = vcombine.high %v1683_v41, %v1687_v44 }
 0x304   : > { %v1675_v59 = vld [vmem:[#allocation8 + $0x2c8] sm:$0xff] }
 0x305   : > { %v1667_v5 = vld [vmem:[#allocation8 + $0x288] sm:$0xff] }
 0x306   : > { %8713 = vmatpush2.bf16.msra.mxu1 %v13727_v34  ;;  %8738 = vmatpush1.bf16.msra.mxu0 %v12897_v48  ;;  %v12985_v48 = vcombine.low %v1699_v16, %v1703_v17  ;;  %v1671_v6 = vld [vmem:[#allocation8 + $0x2a8] sm:$0xff] }
 0x307   : > { %8714 = vmatprep.subr.bf16.mxu1 %v13720_v61  ;;  %8739 = vmatprep.subr.bf16.mxu0 %v12890_v35  ;;  %v13049_v61 = vcombine.low %v1763_v18, %v1767_v29  ;;  %v12978_v35 = vcombine.high %v1691_v24, %v1695_v54  ;;  %v12954_v16 = vcombine.high %v1667_v5, %v1671_v6  ;;  %v1659_v18 = vld [vmem:[#allocation8 + $0x248] sm:$0xff] }
 0x308   : > { %v1663_v29 = vld [vmem:[#allocation8 + $0x268] sm:$0xff] }
 0x30a   : > { %8715 = vmatpush2.bf16.msra.mxu1 %v13719_v46  ;;  %8740 = vmatpush1.bf16.msra.mxu0 %v12889_v47  ;;  %v1747_v46 = vld [vmem:[#allocation8 + $0x508] sm:$0xff] }
 0x30b   : > { %8716 = vmatprep.subr.bf16.mxu1 %v13712_v52  ;;  %8741 = vmatprep.subr.bf16.mxu0 %v12882_v20  ;;  %v1751_v47 = vld [vmem:[#allocation8 + $0x528] sm:$0xff]  ;;  %v12977_v52 = vcombine.low %v1691_v24, %v1695_v54  ;;  %v13041_v20 = vcombine.low %v1755_v27, %v1759_v32 }
 0x30c   : > { %v13034_v55 = vcombine.high %v1747_v46, %v1751_v47  ;;  %v1651_v27 = vld [vmem:[#allocation8 + $0x208] sm:$0xff] }
 0x30d   : > { %v1655_v32 = vld [vmem:[#allocation8 + $0x228] sm:$0xff] }
 0x30e   : > { %8717 = vmatpush2.bf16.msra.mxu1 %v13711_v4  ;;  %8742 = vmatpush1.bf16.msra.mxu0 %v12881_v30  ;;  %v1679_v4 = vld [vmem:[#allocation8 + $0x2e8] sm:$0xff] }
 0x30f   : > { %8718 = vmatprep.subr.bf16.mxu1 %v13704_v60  ;;  %8743 = vmatprep.subr.bf16.mxu0 %v12874_v39  ;;  %v1739_v30 = vld [vmem:[#allocation8 + $0x4c8] sm:$0xff]  ;;  %v13033_v39 = vcombine.low %v1747_v46, %v1751_v47  ;;  %v12962_v1 = vcombine.high %v1675_v59, %v1679_v4 }
 0x310   : > { %v1743_v60 = vld [vmem:[#allocation8 + $0x4e8] sm:$0xff] }
 0x311   : > { %v13026_v3 = vcombine.high %v1739_v30, %v1743_v60  ;;  %v1899_v46 = vld [vmem:[#allocation8 + $0x9c8] sm:$0xff] }
 0x312   : > { %8719 = vmatpush2.bf16.msra.mxu1 %v13703_v21  ;;  %8744 = vmatpush1.bf16.msra.mxu0 %v12873_v10  ;;  %v1731_v21 = vld [vmem:[#allocation8 + $0x488] sm:$0xff] }
 0x313   : > { %8745 = vmatprep.subr.bf16.mxu0 %v12994_v57  ;;  %8770 = vmatprep.subr.bf16.mxu1 %v13058_v15  ;;  %v1735_v10 = vld [vmem:[#allocation8 + $0x4a8] sm:$0xff]  ;;  %v12961_v57 = vcombine.low %v1675_v59, %v1679_v4  ;;  %v13025_v15 = vcombine.low %v1739_v30, %v1743_v60 }
 0x314   : > { %v13018_v17 = vcombine.high %v1731_v21, %v1735_v10  ;;  %v13017_v24 = vcombine.low %v1731_v21, %v1735_v10  ;;  %v1903_v47 = vld [vmem:[#allocation8 + $0x9e8] sm:$0xff] }
 0x315   : > { %v8476_v0 = vpop.f32.mrf.mxu1  ;;  %8721 = vmatmul.mubr.bf16.vlgmr.msra.gmra.mxu1 %v15953_v25  ;;  %v1891_v59 = vld [vmem:[#allocation8 + $0x988] sm:$0xff]  ;;  %v13185_v60 = vcombine.low %v1899_v46, %v1903_v47 }
 0x316   : > { %v15957_v34 = vadd.f32 %v8476_v0, %v15876_v13  ;;  %8746 = vmatpush2.bf16.msra.mxu0 %v12993_v22  ;;  %8771 = vmatpush1.bf16.msra.mxu1 %v13057_v43  ;;  %v1723_v22 = vld [vmem:[#allocation8 + $0x448] sm:$0xff] }
 0x317   : > { %8802 = vmatprep.mubr.bf16.mxu1 %v15859_v49  ;;  %v8478_v51 = vpop.f32.mrf.mxu1  ;;  %8747 = vmatprep.subr.bf16.mxu0 %v12986_v23  ;;  %v1727_v43 = vld [vmem:[#allocation8 + $0x468] sm:$0xff]  ;;  %v12953_v23 = vcombine.low %v1667_v5, %v1671_v6 }
 0x318   : > { %v15961_v11 = vadd.f32 %v8478_v51, %v15879_v14  ;;  %8772 = vmatprep.subr.bf16.mxu1 %v13050_v26  ;;  %v12969_v14 = vcombine.low %v1683_v41, %v1687_v44  ;;  %v12946_v26 = vcombine.high %v1659_v18, %v1663_v29  ;;  %v13010_v54 = vcombine.high %v1723_v22, %v1727_v43  ;;  %v1715_v0 = vld [vmem:[#allocation8 + $0x408] sm:$0xff] }
 0x319   : > { %v8480_v13 = vpop.f32.mrf.mxu1  ;;  %v13009_v51 = vcombine.low %v1723_v22, %v1727_v43  ;;  %v1835_v41 = vld [vmem:[#allocation8 + $0x7c8] sm:$0xff] }
 0x31a   : > { %8748 = vmatpush2.bf16.msra.mxu0 %v12985_v48  ;;  %8773 = vmatpush1.bf16.msra.mxu1 %v13049_v61  ;;  %v1719_v48 = vld [vmem:[#allocation8 + $0x428] sm:$0xff]  ;;  %v12945_v61 = vcombine.low %v1659_v18, %v1663_v29  ;;  %v12937_v13 = vcombine.low %v1651_v27, %v1655_v32 }
 0x31b   : > { %v8481_v53 = vpop.f32.mrf.mxu1  ;;  %8749 = vmatprep.subr.bf16.mxu0 %v12978_v35  ;;  %8774 = vmatprep.subr.bf16.mxu1 %v13042_v38  ;;  %v12938_v35 = vcombine.high %v1651_v27, %v1655_v32  ;;  %v13002_v38 = vcombine.high %v1715_v0, %v1719_v48  ;;  %v1839_v44 = vld [vmem:[#allocation8 + $0x7e8] sm:$0xff] }
 0x31c   : > { %v13186_v53 = vcombine.high %v1899_v46, %v1903_v47  ;;  %v1895_v4 = vld [vmem:[#allocation8 + $0x9a8] sm:$0xff]  ;;  %v13121_v30 = vcombine.low %v1835_v41, %v1839_v44 }
 0x31d   : > { %v1883_v5 = vld [vmem:[#allocation8 + $0x948] sm:$0xff] }
 0x31e   : > { %8750 = vmatpush2.bf16.msra.mxu0 %v12977_v52  ;;  %8775 = vmatpush1.bf16.msra.mxu1 %v13041_v20  ;;  %v13001_v52 = vcombine.low %v1715_v0, %v1719_v48  ;;  %v13122_v20 = vcombine.high %v1835_v41, %v1839_v44  ;;  %v1887_v6 = vld [vmem:[#allocation8 + $0x968] sm:$0xff] }
 0x31f   : > { %8751 = vmatprep.subr.bf16.mxu0 %v12970_v36  ;;  %8776 = vmatprep.subr.bf16.mxu1 %v13034_v55  ;;  %v1827_v36 = vld [vmem:[#allocation8 + $0x788] sm:$0xff]  ;;  %v13170_v18 = vcombine.high %v1883_v5, %v1887_v6 }
 0x320   : > { %v1831_v55 = vld [vmem:[#allocation8 + $0x7a8] sm:$0xff] }
 0x321   : > { %v1811_v29 = vld [vmem:[#allocation8 + $0x708] sm:$0xff] }
 0x322   : > { %8752 = vmatpush2.bf16.msra.mxu0 %v12969_v14  ;;  %8777 = vmatpush1.bf16.msra.mxu1 %v13033_v39  ;;  %v13114_v14 = vcombine.high %v1827_v36, %v1831_v55  ;;  %v1819_v39 = vld [vmem:[#allocation8 + $0x748] sm:$0xff] }
 0x323   : > { %8753 = vmatprep.subr.bf16.mxu0 %v12962_v1  ;;  %8778 = vmatprep.subr.bf16.mxu1 %v13026_v3  ;;  %v13178_v1 = vcombine.high %v1891_v59, %v1895_v4  ;;  %v1823_v3 = vld [vmem:[#allocation8 + $0x768] sm:$0xff] }
 0x324   : > { %v1815_v43 = vld [vmem:[#allocation8 + $0x728] sm:$0xff] }
 0x325   : > { %v13098_v32 = vcombine.high %v1811_v29, %v1815_v43  ;;  %v1803_v48 = vld [vmem:[#allocation8 + $0x6c8] sm:$0xff] }
 0x326   : > { %8754 = vmatpush2.bf16.msra.mxu0 %v12961_v57  ;;  %8779 = vmatpush1.bf16.msra.mxu1 %v13025_v15  ;;  %v13113_v57 = vcombine.low %v1827_v36, %v1831_v55  ;;  %v13177_v15 = vcombine.low %v1891_v59, %v1895_v4  ;;  %v1795_v46 = vld [vmem:[#allocation8 + $0x688] sm:$0xff] }
 0x327   : > { %8755 = vmatprep.subr.bf16.mxu0 %v12954_v16  ;;  %8780 = vmatprep.subr.bf16.mxu1 %v13018_v17  ;;  %v13106_v17 = vcombine.high %v1819_v39, %v1823_v3  ;;  %v1799_v47 = vld [vmem:[#allocation8 + $0x6a8] sm:$0xff] }
 0x328   : > { %v13082_v36 = vcombine.high %v1795_v46, %v1799_v47  ;;  %v1787_v59 = vld [vmem:[#allocation8 + $0x648] sm:$0xff] }
 0x329   : > { %v1791_v4 = vld [vmem:[#allocation8 + $0x668] sm:$0xff] }
 0x32a   : > { %8756 = vmatpush2.bf16.msra.mxu0 %v12953_v23  ;;  %8781 = vmatpush1.bf16.msra.mxu1 %v13017_v24  ;;  %v1875_v23 = vld [vmem:[#allocation8 + $0x908] sm:$0xff] }
 0x32b   : > { %8757 = vmatprep.subr.bf16.mxu0 %v12946_v26  ;;  %8782 = vmatprep.subr.bf16.mxu1 %v13010_v54  ;;  %v1879_v24 = vld [vmem:[#allocation8 + $0x928] sm:$0xff]  ;;  %v13105_v26 = vcombine.low %v1819_v39, %v1823_v3  ;;  %v13169_v54 = vcombine.low %v1883_v5, %v1887_v6 }
 0x32c   : > { %v13162_v0 = vcombine.high %v1875_v23, %v1879_v24  ;;  %v1779_v5 = vld [vmem:[#allocation8 + $0x608] sm:$0xff] }
 0x32d   : > { %v1783_v6 = vld [vmem:[#allocation8 + $0x628] sm:$0xff] }
 0x32e   : > { %8758 = vmatpush2.bf16.msra.mxu0 %v12945_v61  ;;  %8783 = vmatpush1.bf16.msra.mxu1 %v13009_v51  ;;  %v1807_v61 = vld [vmem:[#allocation8 + $0x6e8] sm:$0xff] }
 0x32f   : > { %8759 = vmatprep.subr.bf16.mxu0 %v12938_v35  ;;  %8784 = vmatprep.subr.bf16.mxu1 %v13002_v38  ;;  %v1867_v51 = vld [vmem:[#allocation8 + $0x8c8] sm:$0xff]  ;;  %v13161_v38 = vcombine.low %v1875_v23, %v1879_v24  ;;  %v13090_v41 = vcombine.high %v1803_v48, %v1807_v61 }
 0x330   : > { %v1871_v35 = vld [vmem:[#allocation8 + $0x8e8] sm:$0xff] }
 0x331   : > { %v13154_v44 = vcombine.high %v1867_v51, %v1871_v35  ;;  %v2027_v23 = vld [vmem:[#allocation8 + $0xdc8] sm:$0xff] }
 0x332   : > { %8760 = vmatpush2.bf16.msra.mxu0 %v12937_v13  ;;  %8785 = vmatpush1.bf16.msra.mxu1 %v13001_v52  ;;  %v1859_v13 = vld [vmem:[#allocation8 + $0x888] sm:$0xff] }
 0x333   : > { %8786 = vmatprep.subr.bf16.mxu1 %v13122_v20  ;;  %8811 = vmatprep.subr.bf16.mxu0 %v13186_v53  ;;  %v1863_v52 = vld [vmem:[#allocation8 + $0x8a8] sm:$0xff]  ;;  %v13089_v20 = vcombine.low %v1803_v48, %v1807_v61  ;;  %v13153_v53 = vcombine.low %v1867_v51, %v1871_v35 }
 0x334   : > { %v13146_v55 = vcombine.high %v1859_v13, %v1863_v52  ;;  %v13145_v39 = vcombine.low %v1859_v13, %v1863_v52  ;;  %v2031_v24 = vld [vmem:[#allocation8 + $0xde8] sm:$0xff] }
 0x335   : > { %v8517_v21 = vpop.f32.mrf.mxu0  ;;  %8762 = vmatmul.mubr.bf16.vlgmr.msra.gmra.mxu0 %v15869_v63  ;;  %v2019_v48 = vld [vmem:[#allocation8 + $0xd88] sm:$0xff]  ;;  %v13313_v35 = vcombine.low %v2027_v23, %v2031_v24 }
 0x336   : > { %v15965_v10 = vadd.f32 %v8517_v21, %v15957_v34  ;;  %8787 = vmatpush2.bf16.msra.mxu1 %v13121_v30  ;;  %8812 = vmatpush1.bf16.msra.mxu0 %v13185_v60  ;;  %v1851_v30 = vld [vmem:[#allocation8 + $0x848] sm:$0xff] }
 0x337   : > { %8843 = vmatprep.mubr.bf16.mxu0 %v15873_v8  ;;  %v8519_v16 = vpop.f32.mrf.mxu0  ;;  %8788 = vmatprep.subr.bf16.mxu1 %v13114_v14  ;;  %v1855_v60 = vld [vmem:[#allocation8 + $0x868] sm:$0xff]  ;;  %v13081_v14 = vcombine.low %v1795_v46, %v1799_v47 }
 0x338   : > { %v15969_v22 = vadd.f32 %v8519_v16, %v15961_v11  ;;  %8813 = vmatprep.subr.bf16.mxu0 %v13178_v1  ;;  %v13097_v11 = vcombine.low %v1811_v29, %v1815_v43  ;;  %v13074_v1 = vcombine.high %v1787_v59, %v1791_v4  ;;  %v13138_v3 = vcombine.high %v1851_v30, %v1855_v60  ;;  %v1843_v21 = vld [vmem:[#allocation8 + $0x808] sm:$0xff] }
 0x339   : > { %v8521_v34 = vpop.f32.mrf.mxu0  ;;  %v13137_v16 = vcombine.low %v1851_v30, %v1855_v60  ;;  %v1963_v29 = vld [vmem:[#allocation8 + $0xbc8] sm:$0xff] }
 0x33a   : > { %8789 = vmatpush2.bf16.msra.mxu1 %v13113_v57  ;;  %8814 = vmatpush1.bf16.msra.mxu0 %v13177_v15  ;;  %v1847_v57 = vld [vmem:[#allocation8 + $0x828] sm:$0xff]  ;;  %v13073_v15 = vcombine.low %v1787_v59, %v1791_v4  ;;  %v13065_v34 = vcombine.low %v1779_v5, %v1783_v6 }
 0x33b   : > { %v8522_v27 = vpop.f32.mrf.mxu0  ;;  %8790 = vmatprep.subr.bf16.mxu1 %v13106_v17  ;;  %8815 = vmatprep.subr.bf16.mxu0 %v13170_v18  ;;  %v13066_v17 = vcombine.high %v1779_v5, %v1783_v6  ;;  %v13130_v18 = vcombine.high %v1843_v21, %v1847_v57  ;;  %v1967_v43 = vld [vmem:[#allocation8 + $0xbe8] sm:$0xff] }
 0x33c   : > { %v13314_v27 = vcombine.high %v2027_v23, %v2031_v24  ;;  %v2023_v61 = vld [vmem:[#allocation8 + $0xda8] sm:$0xff]  ;;  %v13249_v51 = vcombine.low %v1963_v29, %v1967_v43 }
 0x33d   : > { %v2011_v46 = vld [vmem:[#allocation8 + $0xd48] sm:$0xff] }
 0x33e   : > { %8791 = vmatpush2.bf16.msra.mxu1 %v13105_v26  ;;  %8816 = vmatpush1.bf16.msra.mxu0 %v13169_v54  ;;  %v13129_v26 = vcombine.low %v1843_v21, %v1847_v57  ;;  %v13250_v54 = vcombine.high %v1963_v29, %v1967_v43  ;;  %v2015_v47 = vld [vmem:[#allocation8 + $0xd68] sm:$0xff] }
 0x33f   : > { %8792 = vmatprep.subr.bf16.mxu1 %v13098_v32  ;;  %8817 = vmatprep.subr.bf16.mxu0 %v13162_v0  ;;  %v1955_v32 = vld [vmem:[#allocation8 + $0xb88] sm:$0xff]  ;;  %v13298_v59 = vcombine.high %v2011_v46, %v2015_v47 }
 0x340   : > { %v1959_v0 = vld [vmem:[#allocation8 + $0xba8] sm:$0xff] }
 0x341   : > { %v1939_v4 = vld [vmem:[#allocation8 + $0xb08] sm:$0xff] }
 0x342   : > { %8793 = vmatpush2.bf16.msra.mxu1 %v13097_v11  ;;  %8818 = vmatpush1.bf16.msra.mxu0 %v13161_v38  ;;  %v13242_v11 = vcombine.high %v1955_v32, %v1959_v0  ;;  %v1947_v38 = vld [vmem:[#allocation8 + $0xb48] sm:$0xff] }
 0x343   : > { %8794 = vmatprep.subr.bf16.mxu1 %v13090_v41  ;;  %8819 = vmatprep.subr.bf16.mxu0 %v13154_v44  ;;  %v13306_v41 = vcombine.high %v2019_v48, %v2023_v61  ;;  %v1951_v44 = vld [vmem:[#allocation8 + $0xb68] sm:$0xff] }
 0x344   : > { %v1943_v60 = vld [vmem:[#allocation8 + $0xb28] sm:$0xff] }
 0x345   : > { %v13226_v6 = vcombine.high %v1939_v4, %v1943_v60  ;;  %v1931_v57 = vld [vmem:[#allocation8 + $0xac8] sm:$0xff] }
 0x346   : > { %8795 = vmatpush2.bf16.msra.mxu1 %v13089_v20  ;;  %8820 = vmatpush1.bf16.msra.mxu0 %v13153_v53  ;;  %v13241_v20 = vcombine.low %v1955_v32, %v1959_v0  ;;  %v13305_v53 = vcombine.low %v2019_v48, %v2023_v61  ;;  %v1923_v23 = vld [vmem:[#allocation8 + $0xa88] sm:$0xff] }
 0x347   : > { %8796 = vmatprep.subr.bf16.mxu1 %v13082_v36  ;;  %8821 = vmatprep.subr.bf16.mxu0 %v13146_v55  ;;  %v13234_v55 = vcombine.high %v1947_v38, %v1951_v44  ;;  %v1927_v24 = vld [vmem:[#allocation8 + $0xaa8] sm:$0xff] }
 0x348   : > { %v13210_v32 = vcombine.high %v1923_v23, %v1927_v24  ;;  %v1915_v48 = vld [vmem:[#allocation8 + $0xa48] sm:$0xff] }
 0x349   : > { %v1919_v61 = vld [vmem:[#allocation8 + $0xa68] sm:$0xff] }
 0x34a   : > { %8797 = vmatpush2.bf16.msra.mxu1 %v13081_v14  ;;  %8822 = vmatpush1.bf16.msra.mxu0 %v13145_v39  ;;  %v2003_v14 = vld [vmem:[#allocation8 + $0xd08] sm:$0xff] }
 0x34b   : > { %8798 = vmatprep.subr.bf16.mxu1 %v13074_v1  ;;  %8823 = vmatprep.subr.bf16.mxu0 %v13138_v3  ;;  %v2007_v39 = vld [vmem:[#allocation8 + $0xd28] sm:$0xff]  ;;  %v13233_v1 = vcombine.low %v1947_v38, %v1951_v44  ;;  %v13297_v3 = vcombine.low %v2011_v46, %v2015_v47 }
 0x34c   : > { %v13290_v21 = vcombine.high %v2003_v14, %v2007_v39  ;;  %v1907_v46 = vld [vmem:[#allocation8 + $0xa08] sm:$0xff] }
 0x34d   : > { %v1911_v47 = vld [vmem:[#allocation8 + $0xa28] sm:$0xff] }
 0x34e   : > { %8799 = vmatpush2.bf16.msra.mxu1 %v13073_v15  ;;  %8824 = vmatpush1.bf16.msra.mxu0 %v13137_v16  ;;  %v1935_v15 = vld [vmem:[#allocation8 + $0xae8] sm:$0xff] }
 0x34f   : > { %8800 = vmatprep.subr.bf16.mxu1 %v13066_v17  ;;  %8825 = vmatprep.subr.bf16.mxu0 %v13130_v18  ;;  %v1995_v16 = vld [vmem:[#allocation8 + $0xcc8] sm:$0xff]  ;;  %v13289_v18 = vcombine.low %v2003_v14, %v2007_v39  ;;  %v13218_v29 = vcombine.high %v1931_v57, %v1935_v15 }
 0x350   : > { %v1999_v17 = vld [vmem:[#allocation8 + $0xce8] sm:$0xff] }
 0x351   : > { %v13282_v43 = vcombine.high %v1995_v16, %v1999_v17  ;;  %v2155_v14 = vld [vmem:[#allocation8 + $0x11c8] sm:$0xff] }
 0x352   : > { %8801 = vmatpush2.bf16.msra.mxu1 %v13065_v34  ;;  %8826 = vmatpush1.bf16.msra.mxu0 %v13129_v26  ;;  %v1987_v34 = vld [vmem:[#allocation8 + $0xc88] sm:$0xff] }
 0x353   : > { %8827 = vmatprep.subr.bf16.mxu0 %v13250_v54  ;;  %8852 = vmatprep.subr.bf16.mxu1 %v13314_v27  ;;  %v1991_v26 = vld [vmem:[#allocation8 + $0xca8] sm:$0xff]  ;;  %v13217_v54 = vcombine.low %v1931_v57, %v1935_v15  ;;  %v13281_v27 = vcombine.low %v1995_v16, %v1999_v17 }
 0x354   : > { %v13274_v0 = vcombine.high %v1987_v34, %v1991_v26  ;;  %v13273_v38 = vcombine.low %v1987_v34, %v1991_v26  ;;  %v2159_v39 = vld [vmem:[#allocation8 + $0x11e8] sm:$0xff] }
 0x355   : > { %v8558_v13 = vpop.f32.mrf.mxu1  ;;  %8803 = vmatmul.mubr.bf16.vlgmr.msra.gmra.mxu1 %v15883_v50  ;;  %v2147_v57 = vld [vmem:[#allocation8 + $0x1188] sm:$0xff]  ;;  %v13441_v17 = vcombine.low %v2155_v14, %v2159_v39 }
 0x356   : > { %v15973_v52 = vadd.f32 %v8558_v13, %v15965_v10  ;;  %8828 = vmatpush2.bf16.msra.mxu0 %v13249_v51  ;;  %8853 = vmatpush1.bf16.msra.mxu1 %v13313_v35  ;;  %v1979_v51 = vld [vmem:[#allocation8 + $0xc48] sm:$0xff] }
 0x357   : > { %8884 = vmatprep.mubr.bf16.mxu1 %v15887_v42  ;;  %v8560_v36 = vpop.f32.mrf.mxu1  ;;  %8829 = vmatprep.subr.bf16.mxu0 %v13242_v11  ;;  %v1983_v35 = vld [vmem:[#allocation8 + $0xc68] sm:$0xff]  ;;  %v13209_v11 = vcombine.low %v1923_v23, %v1927_v24 }
 0x358   : > { %v15977_v30 = vadd.f32 %v8560_v36, %v15969_v22  ;;  %8854 = vmatprep.subr.bf16.mxu1 %v13306_v41  ;;  %v13225_v22 = vcombine.low %v1939_v4, %v1943_v60  ;;  %v13202_v41 = vcombine.high %v1915_v48, %v1919_v61  ;;  %v13266_v44 = vcombine.high %v1979_v51, %v1983_v35  ;;  %v1971_v13 = vld [vmem:[#allocation8 + $0xc08] sm:$0xff] }
 0x359   : > { %v8562_v10 = vpop.f32.mrf.mxu1  ;;  %v13265_v36 = vcombine.low %v1979_v51, %v1983_v35  ;;  %v2091_v4 = vld [vmem:[#allocation8 + $0xfc8] sm:$0xff] }
 0x35a   : > { %8830 = vmatpush2.bf16.msra.mxu0 %v13241_v20  ;;  %8855 = vmatpush1.bf16.msra.mxu1 %v13305_v53  ;;  %v1975_v20 = vld [vmem:[#allocation8 + $0xc28] sm:$0xff]  ;;  %v13201_v53 = vcombine.low %v1915_v48, %v1919_v61  ;;  %v13193_v10 = vcombine.low %v1907_v46, %v1911_v47 }
 0x35b   : > { %v8563_v5 = vpop.f32.mrf.mxu1  ;;  %8831 = vmatprep.subr.bf16.mxu0 %v13234_v55  ;;  %8856 = vmatprep.subr.bf16.mxu1 %v13298_v59  ;;  %v13194_v55 = vcombine.high %v1907_v46, %v1911_v47  ;;  %v13258_v59 = vcombine.high %v1971_v13, %v1975_v20  ;;  %v2095_v60 = vld [vmem:[#allocation8 + $0xfe8] sm:$0xff] }
 0x35c   : > { %v13442_v5 = vcombine.high %v2155_v14, %v2159_v39  ;;  %v2151_v15 = vld [vmem:[#allocation8 + $0x11a8] sm:$0xff]  ;;  %v13377_v16 = vcombine.low %v2091_v4, %v2095_v60 }
 0x35d   : > { %v2139_v23 = vld [vmem:[#allocation8 + $0x1148] sm:$0xff] }
 0x35e   : > { %8832 = vmatpush2.bf16.msra.mxu0 %v13233_v1  ;;  %8857 = vmatpush1.bf16.msra.mxu1 %v13297_v3  ;;  %v13257_v1 = vcombine.low %v1971_v13, %v1975_v20  ;;  %v13378_v3 = vcombine.high %v2091_v4, %v2095_v60  ;;  %v2143_v24 = vld [vmem:[#allocation8 + $0x1168] sm:$0xff] }
 0x35f   : > { %8833 = vmatprep.subr.bf16.mxu0 %v13226_v6  ;;  %8858 = vmatprep.subr.bf16.mxu1 %v13290_v21  ;;  %v2083_v6 = vld [vmem:[#allocation8 + $0xf88] sm:$0xff]  ;;  %v13426_v48 = vcombine.high %v2139_v23, %v2143_v24 }
 0x360   : > { %v2087_v21 = vld [vmem:[#allocation8 + $0xfa8] sm:$0xff] }
 0x361   : > { %v2067_v61 = vld [vmem:[#allocation8 + $0xf08] sm:$0xff] }
 0x362   : > { %8834 = vmatpush2.bf16.msra.mxu0 %v13225_v22  ;;  %8859 = vmatpush1.bf16.msra.mxu1 %v13289_v18  ;;  %v13370_v22 = vcombine.high %v2083_v6, %v2087_v21  ;;  %v2075_v18 = vld [vmem:[#allocation8 + $0xf48] sm:$0xff] }
 0x363   : > { %8835 = vmatprep.subr.bf16.mxu0 %v13218_v29  ;;  %8860 = vmatprep.subr.bf16.mxu1 %v13282_v43  ;;  %v13434_v29 = vcombine.high %v2147_v57, %v2151_v15  ;;  %v2079_v43 = vld [vmem:[#allocation8 + $0xf68] sm:$0xff] }
 0x364   : > { %v2071_v35 = vld [vmem:[#allocation8 + $0xf28] sm:$0xff] }
 0x365   : > { %v13354_v47 = vcombine.high %v2067_v61, %v2071_v35  ;;  %v2059_v20 = vld [vmem:[#allocation8 + $0xec8] sm:$0xff] }
 0x366   : > { %8836 = vmatpush2.bf16.msra.mxu0 %v13217_v54  ;;  %8861 = vmatpush1.bf16.msra.mxu1 %v13281_v27  ;;  %v13369_v54 = vcombine.low %v2083_v6, %v2087_v21  ;;  %v13433_v27 = vcombine.low %v2147_v57, %v2151_v15  ;;  %v2051_v14 = vld [vmem:[#allocation8 + $0xe88] sm:$0xff] }
 0x367   : > { %8837 = vmatprep.subr.bf16.mxu0 %v13210_v32  ;;  %8862 = vmatprep.subr.bf16.mxu1 %v13274_v0  ;;  %v13362_v0 = vcombine.high %v2075_v18, %v2079_v43  ;;  %v2055_v39 = vld [vmem:[#allocation8 + $0xea8] sm:$0xff] }
 0x368   : > { %v13338_v6 = vcombine.high %v2051_v14, %v2055_v39  ;;  %v2043_v57 = vld [vmem:[#allocation8 + $0xe48] sm:$0xff] }
 0x369   : > { %v2047_v15 = vld [vmem:[#allocation8 + $0xe68] sm:$0xff] }
 0x36a   : > { %8838 = vmatpush2.bf16.msra.mxu0 %v13209_v11  ;;  %8863 = vmatpush1.bf16.msra.mxu1 %v13273_v38  ;;  %v2131_v11 = vld [vmem:[#allocation8 + $0x1108] sm:$0xff] }
 0x36b   : > { %8839 = vmatprep.subr.bf16.mxu0 %v13202_v41  ;;  %8864 = vmatprep.subr.bf16.mxu1 %v13266_v44  ;;  %v2135_v38 = vld [vmem:[#allocation8 + $0x1128] sm:$0xff]  ;;  %v13361_v41 = vcombine.low %v2075_v18, %v2079_v43  ;;  %v13425_v44 = vcombine.low %v2139_v23, %v2143_v24 }
 0x36c   : > { %v13418_v13 = vcombine.high %v2131_v11, %v2135_v38  ;;  %v2035_v23 = vld [vmem:[#allocation8 + $0xe08] sm:$0xff] }
 0x36d   : > { %v2039_v24 = vld [vmem:[#allocation8 + $0xe28] sm:$0xff] }
 0x36e   : > { %8840 = vmatpush2.bf16.msra.mxu0 %v13201_v53  ;;  %8865 = vmatpush1.bf16.msra.mxu1 %v13265_v36  ;;  %v2063_v53 = vld [vmem:[#allocation8 + $0xee8] sm:$0xff] }
 0x36f   : > { %8841 = vmatprep.subr.bf16.mxu0 %v13194_v55  ;;  %8866 = vmatprep.subr.bf16.mxu1 %v13258_v59  ;;  %v2123_v36 = vld [vmem:[#allocation8 + $0x10c8] sm:$0xff]  ;;  %v13417_v59 = vcombine.low %v2131_v11, %v2135_v38  ;;  %v13346_v4 = vcombine.high %v2059_v20, %v2063_v53 }
 0x370   : > { %v2127_v55 = vld [vmem:[#allocation8 + $0x10e8] sm:$0xff] }
 0x371   : > { %v13410_v60 = vcombine.high %v2123_v36, %v2127_v55  ;;  %v2283_v11 = vld [vmem:[#allocation8 + $0x15c8] sm:$0xff] }
 0x372   : > { %8842 = vmatpush2.bf16.msra.mxu0 %v13193_v10  ;;  %8867 = vmatpush1.bf16.msra.mxu1 %v13257_v1  ;;  %v2115_v10 = vld [vmem:[#allocation8 + $0x1088] sm:$0xff] }
 0x373   : > { %8868 = vmatprep.subr.bf16.mxu1 %v13378_v3  ;;  %8893 = vmatprep.subr.bf16.mxu0 %v13442_v5  ;;  %v2119_v1 = vld [vmem:[#allocation8 + $0x10a8] sm:$0xff]  ;;  %v13345_v3 = vcombine.low %v2059_v20, %v2063_v53  ;;  %v13409_v5 = vcombine.low %v2123_v36, %v2127_v55 }
 0x374   : > { %v13402_v21 = vcombine.high %v2115_v10, %v2119_v1  ;;  %v13401_v18 = vcombine.low %v2115_v10, %v2119_v1  ;;  %v2287_v38 = vld [vmem:[#allocation8 + $0x15e8] sm:$0xff] }
 0x375   : > { %v8599_v34 = vpop.f32.mrf.mxu0  ;;  %8844 = vmatmul.mubr.bf16.vlgmr.msra.gmra.mxu0 %v15897_v62  ;;  %v2275_v20 = vld [vmem:[#allocation8 + $0x1588] sm:$0xff]  ;;  %v13569_v55 = vcombine.low %v2283_v11, %v2287_v38 }
 0x376   : > { %v15981_v26 = vadd.f32 %v8599_v34, %v15973_v52  ;;  %8869 = vmatpush2.bf16.msra.mxu1 %v13377_v16  ;;  %8894 = vmatpush1.bf16.msra.mxu0 %v13441_v17  ;;  %v2107_v16 = vld [vmem:[#allocation8 + $0x1048] sm:$0xff] }
 0x377   : > { %8925 = vmatprep.mubr.bf16.mxu0 %v15901_v7  ;;  %v8601_v32 = vpop.f32.mrf.mxu0  ;;  %8870 = vmatprep.subr.bf16.mxu1 %v13370_v22  ;;  %v2111_v17 = vld [vmem:[#allocation8 + $0x1068] sm:$0xff]  ;;  %v13337_v22 = vcombine.low %v2051_v14, %v2055_v39 }
 0x378   : > { %v15985_v51 = vadd.f32 %v8601_v32, %v15977_v30  ;;  %8895 = vmatprep.subr.bf16.mxu0 %v13434_v29  ;;  %v13353_v30 = vcombine.low %v2067_v61, %v2071_v35  ;;  %v13330_v29 = vcombine.high %v2043_v57, %v2047_v15  ;;  %v13394_v43 = vcombine.high %v2107_v16, %v2111_v17  ;;  %v2099_v34 = vld [vmem:[#allocation8 + $0x1008] sm:$0xff] }
 0x379   : > { %v8603_v52 = vpop.f32.mrf.mxu0  ;;  %v13393_v32 = vcombine.low %v2107_v16, %v2111_v17  ;;  %v2219_v61 = vld [vmem:[#allocation8 + $0x13c8] sm:$0xff] }
 0x37a   : > { %8871 = vmatpush2.bf16.msra.mxu1 %v13369_v54  ;;  %8896 = vmatpush1.bf16.msra.mxu0 %v13433_v27  ;;  %v2103_v54 = vld [vmem:[#allocation8 + $0x1028] sm:$0xff]  ;;  %v13329_v27 = vcombine.low %v2043_v57, %v2047_v15  ;;  %v13321_v52 = vcombine.low %v2035_v23, %v2039_v24 }
 0x37b   : > { %v8604_v46 = vpop.f32.mrf.mxu0  ;;  %8872 = vmatprep.subr.bf16.mxu1 %v13362_v0  ;;  %8897 = vmatprep.subr.bf16.mxu0 %v13426_v48  ;;  %v13322_v0 = vcombine.high %v2035_v23, %v2039_v24  ;;  %v13386_v48 = vcombine.high %v2099_v34, %v2103_v54  ;;  %v2223_v35 = vld [vmem:[#allocation8 + $0x13e8] sm:$0xff] }
 0x37c   : > { %v13570_v46 = vcombine.high %v2283_v11, %v2287_v38  ;;  %v2279_v53 = vld [vmem:[#allocation8 + $0x15a8] sm:$0xff]  ;;  %v13505_v36 = vcombine.low %v2219_v61, %v2223_v35 }
 0x37d   : > { %v2267_v14 = vld [vmem:[#allocation8 + $0x1548] sm:$0xff] }
 0x37e   : > { %8873 = vmatpush2.bf16.msra.mxu1 %v13361_v41  ;;  %8898 = vmatpush1.bf16.msra.mxu0 %v13425_v44  ;;  %v13385_v41 = vcombine.low %v2099_v34, %v2103_v54  ;;  %v13506_v44 = vcombine.high %v2219_v61, %v2223_v35  ;;  %v2271_v39 = vld [vmem:[#allocation8 + $0x1568] sm:$0xff] }
 0x37f   : > { %8874 = vmatprep.subr.bf16.mxu1 %v13354_v47  ;;  %8899 = vmatprep.subr.bf16.mxu0 %v13418_v13  ;;  %v2211_v47 = vld [vmem:[#allocation8 + $0x1388] sm:$0xff]  ;;  %v13554_v57 = vcombine.high %v2267_v14, %v2271_v39 }
 0x380   : > { %v2215_v13 = vld [vmem:[#allocation8 + $0x13a8] sm:$0xff] }
 0x381   : > { %v2195_v15 = vld [vmem:[#allocation8 + $0x1308] sm:$0xff] }
 0x382   : > { %8875 = vmatpush2.bf16.msra.mxu1 %v13353_v30  ;;  %8900 = vmatpush1.bf16.msra.mxu0 %v13417_v59  ;;  %v13498_v30 = vcombine.high %v2211_v47, %v2215_v13  ;;  %v2203_v59 = vld [vmem:[#allocation8 + $0x1348] sm:$0xff] }
 0x383   : > { %8876 = vmatprep.subr.bf16.mxu1 %v13346_v4  ;;  %8901 = vmatprep.subr.bf16.mxu0 %v13410_v60  ;;  %v13562_v4 = vcombine.high %v2275_v20, %v2279_v53  ;;  %v2207_v60 = vld [vmem:[#allocation8 + $0x1368] sm:$0xff] }
 0x384   : > { %v2199_v17 = vld [vmem:[#allocation8 + $0x1328] sm:$0xff] }
 0x385   : > { %v13482_v24 = vcombine.high %v2195_v15, %v2199_v17  ;;  %v2187_v54 = vld [vmem:[#allocation8 + $0x12c8] sm:$0xff] }
 0x386   : > { %8877 = vmatpush2.bf16.msra.mxu1 %v13345_v3  ;;  %8902 = vmatpush1.bf16.msra.mxu0 %v13409_v5  ;;  %v13497_v3 = vcombine.low %v2211_v47, %v2215_v13  ;;  %v13561_v5 = vcombine.low %v2275_v20, %v2279_v53  ;;  %v2179_v11 = vld [vmem:[#allocation8 + $0x1288] sm:$0xff] }
 0x387   : > { %8878 = vmatprep.subr.bf16.mxu1 %v13338_v6  ;;  %8903 = vmatprep.subr.bf16.mxu0 %v13402_v21  ;;  %v13490_v21 = vcombine.high %v2203_v59, %v2207_v60  ;;  %v2183_v38 = vld [vmem:[#allocation8 + $0x12a8] sm:$0xff] }
 0x388   : > { %v13466_v47 = vcombine.high %v2179_v11, %v2183_v38  ;;  %v2171_v20 = vld [vmem:[#allocation8 + $0x1248] sm:$0xff] }
 0x389   : > { %v2175_v53 = vld [vmem:[#allocation8 + $0x1268] sm:$0xff] }
 0x38a   : > { %8879 = vmatpush2.bf16.msra.mxu1 %v13337_v22  ;;  %8904 = vmatpush1.bf16.msra.mxu0 %v13401_v18  ;;  %v2259_v22 = vld [vmem:[#allocation8 + $0x1508] sm:$0xff] }
 0x38b   : > { %8880 = vmatprep.subr.bf16.mxu1 %v13330_v29  ;;  %8905 = vmatprep.subr.bf16.mxu0 %v13394_v43  ;;  %v2263_v18 = vld [vmem:[#allocation8 + $0x1528] sm:$0xff]  ;;  %v13489_v29 = vcombine.low %v2203_v59, %v2207_v60  ;;  %v13553_v43 = vcombine.low %v2267_v14, %v2271_v39 }
 0x38c   : > { %v13546_v34 = vcombine.high %v2259_v22, %v2263_v18  ;;  %v2163_v14 = vld [vmem:[#allocation8 + $0x1208] sm:$0xff] }
 0x38d   : > { %v2167_v39 = vld [vmem:[#allocation8 + $0x1228] sm:$0xff] }
 0x38e   : > { %8881 = vmatpush2.bf16.msra.mxu1 %v13329_v27  ;;  %8906 = vmatpush1.bf16.msra.mxu0 %v13393_v32  ;;  %v2191_v27 = vld [vmem:[#allocation8 + $0x12e8] sm:$0xff] }
 0x38f   : > { %8882 = vmatprep.subr.bf16.mxu1 %v13322_v0  ;;  %8907 = vmatprep.subr.bf16.mxu0 %v13386_v48  ;;  %v2251_v32 = vld [vmem:[#allocation8 + $0x14c8] sm:$0xff]  ;;  %v13545_v48 = vcombine.low %v2259_v22, %v2263_v18  ;;  %v13474_v61 = vcombine.high %v2187_v54, %v2191_v27 }
 0x390   : > { %v2255_v0 = vld [vmem:[#allocation8 + $0x14e8] sm:$0xff] }
 0x391   : > { %v13538_v35 = vcombine.high %v2251_v32, %v2255_v0  ;;  %v2411_v22 = vld [vmem:[#allocation8 + $0x19c8] sm:$0xff] }
 0x392   : > { %8883 = vmatpush2.bf16.msra.mxu1 %v13321_v52  ;;  %8908 = vmatpush1.bf16.msra.mxu0 %v13385_v41  ;;  %v2243_v52 = vld [vmem:[#allocation8 + $0x1488] sm:$0xff] }
 0x393   : > { %8909 = vmatprep.subr.bf16.mxu0 %v13506_v44  ;;  %8934 = vmatprep.subr.bf16.mxu1 %v13570_v46  ;;  %v2247_v41 = vld [vmem:[#allocation8 + $0x14a8] sm:$0xff]  ;;  %v13473_v44 = vcombine.low %v2187_v54, %v2191_v27  ;;  %v13537_v46 = vcombine.low %v2251_v32, %v2255_v0 }
 0x394   : > { %v13530_v13 = vcombine.high %v2243_v52, %v2247_v41  ;;  %v13529_v59 = vcombine.low %v2243_v52, %v2247_v41  ;;  %v2415_v18 = vld [vmem:[#allocation8 + $0x19e8] sm:$0xff] }
 0x395   : > { %v8640_v10 = vpop.f32.mrf.mxu1  ;;  %8885 = vmatmul.mubr.bf16.vlgmr.msra.gmra.mxu1 %v15913_v31  ;;  %v2403_v54 = vld [vmem:[#allocation8 + $0x1988] sm:$0xff]  ;;  %v13697_v0 = vcombine.low %v2411_v22, %v2415_v18 }
 0x396   : > { %v15989_v1 = vadd.f32 %v8640_v10, %v15981_v26  ;;  %8910 = vmatpush2.bf16.msra.mxu0 %v13505_v36  ;;  %8935 = vmatpush1.bf16.msra.mxu1 %v13569_v55  ;;  %v2235_v36 = vld [vmem:[#allocation8 + $0x1448] sm:$0xff] }
 0x397   : > { %8966 = vmatprep.mubr.bf16.mxu1 %v15917_v40  ;;  %v8642_v6 = vpop.f32.mrf.mxu1  ;;  %8911 = vmatprep.subr.bf16.mxu0 %v13498_v30  ;;  %v2239_v55 = vld [vmem:[#allocation8 + $0x1468] sm:$0xff]  ;;  %v13465_v30 = vcombine.low %v2179_v11, %v2183_v38 }
 0x398   : > { %v15993_v16 = vadd.f32 %v8642_v6, %v15985_v51  ;;  %8936 = vmatprep.subr.bf16.mxu1 %v13562_v4  ;;  %v13481_v51 = vcombine.low %v2195_v15, %v2199_v17  ;;  %v13458_v4 = vcombine.high %v2171_v20, %v2175_v53  ;;  %v13522_v60 = vcombine.high %v2235_v36, %v2239_v55  ;;  %v2227_v10 = vld [vmem:[#allocation8 + $0x1408] sm:$0xff] }
 0x399   : > { %v8644_v26 = vpop.f32.mrf.mxu1  ;;  %v13521_v6 = vcombine.low %v2235_v36, %v2239_v55  ;;  %v2347_v15 = vld [vmem:[#allocation8 + $0x17c8] sm:$0xff] }
 0x39a   : > { %8912 = vmatpush2.bf16.msra.mxu0 %v13497_v3  ;;  %8937 = vmatpush1.bf16.msra.mxu1 %v13561_v5  ;;  %v2231_v3 = vld [vmem:[#allocation8 + $0x1428] sm:$0xff]  ;;  %v13457_v5 = vcombine.low %v2171_v20, %v2175_v53  ;;  %v13449_v26 = vcombine.low %v2163_v14, %v2167_v39 }
 0x39b   : > { %v8645_v23 = vpop.f32.mrf.mxu1  ;;  %8913 = vmatprep.subr.bf16.mxu0 %v13490_v21  ;;  %8938 = vmatprep.subr.bf16.mxu1 %v13554_v57  ;;  %v13450_v21 = vcombine.high %v2163_v14, %v2167_v39  ;;  %v13514_v57 = vcombine.high %v2227_v10, %v2231_v3  ;;  %v2351_v17 = vld [vmem:[#allocation8 + $0x17e8] sm:$0xff] }
 0x39c   : > { %v13698_v23 = vcombine.high %v2411_v22, %v2415_v18  ;;  %v2407_v27 = vld [vmem:[#allocation8 + $0x19a8] sm:$0xff]  ;;  %v13633_v32 = vcombine.low %v2347_v15, %v2351_v17 }
 0x39d   : > { %v2395_v11 = vld [vmem:[#allocation8 + $0x1948] sm:$0xff] }
 0x39e   : > { %8914 = vmatpush2.bf16.msra.mxu0 %v13489_v29  ;;  %8939 = vmatpush1.bf16.msra.mxu1 %v13553_v43  ;;  %v13513_v29 = vcombine.low %v2227_v10, %v2231_v3  ;;  %v13634_v43 = vcombine.high %v2347_v15, %v2351_v17  ;;  %v2399_v38 = vld [vmem:[#allocation8 + $0x1968] sm:$0xff] }
 0x39f   : > { %8915 = vmatprep.subr.bf16.mxu0 %v13482_v24  ;;  %8940 = vmatprep.subr.bf16.mxu1 %v13546_v34  ;;  %v2339_v24 = vld [vmem:[#allocation8 + $0x1788] sm:$0xff]  ;;  %v13682_v20 = vcombine.high %v2395_v11, %v2399_v38 }
 0x3a0   : > { %v2343_v34 = vld [vmem:[#allocation8 + $0x17a8] sm:$0xff] }
 0x3a1   : > { %v2323_v53 = vld [vmem:[#allocation8 + $0x1708] sm:$0xff] }
 0x3a2   : > { %8916 = vmatpush2.bf16.msra.mxu0 %v13481_v51  ;;  %8941 = vmatpush1.bf16.msra.mxu1 %v13545_v48  ;;  %v13626_v51 = vcombine.high %v2339_v24, %v2343_v34  ;;  %v2331_v48 = vld [vmem:[#allocation8 + $0x1748] sm:$0xff] }
 0x3a3   : > { %8917 = vmatprep.subr.bf16.mxu0 %v13474_v61  ;;  %8942 = vmatprep.subr.bf16.mxu1 %v13538_v35  ;;  %v13690_v61 = vcombine.high %v2403_v54, %v2407_v27  ;;  %v2335_v35 = vld [vmem:[#allocation8 + $0x1768] sm:$0xff] }
 0x3a4   : > { %v2327_v55 = vld [vmem:[#allocation8 + $0x1728] sm:$0xff] }
 0x3a5   : > { %v13610_v39 = vcombine.high %v2323_v53, %v2327_v55  ;;  %v2315_v3 = vld [vmem:[#allocation8 + $0x16c8] sm:$0xff] }
 0x3a6   : > { %8918 = vmatpush2.bf16.msra.mxu0 %v13473_v44  ;;  %8943 = vmatpush1.bf16.msra.mxu1 %v13537_v46  ;;  %v13625_v44 = vcombine.low %v2339_v24, %v2343_v34  ;;  %v13689_v46 = vcombine.low %v2403_v54, %v2407_v27  ;;  %v2307_v22 = vld [vmem:[#allocation8 + $0x1688] sm:$0xff] }
 0x3a7   : > { %8919 = vmatprep.subr.bf16.mxu0 %v13466_v47  ;;  %8944 = vmatprep.subr.bf16.mxu1 %v13530_v13  ;;  %v13618_v13 = vcombine.high %v2331_v48, %v2335_v35  ;;  %v2311_v18 = vld [vmem:[#allocation8 + $0x16a8] sm:$0xff] }
 0x3a8   : > { %v13594_v24 = vcombine.high %v2307_v22, %v2311_v18  ;;  %v2299_v54 = vld [vmem:[#allocation8 + $0x1648] sm:$0xff] }
 0x3a9   : > { %v2303_v27 = vld [vmem:[#allocation8 + $0x1668] sm:$0xff] }
 0x3aa   : > { %8920 = vmatpush2.bf16.msra.mxu0 %v13465_v30  ;;  %8945 = vmatpush1.bf16.msra.mxu1 %v13529_v59  ;;  %v2387_v30 = vld [vmem:[#allocation8 + $0x1908] sm:$0xff] }
 0x3ab   : > { %8921 = vmatprep.subr.bf16.mxu0 %v13458_v4  ;;  %8946 = vmatprep.subr.bf16.mxu1 %v13522_v60  ;;  %v2391_v59 = vld [vmem:[#allocation8 + $0x1928] sm:$0xff]  ;;  %v13617_v4 = vcombine.low %v2331_v48, %v2335_v35  ;;  %v13681_v60 = vcombine.low %v2395_v11, %v2399_v38 }
 0x3ac   : > { %v13674_v10 = vcombine.high %v2387_v30, %v2391_v59  ;;  %v2291_v11 = vld [vmem:[#allocation8 + $0x1608] sm:$0xff] }
 0x3ad   : > { %v2295_v38 = vld [vmem:[#allocation8 + $0x1628] sm:$0xff] }
 0x3ae   : > { %8922 = vmatpush2.bf16.msra.mxu0 %v13457_v5  ;;  %8947 = vmatpush1.bf16.msra.mxu1 %v13521_v6  ;;  %v2319_v5 = vld [vmem:[#allocation8 + $0x16e8] sm:$0xff] }
 0x3af   : > { %8923 = vmatprep.subr.bf16.mxu0 %v13450_v21  ;;  %8948 = vmatprep.subr.bf16.mxu1 %v13514_v57  ;;  %v2379_v6 = vld [vmem:[#allocation8 + $0x18c8] sm:$0xff]  ;;  %v13673_v57 = vcombine.low %v2387_v30, %v2391_v59  ;;  %v13602_v15 = vcombine.high %v2315_v3, %v2319_v5  ;;  %v1644_v30 = vld [vmem:[#allocation8 + $0x1d0] sm:$0xff] }
 0x3b0   : > { %v2383_v21 = vld [vmem:[#allocation8 + $0x18e8] sm:$0xff]  ;;  %v1648_v59 = vld [vmem:[#allocation8 + $0x1f0] sm:$0xff] }
 0x3b1   : > { %v13666_v17 = vcombine.high %v2379_v6, %v2383_v21 }
 0x3b2   : > { %8924 = vmatpush2.bf16.msra.mxu0 %v13449_v26  ;;  %8949 = vmatpush1.bf16.msra.mxu1 %v13513_v29  ;;  %v2371_v26 = vld [vmem:[#allocation8 + $0x1888] sm:$0xff] }
 0x3b3   : > { %8950 = vmatprep.subr.bf16.mxu1 %v13634_v43  ;;  %8975 = vmatprep.subr.bf16.mxu0 %v13698_v23  ;;  %v2375_v29 = vld [vmem:[#allocation8 + $0x18a8] sm:$0xff]  ;;  %v13601_v43 = vcombine.low %v2315_v3, %v2319_v5  ;;  %v13665_v23 = vcombine.low %v2379_v6, %v2383_v21  ;;  %v1636_v3 = vld [vmem:[#allocation8 + $0x190] sm:$0xff]  ;;  %v12931_v21 = vcombine.low %v1644_v30, %v1648_v59 }
 0x3b4   : > { %v13658_v34 = vcombine.high %v2371_v26, %v2375_v29  ;;  %v13657_v48 = vcombine.low %v2371_v26, %v2375_v29  ;;  %v1640_v5 = vld [vmem:[#allocation8 + $0x1b0] sm:$0xff] }
 0x3b5   : > { %v8681_v52 = vpop.f32.mrf.mxu0  ;;  %8926 = vmatmul.mubr.bf16.vlgmr.msra.gmra.mxu0 %v15927_v9 }
 0x3b6   : > { %v15997_v41 = vadd.f32 %v8681_v52, %v15989_v1  ;;  %8951 = vmatpush2.bf16.msra.mxu1 %v13633_v32  ;;  %8976 = vmatpush1.bf16.msra.mxu0 %v13697_v0  ;;  %v2363_v32 = vld [vmem:[#allocation8 + $0x1848] sm:$0xff] }
 0x3b7   : > { %9007 = vmatprep.mubr.bf16.mxu0 %v15931_v19  ;;  %v8683_v47 = vpop.f32.mrf.mxu0  ;;  %8952 = vmatprep.subr.bf16.mxu1 %v13626_v51  ;;  %v2367_v0 = vld [vmem:[#allocation8 + $0x1868] sm:$0xff]  ;;  %v13593_v51 = vcombine.low %v2307_v22, %v2311_v18  ;;  %v1628_v22 = vld [vmem:[#allocation8 + $0x150] sm:$0xff] }
 0x3b8   : > { %v16001_v36 = vadd.f32 %v8683_v47, %v15993_v16  ;;  %8977 = vmatprep.subr.bf16.mxu0 %v13690_v61  ;;  %v13609_v16 = vcombine.low %v2323_v53, %v2327_v55  ;;  %v13586_v61 = vcombine.high %v2299_v54, %v2303_v27  ;;  %v13650_v35 = vcombine.high %v2363_v32, %v2367_v0  ;;  %v2355_v52 = vld [vmem:[#allocation8 + $0x1808] sm:$0xff]  ;;  %v1632_v18 = vld [vmem:[#allocation8 + $0x170] sm:$0xff] }
 0x3b9   : > { %v8685_v1 = vpop.f32.mrf.mxu0  ;;  %v13649_v47 = vcombine.low %v2363_v32, %v2367_v0  ;;  %v2475_v53 = vld [vmem:[#allocation8 + $0x1bc8] sm:$0xff] }
 0x3ba   : > { %8953 = vmatpush2.bf16.msra.mxu1 %v13625_v44  ;;  %8978 = vmatpush1.bf16.msra.mxu0 %v13689_v46  ;;  %v2359_v44 = vld [vmem:[#allocation8 + $0x1828] sm:$0xff]  ;;  %v13585_v46 = vcombine.low %v2299_v54, %v2303_v27  ;;  %v13577_v1 = vcombine.low %v2291_v11, %v2295_v38  ;;  %v12916_v54 = vcombine.high %v1628_v22, %v1632_v18 }
 0x3bb   : > { %v8686_v14 = vpop.f32.mrf.mxu0  ;;  %8954 = vmatprep.subr.bf16.mxu1 %v13618_v13  ;;  %8979 = vmatprep.subr.bf16.mxu0 %v13682_v20  ;;  %v13578_v13 = vcombine.high %v2291_v11, %v2295_v38  ;;  %v13642_v20 = vcombine.high %v2355_v52, %v2359_v44  ;;  %v2479_v55 = vld [vmem:[#allocation8 + $0x1be8] sm:$0xff] }
 0x3bc   : > { %v12932_v14 = vcombine.high %v1644_v30, %v1648_v59  ;;  %v13761_v6 = vcombine.low %v2475_v53, %v2479_v55  ;;  %v2451_v27 = vld [vmem:[#allocation8 + $0x1b08] sm:$0xff] }
 0x3bd   : > { %v2455_v0 = vld [vmem:[#allocation8 + $0x1b28] sm:$0xff] }
 0x3be   : > { %8955 = vmatpush2.bf16.msra.mxu1 %v13617_v4  ;;  %8980 = vmatpush1.bf16.msra.mxu0 %v13681_v60  ;;  %v13641_v4 = vcombine.low %v2355_v52, %v2359_v44  ;;  %v13762_v60 = vcombine.high %v2475_v53, %v2479_v55  ;;  %v13738_v38 = vcombine.high %v2451_v27, %v2455_v0  ;;  %v2443_v44 = vld [vmem:[#allocation8 + $0x1ac8] sm:$0xff] }
 0x3bf   : > { %8956 = vmatprep.subr.bf16.mxu1 %v13610_v39  ;;  %8981 = vmatprep.subr.bf16.mxu0 %v13674_v10  ;;  %v2467_v39 = vld [vmem:[#allocation8 + $0x1b88] sm:$0xff] }
 0x3c0   : > { %v2471_v10 = vld [vmem:[#allocation8 + $0x1ba8] sm:$0xff] }
 0x3c1   : > { %v2435_v30 = vld [vmem:[#allocation8 + $0x1a88] sm:$0xff] }
 0x3c2   : > { %8957 = vmatpush2.bf16.msra.mxu1 %v13609_v16  ;;  %8982 = vmatpush1.bf16.msra.mxu0 %v13673_v57  ;;  %v13754_v16 = vcombine.high %v2467_v39, %v2471_v10  ;;  %v2459_v57 = vld [vmem:[#allocation8 + $0x1b48] sm:$0xff] }
 0x3c3   : > { %8958 = vmatprep.subr.bf16.mxu1 %v13602_v15  ;;  %8983 = vmatprep.subr.bf16.mxu0 %v13666_v17  ;;  %v12924_v15 = vcombine.high %v1636_v3, %v1640_v5  ;;  %v2463_v17 = vld [vmem:[#allocation8 + $0x1b68] sm:$0xff] }
 0x3c4   : > { %v2439_v59 = vld [vmem:[#allocation8 + $0x1aa8] sm:$0xff] }
 0x3c6   : > { %8959 = vmatpush2.bf16.msra.mxu1 %v13601_v43  ;;  %8984 = vmatpush1.bf16.msra.mxu0 %v13665_v23  ;;  %v13753_v43 = vcombine.low %v2467_v39, %v2471_v10  ;;  %v12923_v23 = vcombine.low %v1636_v3, %v1640_v5  ;;  %v13722_v39 = vcombine.high %v2435_v30, %v2439_v59  ;;  %v2427_v3 = vld [vmem:[#allocation8 + $0x1a48] sm:$0xff] }
 0x3c7   : > { %8960 = vmatprep.subr.bf16.mxu1 %v13594_v24  ;;  %8985 = vmatprep.subr.bf16.mxu0 %v13658_v34  ;;  %v13746_v34 = vcombine.high %v2459_v57, %v2463_v17  ;;  %v2431_v5 = vld [vmem:[#allocation8 + $0x1a68] sm:$0xff] }
 0x3ca   : > { %8961 = vmatpush2.bf16.msra.mxu1 %v13593_v51  ;;  %8986 = vmatpush1.bf16.msra.mxu0 %v13657_v48  ;;  %v1620_v51 = vld [vmem:[#allocation8 + $0x110] sm:$0xff] }
 0x3cb   : > { %8962 = vmatprep.subr.bf16.mxu1 %v13586_v61  ;;  %8987 = vmatprep.subr.bf16.mxu0 %v13650_v35  ;;  %v1624_v48 = vld [vmem:[#allocation8 + $0x130] sm:$0xff]  ;;  %v13745_v61 = vcombine.low %v2459_v57, %v2463_v17  ;;  %v12915_v35 = vcombine.low %v1628_v22, %v1632_v18  ;;  %v2419_v22 = vld [vmem:[#allocation8 + $0x1a08] sm:$0xff] }
 0x3cc   : > { %v12908_v52 = vcombine.high %v1620_v51, %v1624_v48  ;;  %v2423_v18 = vld [vmem:[#allocation8 + $0x1a28] sm:$0xff] }
 0x3ce   : > { %8963 = vmatpush2.bf16.msra.mxu1 %v13585_v46  ;;  %8988 = vmatpush1.bf16.msra.mxu0 %v13649_v47  ;;  %v2447_v46 = vld [vmem:[#allocation8 + $0x1ae8] sm:$0xff]  ;;  %v1612_v47 = vld [vmem:[#allocation8 + $0xd0] sm:$0xff] }
 0x3cf   : > { %8964 = vmatprep.subr.bf16.mxu1 %v13578_v13  ;;  %8989 = vmatprep.subr.bf16.mxu0 %v13642_v20  ;;  %v1616_v13 = vld [vmem:[#allocation8 + $0xf0] sm:$0xff]  ;;  %v12907_v20 = vcombine.low %v1620_v51, %v1624_v48  ;;  %v13730_v53 = vcombine.high %v2443_v44, %v2447_v46 }
 0x3d0   : > { %v12900_v55 = vcombine.high %v1612_v47, %v1616_v13  ;;  %v1772_v51 = vld [vmem:[#allocation8 + $0x5d0] sm:$0xff] }
 0x3d1   : > { %v1776_v48 = vld [vmem:[#allocation8 + $0x5f0] sm:$0xff] }
 0x3d2   : > { %8965 = vmatpush2.bf16.msra.mxu1 %v13577_v1  ;;  %8990 = vmatpush1.bf16.msra.mxu0 %v13641_v4  ;;  %v1604_v1 = vld [vmem:[#allocation8 + $0x90] sm:$0xff] }
 0x3d3   : > { %8991 = vmatprep.subr.bf16.mxu0 %v13762_v60  ;;  %9016 = vmatprep.subr.bf16.mxu1 %v12932_v14  ;;  %v1608_v4 = vld [vmem:[#allocation8 + $0xb0] sm:$0xff]  ;;  %v13729_v60 = vcombine.low %v2443_v44, %v2447_v46  ;;  %v12899_v14 = vcombine.low %v1612_v47, %v1616_v13  ;;  %v13059_v13 = vcombine.low %v1772_v51, %v1776_v48 }
 0x3d4   : > { %v12892_v10 = vcombine.high %v1604_v1, %v1608_v4  ;;  %v12891_v57 = vcombine.low %v1604_v1, %v1608_v4  ;;  %v1764_v44 = vld [vmem:[#allocation8 + $0x590] sm:$0xff] }
 0x3d5   : > { %v8722_v26 = vpop.f32.mrf.mxu1  ;;  %8967 = vmatmul.mubr.bf16.vlgmr.msra.gmra.mxu1 %v15941_v45  ;;  %v1768_v46 = vld [vmem:[#allocation8 + $0x5b0] sm:$0xff] }
 0x3d6   : > { %v16005_v29 = vadd.f32 %v8722_v26, %v15997_v41  ;;  %8992 = vmatpush2.bf16.msra.mxu0 %v13761_v6  ;;  %9017 = vmatpush1.bf16.msra.mxu1 %v12931_v21  ;;  %v1596_v6 = vld [vmem:[#allocation8 + $0x50] sm:$0xff] }
 0x3d7   : > { %9048 = vmatprep.mubr.bf16.mxu1 %v15845_v28  ;;  %v8724_v24 = vpop.f32.mrf.mxu1  ;;  %8993 = vmatprep.subr.bf16.mxu0 %v13754_v16  ;;  %v1600_v21 = vld [vmem:[#allocation8 + $0x70] sm:$0xff]  ;;  %v13721_v16 = vcombine.low %v2435_v30, %v2439_v59 }
 0x3d8   : > { %v16009_v32 = vadd.f32 %v8724_v24, %v16001_v36  ;;  %9018 = vmatprep.subr.bf16.mxu1 %v12924_v15  ;;  %v13737_v36 = vcombine.low %v2451_v27, %v2455_v0  ;;  %v13714_v15 = vcombine.high %v2427_v3, %v2431_v5  ;;  %v12884_v17 = vcombine.high %v1596_v6, %v1600_v21  ;;  %v1588_v26 = vld [vmem:[#allocation8 + $0x10] sm:$0xff] }
 0x3d9   : > { %v8726_v41 = vpop.f32.mrf.mxu1  ;;  %v12883_v24 = vcombine.low %v1596_v6, %v1600_v21  ;;  %v1708_v27 = vld [vmem:[#allocation8 + $0x3d0] sm:$0xff] }
 0x3da   : > { %8994 = vmatpush2.bf16.msra.mxu0 %v13753_v43  ;;  %9019 = vmatpush1.bf16.msra.mxu1 %v12923_v23  ;;  %v1592_v43 = vld [vmem:[#allocation8 + $0x30] sm:$0xff]  ;;  %v13713_v23 = vcombine.low %v2427_v3, %v2431_v5  ;;  %v13705_v41 = vcombine.low %v2419_v22, %v2423_v18 }
 0x3db   : > { %v8727_v11 = vpop.f32.mrf.mxu1  ;;  %8995 = vmatprep.subr.bf16.mxu0 %v13746_v34  ;;  %9020 = vmatprep.subr.bf16.mxu1 %v12916_v54  ;;  %v13706_v34 = vcombine.high %v2419_v22, %v2423_v18  ;;  %v12876_v54 = vcombine.high %v1588_v26, %v1592_v43  ;;  %v1712_v0 = vld [vmem:[#allocation8 + $0x3f0] sm:$0xff] }
 0x3dc   : > { %v13060_v11 = vcombine.high %v1772_v51, %v1776_v48  ;;  %v12995_v47 = vcombine.low %v1708_v27, %v1712_v0  ;;  %v1756_v30 = vld [vmem:[#allocation8 + $0x550] sm:$0xff] }
 0x3dd   : > { %v1760_v59 = vld [vmem:[#allocation8 + $0x570] sm:$0xff] }
 0x3de   : > { %8996 = vmatpush2.bf16.msra.mxu0 %v13745_v61  ;;  %9021 = vmatpush1.bf16.msra.mxu1 %v12915_v35  ;;  %v12875_v61 = vcombine.low %v1588_v26, %v1592_v43  ;;  %v12996_v35 = vcombine.high %v1708_v27, %v1712_v0  ;;  %v13044_v3 = vcombine.high %v1756_v30, %v1760_v59  ;;  %v1684_v5 = vld [vmem:[#allocation8 + $0x310] sm:$0xff] }
 0x3df   : > { %8997 = vmatprep.subr.bf16.mxu0 %v13738_v38  ;;  %9022 = vmatprep.subr.bf16.mxu1 %v12908_v52  ;;  %v1700_v38 = vld [vmem:[#allocation8 + $0x390] sm:$0xff] }
 0x3e0   : > { %v1704_v52 = vld [vmem:[#allocation8 + $0x3b0] sm:$0xff] }
 0x3e1   : > { %v1688_v21 = vld [vmem:[#allocation8 + $0x330] sm:$0xff] }
 0x3e2   : > { %8998 = vmatpush2.bf16.msra.mxu0 %v13737_v36  ;;  %9023 = vmatpush1.bf16.msra.mxu1 %v12907_v20  ;;  %v12988_v36 = vcombine.high %v1700_v38, %v1704_v52  ;;  %v1692_v20 = vld [vmem:[#allocation8 + $0x350] sm:$0xff]  ;;  %v12972_v18 = vcombine.high %v1684_v5, %v1688_v21 }
 0x3e3   : > { %8999 = vmatprep.subr.bf16.mxu0 %v13730_v53  ;;  %9024 = vmatprep.subr.bf16.mxu1 %v12900_v55  ;;  %v13052_v53 = vcombine.high %v1764_v44, %v1768_v46  ;;  %v1696_v55 = vld [vmem:[#allocation8 + $0x370] sm:$0xff] }
 0x3e4   : > { %v1676_v43 = vld [vmem:[#allocation8 + $0x2d0] sm:$0xff] }
 0x3e5   : > { %v1668_v51 = vld [vmem:[#allocation8 + $0x290] sm:$0xff] }
 0x3e6   : > { %9000 = vmatpush2.bf16.msra.mxu0 %v13729_v60  ;;  %9025 = vmatpush1.bf16.msra.mxu1 %v12899_v14  ;;  %v12987_v60 = vcombine.low %v1700_v38, %v1704_v52  ;;  %v13051_v14 = vcombine.low %v1764_v44, %v1768_v46  ;;  %v1672_v48 = vld [vmem:[#allocation8 + $0x2b0] sm:$0xff] }
 0x3e7   : > { %9001 = vmatprep.subr.bf16.mxu0 %v13722_v39  ;;  %9026 = vmatprep.subr.bf16.mxu1 %v12892_v10  ;;  %v12980_v10 = vcombine.high %v1692_v20, %v1696_v55  ;;  %v12956_v38 = vcombine.high %v1668_v51, %v1672_v48  ;;  %v1660_v44 = vld [vmem:[#allocation8 + $0x250] sm:$0xff] }
 0x3e8   : > { %v1664_v46 = vld [vmem:[#allocation8 + $0x270] sm:$0xff] }
 0x3ea   : > { %9002 = vmatpush2.bf16.msra.mxu0 %v13721_v16  ;;  %9027 = vmatpush1.bf16.msra.mxu1 %v12891_v57  ;;  %v1748_v16 = vld [vmem:[#allocation8 + $0x510] sm:$0xff] }
 0x3eb   : > { %9003 = vmatprep.subr.bf16.mxu0 %v13714_v15  ;;  %9028 = vmatprep.subr.bf16.mxu1 %v12884_v17  ;;  %v1752_v57 = vld [vmem:[#allocation8 + $0x530] sm:$0xff]  ;;  %v12979_v15 = vcombine.low %v1692_v20, %v1696_v55  ;;  %v13043_v17 = vcombine.low %v1756_v30, %v1760_v59 }
 0x3ec   : > { %v13036_v26 = vcombine.high %v1748_v16, %v1752_v57  ;;  %v1652_v30 = vld [vmem:[#allocation8 + $0x210] sm:$0xff] }
 0x3ed   : > { %v1656_v59 = vld [vmem:[#allocation8 + $0x230] sm:$0xff] }
 0x3ee   : > { %9004 = vmatpush2.bf16.msra.mxu0 %v13713_v23  ;;  %9029 = vmatpush1.bf16.msra.mxu1 %v12883_v24  ;;  %v1680_v23 = vld [vmem:[#allocation8 + $0x2f0] sm:$0xff] }
 0x3ef   : > { %9005 = vmatprep.subr.bf16.mxu0 %v13706_v34  ;;  %9030 = vmatprep.subr.bf16.mxu1 %v12876_v54  ;;  %v1740_v24 = vld [vmem:[#allocation8 + $0x4d0] sm:$0xff]  ;;  %v13035_v54 = vcombine.low %v1748_v16, %v1752_v57  ;;  %v12964_v27 = vcombine.high %v1676_v43, %v1680_v23 }
 0x3f0   : > { %v1744_v34 = vld [vmem:[#allocation8 + $0x4f0] sm:$0xff] }
 0x3f1   : > { %v13028_v0 = vcombine.high %v1740_v24, %v1744_v34  ;;  %v1900_v16 = vld [vmem:[#allocation8 + $0x9d0] sm:$0xff] }
 0x3f2   : > { %9006 = vmatpush2.bf16.msra.mxu0 %v13705_v41  ;;  %9031 = vmatpush1.bf16.msra.mxu1 %v12875_v61  ;;  %v1732_v41 = vld [vmem:[#allocation8 + $0x490] sm:$0xff] }
 0x3f3   : > { %9032 = vmatprep.subr.bf16.mxu1 %v12996_v35  ;;  %9057 = vmatprep.subr.bf16.mxu0 %v13060_v11  ;;  %v1736_v61 = vld [vmem:[#allocation8 + $0x4b0] sm:$0xff]  ;;  %v12963_v35 = vcombine.low %v1676_v43, %v1680_v23  ;;  %v13027_v11 = vcombine.low %v1740_v24, %v1744_v34 }
 0x3f4   : > { %v13020_v52 = vcombine.high %v1732_v41, %v1736_v61  ;;  %v13019_v20 = vcombine.low %v1732_v41, %v1736_v61  ;;  %v1904_v57 = vld [vmem:[#allocation8 + $0x9f0] sm:$0xff] }
 0x3f5   : > { %v8763_v1 = vpop.f32.mrf.mxu0  ;;  %9008 = vmatmul.mubr.bf16.vlgmr.msra.gmra.mxu0 %v15953_v25  ;;  %v1892_v43 = vld [vmem:[#allocation8 + $0x990] sm:$0xff]  ;;  %v13187_v34 = vcombine.low %v1900_v16, %v1904_v57 }
 0x3f6   : > { %v16013_v4 = vadd.f32 %v8763_v1, %v15905_v12  ;;  %9033 = vmatpush2.bf16.msra.mxu1 %v12995_v47  ;;  %9058 = vmatpush1.bf16.msra.mxu0 %v13059_v13  ;;  %v1724_v47 = vld [vmem:[#allocation8 + $0x450] sm:$0xff] }
 0x3f7   : > { %9089 = vmatprep.mubr.bf16.mxu0 %v15859_v49  ;;  %v8765_v39 = vpop.f32.mrf.mxu0  ;;  %9034 = vmatprep.subr.bf16.mxu1 %v12988_v36  ;;  %v1728_v13 = vld [vmem:[#allocation8 + $0x470] sm:$0xff]  ;;  %v12955_v36 = vcombine.low %v1668_v51, %v1672_v48 }
 0x3f8   : > { %v16017_v6 = vadd.f32 %v8765_v39, %v15909_v33  ;;  %9059 = vmatprep.subr.bf16.mxu0 %v13052_v53  ;;  %v12971_v33 = vcombine.low %v1684_v5, %v1688_v21  ;;  %v12948_v53 = vcombine.high %v1660_v44, %v1664_v46  ;;  %v13012_v55 = vcombine.high %v1724_v47, %v1728_v13  ;;  %v1716_v1 = vld [vmem:[#allocation8 + $0x410] sm:$0xff] }
 0x3f9   : > { %v8767_v12 = vpop.f32.mrf.mxu0  ;;  %v13011_v39 = vcombine.low %v1724_v47, %v1728_v13  ;;  %v1836_v5 = vld [vmem:[#allocation8 + $0x7d0] sm:$0xff] }
 0x3fa   : > { %9035 = vmatpush2.bf16.msra.mxu1 %v12987_v60  ;;  %9060 = vmatpush1.bf16.msra.mxu0 %v13051_v14  ;;  %v1720_v60 = vld [vmem:[#allocation8 + $0x430] sm:$0xff]  ;;  %v12947_v14 = vcombine.low %v1660_v44, %v1664_v46  ;;  %v12939_v12 = vcombine.low %v1652_v30, %v1656_v59 }
 0x3fb   : > { %v8768_v22 = vpop.f32.mrf.mxu0  ;;  %9036 = vmatprep.subr.bf16.mxu1 %v12980_v10  ;;  %9061 = vmatprep.subr.bf16.mxu0 %v13044_v3  ;;  %v12940_v10 = vcombine.high %v1652_v30, %v1656_v59  ;;  %v13004_v3 = vcombine.high %v1716_v1, %v1720_v60  ;;  %v1840_v21 = vld [vmem:[#allocation8 + $0x7f0] sm:$0xff] }
 0x3fc   : > { %v13188_v22 = vcombine.high %v1900_v16, %v1904_v57  ;;  %v1896_v23 = vld [vmem:[#allocation8 + $0x9b0] sm:$0xff]  ;;  %v13123_v24 = vcombine.low %v1836_v5, %v1840_v21 }
 0x3fd   : > { %v1884_v51 = vld [vmem:[#allocation8 + $0x950] sm:$0xff] }
 0x3fe   : > { %9037 = vmatpush2.bf16.msra.mxu1 %v12979_v15  ;;  %9062 = vmatpush1.bf16.msra.mxu0 %v13043_v17  ;;  %v13003_v15 = vcombine.low %v1716_v1, %v1720_v60  ;;  %v13124_v17 = vcombine.high %v1836_v5, %v1840_v21  ;;  %v1888_v48 = vld [vmem:[#allocation8 + $0x970] sm:$0xff] }
 0x3ff   : > { %9038 = vmatprep.subr.bf16.mxu1 %v12972_v18  ;;  %9063 = vmatprep.subr.bf16.mxu0 %v13036_v26  ;;  %v1828_v18 = vld [vmem:[#allocation8 + $0x790] sm:$0xff]  ;;  %v13172_v44 = vcombine.high %v1884_v51, %v1888_v48 }
 0x400   : > { %v1832_v26 = vld [vmem:[#allocation8 + $0x7b0] sm:$0xff] }
 0x401   : > { %v1812_v46 = vld [vmem:[#allocation8 + $0x710] sm:$0xff] }
 0x402   : > { %9039 = vmatpush2.bf16.msra.mxu1 %v12971_v33  ;;  %9064 = vmatpush1.bf16.msra.mxu0 %v13035_v54  ;;  %v13116_v33 = vcombine.high %v1828_v18, %v1832_v26  ;;  %v1820_v54 = vld [vmem:[#allocation8 + $0x750] sm:$0xff] }
 0x403   : > { %9040 = vmatprep.subr.bf16.mxu1 %v12964_v27  ;;  %9065 = vmatprep.subr.bf16.mxu0 %v13028_v0  ;;  %v13180_v27 = vcombine.high %v1892_v43, %v1896_v23  ;;  %v1824_v0 = vld [vmem:[#allocation8 + $0x770] sm:$0xff] }
 0x404   : > { %v1816_v13 = vld [vmem:[#allocation8 + $0x730] sm:$0xff] }
 0x405   : > { %v13100_v59 = vcombine.high %v1812_v46, %v1816_v13  ;;  %v1804_v60 = vld [vmem:[#allocation8 + $0x6d0] sm:$0xff] }
 0x406   : > { %9041 = vmatpush2.bf16.msra.mxu1 %v12963_v35  ;;  %9066 = vmatpush1.bf16.msra.mxu0 %v13027_v11  ;;  %v13115_v35 = vcombine.low %v1828_v18, %v1832_v26  ;;  %v13179_v11 = vcombine.low %v1892_v43, %v1896_v23  ;;  %v1796_v16 = vld [vmem:[#allocation8 + $0x690] sm:$0xff] }
 0x407   : > { %9042 = vmatprep.subr.bf16.mxu1 %v12956_v38  ;;  %9067 = vmatprep.subr.bf16.mxu0 %v13020_v52  ;;  %v13108_v52 = vcombine.high %v1820_v54, %v1824_v0  ;;  %v1800_v57 = vld [vmem:[#allocation8 + $0x6b0] sm:$0xff] }
 0x408   : > { %v13084_v18 = vcombine.high %v1796_v16, %v1800_v57  ;;  %v1788_v43 = vld [vmem:[#allocation8 + $0x650] sm:$0xff] }
 0x409   : > { %v1792_v23 = vld [vmem:[#allocation8 + $0x670] sm:$0xff] }
 0x40a   : > { %9043 = vmatpush2.bf16.msra.mxu1 %v12955_v36  ;;  %9068 = vmatpush1.bf16.msra.mxu0 %v13019_v20  ;;  %v1876_v36 = vld [vmem:[#allocation8 + $0x910] sm:$0xff] }
 0x40b   : > { %9044 = vmatprep.subr.bf16.mxu1 %v12948_v53  ;;  %9069 = vmatprep.subr.bf16.mxu0 %v13012_v55  ;;  %v1880_v20 = vld [vmem:[#allocation8 + $0x930] sm:$0xff]  ;;  %v13107_v53 = vcombine.low %v1820_v54, %v1824_v0  ;;  %v13171_v55 = vcombine.low %v1884_v51, %v1888_v48 }
 0x40c   : > { %v13164_v1 = vcombine.high %v1876_v36, %v1880_v20  ;;  %v1780_v51 = vld [vmem:[#allocation8 + $0x610] sm:$0xff] }
 0x40d   : > { %v1784_v48 = vld [vmem:[#allocation8 + $0x630] sm:$0xff] }
 0x40e   : > { %9045 = vmatpush2.bf16.msra.mxu1 %v12947_v14  ;;  %9070 = vmatpush1.bf16.msra.mxu0 %v13011_v39  ;;  %v1808_v14 = vld [vmem:[#allocation8 + $0x6f0] sm:$0xff] }
 0x40f   : > { %9046 = vmatprep.subr.bf16.mxu1 %v12940_v10  ;;  %9071 = vmatprep.subr.bf16.mxu0 %v13004_v3  ;;  %v1868_v39 = vld [vmem:[#allocation8 + $0x8d0] sm:$0xff]  ;;  %v13163_v3 = vcombine.low %v1876_v36, %v1880_v20  ;;  %v13092_v5 = vcombine.high %v1804_v60, %v1808_v14 }
 0x410   : > { %v1872_v10 = vld [vmem:[#allocation8 + $0x8f0] sm:$0xff] }
 0x411   : > { %v13156_v21 = vcombine.high %v1868_v39, %v1872_v10  ;;  %v2028_v36 = vld [vmem:[#allocation8 + $0xdd0] sm:$0xff] }
 0x412   : > { %9047 = vmatpush2.bf16.msra.mxu1 %v12939_v12  ;;  %9072 = vmatpush1.bf16.msra.mxu0 %v13003_v15  ;;  %v1860_v12 = vld [vmem:[#allocation8 + $0x890] sm:$0xff] }
 0x413   : > { %9073 = vmatprep.subr.bf16.mxu0 %v13124_v17  ;;  %9098 = vmatprep.subr.bf16.mxu1 %v13188_v22  ;;  %v1864_v15 = vld [vmem:[#allocation8 + $0x8b0] sm:$0xff]  ;;  %v13091_v17 = vcombine.low %v1804_v60, %v1808_v14  ;;  %v13155_v22 = vcombine.low %v1868_v39, %v1872_v10 }
 0x414   : > { %v13148_v26 = vcombine.high %v1860_v12, %v1864_v15  ;;  %v13147_v54 = vcombine.low %v1860_v12, %v1864_v15  ;;  %v2032_v20 = vld [vmem:[#allocation8 + $0xdf0] sm:$0xff] }
 0x415   : > { %v8804_v41 = vpop.f32.mrf.mxu1  ;;  %9049 = vmatmul.mubr.bf16.vlgmr.msra.gmra.mxu1 %v15869_v63  ;;  %v2020_v60 = vld [vmem:[#allocation8 + $0xd90] sm:$0xff]  ;;  %v13315_v10 = vcombine.low %v2028_v36, %v2032_v20 }
 0x416   : > { %v16021_v61 = vadd.f32 %v8804_v41, %v16013_v4  ;;  %9074 = vmatpush2.bf16.msra.mxu0 %v13123_v24  ;;  %9099 = vmatpush1.bf16.msra.mxu1 %v13187_v34  ;;  %v1852_v24 = vld [vmem:[#allocation8 + $0x850] sm:$0xff] }
 0x417   : > { %9130 = vmatprep.mubr.bf16.mxu1 %v15873_v8  ;;  %v8806_v38 = vpop.f32.mrf.mxu1  ;;  %9075 = vmatprep.subr.bf16.mxu0 %v13116_v33  ;;  %v1856_v34 = vld [vmem:[#allocation8 + $0x870] sm:$0xff]  ;;  %v13083_v33 = vcombine.low %v1796_v16, %v1800_v57 }
 0x418   : > { %v16025_v47 = vadd.f32 %v8806_v38, %v16017_v6  ;;  %9100 = vmatprep.subr.bf16.mxu1 %v13180_v27  ;;  %v13099_v6 = vcombine.low %v1812_v46, %v1816_v13  ;;  %v13076_v27 = vcombine.high %v1788_v43, %v1792_v23  ;;  %v13140_v0 = vcombine.high %v1852_v24, %v1856_v34  ;;  %v1844_v41 = vld [vmem:[#allocation8 + $0x810] sm:$0xff] }
 0x419   : > { %v8808_v4 = vpop.f32.mrf.mxu1  ;;  %v13139_v38 = vcombine.low %v1852_v24, %v1856_v34  ;;  %v1964_v46 = vld [vmem:[#allocation8 + $0xbd0] sm:$0xff] }
 0x41a   : > { %9076 = vmatpush2.bf16.msra.mxu0 %v13115_v35  ;;  %9101 = vmatpush1.bf16.msra.mxu1 %v13179_v11  ;;  %v1848_v35 = vld [vmem:[#allocation8 + $0x830] sm:$0xff]  ;;  %v13075_v11 = vcombine.low %v1788_v43, %v1792_v23  ;;  %v13067_v4 = vcombine.low %v1780_v51, %v1784_v48 }
 0x41b   : > { %v8809_v30 = vpop.f32.mrf.mxu1  ;;  %9077 = vmatprep.subr.bf16.mxu0 %v13108_v52  ;;  %9102 = vmatprep.subr.bf16.mxu1 %v13172_v44  ;;  %v13068_v52 = vcombine.high %v1780_v51, %v1784_v48  ;;  %v13132_v44 = vcombine.high %v1844_v41, %v1848_v35  ;;  %v1968_v13 = vld [vmem:[#allocation8 + $0xbf0] sm:$0xff] }
 0x41c   : > { %v13316_v30 = vcombine.high %v2028_v36, %v2032_v20  ;;  %v2024_v14 = vld [vmem:[#allocation8 + $0xdb0] sm:$0xff]  ;;  %v13251_v39 = vcombine.low %v1964_v46, %v1968_v13 }
 0x41d   : > { %v2012_v16 = vld [vmem:[#allocation8 + $0xd50] sm:$0xff] }
 0x41e   : > { %9078 = vmatpush2.bf16.msra.mxu0 %v13107_v53  ;;  %9103 = vmatpush1.bf16.msra.mxu1 %v13171_v55  ;;  %v13131_v53 = vcombine.low %v1844_v41, %v1848_v35  ;;  %v13252_v55 = vcombine.high %v1964_v46, %v1968_v13  ;;  %v2016_v57 = vld [vmem:[#allocation8 + $0xd70] sm:$0xff] }
 0x41f   : > { %9079 = vmatprep.subr.bf16.mxu0 %v13100_v59  ;;  %9104 = vmatprep.subr.bf16.mxu1 %v13164_v1  ;;  %v1956_v59 = vld [vmem:[#allocation8 + $0xb90] sm:$0xff]  ;;  %v13300_v43 = vcombine.high %v2012_v16, %v2016_v57 }
 0x420   : > { %v1960_v1 = vld [vmem:[#allocation8 + $0xbb0] sm:$0xff] }
 0x421   : > { %v1940_v23 = vld [vmem:[#allocation8 + $0xb10] sm:$0xff] }
 0x422   : > { %9080 = vmatpush2.bf16.msra.mxu0 %v13099_v6  ;;  %9105 = vmatpush1.bf16.msra.mxu1 %v13163_v3  ;;  %v13244_v6 = vcombine.high %v1956_v59, %v1960_v1  ;;  %v1948_v3 = vld [vmem:[#allocation8 + $0xb50] sm:$0xff] }
 0x423   : > { %9081 = vmatprep.subr.bf16.mxu0 %v13092_v5  ;;  %9106 = vmatprep.subr.bf16.mxu1 %v13156_v21  ;;  %v13308_v5 = vcombine.high %v2020_v60, %v2024_v14  ;;  %v1952_v21 = vld [vmem:[#allocation8 + $0xb70] sm:$0xff] }
 0x424   : > { %v1944_v34 = vld [vmem:[#allocation8 + $0xb30] sm:$0xff] }
 0x425   : > { %v13228_v48 = vcombine.high %v1940_v23, %v1944_v34  ;;  %v1932_v35 = vld [vmem:[#allocation8 + $0xad0] sm:$0xff] }
 0x426   : > { %9082 = vmatpush2.bf16.msra.mxu0 %v13091_v17  ;;  %9107 = vmatpush1.bf16.msra.mxu1 %v13155_v22  ;;  %v13243_v17 = vcombine.low %v1956_v59, %v1960_v1  ;;  %v13307_v22 = vcombine.low %v2020_v60, %v2024_v14  ;;  %v1924_v36 = vld [vmem:[#allocation8 + $0xa90] sm:$0xff] }
 0x427   : > { %9083 = vmatprep.subr.bf16.mxu0 %v13084_v18  ;;  %9108 = vmatprep.subr.bf16.mxu1 %v13148_v26  ;;  %v13236_v26 = vcombine.high %v1948_v3, %v1952_v21  ;;  %v1928_v20 = vld [vmem:[#allocation8 + $0xab0] sm:$0xff] }
 0x428   : > { %v13212_v59 = vcombine.high %v1924_v36, %v1928_v20  ;;  %v1916_v60 = vld [vmem:[#allocation8 + $0xa50] sm:$0xff] }
 0x429   : > { %v1920_v14 = vld [vmem:[#allocation8 + $0xa70] sm:$0xff] }
 0x42a   : > { %9084 = vmatpush2.bf16.msra.mxu0 %v13083_v33  ;;  %9109 = vmatpush1.bf16.msra.mxu1 %v13147_v54  ;;  %v2004_v33 = vld [vmem:[#allocation8 + $0xd10] sm:$0xff] }
 0x42b   : > { %9085 = vmatprep.subr.bf16.mxu0 %v13076_v27  ;;  %9110 = vmatprep.subr.bf16.mxu1 %v13140_v0  ;;  %v2008_v54 = vld [vmem:[#allocation8 + $0xd30] sm:$0xff]  ;;  %v13235_v27 = vcombine.low %v1948_v3, %v1952_v21  ;;  %v13299_v0 = vcombine.low %v2012_v16, %v2016_v57 }
 0x42c   : > { %v13292_v41 = vcombine.high %v2004_v33, %v2008_v54  ;;  %v1908_v16 = vld [vmem:[#allocation8 + $0xa10] sm:$0xff] }
 0x42d   : > { %v1912_v57 = vld [vmem:[#allocation8 + $0xa30] sm:$0xff] }
 0x42e   : > { %9086 = vmatpush2.bf16.msra.mxu0 %v13075_v11  ;;  %9111 = vmatpush1.bf16.msra.mxu1 %v13139_v38  ;;  %v1936_v11 = vld [vmem:[#allocation8 + $0xaf0] sm:$0xff] }
 0x42f   : > { %9087 = vmatprep.subr.bf16.mxu0 %v13068_v52  ;;  %9112 = vmatprep.subr.bf16.mxu1 %v13132_v44  ;;  %v1996_v38 = vld [vmem:[#allocation8 + $0xcd0] sm:$0xff]  ;;  %v13291_v44 = vcombine.low %v2004_v33, %v2008_v54  ;;  %v13220_v46 = vcombine.high %v1932_v35, %v1936_v11 }
 0x430   : > { %v2000_v52 = vld [vmem:[#allocation8 + $0xcf0] sm:$0xff] }
 0x431   : > { %v13284_v13 = vcombine.high %v1996_v38, %v2000_v52  ;;  %v2156_v33 = vld [vmem:[#allocation8 + $0x11d0] sm:$0xff] }
 0x432   : > { %9088 = vmatpush2.bf16.msra.mxu0 %v13067_v4  ;;  %9113 = vmatpush1.bf16.msra.mxu1 %v13131_v53  ;;  %v1988_v4 = vld [vmem:[#allocation8 + $0xc90] sm:$0xff] }
 0x433   : > { %9114 = vmatprep.subr.bf16.mxu1 %v13252_v55  ;;  %9139 = vmatprep.subr.bf16.mxu0 %v13316_v30  ;;  %v1992_v53 = vld [vmem:[#allocation8 + $0xcb0] sm:$0xff]  ;;  %v13219_v55 = vcombine.low %v1932_v35, %v1936_v11  ;;  %v13283_v30 = vcombine.low %v1996_v38, %v2000_v52 }
 0x434   : > { %v13276_v1 = vcombine.high %v1988_v4, %v1992_v53  ;;  %v13275_v3 = vcombine.low %v1988_v4, %v1992_v53  ;;  %v2160_v54 = vld [vmem:[#allocation8 + $0x11f0] sm:$0xff] }
 0x435   : > { %v8845_v12 = vpop.f32.mrf.mxu0  ;;  %9090 = vmatmul.mubr.bf16.vlgmr.msra.gmra.mxu0 %v15883_v50  ;;  %v2148_v35 = vld [vmem:[#allocation8 + $0x1190] sm:$0xff]  ;;  %v13443_v52 = vcombine.low %v2156_v33, %v2160_v54 }
 0x436   : > { %v16029_v15 = vadd.f32 %v8845_v12, %v16021_v61  ;;  %9115 = vmatpush2.bf16.msra.mxu1 %v13251_v39  ;;  %9140 = vmatpush1.bf16.msra.mxu0 %v13315_v10  ;;  %v1980_v39 = vld [vmem:[#allocation8 + $0xc50] sm:$0xff] }
 0x437   : > { %9171 = vmatprep.mubr.bf16.mxu0 %v15887_v42  ;;  %v8847_v18 = vpop.f32.mrf.mxu0  ;;  %9116 = vmatprep.subr.bf16.mxu1 %v13244_v6  ;;  %v1984_v10 = vld [vmem:[#allocation8 + $0xc70] sm:$0xff]  ;;  %v13211_v6 = vcombine.low %v1924_v36, %v1928_v20 }
 0x438   : > { %v16033_v24 = vadd.f32 %v8847_v18, %v16025_v47  ;;  %9141 = vmatprep.subr.bf16.mxu0 %v13308_v5  ;;  %v13227_v47 = vcombine.low %v1940_v23, %v1944_v34  ;;  %v13204_v5 = vcombine.high %v1916_v60, %v1920_v14  ;;  %v13268_v21 = vcombine.high %v1980_v39, %v1984_v10  ;;  %v1972_v12 = vld [vmem:[#allocation8 + $0xc10] sm:$0xff] }
 0x439   : > { %v8849_v61 = vpop.f32.mrf.mxu0  ;;  %v13267_v18 = vcombine.low %v1980_v39, %v1984_v10  ;;  %v2092_v23 = vld [vmem:[#allocation8 + $0xfd0] sm:$0xff] }
 0x43a   : > { %9117 = vmatpush2.bf16.msra.mxu1 %v13243_v17  ;;  %9142 = vmatpush1.bf16.msra.mxu0 %v13307_v22  ;;  %v1976_v17 = vld [vmem:[#allocation8 + $0xc30] sm:$0xff]  ;;  %v13203_v22 = vcombine.low %v1916_v60, %v1920_v14  ;;  %v13195_v61 = vcombine.low %v1908_v16, %v1912_v57 }
 0x43b   : > { %v8850_v51 = vpop.f32.mrf.mxu0  ;;  %9118 = vmatprep.subr.bf16.mxu1 %v13236_v26  ;;  %9143 = vmatprep.subr.bf16.mxu0 %v13300_v43  ;;  %v13196_v26 = vcombine.high %v1908_v16, %v1912_v57  ;;  %v13260_v43 = vcombine.high %v1972_v12, %v1976_v17  ;;  %v2096_v34 = vld [vmem:[#allocation8 + $0xff0] sm:$0xff] }
 0x43c   : > { %v13444_v51 = vcombine.high %v2156_v33, %v2160_v54  ;;  %v2152_v11 = vld [vmem:[#allocation8 + $0x11b0] sm:$0xff]  ;;  %v13379_v38 = vcombine.low %v2092_v23, %v2096_v34 }
 0x43d   : > { %v2140_v36 = vld [vmem:[#allocation8 + $0x1150] sm:$0xff] }
 0x43e   : > { %9119 = vmatpush2.bf16.msra.mxu1 %v13235_v27  ;;  %9144 = vmatpush1.bf16.msra.mxu0 %v13299_v0  ;;  %v13259_v27 = vcombine.low %v1972_v12, %v1976_v17  ;;  %v13380_v0 = vcombine.high %v2092_v23, %v2096_v34  ;;  %v2144_v20 = vld [vmem:[#allocation8 + $0x1170] sm:$0xff] }
 0x43f   : > { %9120 = vmatprep.subr.bf16.mxu1 %v13228_v48  ;;  %9145 = vmatprep.subr.bf16.mxu0 %v13292_v41  ;;  %v2084_v48 = vld [vmem:[#allocation8 + $0xf90] sm:$0xff]  ;;  %v13428_v60 = vcombine.high %v2140_v36, %v2144_v20 }
 0x440   : > { %v2088_v41 = vld [vmem:[#allocation8 + $0xfb0] sm:$0xff] }
 0x441   : > { %v2068_v14 = vld [vmem:[#allocation8 + $0xf10] sm:$0xff] }
 0x442   : > { %9121 = vmatpush2.bf16.msra.mxu1 %v13227_v47  ;;  %9146 = vmatpush1.bf16.msra.mxu0 %v13291_v44  ;;  %v13372_v47 = vcombine.high %v2084_v48, %v2088_v41  ;;  %v2076_v44 = vld [vmem:[#allocation8 + $0xf50] sm:$0xff] }
 0x443   : > { %9122 = vmatprep.subr.bf16.mxu1 %v13220_v46  ;;  %9147 = vmatprep.subr.bf16.mxu0 %v13284_v13  ;;  %v13436_v46 = vcombine.high %v2148_v35, %v2152_v11  ;;  %v2080_v13 = vld [vmem:[#allocation8 + $0xf70] sm:$0xff] }
 0x444   : > { %v2072_v10 = vld [vmem:[#allocation8 + $0xf30] sm:$0xff] }
 0x445   : > { %v13356_v57 = vcombine.high %v2068_v14, %v2072_v10  ;;  %v2060_v17 = vld [vmem:[#allocation8 + $0xed0] sm:$0xff] }
 0x446   : > { %9123 = vmatpush2.bf16.msra.mxu1 %v13219_v55  ;;  %9148 = vmatpush1.bf16.msra.mxu0 %v13283_v30  ;;  %v13371_v55 = vcombine.low %v2084_v48, %v2088_v41  ;;  %v13435_v30 = vcombine.low %v2148_v35, %v2152_v11  ;;  %v2052_v33 = vld [vmem:[#allocation8 + $0xe90] sm:$0xff] }
 0x447   : > { %9124 = vmatprep.subr.bf16.mxu1 %v13212_v59  ;;  %9149 = vmatprep.subr.bf16.mxu0 %v13276_v1  ;;  %v13364_v1 = vcombine.high %v2076_v44, %v2080_v13  ;;  %v2056_v54 = vld [vmem:[#allocation8 + $0xeb0] sm:$0xff] }
 0x448   : > { %v13340_v48 = vcombine.high %v2052_v33, %v2056_v54  ;;  %v2044_v35 = vld [vmem:[#allocation8 + $0xe50] sm:$0xff] }
 0x449   : > { %v2048_v11 = vld [vmem:[#allocation8 + $0xe70] sm:$0xff] }
 0x44a   : > { %9125 = vmatpush2.bf16.msra.mxu1 %v13211_v6  ;;  %9150 = vmatpush1.bf16.msra.mxu0 %v13275_v3  ;;  %v2132_v6 = vld [vmem:[#allocation8 + $0x1110] sm:$0xff] }
 0x44b   : > { %9126 = vmatprep.subr.bf16.mxu1 %v13204_v5  ;;  %9151 = vmatprep.subr.bf16.mxu0 %v13268_v21  ;;  %v2136_v3 = vld [vmem:[#allocation8 + $0x1130] sm:$0xff]  ;;  %v13363_v5 = vcombine.low %v2076_v44, %v2080_v13  ;;  %v13427_v21 = vcombine.low %v2140_v36, %v2144_v20 }
 0x44c   : > { %v13420_v12 = vcombine.high %v2132_v6, %v2136_v3  ;;  %v2036_v36 = vld [vmem:[#allocation8 + $0xe10] sm:$0xff] }
 0x44d   : > { %v2040_v20 = vld [vmem:[#allocation8 + $0xe30] sm:$0xff] }
 0x44e   : > { %9127 = vmatpush2.bf16.msra.mxu1 %v13203_v22  ;;  %9152 = vmatpush1.bf16.msra.mxu0 %v13267_v18  ;;  %v2064_v22 = vld [vmem:[#allocation8 + $0xef0] sm:$0xff] }
 0x44f   : > { %9128 = vmatprep.subr.bf16.mxu1 %v13196_v26  ;;  %9153 = vmatprep.subr.bf16.mxu0 %v13260_v43  ;;  %v2124_v18 = vld [vmem:[#allocation8 + $0x10d0] sm:$0xff]  ;;  %v13419_v43 = vcombine.low %v2132_v6, %v2136_v3  ;;  %v13348_v23 = vcombine.high %v2060_v17, %v2064_v22 }
 0x450   : > { %v2128_v26 = vld [vmem:[#allocation8 + $0x10f0] sm:$0xff] }
 0x451   : > { %v13412_v34 = vcombine.high %v2124_v18, %v2128_v26  ;;  %v2284_v6 = vld [vmem:[#allocation8 + $0x15d0] sm:$0xff] }
 0x452   : > { %9129 = vmatpush2.bf16.msra.mxu1 %v13195_v61  ;;  %9154 = vmatpush1.bf16.msra.mxu0 %v13259_v27  ;;  %v2116_v61 = vld [vmem:[#allocation8 + $0x1090] sm:$0xff] }
 0x453   : > { %9155 = vmatprep.subr.bf16.mxu0 %v13380_v0  ;;  %9180 = vmatprep.subr.bf16.mxu1 %v13444_v51  ;;  %v2120_v27 = vld [vmem:[#allocation8 + $0x10b0] sm:$0xff]  ;;  %v13347_v0 = vcombine.low %v2060_v17, %v2064_v22  ;;  %v13411_v51 = vcombine.low %v2124_v18, %v2128_v26 }
 0x454   : > { %v13404_v41 = vcombine.high %v2116_v61, %v2120_v27  ;;  %v13403_v44 = vcombine.low %v2116_v61, %v2120_v27  ;;  %v2288_v3 = vld [vmem:[#allocation8 + $0x15f0] sm:$0xff] }
 0x455   : > { %v8886_v4 = vpop.f32.mrf.mxu1  ;;  %9131 = vmatmul.mubr.bf16.vlgmr.msra.gmra.mxu1 %v15897_v62  ;;  %v2276_v17 = vld [vmem:[#allocation8 + $0x1590] sm:$0xff]  ;;  %v13571_v26 = vcombine.low %v2284_v6, %v2288_v3 }
 0x456   : > { %v16037_v53 = vadd.f32 %v8886_v4, %v16029_v15  ;;  %9156 = vmatpush2.bf16.msra.mxu0 %v13379_v38  ;;  %9181 = vmatpush1.bf16.msra.mxu1 %v13443_v52  ;;  %v2108_v38 = vld [vmem:[#allocation8 + $0x1050] sm:$0xff] }
 0x457   : > { %9212 = vmatprep.mubr.bf16.mxu1 %v15901_v7  ;;  %v8888_v59 = vpop.f32.mrf.mxu1  ;;  %9157 = vmatprep.subr.bf16.mxu0 %v13372_v47  ;;  %v2112_v52 = vld [vmem:[#allocation8 + $0x1070] sm:$0xff]  ;;  %v13339_v47 = vcombine.low %v2052_v33, %v2056_v54 }
 0x458   : > { %v16041_v39 = vadd.f32 %v8888_v59, %v16033_v24  ;;  %9182 = vmatprep.subr.bf16.mxu1 %v13436_v46  ;;  %v13355_v24 = vcombine.low %v2068_v14, %v2072_v10  ;;  %v13332_v46 = vcombine.high %v2044_v35, %v2048_v11  ;;  %v13396_v13 = vcombine.high %v2108_v38, %v2112_v52  ;;  %v2100_v4 = vld [vmem:[#allocation8 + $0x1010] sm:$0xff] }
 0x459   : > { %v8890_v15 = vpop.f32.mrf.mxu1  ;;  %v13395_v59 = vcombine.low %v2108_v38, %v2112_v52  ;;  %v2220_v14 = vld [vmem:[#allocation8 + $0x13d0] sm:$0xff] }
 0x45a   : > { %9158 = vmatpush2.bf16.msra.mxu0 %v13371_v55  ;;  %9183 = vmatpush1.bf16.msra.mxu1 %v13435_v30  ;;  %v2104_v55 = vld [vmem:[#allocation8 + $0x1030] sm:$0xff]  ;;  %v13331_v30 = vcombine.low %v2044_v35, %v2048_v11  ;;  %v13323_v15 = vcombine.low %v2036_v36, %v2040_v20 }
 0x45b   : > { %v8891_v16 = vpop.f32.mrf.mxu1  ;;  %9159 = vmatprep.subr.bf16.mxu0 %v13364_v1  ;;  %9184 = vmatprep.subr.bf16.mxu1 %v13428_v60  ;;  %v13324_v1 = vcombine.high %v2036_v36, %v2040_v20  ;;  %v13388_v60 = vcombine.high %v2100_v4, %v2104_v55  ;;  %v2224_v10 = vld [vmem:[#allocation8 + $0x13f0] sm:$0xff] }
 0x45c   : > { %v13572_v16 = vcombine.high %v2284_v6, %v2288_v3  ;;  %v2280_v22 = vld [vmem:[#allocation8 + $0x15b0] sm:$0xff]  ;;  %v13507_v18 = vcombine.low %v2220_v14, %v2224_v10 }
 0x45d   : > { %v2268_v33 = vld [vmem:[#allocation8 + $0x1550] sm:$0xff] }
 0x45e   : > { %9160 = vmatpush2.bf16.msra.mxu0 %v13363_v5  ;;  %9185 = vmatpush1.bf16.msra.mxu1 %v13427_v21  ;;  %v13387_v5 = vcombine.low %v2100_v4, %v2104_v55  ;;  %v13508_v21 = vcombine.high %v2220_v14, %v2224_v10  ;;  %v2272_v54 = vld [vmem:[#allocation8 + $0x1570] sm:$0xff] }
 0x45f   : > { %9161 = vmatprep.subr.bf16.mxu0 %v13356_v57  ;;  %9186 = vmatprep.subr.bf16.mxu1 %v13420_v12  ;;  %v2212_v57 = vld [vmem:[#allocation8 + $0x1390] sm:$0xff]  ;;  %v13556_v35 = vcombine.high %v2268_v33, %v2272_v54 }
 0x460   : > { %v2216_v12 = vld [vmem:[#allocation8 + $0x13b0] sm:$0xff] }
 0x461   : > { %v2196_v11 = vld [vmem:[#allocation8 + $0x1310] sm:$0xff] }
 0x462   : > { %9162 = vmatpush2.bf16.msra.mxu0 %v13355_v24  ;;  %9187 = vmatpush1.bf16.msra.mxu1 %v13419_v43  ;;  %v13500_v24 = vcombine.high %v2212_v57, %v2216_v12  ;;  %v2204_v43 = vld [vmem:[#allocation8 + $0x1350] sm:$0xff] }
 0x463   : > { %9163 = vmatprep.subr.bf16.mxu0 %v13348_v23  ;;  %9188 = vmatprep.subr.bf16.mxu1 %v13412_v34  ;;  %v13564_v23 = vcombine.high %v2276_v17, %v2280_v22  ;;  %v2208_v34 = vld [vmem:[#allocation8 + $0x1370] sm:$0xff] }
 0x464   : > { %v2200_v52 = vld [vmem:[#allocation8 + $0x1330] sm:$0xff] }
 0x465   : > { %v13484_v20 = vcombine.high %v2196_v11, %v2200_v52  ;;  %v2188_v55 = vld [vmem:[#allocation8 + $0x12d0] sm:$0xff] }
 0x466   : > { %9164 = vmatpush2.bf16.msra.mxu0 %v13347_v0  ;;  %9189 = vmatpush1.bf16.msra.mxu1 %v13411_v51  ;;  %v13499_v0 = vcombine.low %v2212_v57, %v2216_v12  ;;  %v13563_v51 = vcombine.low %v2276_v17, %v2280_v22  ;;  %v2180_v6 = vld [vmem:[#allocation8 + $0x1290] sm:$0xff] }
 0x467   : > { %9165 = vmatprep.subr.bf16.mxu0 %v13340_v48  ;;  %9190 = vmatprep.subr.bf16.mxu1 %v13404_v41  ;;  %v13492_v41 = vcombine.high %v2204_v43, %v2208_v34  ;;  %v2184_v3 = vld [vmem:[#allocation8 + $0x12b0] sm:$0xff] }
 0x468   : > { %v13468_v57 = vcombine.high %v2180_v6, %v2184_v3  ;;  %v2172_v17 = vld [vmem:[#allocation8 + $0x1250] sm:$0xff] }
 0x469   : > { %v2176_v22 = vld [vmem:[#allocation8 + $0x1270] sm:$0xff] }
 0x46a   : > { %9166 = vmatpush2.bf16.msra.mxu0 %v13339_v47  ;;  %9191 = vmatpush1.bf16.msra.mxu1 %v13403_v44  ;;  %v2260_v47 = vld [vmem:[#allocation8 + $0x1510] sm:$0xff] }
 0x46b   : > { %9167 = vmatprep.subr.bf16.mxu0 %v13332_v46  ;;  %9192 = vmatprep.subr.bf16.mxu1 %v13396_v13  ;;  %v2264_v44 = vld [vmem:[#allocation8 + $0x1530] sm:$0xff]  ;;  %v13491_v46 = vcombine.low %v2204_v43, %v2208_v34  ;;  %v13555_v13 = vcombine.low %v2268_v33, %v2272_v54 }
 0x46c   : > { %v13548_v4 = vcombine.high %v2260_v47, %v2264_v44  ;;  %v2164_v33 = vld [vmem:[#allocation8 + $0x1210] sm:$0xff] }
 0x46d   : > { %v2168_v54 = vld [vmem:[#allocation8 + $0x1230] sm:$0xff] }
 0x46e   : > { %9168 = vmatpush2.bf16.msra.mxu0 %v13331_v30  ;;  %9193 = vmatpush1.bf16.msra.mxu1 %v13395_v59  ;;  %v2192_v30 = vld [vmem:[#allocation8 + $0x12f0] sm:$0xff] }
 0x46f   : > { %9169 = vmatprep.subr.bf16.mxu0 %v13324_v1  ;;  %9194 = vmatprep.subr.bf16.mxu1 %v13388_v60  ;;  %v2252_v59 = vld [vmem:[#allocation8 + $0x14d0] sm:$0xff]  ;;  %v13547_v60 = vcombine.low %v2260_v47, %v2264_v44  ;;  %v13476_v14 = vcombine.high %v2188_v55, %v2192_v30 }
 0x470   : > { %v2256_v1 = vld [vmem:[#allocation8 + $0x14f0] sm:$0xff] }
 0x471   : > { %v13540_v10 = vcombine.high %v2252_v59, %v2256_v1  ;;  %v2412_v47 = vld [vmem:[#allocation8 + $0x19d0] sm:$0xff] }
 0x472   : > { %9170 = vmatpush2.bf16.msra.mxu0 %v13323_v15  ;;  %9195 = vmatpush1.bf16.msra.mxu1 %v13387_v5  ;;  %v2244_v15 = vld [vmem:[#allocation8 + $0x1490] sm:$0xff] }
 0x473   : > { %9196 = vmatprep.subr.bf16.mxu1 %v13508_v21  ;;  %9221 = vmatprep.subr.bf16.mxu0 %v13572_v16  ;;  %v2248_v5 = vld [vmem:[#allocation8 + $0x14b0] sm:$0xff]  ;;  %v13475_v21 = vcombine.low %v2188_v55, %v2192_v30  ;;  %v13539_v16 = vcombine.low %v2252_v59, %v2256_v1 }
 0x474   : > { %v13532_v12 = vcombine.high %v2244_v15, %v2248_v5  ;;  %v13531_v43 = vcombine.low %v2244_v15, %v2248_v5  ;;  %v2416_v44 = vld [vmem:[#allocation8 + $0x19f0] sm:$0xff] }
 0x475   : > { %v8927_v61 = vpop.f32.mrf.mxu0  ;;  %9172 = vmatmul.mubr.bf16.vlgmr.msra.gmra.mxu0 %v15913_v31  ;;  %v2404_v55 = vld [vmem:[#allocation8 + $0x1990] sm:$0xff]  ;;  %v13699_v1 = vcombine.low %v2412_v47, %v2416_v44 }
 0x476   : > { %v16045_v27 = vadd.f32 %v8927_v61, %v16037_v53  ;;  %9197 = vmatpush2.bf16.msra.mxu1 %v13507_v18  ;;  %9222 = vmatpush1.bf16.msra.mxu0 %v13571_v26  ;;  %v2236_v18 = vld [vmem:[#allocation8 + $0x1450] sm:$0xff] }
 0x477   : > { %9253 = vmatprep.mubr.bf16.mxu0 %v15917_v40  ;;  %v8929_v48 = vpop.f32.mrf.mxu0  ;;  %9198 = vmatprep.subr.bf16.mxu1 %v13500_v24  ;;  %v2240_v26 = vld [vmem:[#allocation8 + $0x1470] sm:$0xff]  ;;  %v13467_v24 = vcombine.low %v2180_v6, %v2184_v3 }
 0x478   : > { %v16049_v38 = vadd.f32 %v8929_v48, %v16041_v39  ;;  %9223 = vmatprep.subr.bf16.mxu0 %v13564_v23  ;;  %v13483_v39 = vcombine.low %v2196_v11, %v2200_v52  ;;  %v13460_v23 = vcombine.high %v2172_v17, %v2176_v22  ;;  %v13524_v34 = vcombine.high %v2236_v18, %v2240_v26  ;;  %v2228_v61 = vld [vmem:[#allocation8 + $0x1410] sm:$0xff] }
 0x479   : > { %v8931_v53 = vpop.f32.mrf.mxu0  ;;  %v13523_v48 = vcombine.low %v2236_v18, %v2240_v26  ;;  %v2348_v11 = vld [vmem:[#allocation8 + $0x17d0] sm:$0xff] }
 0x47a   : > { %9199 = vmatpush2.bf16.msra.mxu1 %v13499_v0  ;;  %9224 = vmatpush1.bf16.msra.mxu0 %v13563_v51  ;;  %v2232_v0 = vld [vmem:[#allocation8 + $0x1430] sm:$0xff]  ;;  %v13459_v51 = vcombine.low %v2172_v17, %v2176_v22  ;;  %v13451_v53 = vcombine.low %v2164_v33, %v2168_v54 }
 0x47b   : > { %v8932_v36 = vpop.f32.mrf.mxu0  ;;  %9200 = vmatprep.subr.bf16.mxu1 %v13492_v41  ;;  %9225 = vmatprep.subr.bf16.mxu0 %v13556_v35  ;;  %v13452_v41 = vcombine.high %v2164_v33, %v2168_v54  ;;  %v13516_v35 = vcombine.high %v2228_v61, %v2232_v0  ;;  %v2352_v52 = vld [vmem:[#allocation8 + $0x17f0] sm:$0xff] }
 0x47c   : > { %v13700_v36 = vcombine.high %v2412_v47, %v2416_v44  ;;  %v2408_v30 = vld [vmem:[#allocation8 + $0x19b0] sm:$0xff]  ;;  %v13635_v59 = vcombine.low %v2348_v11, %v2352_v52 }
 0x47d   : > { %v2396_v6 = vld [vmem:[#allocation8 + $0x1950] sm:$0xff] }
 0x47e   : > { %9201 = vmatpush2.bf16.msra.mxu1 %v13491_v46  ;;  %9226 = vmatpush1.bf16.msra.mxu0 %v13555_v13  ;;  %v13515_v46 = vcombine.low %v2228_v61, %v2232_v0  ;;  %v13636_v13 = vcombine.high %v2348_v11, %v2352_v52  ;;  %v2400_v3 = vld [vmem:[#allocation8 + $0x1970] sm:$0xff] }
 0x47f   : > { %9202 = vmatprep.subr.bf16.mxu1 %v13484_v20  ;;  %9227 = vmatprep.subr.bf16.mxu0 %v13548_v4  ;;  %v2340_v20 = vld [vmem:[#allocation8 + $0x1790] sm:$0xff]  ;;  %v13684_v17 = vcombine.high %v2396_v6, %v2400_v3 }
 0x480   : > { %v2344_v4 = vld [vmem:[#allocation8 + $0x17b0] sm:$0xff] }
 0x481   : > { %v2324_v22 = vld [vmem:[#allocation8 + $0x1710] sm:$0xff] }
 0x482   : > { %9203 = vmatpush2.bf16.msra.mxu1 %v13483_v39  ;;  %9228 = vmatpush1.bf16.msra.mxu0 %v13547_v60  ;;  %v13628_v39 = vcombine.high %v2340_v20, %v2344_v4  ;;  %v2332_v60 = vld [vmem:[#allocation8 + $0x1750] sm:$0xff] }
 0x483   : > { %9204 = vmatprep.subr.bf16.mxu1 %v13476_v14  ;;  %9229 = vmatprep.subr.bf16.mxu0 %v13540_v10  ;;  %v13692_v14 = vcombine.high %v2404_v55, %v2408_v30  ;;  %v2336_v10 = vld [vmem:[#allocation8 + $0x1770] sm:$0xff] }
 0x484   : > { %v2328_v26 = vld [vmem:[#allocation8 + $0x1730] sm:$0xff] }
 0x485   : > { %v13612_v54 = vcombine.high %v2324_v22, %v2328_v26  ;;  %v2316_v0 = vld [vmem:[#allocation8 + $0x16d0] sm:$0xff] }
 0x486   : > { %9205 = vmatpush2.bf16.msra.mxu1 %v13475_v21  ;;  %9230 = vmatpush1.bf16.msra.mxu0 %v13539_v16  ;;  %v13627_v21 = vcombine.low %v2340_v20, %v2344_v4  ;;  %v13691_v16 = vcombine.low %v2404_v55, %v2408_v30  ;;  %v2308_v47 = vld [vmem:[#allocation8 + $0x1690] sm:$0xff] }
 0x487   : > { %9206 = vmatprep.subr.bf16.mxu1 %v13468_v57  ;;  %9231 = vmatprep.subr.bf16.mxu0 %v13532_v12  ;;  %v13620_v12 = vcombine.high %v2332_v60, %v2336_v10  ;;  %v2312_v44 = vld [vmem:[#allocation8 + $0x16b0] sm:$0xff] }
 0x488   : > { %v13596_v20 = vcombine.high %v2308_v47, %v2312_v44  ;;  %v2300_v55 = vld [vmem:[#allocation8 + $0x1650] sm:$0xff] }
 0x489   : > { %v2304_v30 = vld [vmem:[#allocation8 + $0x1670] sm:$0xff] }
 0x48a   : > { %9207 = vmatpush2.bf16.msra.mxu1 %v13467_v24  ;;  %9232 = vmatpush1.bf16.msra.mxu0 %v13531_v43  ;;  %v2388_v24 = vld [vmem:[#allocation8 + $0x1910] sm:$0xff] }
 0x48b   : > { %9208 = vmatprep.subr.bf16.mxu1 %v13460_v23  ;;  %9233 = vmatprep.subr.bf16.mxu0 %v13524_v34  ;;  %v2392_v43 = vld [vmem:[#allocation8 + $0x1930] sm:$0xff]  ;;  %v13619_v23 = vcombine.low %v2332_v60, %v2336_v10  ;;  %v13683_v34 = vcombine.low %v2396_v6, %v2400_v3 }
 0x48c   : > { %v13676_v61 = vcombine.high %v2388_v24, %v2392_v43  ;;  %v2292_v6 = vld [vmem:[#allocation8 + $0x1610] sm:$0xff] }
 0x48d   : > { %v2296_v3 = vld [vmem:[#allocation8 + $0x1630] sm:$0xff] }
 0x48e   : > { %9209 = vmatpush2.bf16.msra.mxu1 %v13459_v51  ;;  %9234 = vmatpush1.bf16.msra.mxu0 %v13523_v48  ;;  %v2320_v51 = vld [vmem:[#allocation8 + $0x16f0] sm:$0xff] }
 0x48f   : > { %9210 = vmatprep.subr.bf16.mxu1 %v13452_v41  ;;  %9235 = vmatprep.subr.bf16.mxu0 %v13516_v35  ;;  %v2380_v48 = vld [vmem:[#allocation8 + $0x18d0] sm:$0xff]  ;;  %v13675_v35 = vcombine.low %v2388_v24, %v2392_v43  ;;  %v13604_v11 = vcombine.high %v2316_v0, %v2320_v51  ;;  %v1645_v24 = vld [vmem:[#allocation8 + $0x1d8] sm:$0xff] }
 0x490   : > { %v2384_v41 = vld [vmem:[#allocation8 + $0x18f0] sm:$0xff]  ;;  %v1649_v43 = vld [vmem:[#allocation8 + $0x1f8] sm:$0xff] }
 0x491   : > { %v13668_v52 = vcombine.high %v2380_v48, %v2384_v41 }
 0x492   : > { %9211 = vmatpush2.bf16.msra.mxu1 %v13451_v53  ;;  %9236 = vmatpush1.bf16.msra.mxu0 %v13515_v46  ;;  %v2372_v53 = vld [vmem:[#allocation8 + $0x1890] sm:$0xff] }
 0x493   : > { %9237 = vmatprep.subr.bf16.mxu0 %v13636_v13  ;;  %9262 = vmatprep.subr.bf16.mxu1 %v13700_v36  ;;  %v2376_v46 = vld [vmem:[#allocation8 + $0x18b0] sm:$0xff]  ;;  %v13603_v13 = vcombine.low %v2316_v0, %v2320_v51  ;;  %v13667_v36 = vcombine.low %v2380_v48, %v2384_v41  ;;  %v1637_v0 = vld [vmem:[#allocation8 + $0x198] sm:$0xff]  ;;  %v12933_v41 = vcombine.low %v1645_v24, %v1649_v43 }
 0x494   : > { %v13660_v4 = vcombine.high %v2372_v53, %v2376_v46  ;;  %v13659_v60 = vcombine.low %v2372_v53, %v2376_v46  ;;  %v1641_v51 = vld [vmem:[#allocation8 + $0x1b8] sm:$0xff] }
 0x495   : > { %v8968_v15 = vpop.f32.mrf.mxu1  ;;  %9213 = vmatmul.mubr.bf16.vlgmr.msra.gmra.mxu1 %v15927_v9 }
 0x496   : > { %v16053_v5 = vadd.f32 %v8968_v15, %v16045_v27  ;;  %9238 = vmatpush2.bf16.msra.mxu0 %v13635_v59  ;;  %9263 = vmatpush1.bf16.msra.mxu1 %v13699_v1  ;;  %v2364_v59 = vld [vmem:[#allocation8 + $0x1850] sm:$0xff] }
 0x497   : > { %9294 = vmatprep.mubr.bf16.mxu1 %v15931_v19  ;;  %v8970_v57 = vpop.f32.mrf.mxu1  ;;  %9239 = vmatprep.subr.bf16.mxu0 %v13628_v39  ;;  %v2368_v1 = vld [vmem:[#allocation8 + $0x1870] sm:$0xff]  ;;  %v13595_v39 = vcombine.low %v2308_v47, %v2312_v44  ;;  %v1629_v47 = vld [vmem:[#allocation8 + $0x158] sm:$0xff] }
 0x498   : > { %v16057_v18 = vadd.f32 %v8970_v57, %v16049_v38  ;;  %9264 = vmatprep.subr.bf16.mxu1 %v13692_v14  ;;  %v13611_v38 = vcombine.low %v2324_v22, %v2328_v26  ;;  %v13588_v14 = vcombine.high %v2300_v55, %v2304_v30  ;;  %v13652_v10 = vcombine.high %v2364_v59, %v2368_v1  ;;  %v2356_v15 = vld [vmem:[#allocation8 + $0x1810] sm:$0xff]  ;;  %v1633_v44 = vld [vmem:[#allocation8 + $0x178] sm:$0xff] }
 0x499   : > { %v8972_v27 = vpop.f32.mrf.mxu1  ;;  %v13651_v57 = vcombine.low %v2364_v59, %v2368_v1  ;;  %v2476_v22 = vld [vmem:[#allocation8 + $0x1bd0] sm:$0xff] }
 0x49a   : > { %9240 = vmatpush2.bf16.msra.mxu0 %v13627_v21  ;;  %9265 = vmatpush1.bf16.msra.mxu1 %v13691_v16  ;;  %v2360_v21 = vld [vmem:[#allocation8 + $0x1830] sm:$0xff]  ;;  %v13587_v16 = vcombine.low %v2300_v55, %v2304_v30  ;;  %v13579_v27 = vcombine.low %v2292_v6, %v2296_v3  ;;  %v12918_v55 = vcombine.high %v1629_v47, %v1633_v44 }
 0x49b   : > { %v8973_v33 = vpop.f32.mrf.mxu1  ;;  %9241 = vmatprep.subr.bf16.mxu0 %v13620_v12  ;;  %9266 = vmatprep.subr.bf16.mxu1 %v13684_v17  ;;  %v13580_v12 = vcombine.high %v2292_v6, %v2296_v3  ;;  %v13644_v17 = vcombine.high %v2356_v15, %v2360_v21  ;;  %v2480_v26 = vld [vmem:[#allocation8 + $0x1bf0] sm:$0xff] }
 0x49c   : > { %v12934_v33 = vcombine.high %v1645_v24, %v1649_v43  ;;  %v13763_v48 = vcombine.low %v2476_v22, %v2480_v26  ;;  %v2452_v30 = vld [vmem:[#allocation8 + $0x1b10] sm:$0xff]  ;;  %v1605_v43 = vld [vmem:[#allocation8 + $0x98] sm:$0xff] }
 0x49d   : > { %v2456_v1 = vld [vmem:[#allocation8 + $0x1b30] sm:$0xff] }
 0x49e   : > { %9242 = vmatpush2.bf16.msra.mxu0 %v13619_v23  ;;  %9267 = vmatpush1.bf16.msra.mxu1 %v13683_v34  ;;  %v13643_v23 = vcombine.low %v2356_v15, %v2360_v21  ;;  %v13764_v34 = vcombine.high %v2476_v22, %v2480_v26  ;;  %v2444_v15 = vld [vmem:[#allocation8 + $0x1ad0] sm:$0xff] }
 0x49f   : > { %9243 = vmatprep.subr.bf16.mxu0 %v13612_v54  ;;  %9268 = vmatprep.subr.bf16.mxu1 %v13676_v61  ;;  %v2468_v54 = vld [vmem:[#allocation8 + $0x1b90] sm:$0xff] }
 0x4a0   : > { %v2472_v61 = vld [vmem:[#allocation8 + $0x1bb0] sm:$0xff] }
 0x4a1   : > { %v2448_v21 = vld [vmem:[#allocation8 + $0x1af0] sm:$0xff] }
 0x4a2   : > { %9244 = vmatpush2.bf16.msra.mxu0 %v13611_v38  ;;  %9269 = vmatpush1.bf16.msra.mxu1 %v13675_v35  ;;  %v13756_v38 = vcombine.high %v2468_v54, %v2472_v61  ;;  %v2460_v35 = vld [vmem:[#allocation8 + $0x1b50] sm:$0xff] }
 0x4a3   : > { %9245 = vmatprep.subr.bf16.mxu0 %v13604_v11  ;;  %9270 = vmatprep.subr.bf16.mxu1 %v13668_v52  ;;  %v12926_v11 = vcombine.high %v1637_v0, %v1641_v51  ;;  %v2464_v52 = vld [vmem:[#allocation8 + $0x1b70] sm:$0xff] }
 0x4a4   : > { %v2436_v26 = vld [vmem:[#allocation8 + $0x1a90] sm:$0xff] }
 0x4a5   : > { %v2440_v24 = vld [vmem:[#allocation8 + $0x1ab0] sm:$0xff] }
 0x4a6   : > { %9246 = vmatpush2.bf16.msra.mxu0 %v13603_v13  ;;  %9271 = vmatpush1.bf16.msra.mxu1 %v13667_v36  ;;  %v13755_v13 = vcombine.low %v2468_v54, %v2472_v61  ;;  %v12925_v36 = vcombine.low %v1637_v0, %v1641_v51  ;;  %v2428_v61 = vld [vmem:[#allocation8 + $0x1a50] sm:$0xff]  ;;  %v1597_v51 = vld [vmem:[#allocation8 + $0x58] sm:$0xff] }
 0x4a7   : > { %9247 = vmatprep.subr.bf16.mxu0 %v13596_v20  ;;  %9272 = vmatprep.subr.bf16.mxu1 %v13660_v4  ;;  %v13748_v4 = vcombine.high %v2460_v35, %v2464_v52  ;;  %v2432_v0 = vld [vmem:[#allocation8 + $0x1a70] sm:$0xff] }
 0x4aa   : > { %9248 = vmatpush2.bf16.msra.mxu0 %v13595_v39  ;;  %9273 = vmatpush1.bf16.msra.mxu1 %v13659_v60  ;;  %v1621_v39 = vld [vmem:[#allocation8 + $0x118] sm:$0xff] }
 0x4ab   : > { %9249 = vmatprep.subr.bf16.mxu0 %v13588_v14  ;;  %9274 = vmatprep.subr.bf16.mxu1 %v13652_v10  ;;  %v1625_v60 = vld [vmem:[#allocation8 + $0x138] sm:$0xff]  ;;  %v13747_v14 = vcombine.low %v2460_v35, %v2464_v52  ;;  %v12917_v10 = vcombine.low %v1629_v47, %v1633_v44  ;;  %v13716_v35 = vcombine.high %v2428_v61, %v2432_v0  ;;  %v2420_v52 = vld [vmem:[#allocation8 + $0x1a10] sm:$0xff] }
 0x4ac   : > { %v12910_v3 = vcombine.high %v1621_v39, %v1625_v60  ;;  %v2424_v47 = vld [vmem:[#allocation8 + $0x1a30] sm:$0xff]  ;;  %v1589_v44 = vld [vmem:[#allocation8 + $0x18] sm:$0xff] }
 0x4ae   : > { %9250 = vmatpush2.bf16.msra.mxu0 %v13587_v16  ;;  %9275 = vmatpush1.bf16.msra.mxu1 %v13651_v57  ;;  %v1613_v16 = vld [vmem:[#allocation8 + $0xd8] sm:$0xff] }
 0x4af   : > { %9251 = vmatprep.subr.bf16.mxu0 %v13580_v12  ;;  %9276 = vmatprep.subr.bf16.mxu1 %v13644_v17  ;;  %v1617_v57 = vld [vmem:[#allocation8 + $0xf8] sm:$0xff]  ;;  %v12909_v12 = vcombine.low %v1621_v39, %v1625_v60  ;;  %v13732_v17 = vcombine.high %v2444_v15, %v2448_v21  ;;  %v13707_v60 = vcombine.low %v2420_v52, %v2424_v47 }
 0x4b0   : > { %v12902_v22 = vcombine.high %v1613_v16, %v1617_v57  ;;  %v1777_v39 = vld [vmem:[#allocation8 + $0x5f8] sm:$0xff] }
 0x4b2   : > { %9252 = vmatpush2.bf16.msra.mxu0 %v13579_v27  ;;  %9277 = vmatpush1.bf16.msra.mxu1 %v13643_v23  ;;  %v1609_v27 = vld [vmem:[#allocation8 + $0xb8] sm:$0xff]  ;;  %v13731_v23 = vcombine.low %v2444_v15, %v2448_v21 }
 0x4b3   : > { %9278 = vmatprep.subr.bf16.mxu1 %v13764_v34  ;;  %9303 = vmatprep.subr.bf16.mxu0 %v12934_v33  ;;  %v12901_v34 = vcombine.low %v1613_v16, %v1617_v57  ;;  %v13724_v33 = vcombine.high %v2436_v26, %v2440_v24  ;;  %v12894_v54 = vcombine.high %v1605_v43, %v1609_v27  ;;  %v1769_v15 = vld [vmem:[#allocation8 + $0x5b8] sm:$0xff] }
 0x4b5   : > { %v9009_v53 = vpop.f32.mrf.mxu0  ;;  %9254 = vmatmul.mubr.bf16.vlgmr.msra.gmra.mxu0 %v15941_v45 }
 0x4b6   : > { %v16061_v46 = vadd.f32 %v9009_v53, %v16053_v5  ;;  %9279 = vmatpush2.bf16.msra.mxu1 %v13763_v48  ;;  %9304 = vmatpush1.bf16.msra.mxu0 %v12933_v41  ;;  %v1601_v48 = vld [vmem:[#allocation8 + $0x78] sm:$0xff]  ;;  %v13723_v41 = vcombine.low %v2436_v26, %v2440_v24 }
 0x4b7   : > { %9335 = vmatprep.mubr.bf16.mxu0 %v15845_v28  ;;  %v9011_v20 = vpop.f32.mrf.mxu0  ;;  %9280 = vmatprep.subr.bf16.mxu1 %v13756_v38  ;;  %v13740_v28 = vcombine.high %v2452_v30, %v2456_v1  ;;  %v12893_v38 = vcombine.low %v1605_v43, %v1609_v27  ;;  %v1593_v53 = vld [vmem:[#allocation8 + $0x38] sm:$0xff] }
 0x4b8   : > { %v16065_v59 = vadd.f32 %v9011_v20, %v16057_v18  ;;  %9305 = vmatprep.subr.bf16.mxu0 %v12926_v11  ;;  %v13739_v18 = vcombine.low %v2452_v30, %v2456_v1  ;;  %v12886_v11 = vcombine.high %v1597_v51, %v1601_v48  ;;  %v13708_v20 = vcombine.high %v2420_v52, %v2424_v47  ;;  %v1713_v30 = vld [vmem:[#allocation8 + $0x3f8] sm:$0xff] }
 0x4b9   : > { %v9013_v5 = vpop.f32.mrf.mxu0  ;;  %v1773_v1 = vld [vmem:[#allocation8 + $0x5d8] sm:$0xff] }
 0x4ba   : > { %9281 = vmatpush2.bf16.msra.mxu1 %v13755_v13  ;;  %9306 = vmatpush1.bf16.msra.mxu0 %v12925_v36  ;;  %v13715_v13 = vcombine.low %v2428_v61, %v2432_v0  ;;  %v12885_v36 = vcombine.low %v1597_v51, %v1601_v48  ;;  %v12877_v5 = vcombine.low %v1589_v44, %v1593_v53  ;;  %v1761_v26 = vld [vmem:[#allocation8 + $0x578] sm:$0xff] }
 0x4bb   : > { %v9014_v6 = vpop.f32.mrf.mxu0  ;;  %9282 = vmatprep.subr.bf16.mxu1 %v13748_v4  ;;  %9307 = vmatprep.subr.bf16.mxu0 %v12918_v55  ;;  %v12878_v4 = vcombine.high %v1589_v44, %v1593_v53  ;;  %v1709_v55 = vld [vmem:[#allocation8 + $0x3d8] sm:$0xff]  ;;  %v13061_v16 = vcombine.low %v1773_v1, %v1777_v39 }
 0x4bc   : > { %v1701_v6 = vld [vmem:[#allocation8 + $0x398] sm:$0xff]  ;;  %v12997_v21 = vcombine.low %v1709_v55, %v1713_v30 }
 0x4bd   : > { %v1685_v61 = vld [vmem:[#allocation8 + $0x318] sm:$0xff] }
 0x4be   : > { %9283 = vmatpush2.bf16.msra.mxu1 %v13747_v14  ;;  %9308 = vmatpush1.bf16.msra.mxu0 %v12917_v10  ;;  %v12998_v14 = vcombine.high %v1709_v55, %v1713_v30  ;;  %v13062_v10 = vcombine.high %v1773_v1, %v1777_v39  ;;  %v1689_v51 = vld [vmem:[#allocation8 + $0x338] sm:$0xff] }
 0x4bf   : > { %9284 = vmatprep.subr.bf16.mxu1 %v13740_v28  ;;  %9309 = vmatprep.subr.bf16.mxu0 %v12910_v3  ;;  %v1705_v28 = vld [vmem:[#allocation8 + $0x3b8] sm:$0xff] }
 0x4c0   : > { %v1765_v3 = vld [vmem:[#allocation8 + $0x598] sm:$0xff]  ;;  %v12990_v57 = vcombine.high %v1701_v6, %v1705_v28  ;;  %v12989_v27 = vcombine.low %v1701_v6, %v1705_v28 }
 0x4c1   : > { %v1749_v48 = vld [vmem:[#allocation8 + $0x518] sm:$0xff] }
 0x4c2   : > { %9285 = vmatpush2.bf16.msra.mxu1 %v13739_v18  ;;  %9310 = vmatpush1.bf16.msra.mxu0 %v12909_v12  ;;  %v1693_v18 = vld [vmem:[#allocation8 + $0x358] sm:$0xff]  ;;  %v13054_v12 = vcombine.high %v1765_v3, %v1769_v15 }
 0x4c3   : > { %9286 = vmatprep.subr.bf16.mxu1 %v13732_v17  ;;  %9311 = vmatprep.subr.bf16.mxu0 %v12902_v22  ;;  %v1697_v17 = vld [vmem:[#allocation8 + $0x378] sm:$0xff] }
 0x4c4   : > { %v1757_v22 = vld [vmem:[#allocation8 + $0x558] sm:$0xff] }
 0x4c5   : > { %v1677_v47 = vld [vmem:[#allocation8 + $0x2d8] sm:$0xff] }
 0x4c6   : > { %9287 = vmatpush2.bf16.msra.mxu1 %v13731_v23  ;;  %9312 = vmatpush1.bf16.msra.mxu0 %v12901_v34  ;;  %v13053_v23 = vcombine.low %v1765_v3, %v1769_v15  ;;  %v1681_v44 = vld [vmem:[#allocation8 + $0x2f8] sm:$0xff] }
 0x4c7   : > { %9288 = vmatprep.subr.bf16.mxu1 %v13724_v33  ;;  %9313 = vmatprep.subr.bf16.mxu0 %v12894_v54  ;;  %v12982_v33 = vcombine.high %v1693_v18, %v1697_v17  ;;  %v13046_v54 = vcombine.high %v1757_v22, %v1761_v26  ;;  %v1741_v53 = vld [vmem:[#allocation8 + $0x4d8] sm:$0xff] }
 0x4c8   : > { %v1669_v55 = vld [vmem:[#allocation8 + $0x298] sm:$0xff] }
 0x4c9   : > { %v1673_v30 = vld [vmem:[#allocation8 + $0x2b8] sm:$0xff] }
 0x4ca   : > { %9289 = vmatpush2.bf16.msra.mxu1 %v13723_v41  ;;  %9314 = vmatpush1.bf16.msra.mxu0 %v12893_v38  ;;  %v1753_v41 = vld [vmem:[#allocation8 + $0x538] sm:$0xff]  ;;  %v12981_v38 = vcombine.low %v1693_v18, %v1697_v17 }
 0x4cb   : > { %9290 = vmatprep.subr.bf16.mxu1 %v13716_v35  ;;  %9315 = vmatprep.subr.bf16.mxu0 %v12886_v11  ;;  %v13045_v35 = vcombine.low %v1757_v22, %v1761_v26  ;;  %v13038_v52 = vcombine.high %v1749_v48, %v1753_v41  ;;  %v1733_v1 = vld [vmem:[#allocation8 + $0x498] sm:$0xff] }
 0x4cc   : > { %v1737_v39 = vld [vmem:[#allocation8 + $0x4b8] sm:$0xff] }
 0x4cd   : > { %v1661_v6 = vld [vmem:[#allocation8 + $0x258] sm:$0xff] }
 0x4ce   : > { %9291 = vmatpush2.bf16.msra.mxu1 %v13715_v13  ;;  %9316 = vmatpush1.bf16.msra.mxu0 %v12885_v36  ;;  %v1745_v13 = vld [vmem:[#allocation8 + $0x4f8] sm:$0xff]  ;;  %v13037_v36 = vcombine.low %v1749_v48, %v1753_v41 }
 0x4cf   : > { %9292 = vmatprep.subr.bf16.mxu1 %v13708_v20  ;;  %9317 = vmatprep.subr.bf16.mxu0 %v12878_v4  ;;  %v12966_v20 = vcombine.high %v1677_v47, %v1681_v44  ;;  %v13030_v4 = vcombine.high %v1741_v53, %v1745_v13  ;;  %v1665_v28 = vld [vmem:[#allocation8 + $0x278] sm:$0xff] }
 0x4d0   : > { %v1725_v3 = vld [vmem:[#allocation8 + $0x458] sm:$0xff] }
 0x4d1   : > { %v1729_v15 = vld [vmem:[#allocation8 + $0x478] sm:$0xff] }
 0x4d2   : > { %9293 = vmatpush2.bf16.msra.mxu1 %v13707_v60  ;;  %9318 = vmatpush1.bf16.msra.mxu0 %v12877_v5  ;;  %v12965_v60 = vcombine.low %v1677_v47, %v1681_v44  ;;  %v13029_v5 = vcombine.low %v1741_v53, %v1745_v13  ;;  %v13014_v18 = vcombine.high %v1725_v3, %v1729_v15  ;;  %v1657_v17 = vld [vmem:[#allocation8 + $0x238] sm:$0xff] }
 0x4d3   : > { %9319 = vmatprep.subr.bf16.mxu0 %v12998_v14  ;;  %9344 = vmatprep.subr.bf16.mxu1 %v13062_v10  ;;  %v12958_v14 = vcombine.high %v1669_v55, %v1673_v30  ;;  %v13022_v10 = vcombine.high %v1733_v1, %v1737_v39  ;;  %v1717_v22 = vld [vmem:[#allocation8 + $0x418] sm:$0xff] }
 0x4d4   : > { %v1721_v26 = vld [vmem:[#allocation8 + $0x438] sm:$0xff] }
 0x4d5   : > { %v9050_v24 = vpop.f32.mrf.mxu1  ;;  %9295 = vmatmul.mubr.bf16.vlgmr.msra.gmra.mxu1 %v15953_v25  ;;  %v13005_v41 = vcombine.low %v1717_v22, %v1721_v26  ;;  %v1821_v13 = vld [vmem:[#allocation8 + $0x758] sm:$0xff] }
 0x4d6   : > { %v16069_v43 = vadd.f32 %v9050_v24, %v15920_v58  ;;  %9320 = vmatpush2.bf16.msra.mxu0 %v12997_v21  ;;  %9345 = vmatpush1.bf16.msra.mxu1 %v13061_v16  ;;  %v12957_v21 = vcombine.low %v1669_v55, %v1673_v30  ;;  %v13021_v16 = vcombine.low %v1733_v1, %v1737_v39 }
 0x4d7   : > { %9376 = vmatprep.mubr.bf16.mxu1 %v15859_v49  ;;  %v9052_v34 = vpop.f32.mrf.mxu1  ;;  %9321 = vmatprep.subr.bf16.mxu0 %v12990_v57  ;;  %v12974_v49 = vcombine.high %v1685_v61, %v1689_v51  ;;  %v12950_v57 = vcombine.high %v1661_v6, %v1665_v28  ;;  %v12949_v24 = vcombine.low %v1661_v6, %v1665_v28  ;;  %v1817_v28 = vld [vmem:[#allocation8 + $0x738] sm:$0xff] }
 0x4d8   : > { %v16073_v0 = vadd.f32 %v9052_v34, %v15923_v37  ;;  %9346 = vmatprep.subr.bf16.mxu1 %v13054_v12  ;;  %v12973_v37 = vcombine.low %v1685_v61, %v1689_v51  ;;  %v1653_v12 = vld [vmem:[#allocation8 + $0x218] sm:$0xff]  ;;  %v13006_v34 = vcombine.high %v1717_v22, %v1721_v26 }
 0x4d9   : > { %v9054_v58 = vpop.f32.mrf.mxu1  ;;  %v1901_v61 = vld [vmem:[#allocation8 + $0x9d8] sm:$0xff]  ;;  %v12941_v48 = vcombine.low %v1653_v12, %v1657_v17 }
 0x4da   : > { %9322 = vmatpush2.bf16.msra.mxu0 %v12989_v27  ;;  %9347 = vmatpush1.bf16.msra.mxu1 %v13053_v23  ;;  %v13013_v27 = vcombine.low %v1725_v3, %v1729_v15  ;;  %v12942_v23 = vcombine.high %v1653_v12, %v1657_v17  ;;  %v1905_v51 = vld [vmem:[#allocation8 + $0x9f8] sm:$0xff] }
 0x4db   : > { %v9055_v11 = vpop.f32.mrf.mxu1  ;;  %9323 = vmatprep.subr.bf16.mxu0 %v12982_v33  ;;  %9348 = vmatprep.subr.bf16.mxu1 %v13046_v54  ;;  %v1837_v33 = vld [vmem:[#allocation8 + $0x7d8] sm:$0xff]  ;;  %v13189_v44 = vcombine.low %v1901_v61, %v1905_v51 }
 0x4dc   : > { %v1841_v54 = vld [vmem:[#allocation8 + $0x7f8] sm:$0xff] }
 0x4dd   : > { %v13126_v58 = vcombine.high %v1837_v33, %v1841_v54  ;;  %v1833_v11 = vld [vmem:[#allocation8 + $0x7b8] sm:$0xff]  ;;  %v13125_v47 = vcombine.low %v1837_v33, %v1841_v54 }
 0x4de   : > { %9324 = vmatpush2.bf16.msra.mxu0 %v12981_v38  ;;  %9349 = vmatpush1.bf16.msra.mxu1 %v13045_v35  ;;  %v13190_v38 = vcombine.high %v1901_v61, %v1905_v51  ;;  %v1829_v35 = vld [vmem:[#allocation8 + $0x798] sm:$0xff] }
 0x4df   : > { %9325 = vmatprep.subr.bf16.mxu0 %v12974_v49  ;;  %9350 = vmatprep.subr.bf16.mxu1 %v13038_v52  ;;  %v1893_v49 = vld [vmem:[#allocation8 + $0x998] sm:$0xff]  ;;  %v13118_v53 = vcombine.high %v1829_v35, %v1833_v11  ;;  %v13117_v1 = vcombine.low %v1829_v35, %v1833_v11 }
 0x4e0   : > { %v1897_v52 = vld [vmem:[#allocation8 + $0x9b8] sm:$0xff] }
 0x4e1   : > { %v13181_v39 = vcombine.low %v1893_v49, %v1897_v52  ;;  %v1881_v3 = vld [vmem:[#allocation8 + $0x938] sm:$0xff] }
 0x4e2   : > { %9326 = vmatpush2.bf16.msra.mxu0 %v12973_v37  ;;  %9351 = vmatpush1.bf16.msra.mxu1 %v13037_v36  ;;  %v13182_v37 = vcombine.high %v1893_v49, %v1897_v52  ;;  %v1825_v36 = vld [vmem:[#allocation8 + $0x778] sm:$0xff] }
 0x4e3   : > { %9327 = vmatprep.subr.bf16.mxu0 %v12966_v20  ;;  %9352 = vmatprep.subr.bf16.mxu1 %v13030_v4  ;;  %v1885_v20 = vld [vmem:[#allocation8 + $0x958] sm:$0xff]  ;;  %v13109_v15 = vcombine.low %v1821_v13, %v1825_v36 }
 0x4e4   : > { %v1889_v4 = vld [vmem:[#allocation8 + $0x978] sm:$0xff] }
 0x4e5   : > { %v1809_v12 = vld [vmem:[#allocation8 + $0x6f8] sm:$0xff] }
 0x4e6   : > { %9328 = vmatpush2.bf16.msra.mxu0 %v12965_v60  ;;  %9353 = vmatpush1.bf16.msra.mxu1 %v13029_v5  ;;  %v13110_v5 = vcombine.high %v1821_v13, %v1825_v36  ;;  %v1869_v17 = vld [vmem:[#allocation8 + $0x8d8] sm:$0xff] }
 0x4e7   : > { %9329 = vmatprep.subr.bf16.mxu0 %v12958_v14  ;;  %9354 = vmatprep.subr.bf16.mxu1 %v13022_v10  ;;  %v13174_v14 = vcombine.high %v1885_v20, %v1889_v4  ;;  %v1813_v10 = vld [vmem:[#allocation8 + $0x718] sm:$0xff] }
 0x4e8   : > { %v1873_v22 = vld [vmem:[#allocation8 + $0x8f8] sm:$0xff] }
 0x4e9   : > { %v1861_v33 = vld [vmem:[#allocation8 + $0x898] sm:$0xff]  ;;  %v13157_v51 = vcombine.low %v1869_v17, %v1873_v22 }
 0x4ea   : > { %9330 = vmatpush2.bf16.msra.mxu0 %v12957_v21  ;;  %9355 = vmatpush1.bf16.msra.mxu1 %v13021_v16  ;;  %v13173_v21 = vcombine.low %v1885_v20, %v1889_v4  ;;  %v1865_v54 = vld [vmem:[#allocation8 + $0x8b8] sm:$0xff] }
 0x4eb   : > { %9331 = vmatprep.subr.bf16.mxu0 %v12950_v57  ;;  %9356 = vmatprep.subr.bf16.mxu1 %v13014_v18  ;;  %v1805_v18 = vld [vmem:[#allocation8 + $0x6d8] sm:$0xff]  ;;  %v13149_v52 = vcombine.low %v1861_v33, %v1865_v54 }
 0x4ec   : > { %v13093_v61 = vcombine.low %v1805_v18, %v1809_v12  ;;  %v1853_v35 = vld [vmem:[#allocation8 + $0x858] sm:$0xff] }
 0x4ed   : > { %v1857_v11 = vld [vmem:[#allocation8 + $0x878] sm:$0xff] }
 0x4ee   : > { %9332 = vmatpush2.bf16.msra.mxu0 %v12949_v24  ;;  %9357 = vmatpush1.bf16.msra.mxu1 %v13013_v27  ;;  %v13094_v24 = vcombine.high %v1805_v18, %v1809_v12  ;;  %v13158_v27 = vcombine.high %v1869_v17, %v1873_v22  ;;  %v1785_v13 = vld [vmem:[#allocation8 + $0x638] sm:$0xff]  ;;  %v13141_v4 = vcombine.low %v1853_v35, %v1857_v11 }
 0x4ef   : > { %9333 = vmatprep.subr.bf16.mxu0 %v12942_v23  ;;  %9358 = vmatprep.subr.bf16.mxu1 %v13006_v34  ;;  %v1797_v23 = vld [vmem:[#allocation8 + $0x698] sm:$0xff] }
 0x4f0   : > { %v1801_v34 = vld [vmem:[#allocation8 + $0x6b8] sm:$0xff] }
 0x4f1   : > { %v13085_v49 = vcombine.low %v1797_v23, %v1801_v34  ;;  %v1849_v36 = vld [vmem:[#allocation8 + $0x838] sm:$0xff] }
 0x4f2   : > { %9334 = vmatpush2.bf16.msra.mxu0 %v12941_v48  ;;  %9359 = vmatpush1.bf16.msra.mxu1 %v13005_v41  ;;  %v13086_v48 = vcombine.high %v1797_v23, %v1801_v34  ;;  %v13150_v41 = vcombine.high %v1861_v33, %v1865_v54  ;;  %v1949_v12 = vld [vmem:[#allocation8 + $0xb58] sm:$0xff] }
 0x4f3   : > { %9360 = vmatprep.subr.bf16.mxu1 %v13126_v58  ;;  %9385 = vmatprep.subr.bf16.mxu0 %v13190_v38  ;;  %v1789_v58 = vld [vmem:[#allocation8 + $0x658] sm:$0xff] }
 0x4f4   : > { %v1793_v38 = vld [vmem:[#allocation8 + $0x678] sm:$0xff] }
 0x4f5   : > { %v9091_v55 = vpop.f32.mrf.mxu0  ;;  %9336 = vmatmul.mubr.bf16.vlgmr.msra.gmra.mxu0 %v15869_v63  ;;  %v1877_v63 = vld [vmem:[#allocation8 + $0x918] sm:$0xff]  ;;  %v13077_v20 = vcombine.low %v1789_v58, %v1793_v38 }
 0x4f6   : > { %v16077_v30 = vadd.f32 %v9091_v55, %v16069_v43  ;;  %9361 = vmatpush2.bf16.msra.mxu1 %v13125_v47  ;;  %9386 = vmatpush1.bf16.msra.mxu0 %v13189_v44  ;;  %v13166_v57 = vcombine.high %v1877_v63, %v1881_v3  ;;  %v13165_v26 = vcombine.low %v1877_v63, %v1881_v3  ;;  %v1953_v22 = vld [vmem:[#allocation8 + $0xb78] sm:$0xff] }
 0x4f7   : > { %9417 = vmatprep.mubr.bf16.mxu0 %v15873_v8  ;;  %v9093_v60 = vpop.f32.mrf.mxu0  ;;  %9362 = vmatprep.subr.bf16.mxu1 %v13118_v53  ;;  %v13102_v8 = vcombine.high %v1813_v10, %v1817_v28  ;;  %v13078_v47 = vcombine.high %v1789_v58, %v1793_v38  ;;  %v13142_v44 = vcombine.high %v1853_v35, %v1857_v11  ;;  %v1781_v53 = vld [vmem:[#allocation8 + $0x618] sm:$0xff] }
 0x4f8   : > { %v16081_v6 = vadd.f32 %v9093_v60, %v16073_v0  ;;  %9387 = vmatprep.subr.bf16.mxu0 %v13182_v37  ;;  %v13101_v0 = vcombine.low %v1813_v10, %v1817_v28  ;;  %v1845_v37 = vld [vmem:[#allocation8 + $0x818] sm:$0xff]  ;;  %v13070_v55 = vcombine.high %v1781_v53, %v1785_v13  ;;  %v13069_v10 = vcombine.low %v1781_v53, %v1785_v13 }
 0x4f9   : > { %v9095_v43 = vpop.f32.mrf.mxu0  ;;  %v1969_v60 = vld [vmem:[#allocation8 + $0xbf8] sm:$0xff]  ;;  %v13133_v28 = vcombine.low %v1845_v37, %v1849_v36  ;;  %v13238_v54 = vcombine.high %v1949_v12, %v1953_v22  ;;  %v13237_v38 = vcombine.low %v1949_v12, %v1953_v22 }
 0x4fa   : > { %9363 = vmatpush2.bf16.msra.mxu1 %v13117_v1  ;;  %9388 = vmatpush1.bf16.msra.mxu0 %v13181_v39  ;;  %v13134_v1 = vcombine.high %v1845_v37, %v1849_v36  ;;  %v1965_v39 = vld [vmem:[#allocation8 + $0xbd8] sm:$0xff] }
 0x4fb   : > { %v9096_v16 = vpop.f32.mrf.mxu0  ;;  %9364 = vmatprep.subr.bf16.mxu1 %v13110_v5  ;;  %9389 = vmatprep.subr.bf16.mxu0 %v13174_v14  ;;  %v2029_v5 = vld [vmem:[#allocation8 + $0xdd8] sm:$0xff]  ;;  %v13254_v63 = vcombine.high %v1965_v39, %v1969_v60 }
 0x4fc   : > { %v2033_v14 = vld [vmem:[#allocation8 + $0xdf8] sm:$0xff] }
 0x4fd   : > { %v13318_v3 = vcombine.high %v2029_v5, %v2033_v14  ;;  %v1957_v43 = vld [vmem:[#allocation8 + $0xb98] sm:$0xff] }
 0x4fe   : > { %9365 = vmatpush2.bf16.msra.mxu1 %v13109_v15  ;;  %9390 = vmatpush1.bf16.msra.mxu0 %v13173_v21  ;;  %v1961_v15 = vld [vmem:[#allocation8 + $0xbb8] sm:$0xff] }
 0x4ff   : > { %9366 = vmatprep.subr.bf16.mxu1 %v13102_v8  ;;  %9391 = vmatprep.subr.bf16.mxu0 %v13166_v57  ;;  %v2021_v21 = vld [vmem:[#allocation8 + $0xd98] sm:$0xff]  ;;  %v13253_v8 = vcombine.low %v1965_v39, %v1969_v60  ;;  %v13317_v57 = vcombine.low %v2029_v5, %v2033_v14  ;;  %v13246_v18 = vcombine.high %v1957_v43, %v1961_v15 }
 0x500   : > { %v2025_v16 = vld [vmem:[#allocation8 + $0xdb8] sm:$0xff]  ;;  %v13245_v23 = vcombine.low %v1957_v43, %v1961_v15 }
 0x501   : > { %v13310_v17 = vcombine.high %v2021_v21, %v2025_v16  ;;  %v13309_v34 = vcombine.low %v2021_v21, %v2025_v16  ;;  %v2009_v58 = vld [vmem:[#allocation8 + $0xd38] sm:$0xff] }
 0x502   : > { %9367 = vmatpush2.bf16.msra.mxu1 %v13101_v0  ;;  %9392 = vmatpush1.bf16.msra.mxu0 %v13165_v26  ;;  %v2013_v0 = vld [vmem:[#allocation8 + $0xd58] sm:$0xff] }
 0x503   : > { %9368 = vmatprep.subr.bf16.mxu1 %v13094_v24  ;;  %9393 = vmatprep.subr.bf16.mxu0 %v13158_v27  ;;  %v2017_v26 = vld [vmem:[#allocation8 + $0xd78] sm:$0xff] }
 0x504   : > { %v13301_v35 = vcombine.low %v2013_v0, %v2017_v26  ;;  %v2001_v53 = vld [vmem:[#allocation8 + $0xcf8] sm:$0xff] }
 0x505   : > { %v1977_v12 = vld [vmem:[#allocation8 + $0xc38] sm:$0xff] }
 0x506   : > { %9369 = vmatpush2.bf16.msra.mxu1 %v13093_v61  ;;  %9394 = vmatpush1.bf16.msra.mxu0 %v13157_v51  ;;  %v13302_v61 = vcombine.high %v2013_v0, %v2017_v26  ;;  %v1941_v51 = vld [vmem:[#allocation8 + $0xb18] sm:$0xff] }
 0x507   : > { %9370 = vmatprep.subr.bf16.mxu1 %v13086_v48  ;;  %9395 = vmatprep.subr.bf16.mxu0 %v13150_v41  ;;  %v1945_v41 = vld [vmem:[#allocation8 + $0xb38] sm:$0xff] }
 0x50a   : > { %9371 = vmatpush2.bf16.msra.mxu1 %v13085_v49  ;;  %9396 = vmatpush1.bf16.msra.mxu0 %v13149_v52  ;;  %v1933_v52 = vld [vmem:[#allocation8 + $0xad8] sm:$0xff] }
 0x50b   : > { %9372 = vmatprep.subr.bf16.mxu1 %v13078_v47  ;;  %9397 = vmatprep.subr.bf16.mxu0 %v13142_v44  ;;  %v1937_v47 = vld [vmem:[#allocation8 + $0xaf8] sm:$0xff] }
 0x50c   : > { %v1997_v44 = vld [vmem:[#allocation8 + $0xcd8] sm:$0xff]  ;;  %v13222_v37 = vcombine.high %v1933_v52, %v1937_v47  ;;  %v13221_v39 = vcombine.low %v1933_v52, %v1937_v47 }
 0x50d   : > { %v13286_v36 = vcombine.high %v1997_v44, %v2001_v53  ;;  %v13285_v60 = vcombine.low %v1997_v44, %v2001_v53  ;;  %v2081_v47 = vld [vmem:[#allocation8 + $0xf78] sm:$0xff] }
 0x50e   : > { %9373 = vmatpush2.bf16.msra.mxu1 %v13077_v20  ;;  %9398 = vmatpush1.bf16.msra.mxu0 %v13141_v4  ;;  %v1925_v20 = vld [vmem:[#allocation8 + $0xa98] sm:$0xff] }
 0x50f   : > { %9374 = vmatprep.subr.bf16.mxu1 %v13070_v55  ;;  %9399 = vmatprep.subr.bf16.mxu0 %v13134_v1  ;;  %v1929_v4 = vld [vmem:[#allocation8 + $0xab8] sm:$0xff] }
 0x510   : > { %v1989_v55 = vld [vmem:[#allocation8 + $0xc98] sm:$0xff]  ;;  %v13214_v5 = vcombine.high %v1925_v20, %v1929_v4  ;;  %v13213_v43 = vcombine.low %v1925_v20, %v1929_v4 }
 0x511   : > { %v1993_v1 = vld [vmem:[#allocation8 + $0xcb8] sm:$0xff] }
 0x512   : > { %9375 = vmatpush2.bf16.msra.mxu1 %v13069_v10  ;;  %9400 = vmatpush1.bf16.msra.mxu0 %v13133_v28  ;;  %v13278_v14 = vcombine.high %v1989_v55, %v1993_v1  ;;  %v1917_v10 = vld [vmem:[#allocation8 + $0xa58] sm:$0xff]  ;;  %v13277_v15 = vcombine.low %v1989_v55, %v1993_v1 }
 0x513   : > { %9401 = vmatprep.subr.bf16.mxu0 %v13254_v63  ;;  %9426 = vmatprep.subr.bf16.mxu1 %v13318_v3  ;;  %v1921_v28 = vld [vmem:[#allocation8 + $0xa78] sm:$0xff] }
 0x514   : > { %v1981_v63 = vld [vmem:[#allocation8 + $0xc58] sm:$0xff]  ;;  %v13206_v21 = vcombine.high %v1917_v10, %v1921_v28 }
 0x515   : > { %v9132_v24 = vpop.f32.mrf.mxu1  ;;  %9377 = vmatmul.mubr.bf16.vlgmr.msra.gmra.mxu1 %v15883_v50  ;;  %v2005_v50 = vld [vmem:[#allocation8 + $0xd18] sm:$0xff] }
 0x516   : > { %v16085_v27 = vadd.f32 %v9132_v24, %v16077_v30  ;;  %9402 = vmatpush2.bf16.msra.mxu0 %v13253_v8  ;;  %9427 = vmatpush1.bf16.msra.mxu1 %v13317_v57  ;;  %v13294_v49 = vcombine.high %v2005_v50, %v2009_v58  ;;  %v13293_v13 = vcombine.low %v2005_v50, %v2009_v58  ;;  %v1985_v3 = vld [vmem:[#allocation8 + $0xc78] sm:$0xff] }
 0x517   : > { %9458 = vmatprep.mubr.bf16.mxu1 %v15887_v42  ;;  %v9134_v33 = vpop.f32.mrf.mxu1  ;;  %9403 = vmatprep.subr.bf16.mxu0 %v13246_v18  ;;  %v13230_v42 = vcombine.high %v1941_v51, %v1945_v41  ;;  %v13270_v16 = vcombine.high %v1981_v63, %v1985_v3  ;;  %v1909_v8 = vld [vmem:[#allocation8 + $0xa18] sm:$0xff]  ;;  %v13269_v22 = vcombine.low %v1981_v63, %v1985_v3 }
 0x518   : > { %v16089_v48 = vadd.f32 %v9134_v33, %v16081_v6  ;;  %9428 = vmatprep.subr.bf16.mxu1 %v13310_v17  ;;  %v13229_v6 = vcombine.low %v1941_v51, %v1945_v41  ;;  %v1913_v57 = vld [vmem:[#allocation8 + $0xa38] sm:$0xff]  ;;  %v13205_v17 = vcombine.low %v1917_v10, %v1921_v28 }
 0x519   : > { %v9136_v30 = vpop.f32.mrf.mxu1  ;;  %v1973_v18 = vld [vmem:[#allocation8 + $0xc18] sm:$0xff]  ;;  %v13198_v0 = vcombine.high %v1909_v8, %v1913_v57 }
 0x51a   : > { %9404 = vmatpush2.bf16.msra.mxu0 %v13245_v23  ;;  %9429 = vmatpush1.bf16.msra.mxu1 %v13309_v34  ;;  %v13262_v26 = vcombine.high %v1973_v18, %v1977_v12  ;;  %v2093_v24 = vld [vmem:[#allocation8 + $0xfd8] sm:$0xff] }
 0x51b   : > { %v9137_v11 = vpop.f32.mrf.mxu1  ;;  %9405 = vmatprep.subr.bf16.mxu0 %v13238_v54  ;;  %9430 = vmatprep.subr.bf16.mxu1 %v13302_v61  ;;  %v2097_v23 = vld [vmem:[#allocation8 + $0xff8] sm:$0xff]  ;;  %v13197_v54 = vcombine.low %v1909_v8, %v1913_v57  ;;  %v13261_v61 = vcombine.low %v1973_v18, %v1977_v12 }
 0x51c   : > { %v2157_v34 = vld [vmem:[#allocation8 + $0x11d8] sm:$0xff]  ;;  %v13382_v51 = vcombine.high %v2093_v24, %v2097_v23 }
 0x51d   : > { %v2161_v33 = vld [vmem:[#allocation8 + $0x11f8] sm:$0xff] }
 0x51e   : > { %9406 = vmatpush2.bf16.msra.mxu0 %v13237_v38  ;;  %9431 = vmatpush1.bf16.msra.mxu1 %v13301_v35  ;;  %v13446_v41 = vcombine.high %v2157_v34, %v2161_v33  ;;  %v2085_v50 = vld [vmem:[#allocation8 + $0xf98] sm:$0xff]  ;;  %v13381_v35 = vcombine.low %v2093_v24, %v2097_v23  ;;  %v13445_v11 = vcombine.low %v2157_v34, %v2161_v33 }
 0x51f   : > { %9407 = vmatprep.subr.bf16.mxu0 %v13230_v42  ;;  %9432 = vmatprep.subr.bf16.mxu1 %v13294_v49  ;;  %v2089_v58 = vld [vmem:[#allocation8 + $0xfb8] sm:$0xff] }
 0x520   : > { %v2149_v30 = vld [vmem:[#allocation8 + $0x1198] sm:$0xff]  ;;  %v13374_v42 = vcombine.high %v2085_v50, %v2089_v58 }
 0x521   : > { %v2153_v38 = vld [vmem:[#allocation8 + $0x11b8] sm:$0xff] }
 0x522   : > { %9408 = vmatpush2.bf16.msra.mxu0 %v13229_v6  ;;  %9433 = vmatpush1.bf16.msra.mxu1 %v13293_v13  ;;  %v2077_v49 = vld [vmem:[#allocation8 + $0xf58] sm:$0xff]  ;;  %v13438_v52 = vcombine.high %v2149_v30, %v2153_v38 }
 0x523   : > { %9409 = vmatprep.subr.bf16.mxu0 %v13222_v37  ;;  %9434 = vmatprep.subr.bf16.mxu1 %v13286_v36  ;;  %v2141_v44 = vld [vmem:[#allocation8 + $0x1158] sm:$0xff]  ;;  %v13373_v37 = vcombine.low %v2085_v50, %v2089_v58  ;;  %v13437_v36 = vcombine.low %v2149_v30, %v2153_v38  ;;  %v13366_v4 = vcombine.high %v2077_v49, %v2081_v47 }
 0x524   : > { %v2145_v53 = vld [vmem:[#allocation8 + $0x1178] sm:$0xff] }
 0x525   : > { %v13430_v55 = vcombine.high %v2141_v44, %v2145_v53  ;;  %v2069_v1 = vld [vmem:[#allocation8 + $0xf18] sm:$0xff]  ;;  %v13429_v10 = vcombine.low %v2141_v44, %v2145_v53 }
 0x526   : > { %9410 = vmatpush2.bf16.msra.mxu0 %v13221_v39  ;;  %9435 = vmatpush1.bf16.msra.mxu1 %v13285_v60  ;;  %v2073_v60 = vld [vmem:[#allocation8 + $0xf38] sm:$0xff] }
 0x527   : > { %9411 = vmatprep.subr.bf16.mxu0 %v13214_v5  ;;  %9436 = vmatprep.subr.bf16.mxu1 %v13278_v14  ;;  %v2137_v5 = vld [vmem:[#allocation8 + $0x1138] sm:$0xff]  ;;  %v13365_v14 = vcombine.low %v2077_v49, %v2081_v47 }
 0x528   : > { %v2061_v3 = vld [vmem:[#allocation8 + $0xed8] sm:$0xff] }
 0x529   : > { %v2053_v18 = vld [vmem:[#allocation8 + $0xe98] sm:$0xff] }
 0x52a   : > { %9412 = vmatpush2.bf16.msra.mxu0 %v13213_v43  ;;  %9437 = vmatpush1.bf16.msra.mxu1 %v13277_v15  ;;  %v2065_v43 = vld [vmem:[#allocation8 + $0xef8] sm:$0xff] }
 0x52b   : > { %9413 = vmatprep.subr.bf16.mxu0 %v13206_v21  ;;  %9438 = vmatprep.subr.bf16.mxu1 %v13270_v16  ;;  %v2125_v15 = vld [vmem:[#allocation8 + $0x10d8] sm:$0xff]  ;;  %v13350_v8 = vcombine.high %v2061_v3, %v2065_v43 }
 0x52c   : > { %v2129_v21 = vld [vmem:[#allocation8 + $0x10f8] sm:$0xff] }
 0x52d   : > { %v13414_v57 = vcombine.high %v2125_v15, %v2129_v21  ;;  %v2057_v12 = vld [vmem:[#allocation8 + $0xeb8] sm:$0xff] }
 0x52e   : > { %9414 = vmatpush2.bf16.msra.mxu0 %v13205_v17  ;;  %9439 = vmatpush1.bf16.msra.mxu1 %v13269_v22  ;;  %v2117_v17 = vld [vmem:[#allocation8 + $0x1098] sm:$0xff]  ;;  %v13342_v24 = vcombine.high %v2053_v18, %v2057_v12 }
 0x52f   : > { %9415 = vmatprep.subr.bf16.mxu0 %v13198_v0  ;;  %9440 = vmatprep.subr.bf16.mxu1 %v13262_v26  ;;  %v2121_v22 = vld [vmem:[#allocation8 + $0x10b8] sm:$0xff]  ;;  %v13349_v0 = vcombine.low %v2061_v3, %v2065_v43  ;;  %v13413_v26 = vcombine.low %v2125_v15, %v2129_v21 }
 0x530   : > { %v13406_v23 = vcombine.high %v2117_v17, %v2121_v22  ;;  %v2045_v34 = vld [vmem:[#allocation8 + $0xe58] sm:$0xff] }
 0x531   : > { %v2049_v33 = vld [vmem:[#allocation8 + $0xe78] sm:$0xff] }
 0x532   : > { %9416 = vmatpush2.bf16.msra.mxu0 %v13197_v54  ;;  %9441 = vmatpush1.bf16.msra.mxu1 %v13261_v61  ;;  %v2109_v54 = vld [vmem:[#allocation8 + $0x1058] sm:$0xff]  ;;  %v13334_v50 = vcombine.high %v2045_v34, %v2049_v33 }
 0x533   : > { %9442 = vmatprep.subr.bf16.mxu1 %v13382_v51  ;;  %9467 = vmatprep.subr.bf16.mxu0 %v13446_v41  ;;  %v2113_v61 = vld [vmem:[#allocation8 + $0x1078] sm:$0xff]  ;;  %v13341_v51 = vcombine.low %v2053_v18, %v2057_v12  ;;  %v13405_v41 = vcombine.low %v2117_v17, %v2121_v22 }
 0x534   : > { %v13398_v58 = vcombine.high %v2109_v54, %v2113_v61  ;;  %v2037_v30 = vld [vmem:[#allocation8 + $0xe18] sm:$0xff]  ;;  %v13397_v49 = vcombine.low %v2109_v54, %v2113_v61 }
 0x535   : > { %v9173_v6 = vpop.f32.mrf.mxu0  ;;  %9418 = vmatmul.mubr.bf16.vlgmr.msra.gmra.mxu0 %v15897_v62  ;;  %v2133_v62 = vld [vmem:[#allocation8 + $0x1118] sm:$0xff] }
 0x536   : > { %v16093_v13 = vadd.f32 %v9173_v6, %v16085_v27  ;;  %9443 = vmatpush2.bf16.msra.mxu1 %v13381_v35  ;;  %9468 = vmatpush1.bf16.msra.mxu0 %v13445_v11  ;;  %v13422_v63 = vcombine.high %v2133_v62, %v2137_v5  ;;  %v13421_v16 = vcombine.low %v2133_v62, %v2137_v5  ;;  %v2041_v38 = vld [vmem:[#allocation8 + $0xe38] sm:$0xff] }
 0x537   : > { %9499 = vmatprep.mubr.bf16.mxu0 %v15901_v7  ;;  %v9175_v20 = vpop.f32.mrf.mxu0  ;;  %9444 = vmatprep.subr.bf16.mxu1 %v13374_v42  ;;  %v13358_v7 = vcombine.high %v2069_v1, %v2073_v60  ;;  %v2101_v35 = vld [vmem:[#allocation8 + $0x1018] sm:$0xff]  ;;  %v13333_v42 = vcombine.low %v2045_v34, %v2049_v33 }
 0x538   : > { %v16097_v39 = vadd.f32 %v9175_v20, %v16089_v48  ;;  %9469 = vmatprep.subr.bf16.mxu0 %v13438_v52  ;;  %v13357_v48 = vcombine.low %v2069_v1, %v2073_v60  ;;  %v2105_v11 = vld [vmem:[#allocation8 + $0x1038] sm:$0xff]  ;;  %v13326_v52 = vcombine.high %v2037_v30, %v2041_v38 }
 0x539   : > { %v9177_v27 = vpop.f32.mrf.mxu0  ;;  %v13390_v47 = vcombine.high %v2101_v35, %v2105_v11  ;;  %v2221_v44 = vld [vmem:[#allocation8 + $0x13d8] sm:$0xff]  ;;  %v13389_v20 = vcombine.low %v2101_v35, %v2105_v11 }
 0x53a   : > { %9445 = vmatpush2.bf16.msra.mxu1 %v13373_v37  ;;  %9470 = vmatpush1.bf16.msra.mxu0 %v13437_v36  ;;  %v2225_v53 = vld [vmem:[#allocation8 + $0x13f8] sm:$0xff]  ;;  %v13325_v36 = vcombine.low %v2037_v30, %v2041_v38 }
 0x53b   : > { %v9178_v28 = vpop.f32.mrf.mxu0  ;;  %9446 = vmatprep.subr.bf16.mxu1 %v13366_v4  ;;  %9471 = vmatprep.subr.bf16.mxu0 %v13430_v55  ;;  %v2285_v6 = vld [vmem:[#allocation8 + $0x15d8] sm:$0xff]  ;;  %v13510_v4 = vcombine.high %v2221_v44, %v2225_v53  ;;  %v13509_v27 = vcombine.low %v2221_v44, %v2225_v53 }
 0x53c   : > { %v2289_v37 = vld [vmem:[#allocation8 + $0x15f8] sm:$0xff] }
 0x53d   : > { %v13574_v55 = vcombine.high %v2285_v6, %v2289_v37  ;;  %v2213_v1 = vld [vmem:[#allocation8 + $0x1398] sm:$0xff] }
 0x53e   : > { %9447 = vmatpush2.bf16.msra.mxu1 %v13365_v14  ;;  %9472 = vmatpush1.bf16.msra.mxu0 %v13429_v10  ;;  %v2217_v60 = vld [vmem:[#allocation8 + $0x13b8] sm:$0xff]  ;;  %v13573_v14 = vcombine.low %v2285_v6, %v2289_v37 }
 0x53f   : > { %9448 = vmatprep.subr.bf16.mxu1 %v13358_v7  ;;  %9473 = vmatprep.subr.bf16.mxu0 %v13422_v63  ;;  %v2277_v62 = vld [vmem:[#allocation8 + $0x1598] sm:$0xff]  ;;  %v13502_v10 = vcombine.high %v2213_v1, %v2217_v60 }
 0x540   : > { %v2281_v5 = vld [vmem:[#allocation8 + $0x15b8] sm:$0xff] }
 0x541   : > { %v2205_v28 = vld [vmem:[#allocation8 + $0x1358] sm:$0xff]  ;;  %v13566_v7 = vcombine.high %v2277_v62, %v2281_v5 }
 0x542   : > { %9449 = vmatpush2.bf16.msra.mxu1 %v13357_v48  ;;  %9474 = vmatpush1.bf16.msra.mxu0 %v13421_v16  ;;  %v2209_v63 = vld [vmem:[#allocation8 + $0x1378] sm:$0xff]  ;;  %v13501_v48 = vcombine.low %v2213_v1, %v2217_v60  ;;  %v13565_v16 = vcombine.low %v2277_v62, %v2281_v5 }
 0x543   : > { %9450 = vmatprep.subr.bf16.mxu1 %v13350_v8  ;;  %9475 = vmatprep.subr.bf16.mxu0 %v13414_v57  ;;  %v2269_v3 = vld [vmem:[#allocation8 + $0x1558] sm:$0xff]  ;;  %v13494_v57 = vcombine.high %v2205_v28, %v2209_v63 }
 0x544   : > { %v2273_v43 = vld [vmem:[#allocation8 + $0x1578] sm:$0xff] }
 0x545   : > { %v13558_v18 = vcombine.high %v2269_v3, %v2273_v43  ;;  %v2197_v12 = vld [vmem:[#allocation8 + $0x1318] sm:$0xff] }
 0x546   : > { %9451 = vmatpush2.bf16.msra.mxu1 %v13349_v0  ;;  %9476 = vmatpush1.bf16.msra.mxu0 %v13413_v26  ;;  %v2201_v22 = vld [vmem:[#allocation8 + $0x1338] sm:$0xff]  ;;  %v13493_v26 = vcombine.low %v2205_v28, %v2209_v63 }
 0x547   : > { %9452 = vmatprep.subr.bf16.mxu1 %v13342_v24  ;;  %9477 = vmatprep.subr.bf16.mxu0 %v13406_v23  ;;  %v2265_v0 = vld [vmem:[#allocation8 + $0x1538] sm:$0xff]  ;;  %v13557_v24 = vcombine.low %v2269_v3, %v2273_v43 }
 0x548   : > { %v2189_v33 = vld [vmem:[#allocation8 + $0x12d8] sm:$0xff] }
 0x549   : > { %v2193_v54 = vld [vmem:[#allocation8 + $0x12f8] sm:$0xff] }
 0x54a   : > { %9453 = vmatpush2.bf16.msra.mxu1 %v13341_v51  ;;  %9478 = vmatpush1.bf16.msra.mxu0 %v13405_v41  ;;  %v2253_v61 = vld [vmem:[#allocation8 + $0x14d8] sm:$0xff] }
 0x54b   : > { %9454 = vmatprep.subr.bf16.mxu1 %v13334_v50  ;;  %9479 = vmatprep.subr.bf16.mxu0 %v13398_v58  ;;  %v2257_v51 = vld [vmem:[#allocation8 + $0x14f8] sm:$0xff]  ;;  %v13478_v50 = vcombine.high %v2189_v33, %v2193_v54 }
 0x54c   : > { %v13542_v58 = vcombine.high %v2253_v61, %v2257_v51  ;;  %v2181_v30 = vld [vmem:[#allocation8 + $0x1298] sm:$0xff] }
 0x54d   : > { %v2185_v38 = vld [vmem:[#allocation8 + $0x12b8] sm:$0xff] }
 0x54e   : > { %9455 = vmatpush2.bf16.msra.mxu1 %v13333_v42  ;;  %9480 = vmatpush1.bf16.msra.mxu0 %v13397_v49  ;;  %v2245_v35 = vld [vmem:[#allocation8 + $0x1498] sm:$0xff]  ;;  %v13477_v42 = vcombine.low %v2189_v33, %v2193_v54  ;;  %v13541_v49 = vcombine.low %v2253_v61, %v2257_v51 }
 0x54f   : > { %9456 = vmatprep.subr.bf16.mxu1 %v13326_v52  ;;  %9481 = vmatprep.subr.bf16.mxu0 %v13390_v47  ;;  %v2249_v11 = vld [vmem:[#allocation8 + $0x14b8] sm:$0xff]  ;;  %v13470_v52 = vcombine.high %v2181_v30, %v2185_v38 }
 0x550   : > { %v13534_v47 = vcombine.high %v2245_v35, %v2249_v11  ;;  %v2173_v44 = vld [vmem:[#allocation8 + $0x1258] sm:$0xff] }
 0x551   : > { %v2177_v53 = vld [vmem:[#allocation8 + $0x1278] sm:$0xff] }
 0x552   : > { %9457 = vmatpush2.bf16.msra.mxu1 %v13325_v36  ;;  %9482 = vmatpush1.bf16.msra.mxu0 %v13389_v20  ;;  %v2237_v6 = vld [vmem:[#allocation8 + $0x1458] sm:$0xff]  ;;  %v13469_v36 = vcombine.low %v2181_v30, %v2185_v38  ;;  %v13533_v20 = vcombine.low %v2245_v35, %v2249_v11 }
 0x553   : > { %9483 = vmatprep.subr.bf16.mxu0 %v13510_v4  ;;  %9508 = vmatprep.subr.bf16.mxu1 %v13574_v55  ;;  %v2241_v37 = vld [vmem:[#allocation8 + $0x1478] sm:$0xff]  ;;  %v9592_v4 = vlaneseq  ;;  %v13462_v55 = vcombine.high %v2173_v44, %v2177_v53 }
 0x554   : > { %v13526_v1 = vcombine.high %v2237_v6, %v2241_v37  ;;  %v2165_v60 = vld [vmem:[#allocation8 + $0x1218] sm:$0xff] }
 0x555   : > { %v9214_v15 = vpop.f32.mrf.mxu1  ;;  %9459 = vmatmul.mubr.bf16.vlgmr.msra.gmra.mxu1 %v15913_v31  ;;  %v2261_v31 = vld [vmem:[#allocation8 + $0x1518] sm:$0xff]  ;;  %v16107_v28 = vshrl.u32 %v9592_v4, 7 }
 0x556   : > { %v16101_v21 = vadd.f32 %v9214_v15, %v16093_v13  ;;  %9484 = vmatpush2.bf16.msra.mxu0 %v13509_v27  ;;  %9509 = vmatpush1.bf16.msra.mxu1 %v13573_v14  ;;  %v13550_v34 = vcombine.high %v2261_v31, %v2265_v0  ;;  %v13549_v41 = vcombine.low %v2261_v31, %v2265_v0  ;;  %v2169_v62 = vld [vmem:[#allocation8 + $0x1238] sm:$0xff] }
 0x557   : > { %9540 = vmatprep.mubr.bf16.mxu1 %v15917_v40  ;;  %v9216_v8 = vpop.f32.mrf.mxu1  ;;  %9485 = vmatprep.subr.bf16.mxu0 %v13502_v10  ;;  %v13486_v40 = vcombine.high %v2197_v12, %v2201_v22  ;;  %v2229_v5 = vld [vmem:[#allocation8 + $0x1418] sm:$0xff]  ;;  %v13461_v14 = vcombine.low %v2173_v44, %v2177_v53  ;;  %v13525_v10 = vcombine.low %v2237_v6, %v2241_v37 }
 0x558   : > { %v16105_v17 = vadd.f32 %v9216_v8, %v16097_v39  ;;  %9510 = vmatprep.subr.bf16.mxu1 %v13566_v7  ;;  %v13485_v39 = vcombine.low %v2197_v12, %v2201_v22  ;;  %v2233_v27 = vld [vmem:[#allocation8 + $0x1438] sm:$0xff]  ;;  %v13454_v7 = vcombine.high %v2165_v60, %v2169_v62  ;;  %v13453_v8 = vcombine.low %v2165_v60, %v2169_v62  ;;  %v16112_v22 = vld [vmem:[#allocation11] sm:$0xff] }
 0x559   : > { %v9218_v13 = vpop.f32.mrf.mxu1  ;;  %v13518_v63 = vcombine.high %v2229_v5, %v2233_v27  ;;  %v2349_v3 = vld [vmem:[#allocation8 + $0x17d8] sm:$0xff] }
 0x55a   : > { %9486 = vmatpush2.bf16.msra.mxu0 %v13501_v48  ;;  %9511 = vmatpush1.bf16.msra.mxu1 %v13565_v16  ;;  %v2353_v43 = vld [vmem:[#allocation8 + $0x17f8] sm:$0xff]  ;;  %v16110_v16 = vsub.s32 1, %v16107_v28 }
 0x55b   : > { %v9219_v23 = vpop.f32.mrf.mxu1  ;;  %9487 = vmatprep.subr.bf16.mxu0 %v13494_v57  ;;  %9512 = vmatprep.subr.bf16.mxu1 %v13558_v18  ;;  %v2413_v15 = vld [vmem:[#allocation8 + $0x19d8] sm:$0xff]  ;;  %v13517_v57 = vcombine.low %v2229_v5, %v2233_v27  ;;  %v13638_v18 = vcombine.high %v2349_v3, %v2353_v43 }
 0x55c   : > { %v2417_v48 = vld [vmem:[#allocation8 + $0x19f8] sm:$0xff]  ;;  %v9599_v13 = vrot.slane %v16112_v22, %v16110_v16  ;;  %v13637_v23 = vcombine.low %v2349_v3, %v2353_v43 }
 0x55d   : > { %v13702_v12 = vcombine.high %v2413_v15, %v2417_v48  ;;  %v2341_v31 = vld [vmem:[#allocation8 + $0x1798] sm:$0xff] }
 0x55e   : > { %9488 = vmatpush2.bf16.msra.mxu0 %v13493_v26  ;;  %9513 = vmatpush1.bf16.msra.mxu1 %v13557_v24  ;;  %v2345_v0 = vld [vmem:[#allocation8 + $0x17b8] sm:$0xff] }
 0x55f   : > { %9489 = vmatprep.subr.bf16.mxu0 %v13486_v40  ;;  %9514 = vmatprep.subr.bf16.mxu1 %v13550_v34  ;;  %v2405_v26 = vld [vmem:[#allocation8 + $0x1998] sm:$0xff]  ;;  %v13701_v40 = vcombine.low %v2413_v15, %v2417_v48  ;;  %v13630_v34 = vcombine.high %v2341_v31, %v2345_v0  ;;  %v13629_v30 = vcombine.low %v2341_v31, %v2345_v0 }
 0x560   : > { %v2409_v24 = vld [vmem:[#allocation8 + $0x19b8] sm:$0xff] }
 0x561   : > { %v2333_v33 = vld [vmem:[#allocation8 + $0x1758] sm:$0xff]  ;;  %v13694_v54 = vcombine.high %v2405_v26, %v2409_v24  ;;  %v13693_v38 = vcombine.low %v2405_v26, %v2409_v24 }
 0x562   : > { %9490 = vmatpush2.bf16.msra.mxu0 %v13485_v39  ;;  %9515 = vmatpush1.bf16.msra.mxu1 %v13549_v41  ;;  %v2337_v61 = vld [vmem:[#allocation8 + $0x1778] sm:$0xff]  ;;  %v16117_v41 = vadd.f32 %v9599_v13, %v16009_v32 }
 0x563   : > { %9491 = vmatprep.subr.bf16.mxu0 %v13478_v50  ;;  %9516 = vmatprep.subr.bf16.mxu1 %v13542_v58  ;;  %v2397_v51 = vld [vmem:[#allocation8 + $0x1958] sm:$0xff]  ;;  %v13622_v11 = vcombine.high %v2333_v33, %v2337_v61  ;;  %v13621_v53 = vcombine.low %v2333_v33, %v2337_v61 }
 0x564   : > { %v2401_v39 = vld [vmem:[#allocation8 + $0x1978] sm:$0xff] }
 0x565   : > { %v13685_v6 = vcombine.low %v2397_v51, %v2401_v39  ;;  %v2321_v4 = vld [vmem:[#allocation8 + $0x16f8] sm:$0xff] }
 0x566   : > { %9492 = vmatpush2.bf16.msra.mxu0 %v13477_v42  ;;  %9517 = vmatpush1.bf16.msra.mxu1 %v13541_v49  ;;  %v13686_v42 = vcombine.high %v2397_v51, %v2401_v39  ;;  %v2325_v49 = vld [vmem:[#allocation8 + $0x1718] sm:$0xff] }
 0x567   : > { %9493 = vmatprep.subr.bf16.mxu0 %v13470_v52  ;;  %9518 = vmatprep.subr.bf16.mxu1 %v13534_v47  ;;  %v2329_v52 = vld [vmem:[#allocation8 + $0x1738] sm:$0xff] }
 0x568   : > { %v2393_v47 = vld [vmem:[#allocation8 + $0x1938] sm:$0xff]  ;;  %v13614_v37 = vcombine.high %v2325_v49, %v2329_v52 }
 0x569   : > { %v2309_v27 = vld [vmem:[#allocation8 + $0x1698] sm:$0xff] }
 0x56a   : > { %9494 = vmatpush2.bf16.msra.mxu0 %v13469_v36  ;;  %9519 = vmatpush1.bf16.msra.mxu1 %v13533_v20  ;;  %v2317_v20 = vld [vmem:[#allocation8 + $0x16d8] sm:$0xff] }
 0x56b   : > { %9495 = vmatprep.subr.bf16.mxu0 %v13462_v55  ;;  %9520 = vmatprep.subr.bf16.mxu1 %v13526_v1  ;;  %v2385_v55 = vld [vmem:[#allocation8 + $0x18f8] sm:$0xff]  ;;  %v13613_v1 = vcombine.low %v2325_v49, %v2329_v52  ;;  %v13606_v62 = vcombine.high %v2317_v20, %v2321_v4 }
 0x56c   : > { %v2301_v48 = vld [vmem:[#allocation8 + $0x1658] sm:$0xff] }
 0x56d   : > { %v2293_v26 = vld [vmem:[#allocation8 + $0x1618] sm:$0xff] }
 0x56e   : > { %9496 = vmatpush2.bf16.msra.mxu0 %v13461_v14  ;;  %9521 = vmatpush1.bf16.msra.mxu1 %v13525_v10  ;;  %v2313_v14 = vld [vmem:[#allocation8 + $0x16b8] sm:$0xff] }
 0x56f   : > { %9497 = vmatprep.subr.bf16.mxu0 %v13454_v7  ;;  %9522 = vmatprep.subr.bf16.mxu1 %v13518_v63  ;;  %v2373_v10 = vld [vmem:[#allocation8 + $0x1898] sm:$0xff]  ;;  %v13605_v63 = vcombine.low %v2317_v20, %v2321_v4  ;;  %v13598_v43 = vcombine.high %v2309_v27, %v2313_v14 }
 0x570   : > { %v2377_v7 = vld [vmem:[#allocation8 + $0x18b8] sm:$0xff] }
 0x571   : > { %v13662_v15 = vcombine.high %v2373_v10, %v2377_v7  ;;  %v13661_v31 = vcombine.low %v2373_v10, %v2377_v7  ;;  %v2297_v24 = vld [vmem:[#allocation8 + $0x1638] sm:$0xff] }
 0x572   : > { %9498 = vmatpush2.bf16.msra.mxu0 %v13453_v8  ;;  %9523 = vmatpush1.bf16.msra.mxu1 %v13517_v57  ;;  %v2305_v8 = vld [vmem:[#allocation8 + $0x1678] sm:$0xff]  ;;  %v13582_v61 = vcombine.high %v2293_v26, %v2297_v24 }
 0x573   : > { %9524 = vmatprep.subr.bf16.mxu1 %v13638_v18  ;;  %9549 = vmatprep.subr.bf16.mxu0 %v13702_v12  ;;  %v2365_v57 = vld [vmem:[#allocation8 + $0x1858] sm:$0xff]  ;;  %v13597_v12 = vcombine.low %v2309_v27, %v2313_v14  ;;  %v13590_v0 = vcombine.high %v2301_v48, %v2305_v8  ;;  %v13589_v33 = vcombine.low %v2301_v48, %v2305_v8 }
 0x574   : > { %v2369_v18 = vld [vmem:[#allocation8 + $0x1878] sm:$0xff] }
 0x575   : > { %v9255_v50 = vpop.f32.mrf.mxu0  ;;  %9500 = vmatmul.mubr.bf16.vlgmr.msra.gmra.mxu0 %v15927_v9  ;;  %v2389_v9 = vld [vmem:[#allocation8 + $0x1918] sm:$0xff]  ;;  %v13654_v13 = vcombine.high %v2365_v57, %v2369_v18 }
 0x576   : > { %v16121_v58 = vadd.f32 %v9255_v50, %v16101_v21  ;;  %9525 = vmatpush2.bf16.msra.mxu1 %v13637_v23  ;;  %9550 = vmatpush1.bf16.msra.mxu0 %v13701_v40  ;;  %v9649_v21 = vmul.f32 0.70710677, %v16117_v41  ;;  %v13678_v36 = vcombine.high %v2389_v9, %v2393_v47  ;;  %v13677_v60 = vcombine.low %v2389_v9, %v2393_v47  ;;  %v2357_v23 = vld [vmem:[#allocation8 + $0x1818] sm:$0xff] }
 0x577   : > { %9581 = vmatprep.mubr.bf16.mxu0 %v15931_v19  ;;  %v9257_v35 = vpop.f32.mrf.mxu0  ;;  %9526 = vmatprep.subr.bf16.mxu1 %v13630_v34  ;;  %v2361_v40 = vld [vmem:[#allocation8 + $0x1838] sm:$0xff] }
 0x578   : > { %v16125_v32 = vadd.f32 %v9257_v35, %v16105_v17  ;;  %9551 = vmatprep.subr.bf16.mxu0 %v13694_v54  ;;  %v2381_v17 = vld [vmem:[#allocation8 + $0x18d8] sm:$0xff]  ;;  %14985 = verf.f32 %v9649_v21  ;;  %v13653_v54 = vcombine.low %v2365_v57, %v2369_v18  ;;  %v13646_v51 = vcombine.high %v2357_v23, %v2361_v40 }
 0x579   : > { %v9259_v44 = vpop.f32.mrf.mxu0  ;;  %v13670_v5 = vcombine.high %v2381_v17, %v2385_v55  ;;  %v13669_v3 = vcombine.low %v2381_v17, %v2385_v55  ;;  %v2477_v39 = vld [vmem:[#allocation8 + $0x1bd8] sm:$0xff]  ;;  %v13581_v35 = vcombine.low %v2293_v26, %v2297_v24 }
 0x57a   : > { %9527 = vmatpush2.bf16.msra.mxu1 %v13629_v30  ;;  %9552 = vmatpush1.bf16.msra.mxu0 %v13693_v38  ;;  %v2481_v50 = vld [vmem:[#allocation8 + $0x1bf8] sm:$0xff]  ;;  %v9606_v30 = vsub.s32 3, %v16107_v28 }
 0x57b   : > { %v9260_v19 = vpop.f32.mrf.mxu0  ;;  %9528 = vmatprep.subr.bf16.mxu1 %v13622_v11  ;;  %9553 = vmatprep.subr.bf16.mxu0 %v13686_v42  ;;  %v13645_v11 = vcombine.low %v2357_v23, %v2361_v40  ;;  %v9641_v42 = vmul.f32 0.5, %v16117_v41  ;;  %v13766_v49 = vcombine.high %v2477_v39, %v2481_v50  ;;  %v14459_v52 = vld [vmem:[#allocation13 + $0xe4] ss:$16 sps:$4 sm:$0xff]   ;;  %v14463_v7 = vld [vmem:[#allocation13 + $0xa0] ss:$16 sps:$4 sm:$0xff]  }
 0x57c   : > { %v2469_v9 = vld [vmem:[#allocation8 + $0x1b98] sm:$0xff]  ;;  %v9607_v21 = vrot.slane %v16112_v22, %v9606_v30 }
 0x57d   : > { %v2473_v47 = vld [vmem:[#allocation8 + $0x1bb8] sm:$0xff] }
 0x57e   : > { %9529 = vmatpush2.bf16.msra.mxu1 %v13621_v53  ;;  %9554 = vmatpush1.bf16.msra.mxu0 %v13685_v6  ;;  %v13765_v53 = vcombine.low %v2477_v39, %v2481_v50  ;;  %v14457_v6 = vld [vmem:[#allocation13 + $0xe0] ss:$16 sps:$4 sm:$0xff]   ;;  %v13758_v19 = vcombine.high %v2469_v9, %v2473_v47  ;;  %v16134_v20 = vadd.f32 %v9607_v21, %v16065_v59  ;;  %v14465_v59 = vld [vmem:[#allocation13 + $0xa4] ss:$16 sps:$4 sm:$0xff]  }
 0x57f   : > { %9530 = vmatprep.subr.bf16.mxu1 %v13614_v37  ;;  %9555 = vmatprep.subr.bf16.mxu0 %v13678_v36  ;;  %v14462_v37 = vld [vmem:[#allocation13 + $0xc4] ss:$16 sps:$4 sm:$0xff]   ;;  %v14466_v57 = vld [vmem:[#allocation13 + $0x80] ss:$16 sps:$4 sm:$0xff]  }
 0x580   : > { %v2461_v41 = vld [vmem:[#allocation8 + $0x1b58] sm:$0xff] }
 0x581   : > { %v2465_v36 = vld [vmem:[#allocation8 + $0x1b78] sm:$0xff] }
 0x582   : > { %9531 = vmatpush2.bf16.msra.mxu1 %v13613_v1  ;;  %9556 = vmatpush1.bf16.msra.mxu0 %v13677_v60  ;;  %v13757_v1 = vcombine.low %v2469_v9, %v2473_v47  ;;  %v14460_v60 = vld [vmem:[#allocation13 + $0xc0] ss:$16 sps:$4 sm:$0xff]   ;;  %v14474_v23 = vld [vmem:[#allocation13 + $0x44] ss:$16 sps:$4 sm:$0xff]   ;;  %v9614_v9 = vsub.s32 5, %v16107_v28 }
 0x583   : > { %9532 = vmatprep.subr.bf16.mxu1 %v13606_v62  ;;  %9557 = vmatprep.subr.bf16.mxu0 %v13670_v5  ;;  %v13750_v5 = vcombine.high %v2461_v41, %v2465_v36  ;;  %v2453_v27 = vld [vmem:[#allocation8 + $0x1b18] sm:$0xff] }
 0x584   : > { %v2457_v14 = vld [vmem:[#allocation8 + $0x1b38] sm:$0xff] }
 0x585   : > { %v14986_v34 = vpop.eup %14985  ;;  %v2449_v48 = vld [vmem:[#allocation8 + $0x1af8] sm:$0xff]  ;;  %v13741_v8 = vcombine.low %v2453_v27, %v2457_v14 }
 0x586   : > { %9533 = vmatpush2.bf16.msra.mxu1 %v13605_v63  ;;  %9558 = vmatpush1.bf16.msra.mxu0 %v13669_v3  ;;  %v9665_v38 = vadd.f32 1.0, %v14986_v34  ;;  %v13742_v3 = vcombine.high %v2453_v27, %v2457_v14  ;;  %v14469_v26 = vld [vmem:[#allocation13 + $0x60] ss:$16 sps:$4 sm:$0xff]  }
 0x587   : > { %9534 = vmatprep.subr.bf16.mxu1 %v13598_v43  ;;  %9559 = vmatprep.subr.bf16.mxu0 %v13662_v15  ;;  %v14468_v43 = vld [vmem:[#allocation13 + $0x84] ss:$16 sps:$4 sm:$0xff]  }
 0x588   : > { %v9673_v44 = vmul.f32 %v9665_v38, %v9641_v42  ;;  %v2445_v15 = vld [vmem:[#allocation8 + $0x1ad8] sm:$0xff]  ;;  %v16147_v42 = vsub.s32 0, %v16107_v28 }
 0x589   : > { %v13734_v18 = vcombine.high %v2445_v15, %v2449_v48  ;;  %v2429_v40 = vld [vmem:[#allocation8 + $0x1a58] sm:$0xff] }
 0x58a   : > { %9535 = vmatpush2.bf16.msra.mxu1 %v13597_v12  ;;  %9560 = vmatpush1.bf16.msra.mxu0 %v13661_v31  ;;  %v16137_v17 = vpack.c.bf16 %v9673_v44, %v9673_v44  ;;  %v14471_v12 = vld [vmem:[#allocation13 + $0x64] ss:$16 sps:$4 sm:$0xff]   ;;  %v14478_v44 = vld [vmem:[#allocation13] ss:$16 sps:$4 sm:$0xff]  }
 0x58b   : > { %9536 = vmatprep.subr.bf16.mxu1 %v13590_v0  ;;  %9561 = vmatprep.subr.bf16.mxu0 %v13654_v13  ;;  %v2437_v31 = vld [vmem:[#allocation8 + $0x1a98] sm:$0xff]  ;;  %v13733_v13 = vcombine.low %v2445_v15, %v2449_v48 }
 0x58c   : > { %v2441_v0 = vld [vmem:[#allocation8 + $0x1ab8] sm:$0xff] }
 0x58d   : > { %v13726_v24 = vcombine.high %v2437_v31, %v2441_v0  ;;  %v2433_v34 = vld [vmem:[#allocation8 + $0x1a78] sm:$0xff] }
 0x58e   : > { %9537 = vmatpush2.bf16.msra.mxu1 %v13589_v33  ;;  %9562 = vmatpush1.bf16.msra.mxu0 %v13653_v54  ;;  %v13725_v33 = vcombine.low %v2437_v31, %v2441_v0  ;;  %v14472_v54 = vld [vmem:[#allocation13 + $0x40] ss:$16 sps:$4 sm:$0xff]   ;;  %v14510_v31 = vld [vmem:[#allocation13 + $0x264] ss:$16 sps:$4 sm:$0xff]  }
 0x58f   : > { %9538 = vmatprep.subr.bf16.mxu1 %v13582_v61  ;;  %9563 = vmatprep.subr.bf16.mxu0 %v13646_v51  ;;  %v13718_v61 = vcombine.high %v2429_v40, %v2433_v34  ;;  %v14477_v51 = vld [vmem:[#allocation13 + $0x24] ss:$16 sps:$4 sm:$0xff]   ;;  %v14496_v15 = vld [vmem:[#allocation13 + $0x2a0] ss:$16 sps:$4 sm:$0xff]  }
 0x590   : > { %v2421_v39 = vld [vmem:[#allocation8 + $0x1a18] sm:$0xff] }
 0x591   : > { %v2425_v50 = vld [vmem:[#allocation8 + $0x1a38] sm:$0xff] }
 0x592   : > { %9539 = vmatpush2.bf16.msra.mxu1 %v13581_v35  ;;  %9564 = vmatpush1.bf16.msra.mxu0 %v13645_v11  ;;  %v13717_v35 = vcombine.low %v2429_v40, %v2433_v34  ;;  %v14475_v11 = vld [vmem:[#allocation13 + $0x20] ss:$16 sps:$4 sm:$0xff]   ;;  %v13709_v21 = vcombine.low %v2421_v39, %v2425_v50  ;;  %v14519_v34 = vld [vmem:[#allocation13 + $0x124] ss:$16 sps:$4 sm:$0xff]  }
 0x593   : > { %9565 = vmatprep.subr.bf16.mxu0 %v13766_v49  ;;  %11246 = vmatprep.subr.bf16.mxu1 %v14459_v52  ;;  %v13710_v49 = vcombine.high %v2421_v39, %v2425_v50  ;;  %v14480_v52 = vld [vmem:[#allocation13 + $0x4] ss:$16 sps:$4 sm:$0xff]   ;;  %v14505_v0 = vld [vmem:[#allocation13 + $0x160] ss:$16 sps:$4 sm:$0xff]  }
 0x594   : > { %v14514_v40 = vld [vmem:[#allocation13 + $0x240] ss:$16 sps:$4 sm:$0xff]  }
 0x595   : > { %v9296_v4 = vpop.f32.mrf.mxu1  ;;  %9541 = vmatmul.mubr.bf16.vlgmr.msra.gmra.mxu1 %v15941_v45  ;;  %v9651_v45 = vmul.f32 0.70710677, %v16134_v20  ;;  %v14520_v39 = vld [vmem:[#allocation13 + $0x220] ss:$16 sps:$4 sm:$0xff]  }
 0x596   : > { %v16140_v55 = vadd.f32 %v9296_v4, %v16121_v58  ;;  %9566 = vmatpush2.bf16.msra.mxu0 %v13765_v53  ;;  %11247 = vmatpush1.bf16.msra.mxu1 %v14457_v6  ;;  %v13749_v58 = vcombine.low %v2461_v41, %v2465_v36  ;;  %v9595_v53 = vrot.slane %v16112_v22, %v16147_v42  ;;  %v9643_v6 = vmul.f32 0.5, %v16134_v20  ;;  %v14489_v20 = vld [vmem:[#allocation13 + $0x1c4] ss:$16 sps:$4 sm:$0xff]  }
 0x597   : > { %11278 = vmatprep.mubr.bf16.mxu1 %v16137_v17  ;;  %v16143_v62 = vpop.f32.mrf.mxu1  ;;  %9567 = vmatprep.subr.bf16.mxu0 %v13758_v19  ;;  %14987 = verf.f32 %v9651_v45  ;;  %v14483_v19 = vld [vmem:[#allocation13 + $0x1e4] ss:$16 sps:$4 sm:$0xff]   ;;  %v9615_v36 = vrot.slane %v16112_v22, %v9614_v9  ;;  %v14487_v45 = vld [vmem:[#allocation13 + $0x1c0] ss:$16 sps:$4 sm:$0xff]  }
 0x598   : > { %11248 = vmatprep.subr.bf16.mxu1 %v14462_v37  ;;  %v14486_v37 = vld [vmem:[#allocation13 + $0x2e4] ss:$16 sps:$4 sm:$0xff]   ;;  %v9299_v41 = vadd.f32 %v16143_v62, %v16125_v32  ;;  %v14523_v9 = vld [vmem:[#allocation13 + $0x100] ss:$16 sps:$4 sm:$0xff]  }
 0x599   : > { %v9300_v10 = vpop.f32.mrf.mxu1 }
 0x59a   : > { %9568 = vmatpush2.bf16.msra.mxu0 %v13757_v1  ;;  %11249 = vmatpush1.bf16.msra.mxu1 %v14460_v60  ;;  %v14481_v1 = vld [vmem:[#allocation13 + $0x1e0] ss:$16 sps:$4 sm:$0xff]   ;;  %v16159_v27 = vadd.f32 %v9615_v36, %v9299_v41 }
 0x59b   : > { %v9301_v63 = vpop.f32.mrf.mxu1  ;;  %9569 = vmatprep.subr.bf16.mxu0 %v13750_v5  ;;  %11250 = vmatprep.subr.bf16.mxu1 %v14465_v59  ;;  %v14484_v60 = vld [vmem:[#allocation13 + $0x2e0] ss:$16 sps:$4 sm:$0xff]   ;;  %v16157_v5 = vadd.f32 %v9595_v53, %v16005_v29  ;;  %v14492_v59 = vld [vmem:[#allocation13 + $0x2c4] ss:$16 sps:$4 sm:$0xff]  }
 0x59c   : > { %v14490_v10 = vld [vmem:[#allocation13 + $0x2c0] ss:$16 sps:$4 sm:$0xff]   ;;  %v14498_v63 = vld [vmem:[#allocation13 + $0x2a4] ss:$16 sps:$4 sm:$0xff]   ;;  %v9645_v53 = vmul.f32 0.5, %v16159_v27 }
 0x59d   : > { %v9648_v29 = vmul.f32 0.70710677, %v16157_v5  ;;  %v14529_v41 = vld [vmem:[#allocation13 + $0x3e0] ss:$16 sps:$4 sm:$0xff]  }
 0x59e   : > { %9570 = vmatpush2.bf16.msra.mxu0 %v13749_v58  ;;  %11251 = vmatpush1.bf16.msra.mxu1 %v14463_v7  ;;  %v14495_v7 = vld [vmem:[#allocation13 + $0x1a4] ss:$16 sps:$4 sm:$0xff]   ;;  %v14532_v36 = vld [vmem:[#allocation13 + $0x4e0] ss:$16 sps:$4 sm:$0xff]  }
 0x59f   : > { %9571 = vmatprep.subr.bf16.mxu0 %v13742_v3  ;;  %11252 = vmatprep.subr.bf16.mxu1 %v14468_v43  ;;  %v14493_v43 = vld [vmem:[#allocation13 + $0x1a0] ss:$16 sps:$4 sm:$0xff]   ;;  %14989 = verf.f32 %v9648_v29  ;;  %v14543_v29 = vld [vmem:[#allocation13 + $0x3a4] ss:$16 sps:$4 sm:$0xff]  }
 0x5a2   : > { %9572 = vmatpush2.bf16.msra.mxu0 %v13741_v8  ;;  %11253 = vmatpush1.bf16.msra.mxu1 %v14466_v57  ;;  %v14501_v8 = vld [vmem:[#allocation13 + $0x184] ss:$16 sps:$4 sm:$0xff]  }
 0x5a3   : > { %9573 = vmatprep.subr.bf16.mxu0 %v13734_v18  ;;  %11254 = vmatprep.subr.bf16.mxu1 %v14471_v12  ;;  %v14504_v57 = vld [vmem:[#allocation13 + $0x284] ss:$16 sps:$4 sm:$0xff]   ;;  %v14499_v18 = vld [vmem:[#allocation13 + $0x180] ss:$16 sps:$4 sm:$0xff]  }
 0x5a4   : > { %v14988_v38 = vpop.eup %14987  ;;  %v14507_v12 = vld [vmem:[#allocation13 + $0x164] ss:$16 sps:$4 sm:$0xff]  }
 0x5a5   : > { %v9667_v47 = vadd.f32 1.0, %v14988_v38  ;;  %v9602_v38 = vsub.s32 2, %v16107_v28 }
 0x5a6   : > { %9574 = vmatpush2.bf16.msra.mxu0 %v13733_v13  ;;  %11255 = vmatpush1.bf16.msra.mxu1 %v14469_v26  ;;  %v14508_v13 = vld [vmem:[#allocation13 + $0x260] ss:$16 sps:$4 sm:$0xff]   ;;  %v14513_v26 = vld [vmem:[#allocation13 + $0x144] ss:$16 sps:$4 sm:$0xff]  }
 0x5a7   : > { %9575 = vmatprep.subr.bf16.mxu0 %v13726_v24  ;;  %11256 = vmatprep.subr.bf16.mxu1 %v14474_v23  ;;  %v9675_v4 = vmul.f32 %v9667_v47, %v9643_v6  ;;  %v14516_v24 = vld [vmem:[#allocation13 + $0x244] ss:$16 sps:$4 sm:$0xff]   ;;  %v14511_v23 = vld [vmem:[#allocation13 + $0x140] ss:$16 sps:$4 sm:$0xff]  }
 0x5a8   : > { %v14526_v47 = vld [vmem:[#allocation13 + $0x200] ss:$16 sps:$4 sm:$0xff]   ;;  %v14531_v6 = vld [vmem:[#allocation13 + $0x3e4] ss:$16 sps:$4 sm:$0xff]  }
 0x5a9   : > { %v16162_v32 = vpack.c.bf16 %v9675_v4, %v9675_v4 }
 0x5aa   : > { %9576 = vmatpush2.bf16.msra.mxu0 %v13725_v33  ;;  %11257 = vmatpush1.bf16.msra.mxu1 %v14472_v54  ;;  %v14522_v33 = vld [vmem:[#allocation13 + $0x224] ss:$16 sps:$4 sm:$0xff]  }
 0x5ab   : > { %9577 = vmatprep.subr.bf16.mxu0 %v13718_v61  ;;  %11258 = vmatprep.subr.bf16.mxu1 %v14477_v51  ;;  %v14517_v51 = vld [vmem:[#allocation13 + $0x120] ss:$16 sps:$4 sm:$0xff]  }
 0x5ac   : > { %v14990_v54 = vpop.eup %14989 }
 0x5ad   : > { %v9664_v50 = vadd.f32 1.0, %v14990_v54  ;;  %v9610_v54 = vsub.s32 4, %v16107_v28 }
 0x5ae   : > { %9578 = vmatpush2.bf16.msra.mxu0 %v13717_v35  ;;  %11259 = vmatpush1.bf16.msra.mxu1 %v14475_v11  ;;  %v14525_v35 = vld [vmem:[#allocation13 + $0x104] ss:$16 sps:$4 sm:$0xff]  }
 0x5af   : > { %9579 = vmatprep.subr.bf16.mxu0 %v13710_v49  ;;  %11260 = vmatprep.subr.bf16.mxu1 %v14480_v52  ;;  %v14528_v11 = vld [vmem:[#allocation13 + $0x204] ss:$16 sps:$4 sm:$0xff]   ;;  %v9640_v49 = vmul.f32 0.5, %v16157_v5 }
 0x5b0   : > { %v14540_v5 = vld [vmem:[#allocation13 + $0x4c4] ss:$16 sps:$4 sm:$0xff]  }
 0x5b2   : > { %9580 = vmatpush2.bf16.msra.mxu0 %v13709_v21  ;;  %11261 = vmatpush1.bf16.msra.mxu1 %v14478_v44  ;;  %v9672_v21 = vmul.f32 %v9664_v50, %v9640_v49  ;;  %v9603_v44 = vrot.slane %v16112_v22, %v9602_v38  ;;  %v14571_v50 = vld [vmem:[#allocation13 + $0x300] ss:$16 sps:$4 sm:$0xff]   ;;  %v9611_v49 = vrot.slane %v16112_v22, %v9610_v54  ;;  %v14601_v54 = vld [vmem:[#allocation13 + $0xe8] ss:$16 sps:$4 sm:$0xff]  }
 0x5b3   : > { %11262 = vmatprep.subr.bf16.mxu1 %v14483_v19  ;;  %11287 = vmatprep.subr.bf16.mxu0 %v14486_v37  ;;  %v14534_v19 = vld [vmem:[#allocation13 + $0x4e4] ss:$16 sps:$4 sm:$0xff]  }
 0x5b4   : > { %v16179_v4 = vpack.c.bf16 %v9672_v21, %v9672_v21  ;;  %v14649_v21 = vld [vmem:[#allocation13 + $0x6e0] ss:$16 sps:$4 sm:$0xff]  }
 0x5b5   : > { %v9337_v14 = vpop.f32.mrf.mxu0  ;;  %9582 = vmatmul.mubr.bf16.vlgmr.msra.gmra.mxu0 %v15953_v25  ;;  %v9653_v25 = vmul.f32 0.70710677, %v16159_v27 }
 0x5b6   : > { %v16165_v62 = vadd.f32 %v9337_v14, %v15945_v56  ;;  %11263 = vmatpush2.bf16.msra.mxu1 %v14481_v1  ;;  %11288 = vmatpush1.bf16.msra.mxu0 %v14484_v60  ;;  %v16182_v1 = vadd.f32 %v9603_v44, %v16061_v46  ;;  %v14537_v60 = vld [vmem:[#allocation13 + $0x3c4] ss:$16 sps:$4 sm:$0xff]   ;;  %v14535_v14 = vld [vmem:[#allocation13 + $0x3c0] ss:$16 sps:$4 sm:$0xff]  }
 0x5b7   : > { %11319 = vmatprep.mubr.bf16.mxu0 %v16162_v32  ;;  %v9339_v58 = vpop.f32.mrf.mxu0  ;;  %11264 = vmatprep.subr.bf16.mxu1 %v14489_v20  ;;  %14991 = verf.f32 %v9653_v25  ;;  %v14544_v25 = vld [vmem:[#allocation13 + $0x4a0] ss:$16 sps:$4 sm:$0xff]  }
 0x5b8   : > { %v16170_v3 = vadd.f32 %v9339_v58, %v15949_v2  ;;  %11289 = vmatprep.subr.bf16.mxu0 %v14492_v59  ;;  %v14502_v2 = vld [vmem:[#allocation13 + $0x280] ss:$16 sps:$4 sm:$0xff]   ;;  %v14546_v58 = vld [vmem:[#allocation13 + $0x4a4] ss:$16 sps:$4 sm:$0xff]  }
 0x5b9   : > { %v9341_v56 = vpop.f32.mrf.mxu0 }
 0x5ba   : > { %11265 = vmatpush2.bf16.msra.mxu1 %v14487_v45  ;;  %11290 = vmatpush1.bf16.msra.mxu0 %v14490_v10  ;;  %v14538_v45 = vld [vmem:[#allocation13 + $0x4c0] ss:$16 sps:$4 sm:$0xff]   ;;  %v9650_v10 = vmul.f32 0.70710677, %v16182_v1 }
 0x5bb   : > { %v9342_v48 = vpop.f32.mrf.mxu0  ;;  %11266 = vmatprep.subr.bf16.mxu1 %v14495_v7  ;;  %11291 = vmatprep.subr.bf16.mxu0 %v14498_v63 }
 0x5bc   : > { %14993 = verf.f32 %v9650_v10  ;;  %v14547_v48 = vld [vmem:[#allocation13 + $0x380] ss:$16 sps:$4 sm:$0xff]  }
 0x5be   : > { %11267 = vmatpush2.bf16.msra.mxu1 %v14493_v43  ;;  %11292 = vmatpush1.bf16.msra.mxu0 %v14496_v15  ;;  %v14549_v43 = vld [vmem:[#allocation13 + $0x384] ss:$16 sps:$4 sm:$0xff]  }
 0x5bf   : > { %11268 = vmatprep.subr.bf16.mxu1 %v14501_v8  ;;  %11293 = vmatprep.subr.bf16.mxu0 %v14504_v57  ;;  %v14552_v15 = vld [vmem:[#allocation13 + $0x484] ss:$16 sps:$4 sm:$0xff]   ;;  %v14550_v8 = vld [vmem:[#allocation13 + $0x480] ss:$16 sps:$4 sm:$0xff]  }
 0x5c0   : > { %v14558_v57 = vld [vmem:[#allocation13 + $0x464] ss:$16 sps:$4 sm:$0xff]  }
 0x5c2   : > { %11269 = vmatpush2.bf16.msra.mxu1 %v14499_v18  ;;  %11294 = vmatpush1.bf16.msra.mxu0 %v14502_v2  ;;  %v14553_v18 = vld [vmem:[#allocation13 + $0x360] ss:$16 sps:$4 sm:$0xff]  }
 0x5c3   : > { %11270 = vmatprep.subr.bf16.mxu1 %v14507_v12  ;;  %11295 = vmatprep.subr.bf16.mxu0 %v14510_v31  ;;  %v14556_v2 = vld [vmem:[#allocation13 + $0x460] ss:$16 sps:$4 sm:$0xff]   ;;  %v14561_v12 = vld [vmem:[#allocation13 + $0x344] ss:$16 sps:$4 sm:$0xff]  }
 0x5c4   : > { %v14992_v61 = vpop.eup %14991  ;;  %v14564_v31 = vld [vmem:[#allocation13 + $0x444] ss:$16 sps:$4 sm:$0xff]  }
 0x5c5   : > { %v9669_v52 = vadd.f32 1.0, %v14992_v61  ;;  %v14573_v61 = vld [vmem:[#allocation13 + $0x304] ss:$16 sps:$4 sm:$0xff]  }
 0x5c6   : > { %11271 = vmatpush2.bf16.msra.mxu1 %v14505_v0  ;;  %11296 = vmatpush1.bf16.msra.mxu0 %v14508_v13  ;;  %v14559_v0 = vld [vmem:[#allocation13 + $0x340] ss:$16 sps:$4 sm:$0xff]  }
 0x5c7   : > { %11272 = vmatprep.subr.bf16.mxu1 %v14513_v26  ;;  %11297 = vmatprep.subr.bf16.mxu0 %v14516_v24  ;;  %v9677_v37 = vmul.f32 %v9669_v52, %v9645_v53  ;;  %v14562_v13 = vld [vmem:[#allocation13 + $0x440] ss:$16 sps:$4 sm:$0xff]   ;;  %v14567_v26 = vld [vmem:[#allocation13 + $0x324] ss:$16 sps:$4 sm:$0xff]   ;;  %v16201_v53 = vadd.f32 %v9611_v49, %v16140_v55  ;;  %v14604_v49 = vld [vmem:[#allocation13 + $0xc8] ss:$16 sps:$4 sm:$0xff]  }
 0x5c8   : > { %v14570_v24 = vld [vmem:[#allocation13 + $0x424] ss:$16 sps:$4 sm:$0xff]  }
 0x5c9   : > { %v16185_v59 = vpack.c.bf16 %v9677_v37, %v9677_v37  ;;  %v14579_v52 = vld [vmem:[#allocation13 + $0x5e4] ss:$16 sps:$4 sm:$0xff]  }
 0x5ca   : > { %11273 = vmatpush2.bf16.msra.mxu1 %v14511_v23  ;;  %11298 = vmatpush1.bf16.msra.mxu0 %v14514_v40  ;;  %v14994_v23 = vpop.eup %14993  ;;  %v14565_v40 = vld [vmem:[#allocation13 + $0x320] ss:$16 sps:$4 sm:$0xff]   ;;  %v14585_v55 = vld [vmem:[#allocation13 + $0x5a4] ss:$16 sps:$4 sm:$0xff]  }
 0x5cb   : > { %11274 = vmatprep.subr.bf16.mxu1 %v14519_v34  ;;  %11299 = vmatprep.subr.bf16.mxu0 %v14522_v33  ;;  %v14568_v34 = vld [vmem:[#allocation13 + $0x420] ss:$16 sps:$4 sm:$0xff]   ;;  %v9666_v33 = vadd.f32 1.0, %v14994_v23 }
 0x5cc   : > { %v14691_v23 = vld [vmem:[#allocation13 + $0x600] ss:$16 sps:$4 sm:$0xff]  }
 0x5ce   : > { %11275 = vmatpush2.bf16.msra.mxu1 %v14517_v51  ;;  %11300 = vmatpush1.bf16.msra.mxu0 %v14520_v39  ;;  %v14576_v51 = vld [vmem:[#allocation13 + $0x404] ss:$16 sps:$4 sm:$0xff]   ;;  %v9642_v39 = vmul.f32 0.5, %v16182_v1  ;;  %v9652_v1 = vmul.f32 0.70710677, %v16201_v53 }
 0x5cf   : > { %11276 = vmatprep.subr.bf16.mxu1 %v14525_v35  ;;  %11301 = vmatprep.subr.bf16.mxu0 %v14528_v11  ;;  %v14574_v35 = vld [vmem:[#allocation13 + $0x400] ss:$16 sps:$4 sm:$0xff]  }
 0x5d0   : > { %v9674_v11 = vmul.f32 %v9666_v33, %v9642_v39  ;;  %14995 = verf.f32 %v9652_v1  ;;  %v14699_v33 = vld [vmem:[#allocation13 + $0x7e4] ss:$16 sps:$4 sm:$0xff]   ;;  %v14697_v39 = vld [vmem:[#allocation13 + $0x7e0] ss:$16 sps:$4 sm:$0xff]   ;;  %v14615_v1 = vld [vmem:[#allocation13 + $0x6c] ss:$16 sps:$4 sm:$0xff]  }
 0x5d2   : > { %11277 = vmatpush2.bf16.msra.mxu1 %v14523_v9  ;;  %11302 = vmatpush1.bf16.msra.mxu0 %v14526_v47  ;;  %v14651_v9 = vld [vmem:[#allocation13 + $0x6e4] ss:$16 sps:$4 sm:$0xff]   ;;  %v14577_v47 = vld [vmem:[#allocation13 + $0x5e0] ss:$16 sps:$4 sm:$0xff]   ;;  %v16198_v44 = vpack.c.bf16 %v9674_v11, %v9674_v11 }
 0x5d3   : > { %11303 = vmatprep.subr.bf16.mxu0 %v14531_v6  ;;  %11328 = vmatprep.subr.bf16.mxu1 %v14534_v19  ;;  %v14582_v6 = vld [vmem:[#allocation13 + $0x5c4] ss:$16 sps:$4 sm:$0xff]  }
 0x5d4   : > { %v14657_v19 = vld [vmem:[#allocation13 + $0x6c4] ss:$16 sps:$4 sm:$0xff]  }
 0x5d5   : > { %v9378_v20 = vpop.f32.mrf.mxu1  ;;  %11279 = vmatmul.mubr.bf16.vlgmr.msra.gmra.mxu1 %v16179_v4 }
 0x5d6   : > { %v16188_v27 = vadd.f32 %v9378_v20, %v16165_v62  ;;  %11304 = vmatpush2.bf16.msra.mxu0 %v14529_v41  ;;  %11329 = vmatpush1.bf16.msra.mxu1 %v14532_v36  ;;  %v14541_v62 = vld [vmem:[#allocation13 + $0x3a0] ss:$16 sps:$4 sm:$0xff]  }
 0x5d7   : > { %11360 = vmatprep.mubr.bf16.mxu1 %v16185_v59  ;;  %v9380_v46 = vpop.f32.mrf.mxu1  ;;  %11305 = vmatprep.subr.bf16.mxu0 %v14537_v60  ;;  %v14580_v41 = vld [vmem:[#allocation13 + $0x5c0] ss:$16 sps:$4 sm:$0xff]  }
 0x5d8   : > { %v16193_v7 = vadd.f32 %v9380_v46, %v16170_v3  ;;  %11330 = vmatprep.subr.bf16.mxu1 %v14540_v5  ;;  %v14555_v3 = vld [vmem:[#allocation13 + $0x364] ss:$16 sps:$4 sm:$0xff]   ;;  %v14655_v36 = vld [vmem:[#allocation13 + $0x6c0] ss:$16 sps:$4 sm:$0xff]  }
 0x5d9   : > { %v9382_v63 = vpop.f32.mrf.mxu1  ;;  %v14663_v5 = vld [vmem:[#allocation13 + $0x6a4] ss:$16 sps:$4 sm:$0xff]  }
 0x5da   : > { %11306 = vmatpush2.bf16.msra.mxu0 %v14535_v14  ;;  %11331 = vmatpush1.bf16.msra.mxu1 %v14538_v45  ;;  %v14583_v45 = vld [vmem:[#allocation13 + $0x5a0] ss:$16 sps:$4 sm:$0xff]   ;;  %v14588_v46 = vld [vmem:[#allocation13 + $0x584] ss:$16 sps:$4 sm:$0xff]  }
 0x5db   : > { %v9383_v56 = vpop.f32.mrf.mxu1  ;;  %11307 = vmatprep.subr.bf16.mxu0 %v14543_v29  ;;  %11332 = vmatprep.subr.bf16.mxu1 %v14546_v58  ;;  %v14669_v29 = vld [vmem:[#allocation13 + $0x684] ss:$16 sps:$4 sm:$0xff]   ;;  %v14586_v58 = vld [vmem:[#allocation13 + $0x580] ss:$16 sps:$4 sm:$0xff]  }
 0x5dc   : > { %v14667_v63 = vld [vmem:[#allocation13 + $0x680] ss:$16 sps:$4 sm:$0xff]  }
 0x5dd   : > { %v14673_v56 = vld [vmem:[#allocation13 + $0x660] ss:$16 sps:$4 sm:$0xff]  }
 0x5de   : > { %11308 = vmatpush2.bf16.msra.mxu0 %v14541_v62  ;;  %11333 = vmatpush1.bf16.msra.mxu1 %v14544_v25  ;;  %v14591_v62 = vld [vmem:[#allocation13 + $0x564] ss:$16 sps:$4 sm:$0xff]   ;;  %v14589_v25 = vld [vmem:[#allocation13 + $0x560] ss:$16 sps:$4 sm:$0xff]  }
 0x5df   : > { %11309 = vmatprep.subr.bf16.mxu0 %v14549_v43  ;;  %11334 = vmatprep.subr.bf16.mxu1 %v14552_v15  ;;  %v14594_v43 = vld [vmem:[#allocation13 + $0x544] ss:$16 sps:$4 sm:$0xff]  }
 0x5e0   : > { %v14681_v15 = vld [vmem:[#allocation13 + $0x644] ss:$16 sps:$4 sm:$0xff]  }
 0x5e2   : > { %11310 = vmatpush2.bf16.msra.mxu0 %v14547_v48  ;;  %11335 = vmatpush1.bf16.msra.mxu1 %v14550_v8  ;;  %v14592_v48 = vld [vmem:[#allocation13 + $0x540] ss:$16 sps:$4 sm:$0xff]  }
 0x5e3   : > { %11311 = vmatprep.subr.bf16.mxu0 %v14555_v3  ;;  %11336 = vmatprep.subr.bf16.mxu1 %v14558_v57  ;;  %v14679_v8 = vld [vmem:[#allocation13 + $0x640] ss:$16 sps:$4 sm:$0xff]   ;;  %v14597_v3 = vld [vmem:[#allocation13 + $0x524] ss:$16 sps:$4 sm:$0xff]  }
 0x5e4   : > { %v14687_v57 = vld [vmem:[#allocation13 + $0x624] ss:$16 sps:$4 sm:$0xff]  }
 0x5e6   : > { %11312 = vmatpush2.bf16.msra.mxu0 %v14553_v18  ;;  %11337 = vmatpush1.bf16.msra.mxu1 %v14556_v2  ;;  %v14996_v18 = vpop.eup %14995  ;;  %v14595_v2 = vld [vmem:[#allocation13 + $0x520] ss:$16 sps:$4 sm:$0xff]  }
 0x5e7   : > { %11313 = vmatprep.subr.bf16.mxu0 %v14561_v12  ;;  %11338 = vmatprep.subr.bf16.mxu1 %v14564_v31  ;;  %v14685_v12 = vld [vmem:[#allocation13 + $0x620] ss:$16 sps:$4 sm:$0xff]   ;;  %v9668_v31 = vadd.f32 1.0, %v14996_v18 }
 0x5ea   : > { %11314 = vmatpush2.bf16.msra.mxu0 %v14559_v0  ;;  %11339 = vmatpush1.bf16.msra.mxu1 %v14562_v13  ;;  %v14600_v0 = vld [vmem:[#allocation13 + $0x504] ss:$16 sps:$4 sm:$0xff]  }
 0x5eb   : > { %11315 = vmatprep.subr.bf16.mxu0 %v14567_v26  ;;  %11340 = vmatprep.subr.bf16.mxu1 %v14570_v24  ;;  %v14693_v13 = vld [vmem:[#allocation13 + $0x604] ss:$16 sps:$4 sm:$0xff]   ;;  %v9644_v26 = vmul.f32 0.5, %v16201_v53  ;;  %v14598_v24 = vld [vmem:[#allocation13 + $0x500] ss:$16 sps:$4 sm:$0xff]  }
 0x5ec   : > { %v14711_v53 = vld [vmem:[#allocation13 + $0x7a4] ss:$16 sps:$4 sm:$0xff]  }
 0x5ee   : > { %11316 = vmatpush2.bf16.msra.mxu0 %v14565_v40  ;;  %11341 = vmatpush1.bf16.msra.mxu1 %v14568_v34  ;;  %v9676_v40 = vmul.f32 %v9668_v31, %v9644_v26  ;;  %v14603_v34 = vld [vmem:[#allocation13 + $0xec] ss:$16 sps:$4 sm:$0xff]   ;;  %v14631_v31 = vld [vmem:[#allocation13 + $0x1a8] ss:$16 sps:$4 sm:$0xff]  }
 0x5ef   : > { %11317 = vmatprep.subr.bf16.mxu0 %v14573_v61  ;;  %11342 = vmatprep.subr.bf16.mxu1 %v14576_v51  ;;  %v14606_v51 = vld [vmem:[#allocation13 + $0xcc] ss:$16 sps:$4 sm:$0xff]   ;;  %v14634_v26 = vld [vmem:[#allocation13 + $0x188] ss:$16 sps:$4 sm:$0xff]  }
 0x5f0   : > { %v16212_v61 = vpack.c.bf16 %v9676_v40, %v9676_v40  ;;  %v14642_v40 = vld [vmem:[#allocation13 + $0x14c] ss:$16 sps:$4 sm:$0xff]  }
 0x5f2   : > { %11318 = vmatpush2.bf16.msra.mxu0 %v14571_v50  ;;  %11343 = vmatpush1.bf16.msra.mxu1 %v14574_v35  ;;  %v14705_v50 = vld [vmem:[#allocation13 + $0x7c4] ss:$16 sps:$4 sm:$0xff]  }
 0x5f3   : > { %11344 = vmatprep.subr.bf16.mxu1 %v14579_v52  ;;  %11369 = vmatprep.subr.bf16.mxu0 %v14651_v9  ;;  %v14609_v9 = vld [vmem:[#allocation13 + $0xac] ss:$16 sps:$4 sm:$0xff]  }
 0x5f5   : > { %v9419_v37 = vpop.f32.mrf.mxu0  ;;  %11320 = vmatmul.mubr.bf16.vlgmr.msra.gmra.mxu0 %v16198_v44 }
 0x5f6   : > { %v16205_v22 = vadd.f32 %v9419_v37, %v16188_v27  ;;  %11345 = vmatpush2.bf16.msra.mxu1 %v14577_v47  ;;  %11370 = vmatpush1.bf16.msra.mxu0 %v14649_v21  ;;  %v14661_v27 = vld [vmem:[#allocation13 + $0x6a0] ss:$16 sps:$4 sm:$0xff]  }
 0x5f7   : > { %v9421_v60 = vpop.f32.mrf.mxu0  ;;  %11346 = vmatprep.subr.bf16.mxu1 %v14582_v6  ;;  %11371 = vmatprep.subr.bf16.mxu0 %v14657_v19  ;;  %v14703_v47 = vld [vmem:[#allocation13 + $0x7c0] ss:$16 sps:$4 sm:$0xff]   ;;  %v14607_v19 = vld [vmem:[#allocation13 + $0xa8] ss:$16 sps:$4 sm:$0xff]  }
 0x5f8   : > { %v16209_v20 = vadd.f32 %v9421_v60, %v16193_v7  ;;  %v14675_v7 = vld [vmem:[#allocation13 + $0x664] ss:$16 sps:$4 sm:$0xff]   ;;  %v14715_v60 = vld [vmem:[#allocation13 + $0x780] ss:$16 sps:$4 sm:$0xff]  }
 0x5f9   : > { %v9423_v14 = vpop.f32.mrf.mxu0 }
 0x5fa   : > { %11347 = vmatpush2.bf16.msra.mxu1 %v14580_v41  ;;  %11372 = vmatpush1.bf16.msra.mxu0 %v14655_v36  ;;  %v14709_v41 = vld [vmem:[#allocation13 + $0x7a0] ss:$16 sps:$4 sm:$0xff]   ;;  %v14610_v36 = vld [vmem:[#allocation13 + $0x88] ss:$16 sps:$4 sm:$0xff]  }
 0x5fb   : > { %v9424_v10 = vpop.f32.mrf.mxu0  ;;  %11348 = vmatprep.subr.bf16.mxu1 %v14585_v55  ;;  %11373 = vmatprep.subr.bf16.mxu0 %v14663_v5  ;;  %v14723_v55 = vld [vmem:[#allocation13 + $0x764] ss:$16 sps:$4 sm:$0xff]   ;;  %v14613_v5 = vld [vmem:[#allocation13 + $0x68] ss:$16 sps:$4 sm:$0xff]   ;;  %v14721_v14 = vld [vmem:[#allocation13 + $0x760] ss:$16 sps:$4 sm:$0xff]  }
 0x5fc   : > { %v14621_v10 = vld [vmem:[#allocation13 + $0x2c] ss:$16 sps:$4 sm:$0xff]  }
 0x5fe   : > { %11349 = vmatpush2.bf16.msra.mxu1 %v14583_v45  ;;  %11374 = vmatpush1.bf16.msra.mxu0 %v14661_v27  ;;  %v14729_v45 = vld [vmem:[#allocation13 + $0x744] ss:$16 sps:$4 sm:$0xff]   ;;  %v14616_v27 = vld [vmem:[#allocation13 + $0x48] ss:$16 sps:$4 sm:$0xff]  }
 0x5ff   : > { %11350 = vmatprep.subr.bf16.mxu1 %v14588_v46  ;;  %11375 = vmatprep.subr.bf16.mxu0 %v14669_v29  ;;  %v14727_v46 = vld [vmem:[#allocation13 + $0x740] ss:$16 sps:$4 sm:$0xff]   ;;  %v14735_v29 = vld [vmem:[#allocation13 + $0x724] ss:$16 sps:$4 sm:$0xff]  }
 0x602   : > { %11351 = vmatpush2.bf16.msra.mxu1 %v14586_v58  ;;  %11376 = vmatpush1.bf16.msra.mxu0 %v14667_v63  ;;  %v14619_v58 = vld [vmem:[#allocation13 + $0x28] ss:$16 sps:$4 sm:$0xff]   ;;  %v14624_v63 = vld [vmem:[#allocation13 + $0xc] ss:$16 sps:$4 sm:$0xff]  }
 0x603   : > { %11352 = vmatprep.subr.bf16.mxu1 %v14591_v62  ;;  %11377 = vmatprep.subr.bf16.mxu0 %v14675_v7  ;;  %v14733_v62 = vld [vmem:[#allocation13 + $0x720] ss:$16 sps:$4 sm:$0xff]   ;;  %v14741_v7 = vld [vmem:[#allocation13 + $0x704] ss:$16 sps:$4 sm:$0xff]  }
 0x606   : > { %11353 = vmatpush2.bf16.msra.mxu1 %v14589_v25  ;;  %11378 = vmatpush1.bf16.msra.mxu0 %v14673_v56  ;;  %v14622_v25 = vld [vmem:[#allocation13 + $0x8] ss:$16 sps:$4 sm:$0xff]   ;;  %v14627_v56 = vld [vmem:[#allocation13 + $0x1ec] ss:$16 sps:$4 sm:$0xff]  }
 0x607   : > { %11354 = vmatprep.subr.bf16.mxu1 %v14594_v43  ;;  %11379 = vmatprep.subr.bf16.mxu0 %v14681_v15  ;;  %v14739_v43 = vld [vmem:[#allocation13 + $0x700] ss:$16 sps:$4 sm:$0xff]   ;;  %v14747_v15 = vld [vmem:[#allocation13 + $0x2ec] ss:$16 sps:$4 sm:$0xff]  }
 0x60a   : > { %11355 = vmatpush2.bf16.msra.mxu1 %v14592_v48  ;;  %11380 = vmatpush1.bf16.msra.mxu0 %v14679_v8  ;;  %v14625_v48 = vld [vmem:[#allocation13 + $0x1e8] ss:$16 sps:$4 sm:$0xff]   ;;  %v14630_v8 = vld [vmem:[#allocation13 + $0x1cc] ss:$16 sps:$4 sm:$0xff]  }
 0x60b   : > { %11356 = vmatprep.subr.bf16.mxu1 %v14597_v3  ;;  %11381 = vmatprep.subr.bf16.mxu0 %v14687_v57  ;;  %v14628_v57 = vld [vmem:[#allocation13 + $0x1c8] ss:$16 sps:$4 sm:$0xff]  }
 0x60e   : > { %11357 = vmatpush2.bf16.msra.mxu1 %v14595_v2  ;;  %11382 = vmatpush1.bf16.msra.mxu0 %v14685_v12  ;;  %v14633_v2 = vld [vmem:[#allocation13 + $0x1ac] ss:$16 sps:$4 sm:$0xff]  }
 0x60f   : > { %11358 = vmatprep.subr.bf16.mxu1 %v14600_v0  ;;  %11383 = vmatprep.subr.bf16.mxu0 %v14693_v13  ;;  %v14636_v13 = vld [vmem:[#allocation13 + $0x18c] ss:$16 sps:$4 sm:$0xff]  }
 0x612   : > { %11359 = vmatpush2.bf16.msra.mxu1 %v14598_v24  ;;  %11384 = vmatpush1.bf16.msra.mxu0 %v14691_v23  ;;  %v14639_v24 = vld [vmem:[#allocation13 + $0x16c] ss:$16 sps:$4 sm:$0xff]   ;;  %v14637_v23 = vld [vmem:[#allocation13 + $0x168] ss:$16 sps:$4 sm:$0xff]  }
 0x613   : > { %11410 = vmatprep.subr.bf16.mxu1 %v14603_v34  ;;  %11385 = vmatprep.subr.bf16.mxu0 %v14699_v33  ;;  %v14640_v34 = vld [vmem:[#allocation13 + $0x148] ss:$16 sps:$4 sm:$0xff]   ;;  %v14645_v33 = vld [vmem:[#allocation13 + $0x12c] ss:$16 sps:$4 sm:$0xff]  }
 0x615   : > { %v9460_v35 = vpop.f32.mrf.mxu1  ;;  %11361 = vmatmul.mubr.bf16.vlgmr.msra.gmra.mxu1 %v16212_v61 }
 0x616   : > { %v16216_v11 = vadd.f32 %v9460_v35, %v16205_v22  ;;  %11411 = vmatpush1.bf16.msra.mxu1 %v14601_v54  ;;  %11442 = vmatprep.mubr.bf16.mxu1 %v16137_v17  ;;  %v14612_v22 = vld [vmem:[#allocation13 + $0x8c] ss:$16 sps:$4 sm:$0xff]   ;;  %v14717_v17 = vld [vmem:[#allocation13 + $0x784] ss:$16 sps:$4 sm:$0xff]   ;;  %v14643_v54 = vld [vmem:[#allocation13 + $0x128] ss:$16 sps:$4 sm:$0xff]  }
 0x617   : > { %v9462_v52 = vpop.f32.mrf.mxu1  ;;  %11412 = vmatprep.subr.bf16.mxu1 %v14606_v51  ;;  %11386 = vmatpush2.bf16.msra.mxu0 %v14697_v39  ;;  %v14648_v51 = vld [vmem:[#allocation13 + $0x10c] ss:$16 sps:$4 sm:$0xff]   ;;  %v14646_v39 = vld [vmem:[#allocation13 + $0x108] ss:$16 sps:$4 sm:$0xff]  }
 0x618   : > { %v16220_v21 = vadd.f32 %v9462_v52, %v16209_v20  ;;  %11387 = vmatprep.subr.bf16.mxu0 %v14705_v50  ;;  %v14618_v20 = vld [vmem:[#allocation13 + $0x4c] ss:$16 sps:$4 sm:$0xff]   ;;  %v14652_v35 = vld [vmem:[#allocation13 + $0x4e8] ss:$16 sps:$4 sm:$0xff]  }
 0x619   : > { %v9464_v6 = vpop.f32.mrf.mxu1  ;;  %v14654_v50 = vld [vmem:[#allocation13 + $0x4ec] ss:$16 sps:$4 sm:$0xff]  }
 0x61a   : > { %11413 = vmatpush1.bf16.msra.mxu1 %v14604_v49  ;;  %v14660_v49 = vld [vmem:[#allocation13 + $0x4cc] ss:$16 sps:$4 sm:$0xff]  }
 0x61b   : > { %v9465_v37 = vpop.f32.mrf.mxu1  ;;  %11414 = vmatprep.subr.bf16.mxu1 %v14609_v9  ;;  %11388 = vmatpush2.bf16.msra.mxu0 %v14703_v47  ;;  %v14658_v9 = vld [vmem:[#allocation13 + $0x4c8] ss:$16 sps:$4 sm:$0xff]  }
 0x61c   : > { %11389 = vmatprep.subr.bf16.mxu0 %v14711_v53  ;;  %v14666_v53 = vld [vmem:[#allocation13 + $0x4ac] ss:$16 sps:$4 sm:$0xff]  }
 0x61e   : > { %11415 = vmatpush1.bf16.msra.mxu1 %v14607_v19  ;;  %v14664_v19 = vld [vmem:[#allocation13 + $0x4a8] ss:$16 sps:$4 sm:$0xff]  }
 0x61f   : > { %11416 = vmatprep.subr.bf16.mxu1 %v14612_v22  ;;  %11390 = vmatpush2.bf16.msra.mxu0 %v14709_v41  ;;  %v14672_v22 = vld [vmem:[#allocation13 + $0x48c] ss:$16 sps:$4 sm:$0xff]   ;;  %v14670_v41 = vld [vmem:[#allocation13 + $0x488] ss:$16 sps:$4 sm:$0xff]  }
 0x620   : > { %11391 = vmatprep.subr.bf16.mxu0 %v14717_v17  ;;  %v14678_v17 = vld [vmem:[#allocation13 + $0x46c] ss:$16 sps:$4 sm:$0xff]  }
 0x622   : > { %11417 = vmatpush1.bf16.msra.mxu1 %v14610_v36  ;;  %v14676_v36 = vld [vmem:[#allocation13 + $0x468] ss:$16 sps:$4 sm:$0xff]  }
 0x623   : > { %11418 = vmatprep.subr.bf16.mxu1 %v14615_v1  ;;  %11392 = vmatpush2.bf16.msra.mxu0 %v14715_v60  ;;  %v14690_v1 = vld [vmem:[#allocation13 + $0x42c] ss:$16 sps:$4 sm:$0xff]   ;;  %v14688_v60 = vld [vmem:[#allocation13 + $0x428] ss:$16 sps:$4 sm:$0xff]  }
 0x624   : > { %11393 = vmatprep.subr.bf16.mxu0 %v14723_v55  ;;  %v14696_v55 = vld [vmem:[#allocation13 + $0x40c] ss:$16 sps:$4 sm:$0xff]  }
 0x626   : > { %11419 = vmatpush1.bf16.msra.mxu1 %v14613_v5  ;;  %v14694_v5 = vld [vmem:[#allocation13 + $0x408] ss:$16 sps:$4 sm:$0xff]  }
 0x627   : > { %11420 = vmatprep.subr.bf16.mxu1 %v14618_v20  ;;  %11394 = vmatpush2.bf16.msra.mxu0 %v14721_v14  ;;  %v14702_v20 = vld [vmem:[#allocation13 + $0x5ec] ss:$16 sps:$4 sm:$0xff]   ;;  %v9618_v14 = vsub.s32 6, %v16107_v28 }
 0x628   : > { %11395 = vmatprep.subr.bf16.mxu0 %v14729_v45 }
 0x62a   : > { %11421 = vmatpush1.bf16.msra.mxu1 %v14616_v27  ;;  %v14700_v27 = vld [vmem:[#allocation13 + $0x5e8] ss:$16 sps:$4 sm:$0xff]  }
 0x62b   : > { %11422 = vmatprep.subr.bf16.mxu1 %v14621_v10  ;;  %11396 = vmatpush2.bf16.msra.mxu0 %v14727_v46  ;;  %v9622_v10 = vsub.s32 7, %v16107_v28  ;;  %v14708_v46 = vld [vmem:[#allocation13 + $0x5cc] ss:$16 sps:$4 sm:$0xff]  }
 0x62c   : > { %11397 = vmatprep.subr.bf16.mxu0 %v14735_v29  ;;  %v14940_v28 = vld [vmem:[#allocation19 + $0x60] ss:$8 sps:$4 sm:$0xff]  }
 0x62e   : > { %11423 = vmatpush1.bf16.msra.mxu1 %v14619_v58 }
 0x62f   : > { %11424 = vmatprep.subr.bf16.mxu1 %v14624_v63  ;;  %11398 = vmatpush2.bf16.msra.mxu0 %v14733_v62  ;;  %v15013_v63 = vld [vmem:[#allocation11] sm:$0xff] }
 0x630   : > { %11399 = vmatprep.subr.bf16.mxu0 %v14741_v7  ;;  %v9619_v62 = vrot.slane %v15013_v63, %v9618_v14  ;;  %v14754_v14 = vld [vmem:[#allocation13 + $0x288] ss:$16 sps:$4 sm:$0xff]  }
 0x632   : > { %11425 = vmatpush1.bf16.msra.mxu1 %v14622_v25 }
 0x633   : > { %11426 = vmatprep.subr.bf16.mxu1 %v14627_v56  ;;  %11400 = vmatpush2.bf16.msra.mxu0 %v14739_v43  ;;  %v9623_v43 = vrot.slane %v15013_v63, %v9622_v10  ;;  %v14757_v10 = vld [vmem:[#allocation13 + $0x268] ss:$16 sps:$4 sm:$0xff]  }
 0x634   : > { %11451 = vmatprep.subr.bf16.mxu0 %v14747_v15  ;;  %v14706_v15 = vld [vmem:[#allocation13 + $0x5c8] ss:$16 sps:$4 sm:$0xff]  }
 0x635   : > { %v16222_v3 = vpop.f32.mrf.mxu0  ;;  %v14760_v63 = vld [vmem:[#allocation13 + $0x248] ss:$16 sps:$4 sm:$0xff]  }
 0x636   : > { %11427 = vmatpush2.bf16.msra.mxu1 %v14625_v48  ;;  %v9502_v45 = vadd.f32 %v16222_v3, %v16216_v11  ;;  %v14714_v11 = vld [vmem:[#allocation13 + $0x5ac] ss:$16 sps:$4 sm:$0xff]  }
 0x637   : > { %v16224_v18 = vpop.f32.mrf.mxu0  ;;  %11428 = vmatprep.subr.bf16.mxu1 %v14630_v8 }
 0x638   : > { %v9504_v29 = vadd.f32 %v16224_v18, %v16220_v21  ;;  %v14720_v18 = vld [vmem:[#allocation13 + $0x58c] ss:$16 sps:$4 sm:$0xff]  }
 0x639   : > { %v9505_v12 = vpop.f32.mrf.mxu0 }
 0x63a   : > { %11429 = vmatpush2.bf16.msra.mxu1 %v14628_v57 }
 0x63b   : > { %v9506_v0 = vpop.f32.mrf.mxu0  ;;  %11430 = vmatprep.subr.bf16.mxu1 %v14633_v2 }
 0x63e   : > { %11431 = vmatpush2.bf16.msra.mxu1 %v14631_v31  ;;  %v14712_v31 = vld [vmem:[#allocation13 + $0x5a8] ss:$16 sps:$4 sm:$0xff]  }
 0x63f   : > { %11432 = vmatprep.subr.bf16.mxu1 %v14636_v13  ;;  %v14718_v13 = vld [vmem:[#allocation13 + $0x588] ss:$16 sps:$4 sm:$0xff]  }
 0x642   : > { %11433 = vmatpush2.bf16.msra.mxu1 %v14634_v26  ;;  %v14726_v26 = vld [vmem:[#allocation13 + $0x56c] ss:$16 sps:$4 sm:$0xff]  }
 0x643   : > { %11434 = vmatprep.subr.bf16.mxu1 %v14639_v24  ;;  %v14724_v24 = vld [vmem:[#allocation13 + $0x568] ss:$16 sps:$4 sm:$0xff]  }
 0x646   : > { %11435 = vmatpush2.bf16.msra.mxu1 %v14637_v23  ;;  %v14732_v23 = vld [vmem:[#allocation13 + $0x54c] ss:$16 sps:$4 sm:$0xff]  }
 0x647   : > { %11436 = vmatprep.subr.bf16.mxu1 %v14642_v40  ;;  %v14730_v40 = vld [vmem:[#allocation13 + $0x548] ss:$16 sps:$4 sm:$0xff]  }
 0x64a   : > { %11437 = vmatpush2.bf16.msra.mxu1 %v14640_v34  ;;  %v14738_v34 = vld [vmem:[#allocation13 + $0x52c] ss:$16 sps:$4 sm:$0xff]  }
 0x64b   : > { %11438 = vmatprep.subr.bf16.mxu1 %v14645_v33 }
 0x64e   : > { %11439 = vmatpush2.bf16.msra.mxu1 %v14643_v54 }
 0x64f   : > { %11440 = vmatprep.subr.bf16.mxu1 %v14648_v51  ;;  %v14736_v51 = vld [vmem:[#allocation13 + $0x528] ss:$16 sps:$4 sm:$0xff]  }
 0x652   : > { %11441 = vmatpush2.bf16.msra.mxu1 %v14646_v39 }
 0x653   : > { %11492 = vmatprep.subr.bf16.mxu1 %v14654_v50 }
 0x655   : > { %v9542_v52 = vpop.f32.mrf.mxu1  ;;  %11443 = vmatmul.mubr.bf16.vlgmr.msra.gmra.mxu1 %v16179_v4  ;;  %v14684_v4 = vld [vmem:[#allocation13 + $0x44c] ss:$16 sps:$4 sm:$0xff]  }
 0x656   : > { %11493 = vmatpush1.bf16.msra.mxu1 %v14652_v35  ;;  %11524 = vmatprep.mubr.bf16.mxu1 %v16185_v59  ;;  %v14682_v59 = vld [vmem:[#allocation13 + $0x448] ss:$16 sps:$4 sm:$0xff]   ;;  %v9543_v58 = vadd.f32 %v9542_v52, %v9502_v45  ;;  %v14744_v35 = vld [vmem:[#allocation13 + $0x50c] ss:$16 sps:$4 sm:$0xff]  }
 0x657   : > { %v9544_v47 = vpop.f32.mrf.mxu1  ;;  %11494 = vmatprep.subr.bf16.mxu1 %v14660_v49  ;;  %v14759_v45 = vld [vmem:[#allocation13 + $0x26c] ss:$16 sps:$4 sm:$0xff]  }
 0x658   : > { %v9545_v25 = vadd.f32 %v9544_v47, %v9504_v29  ;;  %v14742_v47 = vld [vmem:[#allocation13 + $0x508] ss:$16 sps:$4 sm:$0xff]   ;;  %v14847_v29 = vld [vmem:[#allocation16 + $0x50] ss:$8 sps:$4 sm:$0xff]  }
 0x659   : > { %v9546_v6 = vpop.f32.mrf.mxu1 }
 0x65a   : > { %11495 = vmatpush1.bf16.msra.mxu1 %v14658_v9 }
 0x65b   : > { %v9547_v37 = vpop.f32.mrf.mxu1  ;;  %11496 = vmatprep.subr.bf16.mxu1 %v14666_v53 }
 0x65e   : > { %11497 = vmatpush1.bf16.msra.mxu1 %v14664_v19  ;;  %v14745_v19 = vld [vmem:[#allocation13 + $0x2e8] ss:$16 sps:$4 sm:$0xff]  }
 0x65f   : > { %11498 = vmatprep.subr.bf16.mxu1 %v14672_v22  ;;  %v14750_v22 = vld [vmem:[#allocation13 + $0x2cc] ss:$16 sps:$4 sm:$0xff]  }
 0x662   : > { %11499 = vmatpush1.bf16.msra.mxu1 %v14670_v41  ;;  %v14748_v41 = vld [vmem:[#allocation13 + $0x2c8] ss:$16 sps:$4 sm:$0xff]  }
 0x663   : > { %11500 = vmatprep.subr.bf16.mxu1 %v14678_v17 }
 0x666   : > { %11501 = vmatpush1.bf16.msra.mxu1 %v14676_v36  ;;  %v14753_v36 = vld [vmem:[#allocation13 + $0x2ac] ss:$16 sps:$4 sm:$0xff]  }
 0x667   : > { %11502 = vmatprep.subr.bf16.mxu1 %v14684_v4 }
 0x66a   : > { %11503 = vmatpush1.bf16.msra.mxu1 %v14682_v59  ;;  %v14751_v59 = vld [vmem:[#allocation13 + $0x2a8] ss:$16 sps:$4 sm:$0xff]  }
 0x66b   : > { %11504 = vmatprep.subr.bf16.mxu1 %v14690_v1 }
 0x66e   : > { %11505 = vmatpush1.bf16.msra.mxu1 %v14688_v60  ;;  %v14756_v60 = vld [vmem:[#allocation13 + $0x28c] ss:$16 sps:$4 sm:$0xff]  }
 0x66f   : > { %11506 = vmatprep.subr.bf16.mxu1 %v14696_v55 }
 0x672   : > { %11507 = vmatpush1.bf16.msra.mxu1 %v14694_v5  ;;  %v14841_v5 = vld [vmem:[#allocation16 + $0x70] ss:$8 sps:$4 sm:$0xff]  }
 0x673   : > { %11508 = vmatprep.subr.bf16.mxu1 %v14702_v20  ;;  %v14843_v20 = vld [vmem:[#allocation16 + $0x74] ss:$8 sps:$4 sm:$0xff]  }
 0x675   : > { %v9583_v7 = vpop.f32.mrf.mxu0 }
 0x676   : > { %v9584_v56 = vadd.f32 %v9583_v7, %v9543_v58  ;;  %11509 = vmatpush2.bf16.msra.mxu1 %v14700_v27  ;;  %v14849_v27 = vld [vmem:[#allocation16 + $0x54] ss:$8 sps:$4 sm:$0xff]   ;;  %v14852_v58 = vld [vmem:[#allocation16 + $0x44] ss:$8 sps:$4 sm:$0xff]   ;;  %v14850_v7 = vld [vmem:[#allocation16 + $0x40] ss:$8 sps:$4 sm:$0xff]  }
 0x677   : > { %v9585_v48 = vpop.f32.mrf.mxu0  ;;  %11510 = vmatprep.subr.bf16.mxu1 %v14708_v46  ;;  %v14762_v46 = vld [vmem:[#allocation13 + $0x24c] ss:$16 sps:$4 sm:$0xff]  }
 0x678   : > { %v9638_v8 = vadd.f32 %v9619_v62, %v9584_v56  ;;  %v9586_v3 = vadd.f32 %v9585_v48, %v9545_v25  ;;  %v14765_v62 = vld [vmem:[#allocation13 + $0x22c] ss:$16 sps:$4 sm:$0xff]   ;;  %v14855_v25 = vld [vmem:[#allocation16 + $0x34] ss:$8 sps:$4 sm:$0xff]   ;;  %v14858_v48 = vld [vmem:[#allocation16 + $0x24] ss:$8 sps:$4 sm:$0xff]  }
 0x679   : > { %v9587_v57 = vpop.f32.mrf.mxu0  ;;  %v14763_v56 = vld [vmem:[#allocation13 + $0x228] ss:$16 sps:$4 sm:$0xff]  }
 0x67a   : > { %v9654_v2 = vmul.f32 0.70710677, %v9638_v8  ;;  %v9639_v12 = vadd.f32 %v9623_v43, %v9586_v3  ;;  %11511 = vmatpush2.bf16.msra.mxu1 %v14706_v15  ;;  %v9646_v50 = vmul.f32 0.5, %v9638_v8  ;;  %v14768_v43 = vld [vmem:[#allocation13 + $0x20c] ss:$16 sps:$4 sm:$0xff]  }
 0x67b   : > { %v9588_v21 = vpop.f32.mrf.mxu0  ;;  %11512 = vmatprep.subr.bf16.mxu1 %v14714_v11  ;;  %v14853_v15 = vld [vmem:[#allocation16 + $0x30] ss:$8 sps:$4 sm:$0xff]   ;;  %v14766_v11 = vld [vmem:[#allocation13 + $0x208] ss:$16 sps:$4 sm:$0xff]   ;;  %v16246_v8 = vld [vmem:[#allocation14] sm:$0xf] }
 0x67c   : > { %14997 = verf.f32 %v9654_v2  ;;  %v9655_v0 = vmul.f32 0.70710677, %v9639_v12  ;;  %v9647_v49 = vmul.f32 0.5, %v9639_v12  ;;  %v14771_v3 = vld [vmem:[#allocation13 + $0x3ec] ss:$16 sps:$4 sm:$0xff]   ;;  %v9949_v12 = vrot.slane %v16246_v8, %v16147_v42 }
 0x67d   : > { %v14856_v57 = vld [vmem:[#allocation16 + $0x20] ss:$8 sps:$4 sm:$0xff]   ;;  %v14861_v2 = vld [vmem:[#allocation16 + $0x14] ss:$8 sps:$4 sm:$0xff]  }
 0x67e   : > { %14999 = verf.f32 %v9655_v0  ;;  %11513 = vmatpush2.bf16.msra.mxu1 %v14712_v31  ;;  %v14769_v31 = vld [vmem:[#allocation13 + $0x3e8] ss:$16 sps:$4 sm:$0xff]   ;;  %v14774_v21 = vld [vmem:[#allocation13 + $0x3cc] ss:$16 sps:$4 sm:$0xff]  }
 0x67f   : > { %11514 = vmatprep.subr.bf16.mxu1 %v14720_v18  ;;  %v9953_v18 = vrot.slane %v16246_v8, %v16110_v16  ;;  %v14859_v0 = vld [vmem:[#allocation16 + $0x10] ss:$8 sps:$4 sm:$0xff]  }
 0x682   : > { %11515 = vmatpush2.bf16.msra.mxu1 %v14718_v13  ;;  %v14864_v13 = vld [vmem:[#allocation16 + $0x4] ss:$8 sps:$4 sm:$0xff]  }
 0x683   : > { %11516 = vmatprep.subr.bf16.mxu1 %v14726_v26 }
 0x686   : > { %11517 = vmatpush2.bf16.msra.mxu1 %v14724_v24  ;;  %v14772_v24 = vld [vmem:[#allocation13 + $0x3c8] ss:$16 sps:$4 sm:$0xff]  }
 0x687   : > { %11518 = vmatprep.subr.bf16.mxu1 %v14732_v23 }
 0x689   : > { %v14998_v33 = vpop.eup %14997 }
 0x68a   : > { %v9670_v54 = vadd.f32 1.0, %v14998_v33  ;;  %11519 = vmatpush2.bf16.msra.mxu1 %v14730_v40  ;;  %v14777_v40 = vld [vmem:[#allocation13 + $0x3ac] ss:$16 sps:$4 sm:$0xff]  }
 0x68b   : > { %v15000_v39 = vpop.eup %14999  ;;  %11520 = vmatprep.subr.bf16.mxu1 %v14738_v34 }
 0x68c   : > { %v9671_v52 = vadd.f32 1.0, %v15000_v39  ;;  %v9678_v9 = vmul.f32 %v9670_v54, %v9646_v50  ;;  %v14862_v54 = vld [vmem:[#allocation16] ss:$8 sps:$4 sm:$0xff]   ;;  %v14867_v39 = vld [vmem:[#allocation16 + $0xf4] ss:$8 sps:$4 sm:$0xff]  }
 0x68e   : > { %11521 = vmatpush2.bf16.msra.mxu1 %v14736_v51  ;;  %v9679_v53 = vmul.f32 %v9671_v52, %v9647_v49  ;;  %v16236_v37 = vpack.c.bf16 %v9678_v9, %v9678_v9  ;;  %v14780_v52 = vld [vmem:[#allocation13 + $0x38c] ss:$16 sps:$4 sm:$0xff]  }
 0x68f   : > { %11522 = vmatprep.subr.bf16.mxu1 %v14744_v35  ;;  %v14775_v35 = vld [vmem:[#allocation13 + $0x3a8] ss:$16 sps:$4 sm:$0xff]   ;;  %v14865_v9 = vld [vmem:[#allocation16 + $0xf0] ss:$8 sps:$4 sm:$0xff]  }
 0x690   : > { %v16234_v6 = vpack.c.bf16 %v9679_v53, %v9679_v53  ;;  %v14778_v53 = vld [vmem:[#allocation13 + $0x388] ss:$16 sps:$4 sm:$0xff]  }
 0x692   : > { %11401 = vmatprep.mubr.bf16.mxu0 %v16234_v6  ;;  %11523 = vmatpush2.bf16.msra.mxu1 %v14742_v47 }
 0x693   : > { %11402 = vmatmul.mubr.bf16.vlgmr.msra.gmra.mxu0 %v16236_v37  ;;  %11994 = vmatprep.subr.bf16.mxu1 %v14843_v20  ;;  %v14870_v20 = vld [vmem:[#allocation16 + $0xe4] ss:$8 sps:$4 sm:$0xff]  }
 0x694   : > { %11452 = vmatpush1.bf16.msra.mxu0 %v14745_v19  ;;  %11483 = vmatprep.mubr.bf16.mxu0 %v16162_v32  ;;  %v14846_v32 = vld [vmem:[#allocation16 + $0x64] ss:$8 sps:$4 sm:$0xff]   ;;  %v14783_v19 = vld [vmem:[#allocation13 + $0x36c] ss:$16 sps:$4 sm:$0xff]  }
 0x695   : > { %v16241_v17 = vpop.f32.mrf.mxu1  ;;  %11525 = vmatmul.mubr.bf16.vlgmr.msra.gmra.mxu1 %v16212_v61  ;;  %11453 = vmatprep.subr.bf16.mxu0 %v14750_v22  ;;  %v14844_v61 = vld [vmem:[#allocation16 + $0x60] ss:$8 sps:$4 sm:$0xff]   ;;  %v14781_v22 = vld [vmem:[#allocation13 + $0x368] ss:$16 sps:$4 sm:$0xff]  }
 0x696   : > { %11995 = vmatpush1.bf16.msra.mxu1 %v14841_v5  ;;  %v11281_v26 = vadd.f32 %v16241_v17, %v9949_v12  ;;  %v14784_v17 = vld [vmem:[#allocation13 + $0x348] ss:$16 sps:$4 sm:$0xff]   ;;  %v14798_v5 = vld [vmem:[#allocation13 + $0x6cc] ss:$16 sps:$4 sm:$0xff]  }
 0x697   : > { %v16244_v4 = vpop.f32.mrf.mxu1  ;;  %11996 = vmatprep.subr.bf16.mxu1 %v14846_v32  ;;  %v14796_v32 = vld [vmem:[#allocation13 + $0x6c8] ss:$16 sps:$4 sm:$0xff]  }
 0x698   : > { %11454 = vmatpush1.bf16.msra.mxu0 %v14748_v41  ;;  %v11283_v34 = vadd.f32 %v16244_v4, %v9953_v18  ;;  %v14786_v41 = vld [vmem:[#allocation13 + $0x34c] ss:$16 sps:$4 sm:$0xff]   ;;  %v14787_v4 = vld [vmem:[#allocation13 + $0x328] ss:$16 sps:$4 sm:$0xff]  }
 0x699   : > { %v11284_v1 = vpop.f32.mrf.mxu1  ;;  %11455 = vmatprep.subr.bf16.mxu0 %v14753_v36  ;;  %v14789_v36 = vld [vmem:[#allocation13 + $0x32c] ss:$16 sps:$4 sm:$0xff]   ;;  %v14808_v12 = vld [vmem:[#allocation13 + $0x648] ss:$16 sps:$4 sm:$0xff]  }
 0x69a   : > { %11997 = vmatpush1.bf16.msra.mxu1 %v14844_v61  ;;  %v14790_v1 = vld [vmem:[#allocation13 + $0x308] ss:$16 sps:$4 sm:$0xff]   ;;  %v14801_v61 = vld [vmem:[#allocation13 + $0x6ac] ss:$16 sps:$4 sm:$0xff]  }
 0x69b   : > { %v11285_v55 = vpop.f32.mrf.mxu1  ;;  %11998 = vmatprep.subr.bf16.mxu1 %v14849_v27  ;;  %v14883_v18 = vld [vmem:[#allocation16 + $0x90] ss:$8 sps:$4 sm:$0xff]  }
 0x69c   : > { %11456 = vmatpush1.bf16.msra.mxu0 %v14751_v59  ;;  %v14792_v59 = vld [vmem:[#allocation13 + $0x30c] ss:$16 sps:$4 sm:$0xff]   ;;  %v14793_v55 = vld [vmem:[#allocation13 + $0x6e8] ss:$16 sps:$4 sm:$0xff]  }
 0x69d   : > { %11457 = vmatprep.subr.bf16.mxu0 %v14756_v60  ;;  %v14795_v60 = vld [vmem:[#allocation13 + $0x6ec] ss:$16 sps:$4 sm:$0xff]  }
 0x69e   : > { %11999 = vmatpush1.bf16.msra.mxu1 %v14847_v29  ;;  %v14871_v29 = vld [vmem:[#allocation16 + $0xd0] ss:$8 sps:$4 sm:$0xff]  }
 0x69f   : > { %12000 = vmatprep.subr.bf16.mxu1 %v14852_v58 }
 0x6a0   : > { %11458 = vmatpush1.bf16.msra.mxu0 %v14754_v14  ;;  %v14868_v14 = vld [vmem:[#allocation16 + $0xe0] ss:$8 sps:$4 sm:$0xff]  }
 0x6a1   : > { %11459 = vmatprep.subr.bf16.mxu0 %v14759_v45 }
 0x6a2   : > { %12001 = vmatpush1.bf16.msra.mxu1 %v14850_v7 }
 0x6a3   : > { %12002 = vmatprep.subr.bf16.mxu1 %v14855_v25  ;;  %v14874_v25 = vld [vmem:[#allocation16 + $0xc0] ss:$8 sps:$4 sm:$0xff]  }
 0x6a4   : > { %11460 = vmatpush1.bf16.msra.mxu0 %v14757_v10  ;;  %v14873_v10 = vld [vmem:[#allocation16 + $0xd4] ss:$8 sps:$4 sm:$0xff]  }
 0x6a5   : > { %11461 = vmatprep.subr.bf16.mxu0 %v14762_v46 }
 0x6a6   : > { %12003 = vmatpush1.bf16.msra.mxu1 %v14853_v15  ;;  %v14879_v15 = vld [vmem:[#allocation16 + $0xb4] ss:$8 sps:$4 sm:$0xff]  }
 0x6a7   : > { %12004 = vmatprep.subr.bf16.mxu1 %v14858_v48  ;;  %v14877_v48 = vld [vmem:[#allocation16 + $0xb0] ss:$8 sps:$4 sm:$0xff]  }
 0x6a8   : > { %11462 = vmatpush1.bf16.msra.mxu0 %v14760_v63  ;;  %v14799_v63 = vld [vmem:[#allocation13 + $0x6a8] ss:$16 sps:$4 sm:$0xff]  }
 0x6a9   : > { %11463 = vmatprep.subr.bf16.mxu0 %v14765_v62  ;;  %v14804_v62 = vld [vmem:[#allocation13 + $0x68c] ss:$16 sps:$4 sm:$0xff]  }
 0x6aa   : > { %12005 = vmatpush1.bf16.msra.mxu1 %v14856_v57  ;;  %v14882_v57 = vld [vmem:[#allocation16 + $0xa4] ss:$8 sps:$4 sm:$0xff]  }
 0x6ab   : > { %12006 = vmatprep.subr.bf16.mxu1 %v14861_v2  ;;  %v14880_v2 = vld [vmem:[#allocation16 + $0xa0] ss:$8 sps:$4 sm:$0xff]  }
 0x6ac   : > { %11464 = vmatpush1.bf16.msra.mxu0 %v14763_v56  ;;  %v14802_v56 = vld [vmem:[#allocation13 + $0x688] ss:$16 sps:$4 sm:$0xff]  }
 0x6ad   : > { %11465 = vmatprep.subr.bf16.mxu0 %v14768_v43  ;;  %v14807_v43 = vld [vmem:[#allocation13 + $0x66c] ss:$16 sps:$4 sm:$0xff]  }
 0x6ae   : > { %12007 = vmatpush1.bf16.msra.mxu1 %v14859_v0  ;;  %v14811_v0 = vld [vmem:[#allocation13 + $0x628] ss:$16 sps:$4 sm:$0xff]  }
 0x6af   : > { %12008 = vmatprep.subr.bf16.mxu1 %v14864_v13  ;;  %v14816_v13 = vld [vmem:[#allocation13 + $0x60c] ss:$16 sps:$4 sm:$0xff]  }
 0x6b0   : > { %11466 = vmatpush1.bf16.msra.mxu0 %v14766_v11  ;;  %v14805_v11 = vld [vmem:[#allocation13 + $0x668] ss:$16 sps:$4 sm:$0xff]  }
 0x6b1   : > { %11467 = vmatprep.subr.bf16.mxu0 %v14771_v3  ;;  %v14810_v3 = vld [vmem:[#allocation13 + $0x64c] ss:$16 sps:$4 sm:$0xff]  }
 0x6b2   : > { %12009 = vmatpush1.bf16.msra.mxu1 %v14862_v54  ;;  %v14820_v54 = vld [vmem:[#allocation13 + $0x7c8] ss:$16 sps:$4 sm:$0xff]  }
 0x6b3   : > { %12010 = vmatprep.subr.bf16.mxu1 %v14867_v39  ;;  %v14823_v39 = vld [vmem:[#allocation13 + $0x7a8] ss:$16 sps:$4 sm:$0xff]  }
 0x6b4   : > { %11468 = vmatpush2.bf16.msra.mxu0 %v14769_v31  ;;  %v14813_v31 = vld [vmem:[#allocation13 + $0x62c] ss:$16 sps:$4 sm:$0xff]  }
 0x6b5   : > { %v11321_v23 = vpop.f32.mrf.mxu0  ;;  %11469 = vmatprep.subr.bf16.mxu0 %v14774_v21  ;;  %v14885_v21 = vld [vmem:[#allocation16 + $0x94] ss:$8 sps:$4 sm:$0xff]  }
 0x6b6   : > { %v11322_v33 = vadd.f32 %v11321_v23, %v11281_v26  ;;  %12011 = vmatpush2.bf16.msra.mxu1 %v14865_v9  ;;  %v14886_v26 = vld [vmem:[#allocation16 + $0x80] ss:$8 sps:$4 sm:$0xff]   ;;  %v14814_v23 = vld [vmem:[#allocation13 + $0x608] ss:$16 sps:$4 sm:$0xff]  }
 0x6b7   : > { %v11323_v51 = vpop.f32.mrf.mxu0  ;;  %12012 = vmatprep.subr.bf16.mxu1 %v14870_v20  ;;  %v14834_v9 = vld [vmem:[#allocation13 + $0x74c] ss:$16 sps:$4 sm:$0xff]   ;;  %v14897_v20 = vld [vmem:[#allocation16 + $0x154] ss:$8 sps:$4 sm:$0xff]  }
 0x6b8   : > { %v11324_v50 = vadd.f32 %v11323_v51, %v11283_v34  ;;  %11470 = vmatpush2.bf16.msra.mxu0 %v14772_v24  ;;  %v14888_v24 = vld [vmem:[#allocation16 + $0x84] ss:$8 sps:$4 sm:$0xff]   ;;  %v14825_v51 = vld [vmem:[#allocation13 + $0x7ac] ss:$16 sps:$4 sm:$0xff]  }
 0x6b9   : > { %v11325_v49 = vpop.f32.mrf.mxu0  ;;  %11471 = vmatprep.subr.bf16.mxu0 %v14777_v40  ;;  %v14819_v40 = vld [vmem:[#allocation13 + $0x7ec] ss:$16 sps:$4 sm:$0xff]   ;;  %v14817_v34 = vld [vmem:[#allocation13 + $0x7e8] ss:$16 sps:$4 sm:$0xff]  }
 0x6ba   : > { %12013 = vmatpush2.bf16.msra.mxu1 %v14868_v14  ;;  %v14831_v49 = vld [vmem:[#allocation13 + $0x76c] ss:$16 sps:$4 sm:$0xff]  }
 0x6bb   : > { %v11326_v47 = vpop.f32.mrf.mxu0  ;;  %12014 = vmatprep.subr.bf16.mxu1 %v14873_v10  ;;  %v14895_v14 = vld [vmem:[#allocation16 + $0x150] ss:$8 sps:$4 sm:$0xff]   ;;  %v14906_v10 = vld [vmem:[#allocation16 + $0x124] ss:$8 sps:$4 sm:$0xff]  }
 0x6bc   : > { %11472 = vmatpush2.bf16.msra.mxu0 %v14775_v35  ;;  %v14826_v35 = vld [vmem:[#allocation13 + $0x788] ss:$16 sps:$4 sm:$0xff]  }
 0x6bd   : > { %11473 = vmatprep.subr.bf16.mxu0 %v14780_v52  ;;  %v14829_v52 = vld [vmem:[#allocation13 + $0x768] ss:$16 sps:$4 sm:$0xff]  }
 0x6be   : > { %12015 = vmatpush2.bf16.msra.mxu1 %v14871_v29  ;;  %v14832_v47 = vld [vmem:[#allocation13 + $0x748] ss:$16 sps:$4 sm:$0xff]  }
 0x6bf   : > { %v14909_v29 = vld [vmem:[#allocation16 + $0x114] ss:$8 sps:$4 sm:$0xff]  }
 0x6c0   : > { %11474 = vmatpush2.bf16.msra.mxu0 %v14778_v53  ;;  %v14837_v53 = vld [vmem:[#allocation13 + $0x72c] ss:$16 sps:$4 sm:$0xff]  }
 0x6c1   : > { %11475 = vmatprep.subr.bf16.mxu0 %v14783_v19  ;;  %v14835_v19 = vld [vmem:[#allocation13 + $0x728] ss:$16 sps:$4 sm:$0xff]  }
 0x6c4   : > { %11476 = vmatpush2.bf16.msra.mxu0 %v14781_v22  ;;  %v14840_v22 = vld [vmem:[#allocation13 + $0x70c] ss:$16 sps:$4 sm:$0xff]  }
 0x6c5   : > { %11477 = vmatprep.subr.bf16.mxu0 %v14786_v41  ;;  %v14838_v41 = vld [vmem:[#allocation13 + $0x708] ss:$16 sps:$4 sm:$0xff]  }
 0x6c8   : > { %11478 = vmatpush2.bf16.msra.mxu0 %v14784_v17 }
 0x6c9   : > { %11479 = vmatprep.subr.bf16.mxu0 %v14789_v36 }
 0x6cc   : > { %11480 = vmatpush2.bf16.msra.mxu0 %v14787_v4 }
 0x6cd   : > { %11481 = vmatprep.subr.bf16.mxu0 %v14792_v59  ;;  %v14889_v59 = vld [vmem:[#allocation16 + $0x170] ss:$8 sps:$4 sm:$0xff]  }
 0x6d0   : > { %11482 = vmatpush2.bf16.msra.mxu0 %v14790_v1  ;;  %v14891_v1 = vld [vmem:[#allocation16 + $0x174] ss:$8 sps:$4 sm:$0xff]  }
 0x6d1   : > { %11533 = vmatprep.subr.bf16.mxu0 %v14795_v60  ;;  %v14894_v60 = vld [vmem:[#allocation16 + $0x164] ss:$8 sps:$4 sm:$0xff]  }
 0x6d3   : > { %11484 = vmatmul.mubr.bf16.vlgmr.msra.gmra.mxu0 %v16198_v44 }
 0x6d4   : > { %11534 = vmatpush1.bf16.msra.mxu0 %v14793_v55  ;;  %11565 = vmatprep.mubr.bf16.mxu0 %v16234_v6  ;;  %v14876_v6 = vld [vmem:[#allocation16 + $0xc4] ss:$8 sps:$4 sm:$0xff]  }
 0x6d5   : > { %v11362_v45 = vpop.f32.mrf.mxu1  ;;  %11535 = vmatprep.subr.bf16.mxu0 %v14798_v5  ;;  %12016 = vmatprep.subr.bf16.mxu1 %v14876_v6  ;;  %v14892_v5 = vld [vmem:[#allocation16 + $0x160] ss:$8 sps:$4 sm:$0xff]   ;;  %v14915_v6 = vld [vmem:[#allocation16 + $0x1f4] ss:$8 sps:$4 sm:$0xff]  }
 0x6d6   : > { %v16256_v27 = vadd.f32 %v11362_v45, %v11322_v33  ;;  %12017 = vmatpush2.bf16.msra.mxu1 %v14874_v25  ;;  %v14822_v33 = vld [vmem:[#allocation13 + $0x7cc] ss:$16 sps:$4 sm:$0xff]   ;;  %v14903_v45 = vld [vmem:[#allocation16 + $0x134] ss:$8 sps:$4 sm:$0xff]   ;;  %v14918_v25 = vld [vmem:[#allocation16 + $0x1e4] ss:$8 sps:$4 sm:$0xff]  }
 0x6d7   : > { %v11364_v46 = vpop.f32.mrf.mxu1  ;;  %12018 = vmatprep.subr.bf16.mxu1 %v14879_v15 }
 0x6d8   : > { %v16258_v58 = vadd.f32 %v11364_v46, %v11324_v50  ;;  %11536 = vmatpush1.bf16.msra.mxu0 %v14796_v32  ;;  %v14828_v50 = vld [vmem:[#allocation13 + $0x78c] ss:$16 sps:$4 sm:$0xff]   ;;  %v14900_v32 = vld [vmem:[#allocation16 + $0x144] ss:$8 sps:$4 sm:$0xff]  }
 0x6d9   : > { %v11366_v44 = vpop.f32.mrf.mxu1  ;;  %11537 = vmatprep.subr.bf16.mxu0 %v14801_v61  ;;  %v14901_v61 = vld [vmem:[#allocation16 + $0x130] ss:$8 sps:$4 sm:$0xff]   ;;  %v14904_v46 = vld [vmem:[#allocation16 + $0x120] ss:$8 sps:$4 sm:$0xff]  }
 0x6da   : > { %12019 = vmatpush2.bf16.msra.mxu1 %v14877_v48  ;;  %v14912_v44 = vld [vmem:[#allocation16 + $0x104] ss:$8 sps:$4 sm:$0xff]  }
 0x6db   : > { %v11367_v7 = vpop.f32.mrf.mxu1  ;;  %12020 = vmatprep.subr.bf16.mxu1 %v14882_v57 }
 0x6dc   : > { %11538 = vmatpush1.bf16.msra.mxu0 %v14799_v63  ;;  %v14907_v63 = vld [vmem:[#allocation16 + $0x110] ss:$8 sps:$4 sm:$0xff]  }
 0x6dd   : > { %11539 = vmatprep.subr.bf16.mxu0 %v14804_v62  ;;  %v14910_v62 = vld [vmem:[#allocation16 + $0x100] ss:$8 sps:$4 sm:$0xff]   ;;  %v14913_v7 = vld [vmem:[#allocation16 + $0x1f0] ss:$8 sps:$4 sm:$0xff]  }
 0x6de   : > { %12021 = vmatpush2.bf16.msra.mxu1 %v14880_v2 }
 0x6df   : > { %12022 = vmatprep.subr.bf16.mxu1 %v14885_v21 }
 0x6e0   : > { %11540 = vmatpush1.bf16.msra.mxu0 %v14802_v56  ;;  %v14916_v56 = vld [vmem:[#allocation16 + $0x1e0] ss:$8 sps:$4 sm:$0xff]  }
 0x6e1   : > { %11541 = vmatprep.subr.bf16.mxu0 %v14807_v43 }
 0x6e2   : > { %12023 = vmatpush2.bf16.msra.mxu1 %v14883_v18 }
 0x6e3   : > { %12024 = vmatprep.subr.bf16.mxu1 %v14888_v24  ;;  %v14922_v24 = vld [vmem:[#allocation16 + $0x1c0] ss:$8 sps:$4 sm:$0xff]  }
 0x6e4   : > { %11542 = vmatpush1.bf16.msra.mxu0 %v14805_v11 }
 0x6e5   : > { %11543 = vmatprep.subr.bf16.mxu0 %v14810_v3  ;;  %v14921_v3 = vld [vmem:[#allocation16 + $0x1d4] ss:$8 sps:$4 sm:$0xff]  }
 0x6e6   : > { %12025 = vmatpush2.bf16.msra.mxu1 %v14886_v26  ;;  %v14924_v26 = vld [vmem:[#allocation16 + $0x1c4] ss:$8 sps:$4 sm:$0xff]  }
 0x6e8   : > { %11544 = vmatpush1.bf16.msra.mxu0 %v14808_v12  ;;  %v14919_v12 = vld [vmem:[#allocation16 + $0x1d0] ss:$8 sps:$4 sm:$0xff]  }
 0x6e9   : > { %11545 = vmatprep.subr.bf16.mxu0 %v14813_v31 }
 0x6ec   : > { %11546 = vmatpush1.bf16.msra.mxu0 %v14811_v0 }
 0x6ed   : > { %11547 = vmatprep.subr.bf16.mxu0 %v14816_v13 }
 0x6f0   : > { %11548 = vmatpush1.bf16.msra.mxu0 %v14814_v23  ;;  %v14927_v23 = vld [vmem:[#allocation16 + $0x1b4] ss:$8 sps:$4 sm:$0xff]  }
 0x6f1   : > { %11549 = vmatprep.subr.bf16.mxu0 %v14819_v40  ;;  %v14925_v40 = vld [vmem:[#allocation16 + $0x1b0] ss:$8 sps:$4 sm:$0xff]  }
 0x6f4   : > { %11550 = vmatpush2.bf16.msra.mxu0 %v14817_v34  ;;  %v14928_v34 = vld [vmem:[#allocation16 + $0x1a0] ss:$8 sps:$4 sm:$0xff]  }
 0x6f5   : > { %11551 = vmatprep.subr.bf16.mxu0 %v14822_v33 }
 0x6f8   : > { %11552 = vmatpush2.bf16.msra.mxu0 %v14820_v54  ;;  %v14933_v54 = vld [vmem:[#allocation16 + $0x194] ss:$8 sps:$4 sm:$0xff]  }
 0x6f9   : > { %11553 = vmatprep.subr.bf16.mxu0 %v14825_v51 }
 0x6fc   : > { %11554 = vmatpush2.bf16.msra.mxu0 %v14823_v39  ;;  %v14931_v39 = vld [vmem:[#allocation16 + $0x190] ss:$8 sps:$4 sm:$0xff]  }
 0x6fd   : > { %11555 = vmatprep.subr.bf16.mxu0 %v14828_v50 }
 0x700   : > { %11556 = vmatpush2.bf16.msra.mxu0 %v14826_v35 }
 0x701   : > { %11557 = vmatprep.subr.bf16.mxu0 %v14831_v49 }
 0x704   : > { %11558 = vmatpush2.bf16.msra.mxu0 %v14829_v52 }
 0x705   : > { %11559 = vmatprep.subr.bf16.mxu0 %v14834_v9 }
 0x708   : > { %11560 = vmatpush2.bf16.msra.mxu0 %v14832_v47  ;;  %v14936_v47 = vld [vmem:[#allocation16 + $0x184] ss:$8 sps:$4 sm:$0xff]  }
 0x709   : > { %11561 = vmatprep.subr.bf16.mxu0 %v14837_v53 }
 0x70c   : > { %11562 = vmatpush2.bf16.msra.mxu0 %v14835_v19  ;;  %v14934_v19 = vld [vmem:[#allocation16 + $0x180] ss:$8 sps:$4 sm:$0xff]  }
 0x70d   : > { %11563 = vmatprep.subr.bf16.mxu0 %v14840_v22 }
 0x710   : > { %11564 = vmatpush2.bf16.msra.mxu0 %v14838_v41 }
 0x711   : > { %12035 = vmatprep.subr.bf16.mxu0 %v14891_v1 }
 0x713   : > { %11566 = vmatmul.mubr.bf16.vlgmr.msra.gmra.mxu0 %v16236_v37  ;;  %v14898_v37 = vld [vmem:[#allocation16 + $0x140] ss:$8 sps:$4 sm:$0xff]  }
 0x714   : > { %12036 = vmatpush1.bf16.msra.mxu0 %v14889_v59  ;;  %v9961_v59 = vrot.slane %v16246_v8, %v9606_v30  ;;  %v14945_v30 = vld [vmem:[#allocation19 + $0x54] ss:$8 sps:$4 sm:$0xff]  }
 0x715   : > { %v16261_v17 = vpop.f32.mrf.mxu1  ;;  %12037 = vmatprep.subr.bf16.mxu0 %v14894_v60 }
 0x717   : > { %v16263_v36 = vpop.f32.mrf.mxu1 }
 0x718   : > { %12038 = vmatpush1.bf16.msra.mxu0 %v14892_v5 }
 0x719   : > { %v11448_v4 = vpop.f32.mrf.mxu1  ;;  %12039 = vmatprep.subr.bf16.mxu0 %v14897_v20 }
 0x71a   : > { %v9957_v4 = vrot.slane %v16246_v8, %v9602_v38  ;;  %v14943_v38 = vld [vmem:[#allocation19 + $0x50] ss:$8 sps:$4 sm:$0xff]   ;;  %v14948_v8 = vld [vmem:[#allocation19 + $0x44] ss:$8 sps:$4 sm:$0xff]  }
 0x71b   : > { %v11449_v55 = vpop.f32.mrf.mxu1 }
 0x71c   : > { %12040 = vmatpush1.bf16.msra.mxu0 %v14895_v14  ;;  %v11445_v1 = vadd.f32 %v16261_v17, %v9957_v4  ;;  %v11447_v55 = vadd.f32 %v16263_v36, %v9961_v59  ;;  %v14946_v17 = vld [vmem:[#allocation19 + $0x40] ss:$8 sps:$4 sm:$0xff]   ;;  %v14951_v36 = vld [vmem:[#allocation19 + $0x34] ss:$8 sps:$4 sm:$0xff]   ;;  %v14979_v59 = vld [vmem:[#allocation19 + $0x90] ss:$8 sps:$4 sm:$0xff]  }
 0x71d   : > { %12041 = vmatprep.subr.bf16.mxu0 %v14900_v32  ;;  %v14981_v4 = vld [vmem:[#allocation19 + $0x94] ss:$8 sps:$4 sm:$0xff]  }
 0x720   : > { %12042 = vmatpush1.bf16.msra.mxu0 %v14898_v37 }
 0x721   : > { %12043 = vmatprep.subr.bf16.mxu0 %v14903_v45 }
 0x724   : > { %12044 = vmatpush1.bf16.msra.mxu0 %v14901_v61 }
 0x725   : > { %12045 = vmatprep.subr.bf16.mxu0 %v14906_v10  ;;  %v14937_v10 = vld [vmem:[#allocation19 + $0x70] ss:$8 sps:$4 sm:$0xff]  }
 0x728   : > { %12046 = vmatpush1.bf16.msra.mxu0 %v14904_v46  ;;  %v14939_v46 = vld [vmem:[#allocation19 + $0x74] ss:$8 sps:$4 sm:$0xff]  }
 0x729   : > { %12047 = vmatprep.subr.bf16.mxu0 %v14909_v29  ;;  %v14942_v29 = vld [vmem:[#allocation19 + $0x64] ss:$8 sps:$4 sm:$0xff]   ;;  %12292 = vmatprep.subr.bf16.mxu1 %v14939_v46 }
 0x72c   : > { %12048 = vmatpush1.bf16.msra.mxu0 %v14907_v63  ;;  %v14949_v63 = vld [vmem:[#allocation19 + $0x30] ss:$8 sps:$4 sm:$0xff]  }
 0x72d   : > { %12049 = vmatprep.subr.bf16.mxu0 %v14912_v44  ;;  %v14954_v44 = vld [vmem:[#allocation19 + $0x24] ss:$8 sps:$4 sm:$0xff]  }
 0x730   : > { %12050 = vmatpush1.bf16.msra.mxu0 %v14910_v62  ;;  %v14952_v62 = vld [vmem:[#allocation19 + $0x20] ss:$8 sps:$4 sm:$0xff]  }
 0x731   : > { %12051 = vmatprep.subr.bf16.mxu0 %v14915_v6  ;;  %v14957_v6 = vld [vmem:[#allocation19 + $0x14] ss:$8 sps:$4 sm:$0xff]  }
 0x734   : > { %12052 = vmatpush2.bf16.msra.mxu0 %v14913_v7  ;;  %v14955_v7 = vld [vmem:[#allocation19 + $0x10] ss:$8 sps:$4 sm:$0xff]  }
 0x735   : > { %12053 = vmatprep.subr.bf16.mxu0 %v14918_v25  ;;  %v14960_v25 = vld [vmem:[#allocation19 + $0x4] ss:$8 sps:$4 sm:$0xff]  }
 0x738   : > { %12054 = vmatpush2.bf16.msra.mxu0 %v14916_v56  ;;  %v14958_v56 = vld [vmem:[#allocation19] ss:$8 sps:$4 sm:$0xff]  }
 0x739   : > { %12055 = vmatprep.subr.bf16.mxu0 %v14921_v3 }
 0x73c   : > { %12056 = vmatpush2.bf16.msra.mxu0 %v14919_v12 }
 0x73d   : > { %12057 = vmatprep.subr.bf16.mxu0 %v14924_v26 }
 0x740   : > { %12058 = vmatpush2.bf16.msra.mxu0 %v14922_v24 }
 0x741   : > { %12059 = vmatprep.subr.bf16.mxu0 %v14927_v23 }
 0x744   : > { %12060 = vmatpush2.bf16.msra.mxu0 %v14925_v40 }
 0x753   : > { %v11403_v43 = vpop.f32.mrf.mxu0 }
 0x754   : > { %v11404_v15 = vadd.f32 %v11403_v43, %v16256_v27  ;;  %v14963_v43 = vld [vmem:[#allocation19 + $0xf4] ss:$8 sps:$4 sm:$0xff]  }
 0x755   : > { %v11405_v48 = vpop.f32.mrf.mxu0  ;;  %v11526_v11 = vpop.f32.mrf.mxu1 }
 0x756   : > { %v11578_v57 = vmul.f32 0.70710677, %v11404_v15  ;;  %v11406_v2 = vadd.f32 %v11405_v48, %v16258_v58  ;;  %v14930_v58 = vld [vmem:[#allocation16 + $0x1a4] ss:$8 sps:$4 sm:$0xff]   ;;  %v11574_v35 = vmul.f32 0.5, %v11404_v15 }
 0x757   : > { %v11407_v31 = vpop.f32.mrf.mxu0  ;;  %v11528_v21 = vpop.f32.mrf.mxu1  ;;  %12061 = vmatprep.subr.bf16.mxu0 %v14930_v58 }
 0x758   : > { %15001 = verf.f32 %v11578_v57  ;;  %v11579_v18 = vmul.f32 0.70710677, %v11406_v2  ;;  %12062 = vmatpush2.bf16.msra.mxu0 %v14928_v34  ;;  %v11575_v49 = vmul.f32 0.5, %v11406_v2 }
 0x759   : > { %v11408_v0 = vpop.f32.mrf.mxu0  ;;  %v11530_v13 = vpop.f32.mrf.mxu1  ;;  %12063 = vmatprep.subr.bf16.mxu0 %v14933_v54  ;;  %v14964_v54 = vld [vmem:[#allocation19 + $0xe0] ss:$8 sps:$4 sm:$0xff]  }
 0x75a   : > { %15003 = verf.f32 %v11579_v18 }
 0x75b   : > { %v11531_v27 = vpop.f32.mrf.mxu1 }
 0x75c   : > { %12064 = vmatpush2.bf16.msra.mxu0 %v14931_v39 }
 0x75d   : > { %12065 = vmatprep.subr.bf16.mxu0 %v14936_v47  ;;  %v14970_v47 = vld [vmem:[#allocation19 + $0xc0] ss:$8 sps:$4 sm:$0xff]  }
 0x760   : > { %12066 = vmatpush2.bf16.msra.mxu0 %v14934_v19  ;;  %v14973_v19 = vld [vmem:[#allocation19 + $0xb0] ss:$8 sps:$4 sm:$0xff]  }
 0x765   : > { %v15002_v33 = vpop.eup %15001 }
 0x766   : > { %v11586_v51 = vadd.f32 1.0, %v15002_v33  ;;  %v14966_v33 = vld [vmem:[#allocation19 + $0xe4] ss:$8 sps:$4 sm:$0xff]  }
 0x767   : > { %v15004_v50 = vpop.eup %15003 }
 0x768   : > { %v11587_v52 = vadd.f32 1.0, %v15004_v50  ;;  %v11590_v9 = vmul.f32 %v11586_v51, %v11574_v35  ;;  %v14969_v50 = vld [vmem:[#allocation19 + $0xd4] ss:$8 sps:$4 sm:$0xff]   ;;  %v14967_v35 = vld [vmem:[#allocation19 + $0xd0] ss:$8 sps:$4 sm:$0xff]  }
 0x76a   : > { %v11591_v53 = vmul.f32 %v11587_v52, %v11575_v49  ;;  %v11594_v41 = vpack.c.bf16 %v11590_v9, %v11590_v9  ;;  %v14972_v9 = vld [vmem:[#allocation19 + $0xc4] ss:$8 sps:$4 sm:$0xff]  }
 0x76c   : > { %v11595_v22 = vpack.c.bf16 %v11591_v53, %v11591_v53  ;;  %v14975_v53 = vld [vmem:[#allocation19 + $0xb4] ss:$8 sps:$4 sm:$0xff]  }
 0x76e   : > { %12026 = vmatprep.mubr.bf16.mxu1 %v11595_v22  ;;  %v14978_v22 = vld [vmem:[#allocation19 + $0xa4] ss:$8 sps:$4 sm:$0xff]  }
 0x76f   : > { %12027 = vmatmul.mubr.bf16.vlgmr.msra.gmra.mxu1 %v11594_v41  ;;  %v14976_v41 = vld [vmem:[#allocation19 + $0xa0] ss:$8 sps:$4 sm:$0xff]  }
 0x770   : > { %12293 = vmatpush1.bf16.msra.mxu1 %v14937_v10 }
 0x771   : > { %12294 = vmatprep.subr.bf16.mxu1 %v14942_v29 }
 0x774   : > { %12295 = vmatpush1.bf16.msra.mxu1 %v14940_v28 }
 0x775   : > { %12296 = vmatprep.subr.bf16.mxu1 %v14945_v30 }
 0x778   : > { %12297 = vmatpush1.bf16.msra.mxu1 %v14943_v38 }
 0x779   : > { %12298 = vmatprep.subr.bf16.mxu1 %v14948_v8 }
 0x77c   : > { %12299 = vmatpush1.bf16.msra.mxu1 %v14946_v17 }
 0x77d   : > { %12300 = vmatprep.subr.bf16.mxu1 %v14951_v36 }
 0x780   : > { %12301 = vmatpush1.bf16.msra.mxu1 %v14949_v63 }
 0x781   : > { %12302 = vmatprep.subr.bf16.mxu1 %v14954_v44 }
 0x784   : > { %12303 = vmatpush1.bf16.msra.mxu1 %v14952_v62 }
 0x785   : > { %12304 = vmatprep.subr.bf16.mxu1 %v14957_v6 }
 0x788   : > { %12305 = vmatpush1.bf16.msra.mxu1 %v14955_v7 }
 0x789   : > { %12306 = vmatprep.subr.bf16.mxu1 %v14960_v25 }
 0x78c   : > { %12307 = vmatpush1.bf16.msra.mxu1 %v14958_v56  ;;  %v12120_v56 = vld [vmem:[#allocation20] sm:$0x3] }
 0x78d   : > { %12308 = vmatprep.subr.bf16.mxu1 %v14963_v43  ;;  %v12125_v43 = vrot.slane %v12120_v56, %v16147_v42 }
 0x793   : > { %v11485_v60 = vpop.f32.mrf.mxu0 }
 0x794   : > { %v11486_v5 = vadd.f32 %v11485_v60, %v11445_v1  ;;  %v14984_v1 = vld [vmem:[#allocation19 + $0x84] ss:$8 sps:$4 sm:$0xff]   ;;  %v14982_v60 = vld [vmem:[#allocation19 + $0x80] ss:$8 sps:$4 sm:$0xff]  }
 0x795   : > { %v11487_v20 = vpop.f32.mrf.mxu0 }
 0x796   : > { %v11488_v14 = vadd.f32 %v11487_v20, %v11447_v55  ;;  %v11527_v32 = vadd.f32 %v11526_v11, %v11486_v5  ;;  %v14961_v11 = vld [vmem:[#allocation19 + $0xf0] ss:$8 sps:$4 sm:$0xff]   ;;  %v11662_v55 = vld [vmem:[#allocation17] sm:$0x3] }
 0x797   : > { %v11489_v37 = vpop.f32.mrf.mxu0  ;;  %12309 = vmatpush2.bf16.msra.mxu1 %v14961_v11  ;;  %v11667_v5 = vrot.slane %v11662_v55, %v16147_v42  ;;  %v11671_v20 = vrot.slane %v11662_v55, %v16110_v16 }
 0x798   : > { %v11529_v45 = vadd.f32 %v11528_v21, %v11488_v14  ;;  %12310 = vmatprep.subr.bf16.mxu1 %v14966_v33 }
 0x799   : > { %v11490_v61 = vpop.f32.mrf.mxu0 }
 0x79b   : > { %12311 = vmatpush2.bf16.msra.mxu1 %v14964_v54 }
 0x79c   : > { %12312 = vmatprep.subr.bf16.mxu1 %v14969_v50 }
 0x79f   : > { %12313 = vmatpush2.bf16.msra.mxu1 %v14967_v35 }
 0x7a0   : > { %12314 = vmatprep.subr.bf16.mxu1 %v14972_v9 }
 0x7a3   : > { %12315 = vmatpush2.bf16.msra.mxu1 %v14970_v47 }
 0x7a4   : > { %12316 = vmatprep.subr.bf16.mxu1 %v14975_v53 }
 0x7a7   : > { %12317 = vmatpush2.bf16.msra.mxu1 %v14973_v19 }
 0x7a8   : > { %12318 = vmatprep.subr.bf16.mxu1 %v14978_v22 }
 0x7ab   : > { %12319 = vmatpush2.bf16.msra.mxu1 %v14976_v41 }
 0x7ac   : > { %12320 = vmatprep.subr.bf16.mxu1 %v14981_v4 }
 0x7af   : > { %12321 = vmatpush2.bf16.msra.mxu1 %v14979_v59 }
 0x7b0   : > { %12322 = vmatprep.subr.bf16.mxu1 %v14984_v1 }
 0x7b3   : > { %12323 = vmatpush2.bf16.msra.mxu1 %v14982_v60 }
 0x7d3   : > { %v11567_v15 = vpop.f32.mrf.mxu0 }
 0x7d4   : > { %v11568_v48 = vadd.f32 %v11567_v15, %v11527_v32  ;;  %v12129_v15 = vrot.slane %v12120_v56, %v16110_v16 }
 0x7d5   : > { %v11569_v3 = vpop.f32.mrf.mxu0 }
 0x7d6   : > { %v11580_v57 = vmul.f32 0.70710677, %v11568_v48  ;;  %v11570_v2 = vadd.f32 %v11569_v3, %v11529_v45  ;;  %v11576_v26 = vmul.f32 0.5, %v11568_v48 }
 0x7d7   : > { %v11571_v12 = vpop.f32.mrf.mxu0 }
 0x7d8   : > { %15005 = verf.f32 %v11580_v57  ;;  %v11581_v31 = vmul.f32 0.70710677, %v11570_v2  ;;  %v11577_v24 = vmul.f32 0.5, %v11570_v2 }
 0x7d9   : > { %v11572_v21 = vpop.f32.mrf.mxu0 }
 0x7da   : > { %15007 = verf.f32 %v11581_v31 }
 0x7e5   : > { %v15006_v18 = vpop.eup %15005 }
 0x7e6   : > { %v11588_v0 = vadd.f32 1.0, %v15006_v18 }
 0x7e7   : > { %v15008_v13 = vpop.eup %15007 }
 0x7e8   : > { %v11589_v27 = vadd.f32 1.0, %v15008_v13  ;;  %v11592_v23 = vmul.f32 %v11588_v0, %v11576_v26 }
 0x7ea   : > { %v11593_v40 = vmul.f32 %v11589_v27, %v11577_v24  ;;  %v11596_v34 = vpack.c.bf16 %v11592_v23, %v11592_v23 }
 0x7ec   : > { %v11597_v58 = vpack.c.bf16 %v11593_v40, %v11593_v40 }
 0x7ee   : > { %12067 = vmatprep.mubr.bf16.mxu0 %v11597_v58 }
 0x7ef   : > { %12068 = vmatmul.mubr.bf16.vlgmr.msra.gmra.mxu0 %v11596_v34 }
 0x82f   : > { %v12028_v51 = vpop.f32.mrf.mxu1 }
 0x830   : > { %v12029_v14 = vadd.f32 %v12028_v51, %v11667_v5 }
 0x831   : > { %v12030_v39 = vpop.f32.mrf.mxu1 }
 0x832   : > { %v12031_v37 = vadd.f32 %v12030_v39, %v11671_v20 }
 0x833   : > { %v12032_v49 = vpop.f32.mrf.mxu1 }
 0x835   : > { %v12033_v52 = vpop.f32.mrf.mxu1 }
 0x8af   : > { %v12069_v32 = vpop.f32.mrf.mxu0 }
 0x8b0   : > { %v12070_v45 = vadd.f32 %v12069_v32, %v12029_v14 }
 0x8b1   : > { %v12071_v61 = vpop.f32.mrf.mxu0 }
 0x8b2   : > { %v12078_v10 = vmul.f32 0.70710677, %v12070_v45  ;;  %v12072_v46 = vadd.f32 %v12071_v61, %v12031_v37  ;;  %v12076_v36 = vmul.f32 0.5, %v12070_v45 }
 0x8b3   : > { %v12073_v29 = vpop.f32.mrf.mxu0 }
 0x8b4   : > { %15009 = verf.f32 %v12078_v10  ;;  %v12079_v28 = vmul.f32 0.70710677, %v12072_v46  ;;  %v12077_v63 = vmul.f32 0.5, %v12072_v46 }
 0x8b5   : > { %v12074_v30 = vpop.f32.mrf.mxu0 }
 0x8b6   : > { %15011 = verf.f32 %v12079_v28 }
 0x8c1   : > { %v15010_v38 = vpop.eup %15009 }
 0x8c2   : > { %v12082_v8 = vadd.f32 1.0, %v15010_v38 }
 0x8c3   : > { %v15012_v17 = vpop.eup %15011 }
 0x8c4   : > { %v12083_v44 = vadd.f32 1.0, %v15012_v17  ;;  %v12084_v62 = vmul.f32 %v12082_v8, %v12076_v36 }
 0x8c6   : > { %v12085_v6 = vmul.f32 %v12083_v44, %v12077_v63  ;;  %v12086_v25 = vpack.c.bf16 %v12084_v62, %v12084_v62 }
 0x8c8   : > { %v12087_v7 = vpack.c.bf16 %v12085_v6, %v12085_v6 }
 0x8ca   : > { %12324 = vmatprep.mubr.bf16.mxu1 %v12087_v7 }
 0x8cb   : > { %12325 = vmatmul.mubr.bf16.vlgmr.msra.gmra.mxu1 %v12086_v25 }
 0x98b   : > { %v12326_v48 = vpop.f32.mrf.mxu1 }
 0x98c   : > { %v12327_v11 = vadd.f32 %v12326_v48, %v12125_v43 }
 0x98d   : > { %v12328_v3 = vpop.f32.mrf.mxu1 }
 0x98e   : > { %12333 = vst [vmem:[%s603_s2] sm:$0xff] %v12327_v11  ;;  %v12329_v57 = vadd.f32 %v12328_v3, %v12129_v15 }
 0x98f   : > { %v12330_v16 = vpop.f32.mrf.mxu1 }
 0x990   : > { %12334 = vst [vmem:[%s603_s2 + $0x8] sm:$0xff] %v12329_v57 }
 0x991   : > { %v12331_v42 = vpop.f32.mrf.mxu1 }
 0x992   : > { %15343 = shalt.err (!%p15340_p3)
}
 0x993   : > { %s15344_s20 = scalar_lea.hbm %s16284_s16, 256  ;;  %s15348_s0 = scalar_lea.hbm %s16339_s12, 512 }
 0x994   : > { %p15345_p4 = scmp.ne.s32.totalorder %s16284_s16, %s15344_s20  ;;  %p15349_p0 = scmp.lt.s32.totalorder %s16284_s16, %s16339_s12 }
 0x995   : > { %p15350_p8 = scmp.lt.s32.totalorder %s15348_s0, %s15344_s20 }
 0x996   : > { %p15346_p11 = pnand %p15345_p4, %p16388_p7 }
 0x997   : > { %p15351_p9 = por %p15350_p8, %p15349_p0 }
 0x998   : > { %p15347_p12 = pneg %p15346_p11 }
 0x99a   : > { %p15352_p13 = pnand %p15351_p9, %p15347_p12 }
 0x99c   : > { %15355 = shalt.err (!%p15352_p13)
}
 0x99d   : > { %14172 = dma.vmem_to_hbm [thread:$0]  (%p16388_p7), %s16286_s3, 256, %s16284_s16, %s12336_s27  }
 0x99e PF: > { %s12362_s14 = sand.u32 1, %s15410_s21   ;;  %p16389_p6 = scmp.ne.s32.totalorder %s16370_s30, 0 }
 0x99f   : > { %p16390_p10 = scmp.ge.s32.totalorder %s15422_s24, 2  ;;  %s12363_s18 = scalar_lea.sflag [#allocation4], %s12362_s14 }
 0x9a1   : > { %p14213_p2 = pnand %p16390_p10, %p16389_p6 }
 0x9a3   : > { %p14214_p5 = pneg %p14213_p2 }
 0x9a5   : > { %15405 = dma.done.wait (%p14214_p5), %s12363_s18, 256  }
 0x9a6   : > { %15407 = vsyncadd (%p14214_p5), %s12363_s18, 4294967040  ;;  %p33_p1 = scmp.ge.s32.totalorder %s15644_s13, 4   ;;  %s16391_s21 = smov %s15414_s22 }
 0x9a7   : > { %s16392_s22 = smov %s15418_s23  ;;  %s16393_s23 = smov %s15655_s29 }
 0x9a8   : > { %s16394_s24 = smov %s15644_s13  ;;  %35 = sbr.rel (!%p33_p1) target bundleno = 22 (0x16), region = 166 }
 0x9ad   :  { %12368 = vsyncpa [#allocation3], 1 }
 0x9ae   :  { %12370 = vsyncpa [#allocation3 + $0x1], 1 }
 0x9af   :  { %12371 = vsyncpa [#allocation6], 1 }
 0x9b0   :  { %12373 = vsyncpa [#allocation6 + $0x1], 1 }
 0x9b1   :  { %12374 = vsyncpa [#allocation9], 1 }
 0x9b2   :  { %12375 = vsyncpa [#allocation12], 1 }
 0x9b3   :  { %12376 = vsyncpa [#allocation15], 1 }
 0x9b4   :  { %12377 = vsyncpa [#allocation18], 1 }
 0x9b5   :  { %12378 = vsyncpa [#allocation21], 1 }
 0x9b6   :  { %12379 = vsyncpa [#allocation4], 1 }
 0x9b7   :  { %12381 = vsyncpa [#allocation4 + $0x1], 1 }

</bundles_post_ra>
